<compile_context>
chip_gen: v7x
topology: tpu7x:2x2x1
jax: 0.10.0
libtpu: 0.0.40
codegen_flags: <defaults>
</compile_context>

<pallas_src>
import functools

import jax
import jax.numpy as jnp
from jax import lax
from jax.experimental import pallas as pl
from jax.experimental.pallas import tpu as pltpu

F32 = jnp.float32
_VMEM = pl.BlockSpec(memory_space=pltpu.MemorySpace.VMEM)


# --------------------------------------------------------------------------- #
#  In-kernel helpers (traced; loops are fully unrolled at trace time)
# --------------------------------------------------------------------------- #
def _gru_scan(x2d, w, u, b, S, M, want_mean=False):
    """GRU recurrence.  x2d: (S*M, Din).  Input projections are precomputed in one
    matmul; the time loop only does gh = h @ U.  Returns (h_last, time_mean|None)."""
    H = u.shape[0]
    gx_all = jnp.dot(x2d, w, preferred_element_type=F32) + b          # (S*M, 3H)
    h = jnp.zeros((M, H), F32)
    hsum = jnp.zeros((M, H), F32) if want_mean else None
    for t in range(S):
        gx = gx_all[t * M:(t + 1) * M, :]
        gh = jnp.dot(h, u, preferred_element_type=F32)
        zg = jax.nn.sigmoid(gx[:, 0:H] + gh[:, 0:H])
        rg = jax.nn.sigmoid(gx[:, H:2 * H] + gh[:, H:2 * H])
        ng = jnp.tanh(gx[:, 2 * H:3 * H] + rg * gh[:, 2 * H:3 * H])
        h = (1.0 - zg) * ng + zg * h
        if want_mean:
            hsum = hsum + h
    hmean = hsum * (1.0 / S) if want_mean else None
    return h, hmean


def _gru_decode(h0, y0, wu4, b4, wo, bo, steps, hid, feedback_dim):
    """Autoregressive GRU rollout.  One fused [y|h] @ WU4 matmul per step
    (gate columns [z | r | n_x | n_h]).  Returns the list of per-step readouts."""
    M = h0.shape[0]
    b4b = jnp.broadcast_to(b4, (M, b4.shape[1]))    # hoisted broadcasts (no CSE in loop)
    bob = jnp.broadcast_to(bo, (M, bo.shape[1]))
    h, y = h0, y0
    outs = []
    for _ in range(steps):
        yh = jnp.concatenate([y, h], axis=-1)
        g = jnp.dot(yh, wu4, preferred_element_type=F32) + b4b
        zg = jax.nn.sigmoid(g[:, 0:hid])
        rg = jax.nn.sigmoid(g[:, hid:2 * hid])
        ng = jnp.tanh(g[:, 2 * hid:3 * hid] + rg * g[:, 3 * hid:4 * hid])
        h = (1.0 - zg) * ng + zg * h
        o = jnp.dot(h, wo, preferred_element_type=F32) + bob
        outs.append(o)
        y = o[:, 0:feedback_dim]
    return outs


def _quat_normalize(mean, std=None):
    """Normalize quaternion dims 0:4 of each 7-dim pose (nposes == 1)."""
    # TODO(synk): the reference torch code also divides by the raw norm (no epsilon).
    rot = mean[:, 0:4]
    norm = jnp.sqrt(jnp.sum(rot * rot, axis=-1, keepdims=True))       # (M, 1)
    col = lax.broadcasted_iota(jnp.int32, mean.shape, 1)
    divisor = jnp.where(col < 4, norm, 1.0)
    mean_n = mean / divisor
    std_n = std / divisor if std is not None else None
    return mean_n, std_n


# --------------------------------------------------------------------------- #
#  Fused forward kernel (single launch, no grid)
# --------------------------------------------------------------------------- #
def _fused_forward_kernel(
        # data
        x_ctx_ref, x_trg_ref, eps_ref, qin_ref, kin_ref,
        # latent_encdec (encoder + packed decoder)
        lew_ref, leu_ref, leb_ref, ldwu_ref, ldb_ref, ldwo_ref, ldbo_ref,
        # det_encdec (encoder + packed decoder)
        dew_ref, deu_ref, deb_ref, ddwu_ref, ddb_ref, ddwo_ref, ddbo_ref,
        # z encoder MLP
        zw1_ref, zb1_ref, zw2_ref, zb2_ref,
        # attender projections
        wq_ref, wk_ref,
        # trg_encdec (encoder + init MLP + packed stochastic decoder)
        tew_ref, teu_ref, teb_ref,
        wih_ref, wiz_ref, wir_ref, bi_ref,
        tdwu_ref, tdb_ref, tdwo_ref, tdbo_ref,
        # outputs
        qmu_ref, qsigma_ref, det_ref, mu_ref, sigma_ref, rep_ref,
        *, S, Mc, Mt, D, Fh, Z, nz, norm_rot):
    x_ctx = x_ctx_ref[...]                                             # (S*Mc, D)
    x_trg = x_trg_ref[...]                                             # (S*Mt, D)
    y0_trg = x_trg[(S - 1) * Mt:S * Mt, :]                             # last observed frame

    # ---- latent path: context GRU encoder + (time, batch*people) mean + z-MLP ----
    _, hmean = _gru_scan(x_ctx, lew_ref[...], leu_ref[...], leb_ref[...], S, Mc,
                         want_mean=True)                               # (Mc, R)
    r_agg = jnp.mean(hmean, axis=0, keepdims=True)                     # (1, R)
    zh = jnp.tanh(jnp.dot(r_agg, zw1_ref[...], preferred_element_type=F32) + zb1_ref[...])
    zout = jnp.dot(zh, zw2_ref[...], preferred_element_type=F32) + zb2_ref[...]
    q_mu = zout[:, 0:Z]
    q_sigma = 0.1 + 0.9 * jax.nn.softplus(zout[:, Z:2 * Z])
    qmu_ref[...] = q_mu
    qsigma_ref[...] = q_sigma

    # ---- deterministic decodings of the target samples (2 parameter sets) ----
    # TODO(synk): teacher forcing is a Bernoulli draw in torch; eval uses pure autoregression.
    det_params = (
        (lew_ref, leu_ref, leb_ref, ldwu_ref, ldb_ref, ldwo_ref, ldbo_ref),
        (dew_ref, deu_ref, deb_ref, ddwu_ref, ddb_ref, ddwo_ref, ddbo_ref),
    )
    for idx, (ew, eu, eb, dwu, db, dwo, dbo) in enumerate(det_params):
        hid = eu.shape[0]
        h_last, _ = _gru_scan(x_trg, ew[...], eu[...], eb[...], S, Mt, want_mean=False)
        outs = _gru_decode(h_last, y0_trg, dwu[...], db[...], dwo[...], dbo[...],
                           Fh, hid, D)
        fut = jnp.concatenate(outs, axis=0)                            # (Fh*Mt, D)
        if norm_rot:
            fut, _ = _quat_normalize(fut)
        det_ref[idx] = fut

    # ---- stochastic path: z-independent part (encoders + cross-attention) ----
    H = teu_ref.shape[0]
    henc, _ = _gru_scan(x_trg, tew_ref[...], teu_ref[...], teb_ref[...], S, Mt,
                        want_mean=False)                               # (Mt, H)
    rep_ref[...] = henc                                                # encoded_rep
    _, v_ctx = _gru_scan(x_ctx, dew_ref[...], deu_ref[...], deb_ref[...], S, Mc,
                         want_mean=True)                               # (Mc, R) attention values

    q = jnp.dot(qin_ref[...], wq_ref[...], preferred_element_type=F32)  # (Mt, dk)
    k = jnp.dot(kin_ref[...], wk_ref[...], preferred_element_type=F32)  # (Mc, dk)
    dk = q.shape[-1]
    scores = jnp.dot(q, k.T, preferred_element_type=F32) * (1.0 / (dk ** 0.5))
    scores = scores - jnp.max(scores, axis=-1, keepdims=True)
    w_att = jnp.exp(scores)
    w_att = w_att * pl.reciprocal(jnp.sum(w_att, axis=-1, keepdims=True), approx=True)
    r_ctx = jnp.dot(w_att, v_ctx, preferred_element_type=F32)           # (Mt, R)

    # decoder init base: [h_enc | r_context] projections + bias (z added per sample)
    base = (jnp.dot(henc, wih_ref[...], preferred_element_type=F32)
            + jnp.dot(r_ctx, wir_ref[...], preferred_element_type=F32)
            + bi_ref[...])                                               # (Mt, H)

    # ---- stochastic rollouts, one per z sample (in-kernel reparameterization) ----
    z_all = q_mu + q_sigma * eps_ref[...]                                # (nz, Z)
    z_proj_all = jnp.dot(z_all, wiz_ref[...], preferred_element_type=F32)  # (nz, H)
    for i in range(nz):
        h0 = jnp.tanh(base + z_proj_all[i:i + 1, :])                     # (Mt, H)
        outs = _gru_decode(h0, y0_trg, tdwu_ref[...], tdb_ref[...],
                           tdwo_ref[...], tdbo_ref[...], Fh, H, D)
        o2d = jnp.concatenate(outs, axis=0)                              # (Fh*Mt, 2D)
        mu_i = o2d[:, 0:D]
        sigma_i = 0.1 + 0.9 * jax.nn.softplus(o2d[:, D:2 * D])
        if norm_rot:
            mu_i, sigma_i = _quat_normalize(mu_i, sigma_i)
        mu_ref[i] = mu_i
        sigma_ref[i] = sigma_i


# --------------------------------------------------------------------------- #
#  pallas_call wrapper
# --------------------------------------------------------------------------- #
def fused_forward_call(params, x_ctx2d, x_trg2d, eps, qin, kin, *,
                       S, Mc, Mt, D, Fh, Z, nz, H, norm_rot):
    lat = params["latent_encdec"]
    det = params["det_encdec"]
    tp = params["trg_encdec"]
    zp = params["z_encoder"]
    att = params["attender"]

    operands = (
        x_ctx2d, x_trg2d, eps, qin, kin,
        lat["enc"]["w"], lat["enc"]["u"], lat["enc"]["b"],
        lat["dec"]["wu4"], lat["dec"]["b4"], lat["dec"]["wo"], lat["dec"]["bo"],
        det["enc"]["w"], det["enc"]["u"], det["enc"]["b"],
        det["dec"]["wu4"], det["dec"]["b4"], det["dec"]["wo"], det["dec"]["bo"],
        zp["w1"], zp["b1"], zp["w2"], zp["b2"],
        att["wq"], att["wk"],
        tp["enc"]["w"], tp["enc"]["u"], tp["enc"]["b"],
        tp["init"]["wih"], tp["init"]["wiz"], tp["init"]["wir"], tp["init"]["bi"],
        tp["dec"]["wu4"], tp["dec"]["b4"], tp["dec"]["wo"], tp["dec"]["bo"],
    )

    kern = functools.partial(_fused_forward_kernel, S=S, Mc=Mc, Mt=Mt, D=D, Fh=Fh,
                             Z=Z, nz=nz, norm_rot=norm_rot)
    out_shapes = (
        jax.ShapeDtypeStruct((1, Z), F32),                 # q_mu
        jax.ShapeDtypeStruct((1, Z), F32),                 # q_sigma
        jax.ShapeDtypeStruct((2, Fh * Mt, D), F32),        # latent/det deterministic futures
        jax.ShapeDtypeStruct((nz, Fh * Mt, D), F32),       # future mu
        jax.ShapeDtypeStruct((nz, Fh * Mt, D), F32),       # future sigma
        jax.ShapeDtypeStruct((Mt, H), F32),                # encoded_rep
    )
    return pl.pallas_call(
        kern,
        out_shape=out_shapes,
        in_specs=[_VMEM] * len(operands),
        out_specs=tuple([_VMEM] * len(out_shapes)),
    )(*operands)


# --------------------------------------------------------------------------- #
#  Parameters & forward
# --------------------------------------------------------------------------- #
def init_params(key, D, R, H, Z, S, dk):
    keys = iter(jax.random.split(key, 64))

    def mat(shape, scale=0.1):
        return scale * jax.random.normal(next(keys), shape, dtype=F32)

    def gru_enc(din, hid):
        return {"w": mat((din, 3 * hid)), "u": mat((hid, 3 * hid)),
                "b": jnp.zeros((1, 3 * hid), F32)}

    def pack_gru_dec(w, u, b):
        """Pack (Din,3H),(H,3H),(1,3H) into the fused [y|h] @ WU4 layout with
        gate columns [z | r | n_x | n_h]."""
        hid = u.shape[0]
        top = jnp.concatenate([w[:, 0:hid], w[:, hid:2 * hid], w[:, 2 * hid:3 * hid],
                               jnp.zeros((w.shape[0], hid), F32)], axis=1)
        bot = jnp.concatenate([u[:, 0:hid], u[:, hid:2 * hid],
                               jnp.zeros((hid, hid), F32), u[:, 2 * hid:3 * hid]], axis=1)
        wu4 = jnp.concatenate([top, bot], axis=0)            # (Din+H, 4H)
        b4 = jnp.concatenate([b, jnp.zeros((1, hid), F32)], axis=1)
        return wu4, b4

    def gru_dec(din, hid, dout):
        wu4, b4 = pack_gru_dec(mat((din, 3 * hid)), mat((hid, 3 * hid)),
                               jnp.zeros((1, 3 * hid), F32))
        return {"wu4": wu4, "b4": b4, "wo": mat((hid, dout)), "bo": jnp.zeros((1, dout), F32)}

    return {
        "latent_encdec": {"enc": gru_enc(D, R), "dec": gru_dec(D, R, D)},
        "det_encdec": {"enc": gru_enc(D, R), "dec": gru_dec(D, R, D)},
        "z_encoder": {"w1": mat((R, H)), "b1": jnp.zeros((1, H), F32),
                      "w2": mat((H, 2 * Z)), "b2": jnp.zeros((1, 2 * Z), F32)},
        "attender": {"wq": mat((S * D, dk)), "wk": mat((S * D, dk))},
        "trg_encdec": {"enc": gru_enc(D, H),
                       "init": {"wih": mat((H, H)), "wiz": mat((Z, H)),
                                "wir": mat((R, H)), "bi": jnp.zeros((1, H), F32)},
                       "dec": gru_dec(D, H, 2 * D)},
    }


@functools.partial(jax.jit, static_argnames=("nz_samples", "teacher_forcing", "norm_rot"))
def social_process_forward(params, split, key, nz_samples=1, teacher_forcing=0.0,
                           norm_rot=True):
    """Eval-mode forward of SocialProcessSeq2Seq (merge_observed_with_future=False)."""
    ctx_obs, ctx_fut, trg_obs, trg_fut = split
    S, N, P, D = ctx_obs.shape
    B = trg_obs.shape[1]
    Fh = trg_fut.shape[0]
    Z = params["z_encoder"]["w2"].shape[1] // 2
    H = params["trg_encdec"]["enc"]["u"].shape[0]
    Mc, Mt = N * P, B * P

    x_ctx2d = ctx_obs.reshape(S * Mc, D)
    x_trg2d = trg_obs.reshape(S * Mt, D)

    # Only the standard-normal draw happens on host; z = mu + sigma*eps is in-kernel.
    eps = jax.random.normal(key, (nz_samples, Z), dtype=F32)

    # Attention operands (host-side layout plumbing; tiny, off the kernel's hot path).
    qin = jnp.transpose(trg_obs.reshape(S, Mt, D), (1, 0, 2)).reshape(Mt, S * D)
    kin = jnp.transpose(ctx_obs.reshape(S, Mc, D), (1, 0, 2)).reshape(Mc, S * D)

    q_mu, q_sigma, det_out, mu, sigma, rep = fused_forward_call(
        params, x_ctx2d, x_trg2d, eps, qin, kin,
        S=S, Mc=Mc, Mt=Mt, D=D, Fh=Fh, Z=Z, nz=nz_samples, H=H, norm_rot=norm_rot)

    q_context = (q_mu, q_sigma)
    q_target = None                                   # eval mode

    latent_path = det_out[0].reshape(Fh, B, P, D)
    det_path = det_out[1].reshape(Fh, B, P, D)
    future_mu = mu.reshape(nz_samples, Fh, B, P, D)
    future_sigma = sigma.reshape(nz_samples, Fh, B, P, D)

    return {
        "stochastic": (future_mu, future_sigma),      # Normal(loc, scale)
        "posteriors": (q_context, q_target),
        "encoded_rep": rep,                           # (B*P, H)
        "deterministic": (latent_path, det_path),
    }


# --------------------------------------------------------------------------- #
#  Main
# --------------------------------------------------------------------------- #
if __name__ == "__main__":
    S, Fh, N, B, P, D = 8, 4, 3, 2, 2, 7      # nposes=1 -> data_dim = 7 (4 rot + 3 loc)
    R, H, Z, dk = 32, 32, 16, 32

    key = jax.random.PRNGKey(0)
    k1, k2, k3, k4, kz = jax.random.split(key, 5)
    ctx_obs = jax.random.normal(k1, (S, N, P, D), dtype=F32)
    ctx_fut = jax.random.normal(k2, (Fh, N, P, D), dtype=F32)
    trg_obs = jax.random.normal(k3, (S, B, P, D), dtype=F32)
    trg_fut = jax.random.normal(k4, (Fh, B, P, D), dtype=F32)

    params = init_params(jax.random.PRNGKey(42), D, R, H, Z, S, dk)

    out = social_process_forward(params, (ctx_obs, ctx_fut, trg_obs, trg_fut), kz,
                                 nz_samples=1, teacher_forcing=0.0)
    jax.block_until_ready(out)

    mu, sigma = out["stochastic"]
    assert mu.shape == (1, Fh, B, P, D) and sigma.shape == (1, Fh, B, P, D)
    (q_mu, q_sigma), q_target = out["posteriors"]
    assert q_mu.shape == (1, Z) and q_sigma.shape == (1, Z) and q_target is None
    lat, det = out["deterministic"]
    assert lat.shape == (Fh, B, P, D) and det.shape == (Fh, B, P, D)
    assert out["encoded_rep"].shape == (B * P, H)
    assert bool(jnp.all(jnp.isfinite(mu))) and bool(jnp.all(sigma > 0))
    assert bool(jnp.all(jnp.isfinite(lat))) and bool(jnp.all(jnp.isfinite(det)))
    assert bool(jnp.all(jnp.isfinite(q_mu))) and bool(jnp.all(q_sigma > 0))

    print("KERNEL_OK")
</pallas_src>

<mosaic_0001>
module attributes {stable_mosaic.version = 11 : i64} {
  func.func @_fused_forward_kernel(%arg0: memref<48x7xf32, #tpu.memory_space<vmem>>, %arg1: memref<32x7xf32, #tpu.memory_space<vmem>>, %arg2: memref<1x16xf32, #tpu.memory_space<vmem>>, %arg3: memref<4x56xf32, #tpu.memory_space<vmem>>, %arg4: memref<6x56xf32, #tpu.memory_space<vmem>>, %arg5: memref<7x96xf32, #tpu.memory_space<vmem>>, %arg6: memref<32x96xf32, #tpu.memory_space<vmem>>, %arg7: memref<1x96xf32, #tpu.memory_space<vmem>>, %arg8: memref<39x128xf32, #tpu.memory_space<vmem>>, %arg9: memref<1x128xf32, #tpu.memory_space<vmem>>, %arg10: memref<32x7xf32, #tpu.memory_space<vmem>>, %arg11: memref<1x7xf32, #tpu.memory_space<vmem>>, %arg12: memref<7x96xf32, #tpu.memory_space<vmem>>, %arg13: memref<32x96xf32, #tpu.memory_space<vmem>>, %arg14: memref<1x96xf32, #tpu.memory_space<vmem>>, %arg15: memref<39x128xf32, #tpu.memory_space<vmem>>, %arg16: memref<1x128xf32, #tpu.memory_space<vmem>>, %arg17: memref<32x7xf32, #tpu.memory_space<vmem>>, %arg18: memref<1x7xf32, #tpu.memory_space<vmem>>, %arg19: memref<32x32xf32, #tpu.memory_space<vmem>>, %arg20: memref<1x32xf32, #tpu.memory_space<vmem>>, %arg21: memref<32x32xf32, #tpu.memory_space<vmem>>, %arg22: memref<1x32xf32, #tpu.memory_space<vmem>>, %arg23: memref<56x32xf32, #tpu.memory_space<vmem>>, %arg24: memref<56x32xf32, #tpu.memory_space<vmem>>, %arg25: memref<7x96xf32, #tpu.memory_space<vmem>>, %arg26: memref<32x96xf32, #tpu.memory_space<vmem>>, %arg27: memref<1x96xf32, #tpu.memory_space<vmem>>, %arg28: memref<32x32xf32, #tpu.memory_space<vmem>>, %arg29: memref<16x32xf32, #tpu.memory_space<vmem>>, %arg30: memref<32x32xf32, #tpu.memory_space<vmem>>, %arg31: memref<1x32xf32, #tpu.memory_space<vmem>>, %arg32: memref<39x128xf32, #tpu.memory_space<vmem>>, %arg33: memref<1x128xf32, #tpu.memory_space<vmem>>, %arg34: memref<32x14xf32, #tpu.memory_space<vmem>>, %arg35: memref<1x14xf32, #tpu.memory_space<vmem>>, %arg36: memref<1x16xf32, #tpu.memory_space<vmem>>, %arg37: memref<1x16xf32, #tpu.memory_space<vmem>>, %arg38: memref<2x16x7xf32, #tpu.memory_space<vmem>>, %arg39: memref<1x16x7xf32, #tpu.memory_space<vmem>>, %arg40: memref<1x16x7xf32, #tpu.memory_space<vmem>>, %arg41: memref<4x32xf32, #tpu.memory_space<vmem>>) attributes {dimension_semantics = [], scalar_prefetch = 0 : i64, scratch_operands = 0 : i64, tpu.core_type = #tpu.core_type<tc>} {
    %c0 = arith.constant 0 : index
    %c0_0 = arith.constant 0 : index
    %0 = vector.load %arg0[%c0, %c0_0] : memref<48x7xf32, #tpu.memory_space<vmem>>, vector<48x7xf32>
    %c0_1 = arith.constant 0 : index
    %c0_2 = arith.constant 0 : index
    %1 = vector.load %arg1[%c0_1, %c0_2] : memref<32x7xf32, #tpu.memory_space<vmem>>, vector<32x7xf32>
    %2 = vector.extract_strided_slice %1 {offsets = [28, 0], sizes = [4, 7], strides = [1, 1]} : vector<32x7xf32> to vector<4x7xf32>
    %c0_3 = arith.constant 0 : index
    %c0_4 = arith.constant 0 : index
    %3 = vector.load %arg5[%c0_3, %c0_4] : memref<7x96xf32, #tpu.memory_space<vmem>>, vector<7x96xf32>
    %c0_5 = arith.constant 0 : index
    %c0_6 = arith.constant 0 : index
    %4 = vector.load %arg6[%c0_5, %c0_6] : memref<32x96xf32, #tpu.memory_space<vmem>>, vector<32x96xf32>
    %c0_7 = arith.constant 0 : index
    %c0_8 = arith.constant 0 : index
    %5 = vector.load %arg7[%c0_7, %c0_8] : memref<1x96xf32, #tpu.memory_space<vmem>>, vector<1x96xf32>
    %cst = arith.constant dense<0.000000e+00> : vector<48x96xf32>
    %6 = tpu.matmul %0, %3, %cst {dimension_numbers = #tpu.dot_dimension_numbers<[1], [0], [0], [1], [0, 0, 1, 1], [], []>} : vector<48x7xf32>, vector<7x96xf32>, vector<48x96xf32> -> vector<48x96xf32>
    %7 = vector.broadcast %5 : vector<1x96xf32> to vector<48x96xf32>
    %8 = arith.addf %6, %7 : vector<48x96xf32>
    %cst_9 = arith.constant 0.000000e+00 : f32
    %9 = vector.broadcast %cst_9 : f32 to vector<6x32xf32>
    %cst_10 = arith.constant 0.000000e+00 : f32
    %10 = vector.broadcast %cst_10 : f32 to vector<6x32xf32>
    %11 = vector.extract_strided_slice %8 {offsets = [0, 0], sizes = [6, 96], strides = [1, 1]} : vector<48x96xf32> to vector<6x96xf32>
    %cst_11 = arith.constant dense<0.000000e+00> : vector<6x96xf32>
    %12 = tpu.matmul %9, %4, %cst_11 {dimension_numbers = #tpu.dot_dimension_numbers<[1], [0], [0], [1], [0, 0, 1, 1], [], []>} : vector<6x32xf32>, vector<32x96xf32>, vector<6x96xf32> -> vector<6x96xf32>
    %13 = vector.extract_strided_slice %11 {offsets = [0, 0], sizes = [6, 32], strides = [1, 1]} : vector<6x96xf32> to vector<6x32xf32>
    %14 = vector.extract_strided_slice %12 {offsets = [0, 0], sizes = [6, 32], strides = [1, 1]} : vector<6x96xf32> to vector<6x32xf32>
    %15 = arith.addf %13, %14 : vector<6x32xf32>
    %16 = arith.negf %15 : vector<6x32xf32>
    %17 = math.exp %16 : vector<6x32xf32>
    %cst_12 = arith.constant 1.000000e+00 : f32
    %18 = vector.broadcast %cst_12 : f32 to vector<6x32xf32>
    %19 = arith.addf %18, %17 : vector<6x32xf32>
    %20 = arith.divf %18, %19 : vector<6x32xf32>
    %21 = vector.extract_strided_slice %11 {offsets = [0, 32], sizes = [6, 32], strides = [1, 1]} : vector<6x96xf32> to vector<6x32xf32>
    %22 = vector.extract_strided_slice %12 {offsets = [0, 32], sizes = [6, 32], strides = [1, 1]} : vector<6x96xf32> to vector<6x32xf32>
    %23 = arith.addf %21, %22 : vector<6x32xf32>
    %24 = arith.negf %23 : vector<6x32xf32>
    %25 = math.exp %24 : vector<6x32xf32>
    %cst_13 = arith.constant 1.000000e+00 : f32
    %26 = vector.broadcast %cst_13 : f32 to vector<6x32xf32>
    %27 = arith.addf %26, %25 : vector<6x32xf32>
    %28 = arith.divf %26, %27 : vector<6x32xf32>
    %29 = vector.extract_strided_slice %11 {offsets = [0, 64], sizes = [6, 32], strides = [1, 1]} : vector<6x96xf32> to vector<6x32xf32>
    %30 = vector.extract_strided_slice %12 {offsets = [0, 64], sizes = [6, 32], strides = [1, 1]} : vector<6x96xf32> to vector<6x32xf32>
    %31 = arith.mulf %28, %30 : vector<6x32xf32>
    %32 = arith.addf %29, %31 : vector<6x32xf32>
    %33 = math.tanh %32 : vector<6x32xf32>
    %cst_14 = arith.constant 1.000000e+00 : f32
    %34 = vector.broadcast %cst_14 : f32 to vector<6x32xf32>
    %35 = arith.subf %34, %20 : vector<6x32xf32>
    %36 = arith.mulf %35, %33 : vector<6x32xf32>
    %37 = arith.mulf %20, %9 : vector<6x32xf32>
    %38 = arith.addf %36, %37 : vector<6x32xf32>
    %39 = arith.addf %10, %38 : vector<6x32xf32>
    %40 = vector.extract_strided_slice %8 {offsets = [6, 0], sizes = [6, 96], strides = [1, 1]} : vector<48x96xf32> to vector<6x96xf32>
    %cst_15 = arith.constant dense<0.000000e+00> : vector<6x96xf32>
    %41 = tpu.matmul %38, %4, %cst_15 {dimension_numbers = #tpu.dot_dimension_numbers<[1], [0], [0], [1], [0, 0, 1, 1], [], []>} : vector<6x32xf32>, vector<32x96xf32>, vector<6x96xf32> -> vector<6x96xf32>
    %42 = vector.extract_strided_slice %40 {offsets = [0, 0], sizes = [6, 32], strides = [1, 1]} : vector<6x96xf32> to vector<6x32xf32>
    %43 = vector.extract_strided_slice %41 {offsets = [0, 0], sizes = [6, 32], strides = [1, 1]} : vector<6x96xf32> to vector<6x32xf32>
    %44 = arith.addf %42, %43 : vector<6x32xf32>
    %45 = arith.negf %44 : vector<6x32xf32>
    %46 = math.exp %45 : vector<6x32xf32>
    %cst_16 = arith.constant 1.000000e+00 : f32
    %47 = vector.broadcast %cst_16 : f32 to vector<6x32xf32>
    %48 = arith.addf %47, %46 : vector<6x32xf32>
    %49 = arith.divf %47, %48 : vector<6x32xf32>
    %50 = vector.extract_strided_slice %40 {offsets = [0, 32], sizes = [6, 32], strides = [1, 1]} : vector<6x96xf32> to vector<6x32xf32>
    %51 = vector.extract_strided_slice %41 {offsets = [0, 32], sizes = [6, 32], strides = [1, 1]} : vector<6x96xf32> to vector<6x32xf32>
    %52 = arith.addf %50, %51 : vector<6x32xf32>
    %53 = arith.negf %52 : vector<6x32xf32>
    %54 = math.exp %53 : vector<6x32xf32>
    %cst_17 = arith.constant 1.000000e+00 : f32
    %55 = vector.broadcast %cst_17 : f32 to vector<6x32xf32>
    %56 = arith.addf %55, %54 : vector<6x32xf32>
    %57 = arith.divf %55, %56 : vector<6x32xf32>
    %58 = vector.extract_strided_slice %40 {offsets = [0, 64], sizes = [6, 32], strides = [1, 1]} : vector<6x96xf32> to vector<6x32xf32>
    %59 = vector.extract_strided_slice %41 {offsets = [0, 64], sizes = [6, 32], strides = [1, 1]} : vector<6x96xf32> to vector<6x32xf32>
    %60 = arith.mulf %57, %59 : vector<6x32xf32>
    %61 = arith.addf %58, %60 : vector<6x32xf32>
    %62 = math.tanh %61 : vector<6x32xf32>
    %cst_18 = arith.constant 1.000000e+00 : f32
    %63 = vector.broadcast %cst_18 : f32 to vector<6x32xf32>
    %64 = arith.subf %63, %49 : vector<6x32xf32>
    %65 = arith.mulf %64, %62 : vector<6x32xf32>
    %66 = arith.mulf %49, %38 : vector<6x32xf32>
    %67 = arith.addf %65, %66 : vector<6x32xf32>
    %68 = arith.addf %39, %67 : vector<6x32xf32>
    %69 = vector.extract_strided_slice %8 {offsets = [12, 0], sizes = [6, 96], strides = [1, 1]} : vector<48x96xf32> to vector<6x96xf32>
    %cst_19 = arith.constant dense<0.000000e+00> : vector<6x96xf32>
    %70 = tpu.matmul %67, %4, %cst_19 {dimension_numbers = #tpu.dot_dimension_numbers<[1], [0], [0], [1], [0, 0, 1, 1], [], []>} : vector<6x32xf32>, vector<32x96xf32>, vector<6x96xf32> -> vector<6x96xf32>
    %71 = vector.extract_strided_slice %69 {offsets = [0, 0], sizes = [6, 32], strides = [1, 1]} : vector<6x96xf32> to vector<6x32xf32>
    %72 = vector.extract_strided_slice %70 {offsets = [0, 0], sizes = [6, 32], strides = [1, 1]} : vector<6x96xf32> to vector<6x32xf32>
    %73 = arith.addf %71, %72 : vector<6x32xf32>
    %74 = arith.negf %73 : vector<6x32xf32>
    %75 = math.exp %74 : vector<6x32xf32>
    %cst_20 = arith.constant 1.000000e+00 : f32
    %76 = vector.broadcast %cst_20 : f32 to vector<6x32xf32>
    %77 = arith.addf %76, %75 : vector<6x32xf32>
    %78 = arith.divf %76, %77 : vector<6x32xf32>
    %79 = vector.extract_strided_slice %69 {offsets = [0, 32], sizes = [6, 32], strides = [1, 1]} : vector<6x96xf32> to vector<6x32xf32>
    %80 = vector.extract_strided_slice %70 {offsets = [0, 32], sizes = [6, 32], strides = [1, 1]} : vector<6x96xf32> to vector<6x32xf32>
    %81 = arith.addf %79, %80 : vector<6x32xf32>
    %82 = arith.negf %81 : vector<6x32xf32>
    %83 = math.exp %82 : vector<6x32xf32>
    %cst_21 = arith.constant 1.000000e+00 : f32
    %84 = vector.broadcast %cst_21 : f32 to vector<6x32xf32>
    %85 = arith.addf %84, %83 : vector<6x32xf32>
    %86 = arith.divf %84, %85 : vector<6x32xf32>
    %87 = vector.extract_strided_slice %69 {offsets = [0, 64], sizes = [6, 32], strides = [1, 1]} : vector<6x96xf32> to vector<6x32xf32>
    %88 = vector.extract_strided_slice %70 {offsets = [0, 64], sizes = [6, 32], strides = [1, 1]} : vector<6x96xf32> to vector<6x32xf32>
    %89 = arith.mulf %86, %88 : vector<6x32xf32>
    %90 = arith.addf %87, %89 : vector<6x32xf32>
    %91 = math.tanh %90 : vector<6x32xf32>
    %cst_22 = arith.constant 1.000000e+00 : f32
    %92 = vector.broadcast %cst_22 : f32 to vector<6x32xf32>
    %93 = arith.subf %92, %78 : vector<6x32xf32>
    %94 = arith.mulf %93, %91 : vector<6x32xf32>
    %95 = arith.mulf %78, %67 : vector<6x32xf32>
    %96 = arith.addf %94, %95 : vector<6x32xf32>
    %97 = arith.addf %68, %96 : vector<6x32xf32>
    %98 = vector.extract_strided_slice %8 {offsets = [18, 0], sizes = [6, 96], strides = [1, 1]} : vector<48x96xf32> to vector<6x96xf32>
    %cst_23 = arith.constant dense<0.000000e+00> : vector<6x96xf32>
    %99 = tpu.matmul %96, %4, %cst_23 {dimension_numbers = #tpu.dot_dimension_numbers<[1], [0], [0], [1], [0, 0, 1, 1], [], []>} : vector<6x32xf32>, vector<32x96xf32>, vector<6x96xf32> -> vector<6x96xf32>
    %100 = vector.extract_strided_slice %98 {offsets = [0, 0], sizes = [6, 32], strides = [1, 1]} : vector<6x96xf32> to vector<6x32xf32>
    %101 = vector.extract_strided_slice %99 {offsets = [0, 0], sizes = [6, 32], strides = [1, 1]} : vector<6x96xf32> to vector<6x32xf32>
    %102 = arith.addf %100, %101 : vector<6x32xf32>
    %103 = arith.negf %102 : vector<6x32xf32>
    %104 = math.exp %103 : vector<6x32xf32>
    %cst_24 = arith.constant 1.000000e+00 : f32
    %105 = vector.broadcast %cst_24 : f32 to vector<6x32xf32>
    %106 = arith.addf %105, %104 : vector<6x32xf32>
    %107 = arith.divf %105, %106 : vector<6x32xf32>
    %108 = vector.extract_strided_slice %98 {offsets = [0, 32], sizes = [6, 32], strides = [1, 1]} : vector<6x96xf32> to vector<6x32xf32>
    %109 = vector.extract_strided_slice %99 {offsets = [0, 32], sizes = [6, 32], strides = [1, 1]} : vector<6x96xf32> to vector<6x32xf32>
    %110 = arith.addf %108, %109 : vector<6x32xf32>
    %111 = arith.negf %110 : vector<6x32xf32>
    %112 = math.exp %111 : vector<6x32xf32>
    %cst_25 = arith.constant 1.000000e+00 : f32
    %113 = vector.broadcast %cst_25 : f32 to vector<6x32xf32>
    %114 = arith.addf %113, %112 : vector<6x32xf32>
    %115 = arith.divf %113, %114 : vector<6x32xf32>
    %116 = vector.extract_strided_slice %98 {offsets = [0, 64], sizes = [6, 32], strides = [1, 1]} : vector<6x96xf32> to vector<6x32xf32>
    %117 = vector.extract_strided_slice %99 {offsets = [0, 64], sizes = [6, 32], strides = [1, 1]} : vector<6x96xf32> to vector<6x32xf32>
    %118 = arith.mulf %115, %117 : vector<6x32xf32>
    %119 = arith.addf %116, %118 : vector<6x32xf32>
    %120 = math.tanh %119 : vector<6x32xf32>
    %cst_26 = arith.constant 1.000000e+00 : f32
    %121 = vector.broadcast %cst_26 : f32 to vector<6x32xf32>
    %122 = arith.subf %121, %107 : vector<6x32xf32>
    %123 = arith.mulf %122, %120 : vector<6x32xf32>
    %124 = arith.mulf %107, %96 : vector<6x32xf32>
    %125 = arith.addf %123, %124 : vector<6x32xf32>
    %126 = arith.addf %97, %125 : vector<6x32xf32>
    %127 = vector.extract_strided_slice %8 {offsets = [24, 0], sizes = [6, 96], strides = [1, 1]} : vector<48x96xf32> to vector<6x96xf32>
    %cst_27 = arith.constant dense<0.000000e+00> : vector<6x96xf32>
    %128 = tpu.matmul %125, %4, %cst_27 {dimension_numbers = #tpu.dot_dimension_numbers<[1], [0], [0], [1], [0, 0, 1, 1], [], []>} : vector<6x32xf32>, vector<32x96xf32>, vector<6x96xf32> -> vector<6x96xf32>
    %129 = vector.extract_strided_slice %127 {offsets = [0, 0], sizes = [6, 32], strides = [1, 1]} : vector<6x96xf32> to vector<6x32xf32>
    %130 = vector.extract_strided_slice %128 {offsets = [0, 0], sizes = [6, 32], strides = [1, 1]} : vector<6x96xf32> to vector<6x32xf32>
    %131 = arith.addf %129, %130 : vector<6x32xf32>
    %132 = arith.negf %131 : vector<6x32xf32>
    %133 = math.exp %132 : vector<6x32xf32>
    %cst_28 = arith.constant 1.000000e+00 : f32
    %134 = vector.broadcast %cst_28 : f32 to vector<6x32xf32>
    %135 = arith.addf %134, %133 : vector<6x32xf32>
    %136 = arith.divf %134, %135 : vector<6x32xf32>
    %137 = vector.extract_strided_slice %127 {offsets = [0, 32], sizes = [6, 32], strides = [1, 1]} : vector<6x96xf32> to vector<6x32xf32>
    %138 = vector.extract_strided_slice %128 {offsets = [0, 32], sizes = [6, 32], strides = [1, 1]} : vector<6x96xf32> to vector<6x32xf32>
    %139 = arith.addf %137, %138 : vector<6x32xf32>
    %140 = arith.negf %139 : vector<6x32xf32>
    %141 = math.exp %140 : vector<6x32xf32>
    %cst_29 = arith.constant 1.000000e+00 : f32
    %142 = vector.broadcast %cst_29 : f32 to vector<6x32xf32>
    %143 = arith.addf %142, %141 : vector<6x32xf32>
    %144 = arith.divf %142, %143 : vector<6x32xf32>
    %145 = vector.extract_strided_slice %127 {offsets = [0, 64], sizes = [6, 32], strides = [1, 1]} : vector<6x96xf32> to vector<6x32xf32>
    %146 = vector.extract_strided_slice %128 {offsets = [0, 64], sizes = [6, 32], strides = [1, 1]} : vector<6x96xf32> to vector<6x32xf32>
    %147 = arith.mulf %144, %146 : vector<6x32xf32>
    %148 = arith.addf %145, %147 : vector<6x32xf32>
    %149 = math.tanh %148 : vector<6x32xf32>
    %cst_30 = arith.constant 1.000000e+00 : f32
    %150 = vector.broadcast %cst_30 : f32 to vector<6x32xf32>
    %151 = arith.subf %150, %136 : vector<6x32xf32>
    %152 = arith.mulf %151, %149 : vector<6x32xf32>
    %153 = arith.mulf %136, %125 : vector<6x32xf32>
    %154 = arith.addf %152, %153 : vector<6x32xf32>
    %155 = arith.addf %126, %154 : vector<6x32xf32>
    %156 = vector.extract_strided_slice %8 {offsets = [30, 0], sizes = [6, 96], strides = [1, 1]} : vector<48x96xf32> to vector<6x96xf32>
    %cst_31 = arith.constant dense<0.000000e+00> : vector<6x96xf32>
    %157 = tpu.matmul %154, %4, %cst_31 {dimension_numbers = #tpu.dot_dimension_numbers<[1], [0], [0], [1], [0, 0, 1, 1], [], []>} : vector<6x32xf32>, vector<32x96xf32>, vector<6x96xf32> -> vector<6x96xf32>
    %158 = vector.extract_strided_slice %156 {offsets = [0, 0], sizes = [6, 32], strides = [1, 1]} : vector<6x96xf32> to vector<6x32xf32>
    %159 = vector.extract_strided_slice %157 {offsets = [0, 0], sizes = [6, 32], strides = [1, 1]} : vector<6x96xf32> to vector<6x32xf32>
    %160 = arith.addf %158, %159 : vector<6x32xf32>
    %161 = arith.negf %160 : vector<6x32xf32>
    %162 = math.exp %161 : vector<6x32xf32>
    %cst_32 = arith.constant 1.000000e+00 : f32
    %163 = vector.broadcast %cst_32 : f32 to vector<6x32xf32>
    %164 = arith.addf %163, %162 : vector<6x32xf32>
    %165 = arith.divf %163, %164 : vector<6x32xf32>
    %166 = vector.extract_strided_slice %156 {offsets = [0, 32], sizes = [6, 32], strides = [1, 1]} : vector<6x96xf32> to vector<6x32xf32>
    %167 = vector.extract_strided_slice %157 {offsets = [0, 32], sizes = [6, 32], strides = [1, 1]} : vector<6x96xf32> to vector<6x32xf32>
    %168 = arith.addf %166, %167 : vector<6x32xf32>
    %169 = arith.negf %168 : vector<6x32xf32>
    %170 = math.exp %169 : vector<6x32xf32>
    %cst_33 = arith.constant 1.000000e+00 : f32
    %171 = vector.broadcast %cst_33 : f32 to vector<6x32xf32>
    %172 = arith.addf %171, %170 : vector<6x32xf32>
    %173 = arith.divf %171, %172 : vector<6x32xf32>
    %174 = vector.extract_strided_slice %156 {offsets = [0, 64], sizes = [6, 32], strides = [1, 1]} : vector<6x96xf32> to vector<6x32xf32>
    %175 = vector.extract_strided_slice %157 {offsets = [0, 64], sizes = [6, 32], strides = [1, 1]} : vector<6x96xf32> to vector<6x32xf32>
    %176 = arith.mulf %173, %175 : vector<6x32xf32>
    %177 = arith.addf %174, %176 : vector<6x32xf32>
    %178 = math.tanh %177 : vector<6x32xf32>
    %cst_34 = arith.constant 1.000000e+00 : f32
    %179 = vector.broadcast %cst_34 : f32 to vector<6x32xf32>
    %180 = arith.subf %179, %165 : vector<6x32xf32>
    %181 = arith.mulf %180, %178 : vector<6x32xf32>
    %182 = arith.mulf %165, %154 : vector<6x32xf32>
    %183 = arith.addf %181, %182 : vector<6x32xf32>
    %184 = arith.addf %155, %183 : vector<6x32xf32>
    %185 = vector.extract_strided_slice %8 {offsets = [36, 0], sizes = [6, 96], strides = [1, 1]} : vector<48x96xf32> to vector<6x96xf32>
    %cst_35 = arith.constant dense<0.000000e+00> : vector<6x96xf32>
    %186 = tpu.matmul %183, %4, %cst_35 {dimension_numbers = #tpu.dot_dimension_numbers<[1], [0], [0], [1], [0, 0, 1, 1], [], []>} : vector<6x32xf32>, vector<32x96xf32>, vector<6x96xf32> -> vector<6x96xf32>
    %187 = vector.extract_strided_slice %185 {offsets = [0, 0], sizes = [6, 32], strides = [1, 1]} : vector<6x96xf32> to vector<6x32xf32>
    %188 = vector.extract_strided_slice %186 {offsets = [0, 0], sizes = [6, 32], strides = [1, 1]} : vector<6x96xf32> to vector<6x32xf32>
    %189 = arith.addf %187, %188 : vector<6x32xf32>
    %190 = arith.negf %189 : vector<6x32xf32>
    %191 = math.exp %190 : vector<6x32xf32>
    %cst_36 = arith.constant 1.000000e+00 : f32
    %192 = vector.broadcast %cst_36 : f32 to vector<6x32xf32>
    %193 = arith.addf %192, %191 : vector<6x32xf32>
    %194 = arith.divf %192, %193 : vector<6x32xf32>
    %195 = vector.extract_strided_slice %185 {offsets = [0, 32], sizes = [6, 32], strides = [1, 1]} : vector<6x96xf32> to vector<6x32xf32>
    %196 = vector.extract_strided_slice %186 {offsets = [0, 32], sizes = [6, 32], strides = [1, 1]} : vector<6x96xf32> to vector<6x32xf32>
    %197 = arith.addf %195, %196 : vector<6x32xf32>
    %198 = arith.negf %197 : vector<6x32xf32>
    %199 = math.exp %198 : vector<6x32xf32>
    %cst_37 = arith.constant 1.000000e+00 : f32
    %200 = vector.broadcast %cst_37 : f32 to vector<6x32xf32>
    %201 = arith.addf %200, %199 : vector<6x32xf32>
    %202 = arith.divf %200, %201 : vector<6x32xf32>
    %203 = vector.extract_strided_slice %185 {offsets = [0, 64], sizes = [6, 32], strides = [1, 1]} : vector<6x96xf32> to vector<6x32xf32>
    %204 = vector.extract_strided_slice %186 {offsets = [0, 64], sizes = [6, 32], strides = [1, 1]} : vector<6x96xf32> to vector<6x32xf32>
    %205 = arith.mulf %202, %204 : vector<6x32xf32>
    %206 = arith.addf %203, %205 : vector<6x32xf32>
    %207 = math.tanh %206 : vector<6x32xf32>
    %cst_38 = arith.constant 1.000000e+00 : f32
    %208 = vector.broadcast %cst_38 : f32 to vector<6x32xf32>
    %209 = arith.subf %208, %194 : vector<6x32xf32>
    %210 = arith.mulf %209, %207 : vector<6x32xf32>
    %211 = arith.mulf %194, %183 : vector<6x32xf32>
    %212 = arith.addf %210, %211 : vector<6x32xf32>
    %213 = arith.addf %184, %212 : vector<6x32xf32>
    %214 = vector.extract_strided_slice %8 {offsets = [42, 0], sizes = [6, 96], strides = [1, 1]} : vector<48x96xf32> to vector<6x96xf32>
    %cst_39 = arith.constant dense<0.000000e+00> : vector<6x96xf32>
    %215 = tpu.matmul %212, %4, %cst_39 {dimension_numbers = #tpu.dot_dimension_numbers<[1], [0], [0], [1], [0, 0, 1, 1], [], []>} : vector<6x32xf32>, vector<32x96xf32>, vector<6x96xf32> -> vector<6x96xf32>
    %216 = vector.extract_strided_slice %214 {offsets = [0, 0], sizes = [6, 32], strides = [1, 1]} : vector<6x96xf32> to vector<6x32xf32>
    %217 = vector.extract_strided_slice %215 {offsets = [0, 0], sizes = [6, 32], strides = [1, 1]} : vector<6x96xf32> to vector<6x32xf32>
    %218 = arith.addf %216, %217 : vector<6x32xf32>
    %219 = arith.negf %218 : vector<6x32xf32>
    %220 = math.exp %219 : vector<6x32xf32>
    %cst_40 = arith.constant 1.000000e+00 : f32
    %221 = vector.broadcast %cst_40 : f32 to vector<6x32xf32>
    %222 = arith.addf %221, %220 : vector<6x32xf32>
    %223 = arith.divf %221, %222 : vector<6x32xf32>
    %224 = vector.extract_strided_slice %214 {offsets = [0, 32], sizes = [6, 32], strides = [1, 1]} : vector<6x96xf32> to vector<6x32xf32>
    %225 = vector.extract_strided_slice %215 {offsets = [0, 32], sizes = [6, 32], strides = [1, 1]} : vector<6x96xf32> to vector<6x32xf32>
    %226 = arith.addf %224, %225 : vector<6x32xf32>
    %227 = arith.negf %226 : vector<6x32xf32>
    %228 = math.exp %227 : vector<6x32xf32>
    %cst_41 = arith.constant 1.000000e+00 : f32
    %229 = vector.broadcast %cst_41 : f32 to vector<6x32xf32>
    %230 = arith.addf %229, %228 : vector<6x32xf32>
    %231 = arith.divf %229, %230 : vector<6x32xf32>
    %232 = vector.extract_strided_slice %214 {offsets = [0, 64], sizes = [6, 32], strides = [1, 1]} : vector<6x96xf32> to vector<6x32xf32>
    %233 = vector.extract_strided_slice %215 {offsets = [0, 64], sizes = [6, 32], strides = [1, 1]} : vector<6x96xf32> to vector<6x32xf32>
    %234 = arith.mulf %231, %233 : vector<6x32xf32>
    %235 = arith.addf %232, %234 : vector<6x32xf32>
    %236 = math.tanh %235 : vector<6x32xf32>
    %cst_42 = arith.constant 1.000000e+00 : f32
    %237 = vector.broadcast %cst_42 : f32 to vector<6x32xf32>
    %238 = arith.subf %237, %223 : vector<6x32xf32>
    %239 = arith.mulf %238, %236 : vector<6x32xf32>
    %240 = arith.mulf %223, %212 : vector<6x32xf32>
    %241 = arith.addf %239, %240 : vector<6x32xf32>
    %242 = arith.addf %213, %241 : vector<6x32xf32>
    %cst_43 = arith.constant 1.250000e-01 : f32
    %243 = vector.broadcast %cst_43 : f32 to vector<6x32xf32>
    %244 = arith.mulf %242, %243 : vector<6x32xf32>
    %cst_44 = arith.constant dense<0.000000e+00> : vector<32xf32>
    %245 = vector.multi_reduction <add>, %244, %cst_44 [0] : vector<6x32xf32> to vector<32xf32>
    %246 = vector.shape_cast %245 : vector<32xf32> to vector<1x32xf32>
    %cst_45 = arith.constant 6.000000e+00 : f32
    %247 = vector.broadcast %cst_45 : f32 to vector<1x32xf32>
    %248 = arith.divf %246, %247 : vector<1x32xf32>
    %c0_46 = arith.constant 0 : index
    %c0_47 = arith.constant 0 : index
    %249 = vector.load %arg19[%c0_46, %c0_47] : memref<32x32xf32, #tpu.memory_space<vmem>>, vector<32x32xf32>
    %cst_48 = arith.constant dense<0.000000e+00> : vector<1x32xf32>
    %250 = tpu.matmul %248, %249, %cst_48 {dimension_numbers = #tpu.dot_dimension_numbers<[1], [0], [0], [1], [0, 0, 1, 1], [], []>} : vector<1x32xf32>, vector<32x32xf32>, vector<1x32xf32> -> vector<1x32xf32>
    %c0_49 = arith.constant 0 : index
    %c0_50 = arith.constant 0 : index
    %251 = vector.load %arg20[%c0_49, %c0_50] : memref<1x32xf32, #tpu.memory_space<vmem>>, vector<1x32xf32>
    %252 = arith.addf %250, %251 : vector<1x32xf32>
    %253 = math.tanh %252 : vector<1x32xf32>
    %c0_51 = arith.constant 0 : index
    %c0_52 = arith.constant 0 : index
    %254 = vector.load %arg21[%c0_51, %c0_52] : memref<32x32xf32, #tpu.memory_space<vmem>>, vector<32x32xf32>
    %cst_53 = arith.constant dense<0.000000e+00> : vector<1x32xf32>
    %255 = tpu.matmul %253, %254, %cst_53 {dimension_numbers = #tpu.dot_dimension_numbers<[1], [0], [0], [1], [0, 0, 1, 1], [], []>} : vector<1x32xf32>, vector<32x32xf32>, vector<1x32xf32> -> vector<1x32xf32>
    %c0_54 = arith.constant 0 : index
    %c0_55 = arith.constant 0 : index
    %256 = vector.load %arg22[%c0_54, %c0_55] : memref<1x32xf32, #tpu.memory_space<vmem>>, vector<1x32xf32>
    %257 = arith.addf %255, %256 : vector<1x32xf32>
    %258 = vector.extract_strided_slice %257 {offsets = [0, 0], sizes = [1, 16], strides = [1, 1]} : vector<1x32xf32> to vector<1x16xf32>
    %259 = vector.extract_strided_slice %257 {offsets = [0, 16], sizes = [1, 16], strides = [1, 1]} : vector<1x32xf32> to vector<1x16xf32>
    %cst_56 = arith.constant 0.000000e+00 : f32
    %260 = vector.broadcast %cst_56 : f32 to vector<1x16xf32>
    %261 = arith.maximumf %259, %260 : vector<1x16xf32>
    %262 = vector.broadcast %cst_56 : f32 to vector<1x16xf32>
    %263 = arith.subf %259, %262 : vector<1x16xf32>
    %264 = arith.cmpf one, %263, %263 : vector<1x16xf32>
    %265 = vector.broadcast %cst_56 : f32 to vector<1x16xf32>
    %266 = arith.addf %259, %265 : vector<1x16xf32>
    %267 = math.absf %263 : vector<1x16xf32>
    %cst_57 = arith.constant 0.000000e+00 : f32
    %268 = vector.broadcast %cst_57 : f32 to vector<1x16xf32>
    %269 = arith.subf %268, %267 : vector<1x16xf32>
    %270 = math.exp %269 : vector<1x16xf32>
    %271 = math.log1p %270 : vector<1x16xf32>
    %272 = arith.addf %261, %271 : vector<1x16xf32>
    %273 = arith.select %264, %266, %272 : vector<1x16xi1>, vector<1x16xf32>
    %cst_58 = arith.constant 0.899999976 : f32
    %274 = vector.broadcast %cst_58 : f32 to vector<1x16xf32>
    %275 = arith.mulf %274, %273 : vector<1x16xf32>
    %cst_59 = arith.constant 1.000000e-01 : f32
    %276 = vector.broadcast %cst_59 : f32 to vector<1x16xf32>
    %277 = arith.addf %276, %275 : vector<1x16xf32>
    %c0_60 = arith.constant 0 : index
    %c0_61 = arith.constant 0 : index
    %278 = vector.load %arg36[%c0_60, %c0_61] : memref<1x16xf32, #tpu.memory_space<vmem>>, vector<1x16xf32>
    tpu.vector_store %arg36[%c0_60, %c0_61], %258 {strides = array<i32>} : memref<1x16xf32, #tpu.memory_space<vmem>>, vector<1x16xf32>,
    %c0_62 = arith.constant 0 : index
    %c0_63 = arith.constant 0 : index
    %279 = vector.load %arg37[%c0_62, %c0_63] : memref<1x16xf32, #tpu.memory_space<vmem>>, vector<1x16xf32>
    tpu.vector_store %arg37[%c0_62, %c0_63], %277 {strides = array<i32>} : memref<1x16xf32, #tpu.memory_space<vmem>>, vector<1x16xf32>,
    %c0_64 = arith.constant 0 : index
    %c0_65 = arith.constant 0 : index
    %280 = vector.load %arg5[%c0_64, %c0_65] : memref<7x96xf32, #tpu.memory_space<vmem>>, vector<7x96xf32>
    %c0_66 = arith.constant 0 : index
    %c0_67 = arith.constant 0 : index
    %281 = vector.load %arg6[%c0_66, %c0_67] : memref<32x96xf32, #tpu.memory_space<vmem>>, vector<32x96xf32>
    %c0_68 = arith.constant 0 : index
    %c0_69 = arith.constant 0 : index
    %282 = vector.load %arg7[%c0_68, %c0_69] : memref<1x96xf32, #tpu.memory_space<vmem>>, vector<1x96xf32>
    %cst_70 = arith.constant dense<0.000000e+00> : vector<32x96xf32>
    %283 = tpu.matmul %1, %280, %cst_70 {dimension_numbers = #tpu.dot_dimension_numbers<[1], [0], [0], [1], [0, 0, 1, 1], [], []>} : vector<32x7xf32>, vector<7x96xf32>, vector<32x96xf32> -> vector<32x96xf32>
    %284 = vector.broadcast %282 : vector<1x96xf32> to vector<32x96xf32>
    %285 = arith.addf %283, %284 : vector<32x96xf32>
    %cst_71 = arith.constant 0.000000e+00 : f32
    %286 = vector.broadcast %cst_71 : f32 to vector<4x32xf32>
    %287 = vector.extract_strided_slice %285 {offsets = [0, 0], sizes = [4, 96], strides = [1, 1]} : vector<32x96xf32> to vector<4x96xf32>
    %cst_72 = arith.constant dense<0.000000e+00> : vector<4x96xf32>
    %288 = tpu.matmul %286, %281, %cst_72 {dimension_numbers = #tpu.dot_dimension_numbers<[1], [0], [0], [1], [0, 0, 1, 1], [], []>} : vector<4x32xf32>, vector<32x96xf32>, vector<4x96xf32> -> vector<4x96xf32>
    %289 = vector.extract_strided_slice %287 {offsets = [0, 0], sizes = [4, 32], strides = [1, 1]} : vector<4x96xf32> to vector<4x32xf32>
    %290 = vector.extract_strided_slice %288 {offsets = [0, 0], sizes = [4, 32], strides = [1, 1]} : vector<4x96xf32> to vector<4x32xf32>
    %291 = arith.addf %289, %290 : vector<4x32xf32>
    %292 = arith.negf %291 : vector<4x32xf32>
    %293 = math.exp %292 : vector<4x32xf32>
    %cst_73 = arith.constant 1.000000e+00 : f32
    %294 = vector.broadcast %cst_73 : f32 to vector<4x32xf32>
    %295 = arith.addf %294, %293 : vector<4x32xf32>
    %296 = arith.divf %294, %295 : vector<4x32xf32>
    %297 = vector.extract_strided_slice %287 {offsets = [0, 32], sizes = [4, 32], strides = [1, 1]} : vector<4x96xf32> to vector<4x32xf32>
    %298 = vector.extract_strided_slice %288 {offsets = [0, 32], sizes = [4, 32], strides = [1, 1]} : vector<4x96xf32> to vector<4x32xf32>
    %299 = arith.addf %297, %298 : vector<4x32xf32>
    %300 = arith.negf %299 : vector<4x32xf32>
    %301 = math.exp %300 : vector<4x32xf32>
    %cst_74 = arith.constant 1.000000e+00 : f32
    %302 = vector.broadcast %cst_74 : f32 to vector<4x32xf32>
    %303 = arith.addf %302, %301 : vector<4x32xf32>
    %304 = arith.divf %302, %303 : vector<4x32xf32>
    %305 = vector.extract_strided_slice %287 {offsets = [0, 64], sizes = [4, 32], strides = [1, 1]} : vector<4x96xf32> to vector<4x32xf32>
    %306 = vector.extract_strided_slice %288 {offsets = [0, 64], sizes = [4, 32], strides = [1, 1]} : vector<4x96xf32> to vector<4x32xf32>
    %307 = arith.mulf %304, %306 : vector<4x32xf32>
    %308 = arith.addf %305, %307 : vector<4x32xf32>
    %309 = math.tanh %308 : vector<4x32xf32>
    %cst_75 = arith.constant 1.000000e+00 : f32
    %310 = vector.broadcast %cst_75 : f32 to vector<4x32xf32>
    %311 = arith.subf %310, %296 : vector<4x32xf32>
    %312 = arith.mulf %311, %309 : vector<4x32xf32>
    %313 = arith.mulf %296, %286 : vector<4x32xf32>
    %314 = arith.addf %312, %313 : vector<4x32xf32>
    %315 = vector.extract_strided_slice %285 {offsets = [4, 0], sizes = [4, 96], strides = [1, 1]} : vector<32x96xf32> to vector<4x96xf32>
    %cst_76 = arith.constant dense<0.000000e+00> : vector<4x96xf32>
    %316 = tpu.matmul %314, %281, %cst_76 {dimension_numbers = #tpu.dot_dimension_numbers<[1], [0], [0], [1], [0, 0, 1, 1], [], []>} : vector<4x32xf32>, vector<32x96xf32>, vector<4x96xf32> -> vector<4x96xf32>
    %317 = vector.extract_strided_slice %315 {offsets = [0, 0], sizes = [4, 32], strides = [1, 1]} : vector<4x96xf32> to vector<4x32xf32>
    %318 = vector.extract_strided_slice %316 {offsets = [0, 0], sizes = [4, 32], strides = [1, 1]} : vector<4x96xf32> to vector<4x32xf32>
    %319 = arith.addf %317, %318 : vector<4x32xf32>
    %320 = arith.negf %319 : vector<4x32xf32>
    %321 = math.exp %320 : vector<4x32xf32>
    %cst_77 = arith.constant 1.000000e+00 : f32
    %322 = vector.broadcast %cst_77 : f32 to vector<4x32xf32>
    %323 = arith.addf %322, %321 : vector<4x32xf32>
    %324 = arith.divf %322, %323 : vector<4x32xf32>
    %325 = vector.extract_strided_slice %315 {offsets = [0, 32], sizes = [4, 32], strides = [1, 1]} : vector<4x96xf32> to vector<4x32xf32>
    %326 = vector.extract_strided_slice %316 {offsets = [0, 32], sizes = [4, 32], strides = [1, 1]} : vector<4x96xf32> to vector<4x32xf32>
    %327 = arith.addf %325, %326 : vector<4x32xf32>
    %328 = arith.negf %327 : vector<4x32xf32>
    %329 = math.exp %328 : vector<4x32xf32>
    %cst_78 = arith.constant 1.000000e+00 : f32
    %330 = vector.broadcast %cst_78 : f32 to vector<4x32xf32>
    %331 = arith.addf %330, %329 : vector<4x32xf32>
    %332 = arith.divf %330, %331 : vector<4x32xf32>
    %333 = vector.extract_strided_slice %315 {offsets = [0, 64], sizes = [4, 32], strides = [1, 1]} : vector<4x96xf32> to vector<4x32xf32>
    %334 = vector.extract_strided_slice %316 {offsets = [0, 64], sizes = [4, 32], strides = [1, 1]} : vector<4x96xf32> to vector<4x32xf32>
    %335 = arith.mulf %332, %334 : vector<4x32xf32>
    %336 = arith.addf %333, %335 : vector<4x32xf32>
    %337 = math.tanh %336 : vector<4x32xf32>
    %cst_79 = arith.constant 1.000000e+00 : f32
    %338 = vector.broadcast %cst_79 : f32 to vector<4x32xf32>
    %339 = arith.subf %338, %324 : vector<4x32xf32>
    %340 = arith.mulf %339, %337 : vector<4x32xf32>
    %341 = arith.mulf %324, %314 : vector<4x32xf32>
    %342 = arith.addf %340, %341 : vector<4x32xf32>
    %343 = vector.extract_strided_slice %285 {offsets = [8, 0], sizes = [4, 96], strides = [1, 1]} : vector<32x96xf32> to vector<4x96xf32>
    %cst_80 = arith.constant dense<0.000000e+00> : vector<4x96xf32>
    %344 = tpu.matmul %342, %281, %cst_80 {dimension_numbers = #tpu.dot_dimension_numbers<[1], [0], [0], [1], [0, 0, 1, 1], [], []>} : vector<4x32xf32>, vector<32x96xf32>, vector<4x96xf32> -> vector<4x96xf32>
    %345 = vector.extract_strided_slice %343 {offsets = [0, 0], sizes = [4, 32], strides = [1, 1]} : vector<4x96xf32> to vector<4x32xf32>
    %346 = vector.extract_strided_slice %344 {offsets = [0, 0], sizes = [4, 32], strides = [1, 1]} : vector<4x96xf32> to vector<4x32xf32>
    %347 = arith.addf %345, %346 : vector<4x32xf32>
    %348 = arith.negf %347 : vector<4x32xf32>
    %349 = math.exp %348 : vector<4x32xf32>
    %cst_81 = arith.constant 1.000000e+00 : f32
    %350 = vector.broadcast %cst_81 : f32 to vector<4x32xf32>
    %351 = arith.addf %350, %349 : vector<4x32xf32>
    %352 = arith.divf %350, %351 : vector<4x32xf32>
    %353 = vector.extract_strided_slice %343 {offsets = [0, 32], sizes = [4, 32], strides = [1, 1]} : vector<4x96xf32> to vector<4x32xf32>
    %354 = vector.extract_strided_slice %344 {offsets = [0, 32], sizes = [4, 32], strides = [1, 1]} : vector<4x96xf32> to vector<4x32xf32>
    %355 = arith.addf %353, %354 : vector<4x32xf32>
    %356 = arith.negf %355 : vector<4x32xf32>
    %357 = math.exp %356 : vector<4x32xf32>
    %cst_82 = arith.constant 1.000000e+00 : f32
    %358 = vector.broadcast %cst_82 : f32 to vector<4x32xf32>
    %359 = arith.addf %358, %357 : vector<4x32xf32>
    %360 = arith.divf %358, %359 : vector<4x32xf32>
    %361 = vector.extract_strided_slice %343 {offsets = [0, 64], sizes = [4, 32], strides = [1, 1]} : vector<4x96xf32> to vector<4x32xf32>
    %362 = vector.extract_strided_slice %344 {offsets = [0, 64], sizes = [4, 32], strides = [1, 1]} : vector<4x96xf32> to vector<4x32xf32>
    %363 = arith.mulf %360, %362 : vector<4x32xf32>
    %364 = arith.addf %361, %363 : vector<4x32xf32>
    %365 = math.tanh %364 : vector<4x32xf32>
    %cst_83 = arith.constant 1.000000e+00 : f32
    %366 = vector.broadcast %cst_83 : f32 to vector<4x32xf32>
    %367 = arith.subf %366, %352 : vector<4x32xf32>
    %368 = arith.mulf %367, %365 : vector<4x32xf32>
    %369 = arith.mulf %352, %342 : vector<4x32xf32>
    %370 = arith.addf %368, %369 : vector<4x32xf32>
    %371 = vector.extract_strided_slice %285 {offsets = [12, 0], sizes = [4, 96], strides = [1, 1]} : vector<32x96xf32> to vector<4x96xf32>
    %cst_84 = arith.constant dense<0.000000e+00> : vector<4x96xf32>
    %372 = tpu.matmul %370, %281, %cst_84 {dimension_numbers = #tpu.dot_dimension_numbers<[1], [0], [0], [1], [0, 0, 1, 1], [], []>} : vector<4x32xf32>, vector<32x96xf32>, vector<4x96xf32> -> vector<4x96xf32>
    %373 = vector.extract_strided_slice %371 {offsets = [0, 0], sizes = [4, 32], strides = [1, 1]} : vector<4x96xf32> to vector<4x32xf32>
    %374 = vector.extract_strided_slice %372 {offsets = [0, 0], sizes = [4, 32], strides = [1, 1]} : vector<4x96xf32> to vector<4x32xf32>
    %375 = arith.addf %373, %374 : vector<4x32xf32>
    %376 = arith.negf %375 : vector<4x32xf32>
    %377 = math.exp %376 : vector<4x32xf32>
    %cst_85 = arith.constant 1.000000e+00 : f32
    %378 = vector.broadcast %cst_85 : f32 to vector<4x32xf32>
    %379 = arith.addf %378, %377 : vector<4x32xf32>
    %380 = arith.divf %378, %379 : vector<4x32xf32>
    %381 = vector.extract_strided_slice %371 {offsets = [0, 32], sizes = [4, 32], strides = [1, 1]} : vector<4x96xf32> to vector<4x32xf32>
    %382 = vector.extract_strided_slice %372 {offsets = [0, 32], sizes = [4, 32], strides = [1, 1]} : vector<4x96xf32> to vector<4x32xf32>
    %383 = arith.addf %381, %382 : vector<4x32xf32>
    %384 = arith.negf %383 : vector<4x32xf32>
    %385 = math.exp %384 : vector<4x32xf32>
    %cst_86 = arith.constant 1.000000e+00 : f32
    %386 = vector.broadcast %cst_86 : f32 to vector<4x32xf32>
    %387 = arith.addf %386, %385 : vector<4x32xf32>
    %388 = arith.divf %386, %387 : vector<4x32xf32>
    %389 = vector.extract_strided_slice %371 {offsets = [0, 64], sizes = [4, 32], strides = [1, 1]} : vector<4x96xf32> to vector<4x32xf32>
    %390 = vector.extract_strided_slice %372 {offsets = [0, 64], sizes = [4, 32], strides = [1, 1]} : vector<4x96xf32> to vector<4x32xf32>
    %391 = arith.mulf %388, %390 : vector<4x32xf32>
    %392 = arith.addf %389, %391 : vector<4x32xf32>
    %393 = math.tanh %392 : vector<4x32xf32>
    %cst_87 = arith.constant 1.000000e+00 : f32
    %394 = vector.broadcast %cst_87 : f32 to vector<4x32xf32>
    %395 = arith.subf %394, %380 : vector<4x32xf32>
    %396 = arith.mulf %395, %393 : vector<4x32xf32>
    %397 = arith.mulf %380, %370 : vector<4x32xf32>
    %398 = arith.addf %396, %397 : vector<4x32xf32>
    %399 = vector.extract_strided_slice %285 {offsets = [16, 0], sizes = [4, 96], strides = [1, 1]} : vector<32x96xf32> to vector<4x96xf32>
    %cst_88 = arith.constant dense<0.000000e+00> : vector<4x96xf32>
    %400 = tpu.matmul %398, %281, %cst_88 {dimension_numbers = #tpu.dot_dimension_numbers<[1], [0], [0], [1], [0, 0, 1, 1], [], []>} : vector<4x32xf32>, vector<32x96xf32>, vector<4x96xf32> -> vector<4x96xf32>
    %401 = vector.extract_strided_slice %399 {offsets = [0, 0], sizes = [4, 32], strides = [1, 1]} : vector<4x96xf32> to vector<4x32xf32>
    %402 = vector.extract_strided_slice %400 {offsets = [0, 0], sizes = [4, 32], strides = [1, 1]} : vector<4x96xf32> to vector<4x32xf32>
    %403 = arith.addf %401, %402 : vector<4x32xf32>
    %404 = arith.negf %403 : vector<4x32xf32>
    %405 = math.exp %404 : vector<4x32xf32>
    %cst_89 = arith.constant 1.000000e+00 : f32
    %406 = vector.broadcast %cst_89 : f32 to vector<4x32xf32>
    %407 = arith.addf %406, %405 : vector<4x32xf32>
    %408 = arith.divf %406, %407 : vector<4x32xf32>
    %409 = vector.extract_strided_slice %399 {offsets = [0, 32], sizes = [4, 32], strides = [1, 1]} : vector<4x96xf32> to vector<4x32xf32>
    %410 = vector.extract_strided_slice %400 {offsets = [0, 32], sizes = [4, 32], strides = [1, 1]} : vector<4x96xf32> to vector<4x32xf32>
    %411 = arith.addf %409, %410 : vector<4x32xf32>
    %412 = arith.negf %411 : vector<4x32xf32>
    %413 = math.exp %412 : vector<4x32xf32>
    %cst_90 = arith.constant 1.000000e+00 : f32
    %414 = vector.broadcast %cst_90 : f32 to vector<4x32xf32>
    %415 = arith.addf %414, %413 : vector<4x32xf32>
    %416 = arith.divf %414, %415 : vector<4x32xf32>
    %417 = vector.extract_strided_slice %399 {offsets = [0, 64], sizes = [4, 32], strides = [1, 1]} : vector<4x96xf32> to vector<4x32xf32>
    %418 = vector.extract_strided_slice %400 {offsets = [0, 64], sizes = [4, 32], strides = [1, 1]} : vector<4x96xf32> to vector<4x32xf32>
    %419 = arith.mulf %416, %418 : vector<4x32xf32>
    %420 = arith.addf %417, %419 : vector<4x32xf32>
    %421 = math.tanh %420 : vector<4x32xf32>
    %cst_91 = arith.constant 1.000000e+00 : f32
    %422 = vector.broadcast %cst_91 : f32 to vector<4x32xf32>
    %423 = arith.subf %422, %408 : vector<4x32xf32>
    %424 = arith.mulf %423, %421 : vector<4x32xf32>
    %425 = arith.mulf %408, %398 : vector<4x32xf32>
    %426 = arith.addf %424, %425 : vector<4x32xf32>
    %427 = vector.extract_strided_slice %285 {offsets = [20, 0], sizes = [4, 96], strides = [1, 1]} : vector<32x96xf32> to vector<4x96xf32>
    %cst_92 = arith.constant dense<0.000000e+00> : vector<4x96xf32>
    %428 = tpu.matmul %426, %281, %cst_92 {dimension_numbers = #tpu.dot_dimension_numbers<[1], [0], [0], [1], [0, 0, 1, 1], [], []>} : vector<4x32xf32>, vector<32x96xf32>, vector<4x96xf32> -> vector<4x96xf32>
    %429 = vector.extract_strided_slice %427 {offsets = [0, 0], sizes = [4, 32], strides = [1, 1]} : vector<4x96xf32> to vector<4x32xf32>
    %430 = vector.extract_strided_slice %428 {offsets = [0, 0], sizes = [4, 32], strides = [1, 1]} : vector<4x96xf32> to vector<4x32xf32>
    %431 = arith.addf %429, %430 : vector<4x32xf32>
    %432 = arith.negf %431 : vector<4x32xf32>
    %433 = math.exp %432 : vector<4x32xf32>
    %cst_93 = arith.constant 1.000000e+00 : f32
    %434 = vector.broadcast %cst_93 : f32 to vector<4x32xf32>
    %435 = arith.addf %434, %433 : vector<4x32xf32>
    %436 = arith.divf %434, %435 : vector<4x32xf32>
    %437 = vector.extract_strided_slice %427 {offsets = [0, 32], sizes = [4, 32], strides = [1, 1]} : vector<4x96xf32> to vector<4x32xf32>
    %438 = vector.extract_strided_slice %428 {offsets = [0, 32], sizes = [4, 32], strides = [1, 1]} : vector<4x96xf32> to vector<4x32xf32>
    %439 = arith.addf %437, %438 : vector<4x32xf32>
    %440 = arith.negf %439 : vector<4x32xf32>
    %441 = math.exp %440 : vector<4x32xf32>
    %cst_94 = arith.constant 1.000000e+00 : f32
    %442 = vector.broadcast %cst_94 : f32 to vector<4x32xf32>
    %443 = arith.addf %442, %441 : vector<4x32xf32>
    %444 = arith.divf %442, %443 : vector<4x32xf32>
    %445 = vector.extract_strided_slice %427 {offsets = [0, 64], sizes = [4, 32], strides = [1, 1]} : vector<4x96xf32> to vector<4x32xf32>
    %446 = vector.extract_strided_slice %428 {offsets = [0, 64], sizes = [4, 32], strides = [1, 1]} : vector<4x96xf32> to vector<4x32xf32>
    %447 = arith.mulf %444, %446 : vector<4x32xf32>
    %448 = arith.addf %445, %447 : vector<4x32xf32>
    %449 = math.tanh %448 : vector<4x32xf32>
    %cst_95 = arith.constant 1.000000e+00 : f32
    %450 = vector.broadcast %cst_95 : f32 to vector<4x32xf32>
    %451 = arith.subf %450, %436 : vector<4x32xf32>
    %452 = arith.mulf %451, %449 : vector<4x32xf32>
    %453 = arith.mulf %436, %426 : vector<4x32xf32>
    %454 = arith.addf %452, %453 : vector<4x32xf32>
    %455 = vector.extract_strided_slice %285 {offsets = [24, 0], sizes = [4, 96], strides = [1, 1]} : vector<32x96xf32> to vector<4x96xf32>
    %cst_96 = arith.constant dense<0.000000e+00> : vector<4x96xf32>
    %456 = tpu.matmul %454, %281, %cst_96 {dimension_numbers = #tpu.dot_dimension_numbers<[1], [0], [0], [1], [0, 0, 1, 1], [], []>} : vector<4x32xf32>, vector<32x96xf32>, vector<4x96xf32> -> vector<4x96xf32>
    %457 = vector.extract_strided_slice %455 {offsets = [0, 0], sizes = [4, 32], strides = [1, 1]} : vector<4x96xf32> to vector<4x32xf32>
    %458 = vector.extract_strided_slice %456 {offsets = [0, 0], sizes = [4, 32], strides = [1, 1]} : vector<4x96xf32> to vector<4x32xf32>
    %459 = arith.addf %457, %458 : vector<4x32xf32>
    %460 = arith.negf %459 : vector<4x32xf32>
    %461 = math.exp %460 : vector<4x32xf32>
    %cst_97 = arith.constant 1.000000e+00 : f32
    %462 = vector.broadcast %cst_97 : f32 to vector<4x32xf32>
    %463 = arith.addf %462, %461 : vector<4x32xf32>
    %464 = arith.divf %462, %463 : vector<4x32xf32>
    %465 = vector.extract_strided_slice %455 {offsets = [0, 32], sizes = [4, 32], strides = [1, 1]} : vector<4x96xf32> to vector<4x32xf32>
    %466 = vector.extract_strided_slice %456 {offsets = [0, 32], sizes = [4, 32], strides = [1, 1]} : vector<4x96xf32> to vector<4x32xf32>
    %467 = arith.addf %465, %466 : vector<4x32xf32>
    %468 = arith.negf %467 : vector<4x32xf32>
    %469 = math.exp %468 : vector<4x32xf32>
    %cst_98 = arith.constant 1.000000e+00 : f32
    %470 = vector.broadcast %cst_98 : f32 to vector<4x32xf32>
    %471 = arith.addf %470, %469 : vector<4x32xf32>
    %472 = arith.divf %470, %471 : vector<4x32xf32>
    %473 = vector.extract_strided_slice %455 {offsets = [0, 64], sizes = [4, 32], strides = [1, 1]} : vector<4x96xf32> to vector<4x32xf32>
    %474 = vector.extract_strided_slice %456 {offsets = [0, 64], sizes = [4, 32], strides = [1, 1]} : vector<4x96xf32> to vector<4x32xf32>
    %475 = arith.mulf %472, %474 : vector<4x32xf32>
    %476 = arith.addf %473, %475 : vector<4x32xf32>
    %477 = math.tanh %476 : vector<4x32xf32>
    %cst_99 = arith.constant 1.000000e+00 : f32
    %478 = vector.broadcast %cst_99 : f32 to vector<4x32xf32>
    %479 = arith.subf %478, %464 : vector<4x32xf32>
    %480 = arith.mulf %479, %477 : vector<4x32xf32>
    %481 = arith.mulf %464, %454 : vector<4x32xf32>
    %482 = arith.addf %480, %481 : vector<4x32xf32>
    %483 = vector.extract_strided_slice %285 {offsets = [28, 0], sizes = [4, 96], strides = [1, 1]} : vector<32x96xf32> to vector<4x96xf32>
    %cst_100 = arith.constant dense<0.000000e+00> : vector<4x96xf32>
    %484 = tpu.matmul %482, %281, %cst_100 {dimension_numbers = #tpu.dot_dimension_numbers<[1], [0], [0], [1], [0, 0, 1, 1], [], []>} : vector<4x32xf32>, vector<32x96xf32>, vector<4x96xf32> -> vector<4x96xf32>
    %485 = vector.extract_strided_slice %483 {offsets = [0, 0], sizes = [4, 32], strides = [1, 1]} : vector<4x96xf32> to vector<4x32xf32>
    %486 = vector.extract_strided_slice %484 {offsets = [0, 0], sizes = [4, 32], strides = [1, 1]} : vector<4x96xf32> to vector<4x32xf32>
    %487 = arith.addf %485, %486 : vector<4x32xf32>
    %488 = arith.negf %487 : vector<4x32xf32>
    %489 = math.exp %488 : vector<4x32xf32>
    %cst_101 = arith.constant 1.000000e+00 : f32
    %490 = vector.broadcast %cst_101 : f32 to vector<4x32xf32>
    %491 = arith.addf %490, %489 : vector<4x32xf32>
    %492 = arith.divf %490, %491 : vector<4x32xf32>
    %493 = vector.extract_strided_slice %483 {offsets = [0, 32], sizes = [4, 32], strides = [1, 1]} : vector<4x96xf32> to vector<4x32xf32>
    %494 = vector.extract_strided_slice %484 {offsets = [0, 32], sizes = [4, 32], strides = [1, 1]} : vector<4x96xf32> to vector<4x32xf32>
    %495 = arith.addf %493, %494 : vector<4x32xf32>
    %496 = arith.negf %495 : vector<4x32xf32>
    %497 = math.exp %496 : vector<4x32xf32>
    %cst_102 = arith.constant 1.000000e+00 : f32
    %498 = vector.broadcast %cst_102 : f32 to vector<4x32xf32>
    %499 = arith.addf %498, %497 : vector<4x32xf32>
    %500 = arith.divf %498, %499 : vector<4x32xf32>
    %501 = vector.extract_strided_slice %483 {offsets = [0, 64], sizes = [4, 32], strides = [1, 1]} : vector<4x96xf32> to vector<4x32xf32>
    %502 = vector.extract_strided_slice %484 {offsets = [0, 64], sizes = [4, 32], strides = [1, 1]} : vector<4x96xf32> to vector<4x32xf32>
    %503 = arith.mulf %500, %502 : vector<4x32xf32>
    %504 = arith.addf %501, %503 : vector<4x32xf32>
    %505 = math.tanh %504 : vector<4x32xf32>
    %cst_103 = arith.constant 1.000000e+00 : f32
    %506 = vector.broadcast %cst_103 : f32 to vector<4x32xf32>
    %507 = arith.subf %506, %492 : vector<4x32xf32>
    %508 = arith.mulf %507, %505 : vector<4x32xf32>
    %509 = arith.mulf %492, %482 : vector<4x32xf32>
    %510 = arith.addf %508, %509 : vector<4x32xf32>
    %c0_104 = arith.constant 0 : index
    %c0_105 = arith.constant 0 : index
    %511 = vector.load %arg8[%c0_104, %c0_105] : memref<39x128xf32, #tpu.memory_space<vmem>>, vector<39x128xf32>
    %c0_106 = arith.constant 0 : index
    %c0_107 = arith.constant 0 : index
    %512 = vector.load %arg9[%c0_106, %c0_107] : memref<1x128xf32, #tpu.memory_space<vmem>>, vector<1x128xf32>
    %c0_108 = arith.constant 0 : index
    %c0_109 = arith.constant 0 : index
    %513 = vector.load %arg10[%c0_108, %c0_109] : memref<32x7xf32, #tpu.memory_space<vmem>>, vector<32x7xf32>
    %c0_110 = arith.constant 0 : index
    %c0_111 = arith.constant 0 : index
    %514 = vector.load %arg11[%c0_110, %c0_111] : memref<1x7xf32, #tpu.memory_space<vmem>>, vector<1x7xf32>
    %515 = vector.shape_cast %512 : vector<1x128xf32> to vector<1x128xf32>
    %516 = vector.broadcast %515 : vector<1x128xf32> to vector<4x128xf32>
    %517 = vector.shape_cast %514 : vector<1x7xf32> to vector<1x7xf32>
    %518 = vector.broadcast %517 : vector<1x7xf32> to vector<4x7xf32>
    %519 = tpu.concatenate %2, %510 in 1 : vector<4x7xf32>, vector<4x32xf32> -> vector<4x39xf32>
    %cst_112 = arith.constant dense<0.000000e+00> : vector<4x128xf32>
    %520 = tpu.matmul %519, %511, %cst_112 {dimension_numbers = #tpu.dot_dimension_numbers<[1], [0], [0], [1], [0, 0, 1, 1], [], []>} : vector<4x39xf32>, vector<39x128xf32>, vector<4x128xf32> -> vector<4x128xf32>
    %521 = arith.addf %520, %516 : vector<4x128xf32>
    %522 = vector.extract_strided_slice %521 {offsets = [0, 0], sizes = [4, 32], strides = [1, 1]} : vector<4x128xf32> to vector<4x32xf32>
    %523 = arith.negf %522 : vector<4x32xf32>
    %524 = math.exp %523 : vector<4x32xf32>
    %cst_113 = arith.constant 1.000000e+00 : f32
    %525 = vector.broadcast %cst_113 : f32 to vector<4x32xf32>
    %526 = arith.addf %525, %524 : vector<4x32xf32>
    %527 = arith.divf %525, %526 : vector<4x32xf32>
    %528 = vector.extract_strided_slice %521 {offsets = [0, 32], sizes = [4, 32], strides = [1, 1]} : vector<4x128xf32> to vector<4x32xf32>
    %529 = arith.negf %528 : vector<4x32xf32>
    %530 = math.exp %529 : vector<4x32xf32>
    %cst_114 = arith.constant 1.000000e+00 : f32
    %531 = vector.broadcast %cst_114 : f32 to vector<4x32xf32>
    %532 = arith.addf %531, %530 : vector<4x32xf32>
    %533 = arith.divf %531, %532 : vector<4x32xf32>
    %534 = vector.extract_strided_slice %521 {offsets = [0, 64], sizes = [4, 32], strides = [1, 1]} : vector<4x128xf32> to vector<4x32xf32>
    %535 = vector.extract_strided_slice %521 {offsets = [0, 96], sizes = [4, 32], strides = [1, 1]} : vector<4x128xf32> to vector<4x32xf32>
    %536 = arith.mulf %533, %535 : vector<4x32xf32>
    %537 = arith.addf %534, %536 : vector<4x32xf32>
    %538 = math.tanh %537 : vector<4x32xf32>
    %cst_115 = arith.constant 1.000000e+00 : f32
    %539 = vector.broadcast %cst_115 : f32 to vector<4x32xf32>
    %540 = arith.subf %539, %527 : vector<4x32xf32>
    %541 = arith.mulf %540, %538 : vector<4x32xf32>
    %542 = arith.mulf %527, %510 : vector<4x32xf32>
    %543 = arith.addf %541, %542 : vector<4x32xf32>
    %cst_116 = arith.constant dense<0.000000e+00> : vector<4x7xf32>
    %544 = tpu.matmul %543, %513, %cst_116 {dimension_numbers = #tpu.dot_dimension_numbers<[1], [0], [0], [1], [0, 0, 1, 1], [], []>} : vector<4x32xf32>, vector<32x7xf32>, vector<4x7xf32> -> vector<4x7xf32>
    %545 = arith.addf %544, %518 : vector<4x7xf32>
    %546 = tpu.concatenate %545, %543 in 1 : vector<4x7xf32>, vector<4x32xf32> -> vector<4x39xf32>
    %cst_117 = arith.constant dense<0.000000e+00> : vector<4x128xf32>
    %547 = tpu.matmul %546, %511, %cst_117 {dimension_numbers = #tpu.dot_dimension_numbers<[1], [0], [0], [1], [0, 0, 1, 1], [], []>} : vector<4x39xf32>, vector<39x128xf32>, vector<4x128xf32> -> vector<4x128xf32>
    %548 = arith.addf %547, %516 : vector<4x128xf32>
    %549 = vector.extract_strided_slice %548 {offsets = [0, 0], sizes = [4, 32], strides = [1, 1]} : vector<4x128xf32> to vector<4x32xf32>
    %550 = arith.negf %549 : vector<4x32xf32>
    %551 = math.exp %550 : vector<4x32xf32>
    %cst_118 = arith.constant 1.000000e+00 : f32
    %552 = vector.broadcast %cst_118 : f32 to vector<4x32xf32>
    %553 = arith.addf %552, %551 : vector<4x32xf32>
    %554 = arith.divf %552, %553 : vector<4x32xf32>
    %555 = vector.extract_strided_slice %548 {offsets = [0, 32], sizes = [4, 32], strides = [1, 1]} : vector<4x128xf32> to vector<4x32xf32>
    %556 = arith.negf %555 : vector<4x32xf32>
    %557 = math.exp %556 : vector<4x32xf32>
    %cst_119 = arith.constant 1.000000e+00 : f32
    %558 = vector.broadcast %cst_119 : f32 to vector<4x32xf32>
    %559 = arith.addf %558, %557 : vector<4x32xf32>
    %560 = arith.divf %558, %559 : vector<4x32xf32>
    %561 = vector.extract_strided_slice %548 {offsets = [0, 64], sizes = [4, 32], strides = [1, 1]} : vector<4x128xf32> to vector<4x32xf32>
    %562 = vector.extract_strided_slice %548 {offsets = [0, 96], sizes = [4, 32], strides = [1, 1]} : vector<4x128xf32> to vector<4x32xf32>
    %563 = arith.mulf %560, %562 : vector<4x32xf32>
    %564 = arith.addf %561, %563 : vector<4x32xf32>
    %565 = math.tanh %564 : vector<4x32xf32>
    %cst_120 = arith.constant 1.000000e+00 : f32
    %566 = vector.broadcast %cst_120 : f32 to vector<4x32xf32>
    %567 = arith.subf %566, %554 : vector<4x32xf32>
    %568 = arith.mulf %567, %565 : vector<4x32xf32>
    %569 = arith.mulf %554, %543 : vector<4x32xf32>
    %570 = arith.addf %568, %569 : vector<4x32xf32>
    %cst_121 = arith.constant dense<0.000000e+00> : vector<4x7xf32>
    %571 = tpu.matmul %570, %513, %cst_121 {dimension_numbers = #tpu.dot_dimension_numbers<[1], [0], [0], [1], [0, 0, 1, 1], [], []>} : vector<4x32xf32>, vector<32x7xf32>, vector<4x7xf32> -> vector<4x7xf32>
    %572 = arith.addf %571, %518 : vector<4x7xf32>
    %573 = tpu.concatenate %572, %570 in 1 : vector<4x7xf32>, vector<4x32xf32> -> vector<4x39xf32>
    %cst_122 = arith.constant dense<0.000000e+00> : vector<4x128xf32>
    %574 = tpu.matmul %573, %511, %cst_122 {dimension_numbers = #tpu.dot_dimension_numbers<[1], [0], [0], [1], [0, 0, 1, 1], [], []>} : vector<4x39xf32>, vector<39x128xf32>, vector<4x128xf32> -> vector<4x128xf32>
    %575 = arith.addf %574, %516 : vector<4x128xf32>
    %576 = vector.extract_strided_slice %575 {offsets = [0, 0], sizes = [4, 32], strides = [1, 1]} : vector<4x128xf32> to vector<4x32xf32>
    %577 = arith.negf %576 : vector<4x32xf32>
    %578 = math.exp %577 : vector<4x32xf32>
    %cst_123 = arith.constant 1.000000e+00 : f32
    %579 = vector.broadcast %cst_123 : f32 to vector<4x32xf32>
    %580 = arith.addf %579, %578 : vector<4x32xf32>
    %581 = arith.divf %579, %580 : vector<4x32xf32>
    %582 = vector.extract_strided_slice %575 {offsets = [0, 32], sizes = [4, 32], strides = [1, 1]} : vector<4x128xf32> to vector<4x32xf32>
    %583 = arith.negf %582 : vector<4x32xf32>
    %584 = math.exp %583 : vector<4x32xf32>
    %cst_124 = arith.constant 1.000000e+00 : f32
    %585 = vector.broadcast %cst_124 : f32 to vector<4x32xf32>
    %586 = arith.addf %585, %584 : vector<4x32xf32>
    %587 = arith.divf %585, %586 : vector<4x32xf32>
    %588 = vector.extract_strided_slice %575 {offsets = [0, 64], sizes = [4, 32], strides = [1, 1]} : vector<4x128xf32> to vector<4x32xf32>
    %589 = vector.extract_strided_slice %575 {offsets = [0, 96], sizes = [4, 32], strides = [1, 1]} : vector<4x128xf32> to vector<4x32xf32>
    %590 = arith.mulf %587, %589 : vector<4x32xf32>
    %591 = arith.addf %588, %590 : vector<4x32xf32>
    %592 = math.tanh %591 : vector<4x32xf32>
    %cst_125 = arith.constant 1.000000e+00 : f32
    %593 = vector.broadcast %cst_125 : f32 to vector<4x32xf32>
    %594 = arith.subf %593, %581 : vector<4x32xf32>
    %595 = arith.mulf %594, %592 : vector<4x32xf32>
    %596 = arith.mulf %581, %570 : vector<4x32xf32>
    %597 = arith.addf %595, %596 : vector<4x32xf32>
    %cst_126 = arith.constant dense<0.000000e+00> : vector<4x7xf32>
    %598 = tpu.matmul %597, %513, %cst_126 {dimension_numbers = #tpu.dot_dimension_numbers<[1], [0], [0], [1], [0, 0, 1, 1], [], []>} : vector<4x32xf32>, vector<32x7xf32>, vector<4x7xf32> -> vector<4x7xf32>
    %599 = arith.addf %598, %518 : vector<4x7xf32>
    %600 = tpu.concatenate %599, %597 in 1 : vector<4x7xf32>, vector<4x32xf32> -> vector<4x39xf32>
    %cst_127 = arith.constant dense<0.000000e+00> : vector<4x128xf32>
    %601 = tpu.matmul %600, %511, %cst_127 {dimension_numbers = #tpu.dot_dimension_numbers<[1], [0], [0], [1], [0, 0, 1, 1], [], []>} : vector<4x39xf32>, vector<39x128xf32>, vector<4x128xf32> -> vector<4x128xf32>
    %602 = arith.addf %601, %516 : vector<4x128xf32>
    %603 = vector.extract_strided_slice %602 {offsets = [0, 0], sizes = [4, 32], strides = [1, 1]} : vector<4x128xf32> to vector<4x32xf32>
    %604 = arith.negf %603 : vector<4x32xf32>
    %605 = math.exp %604 : vector<4x32xf32>
    %cst_128 = arith.constant 1.000000e+00 : f32
    %606 = vector.broadcast %cst_128 : f32 to vector<4x32xf32>
    %607 = arith.addf %606, %605 : vector<4x32xf32>
    %608 = arith.divf %606, %607 : vector<4x32xf32>
    %609 = vector.extract_strided_slice %602 {offsets = [0, 32], sizes = [4, 32], strides = [1, 1]} : vector<4x128xf32> to vector<4x32xf32>
    %610 = arith.negf %609 : vector<4x32xf32>
    %611 = math.exp %610 : vector<4x32xf32>
    %cst_129 = arith.constant 1.000000e+00 : f32
    %612 = vector.broadcast %cst_129 : f32 to vector<4x32xf32>
    %613 = arith.addf %612, %611 : vector<4x32xf32>
    %614 = arith.divf %612, %613 : vector<4x32xf32>
    %615 = vector.extract_strided_slice %602 {offsets = [0, 64], sizes = [4, 32], strides = [1, 1]} : vector<4x128xf32> to vector<4x32xf32>
    %616 = vector.extract_strided_slice %602 {offsets = [0, 96], sizes = [4, 32], strides = [1, 1]} : vector<4x128xf32> to vector<4x32xf32>
    %617 = arith.mulf %614, %616 : vector<4x32xf32>
    %618 = arith.addf %615, %617 : vector<4x32xf32>
    %619 = math.tanh %618 : vector<4x32xf32>
    %cst_130 = arith.constant 1.000000e+00 : f32
    %620 = vector.broadcast %cst_130 : f32 to vector<4x32xf32>
    %621 = arith.subf %620, %608 : vector<4x32xf32>
    %622 = arith.mulf %621, %619 : vector<4x32xf32>
    %623 = arith.mulf %608, %597 : vector<4x32xf32>
    %624 = arith.addf %622, %623 : vector<4x32xf32>
    %cst_131 = arith.constant dense<0.000000e+00> : vector<4x7xf32>
    %625 = tpu.matmul %624, %513, %cst_131 {dimension_numbers = #tpu.dot_dimension_numbers<[1], [0], [0], [1], [0, 0, 1, 1], [], []>} : vector<4x32xf32>, vector<32x7xf32>, vector<4x7xf32> -> vector<4x7xf32>
    %626 = arith.addf %625, %518 : vector<4x7xf32>
    %627 = tpu.concatenate %545, %572, %599, %626 in 0 : vector<4x7xf32>, vector<4x7xf32>, vector<4x7xf32>, vector<4x7xf32> -> vector<16x7xf32>
    %628 = vector.extract_strided_slice %627 {offsets = [0, 0], sizes = [16, 4], strides = [1, 1]} : vector<16x7xf32> to vector<16x4xf32>
    %629 = arith.mulf %628, %628 : vector<16x4xf32>
    %cst_132 = arith.constant dense<0.000000e+00> : vector<16xf32>
    %630 = vector.multi_reduction <add>, %629, %cst_132 [1] : vector<16x4xf32> to vector<16xf32>
    %631 = vector.shape_cast %630 : vector<16xf32> to vector<16x1xf32>
    %632 = math.sqrt %631 : vector<16x1xf32>
    %633 = tpu.iota {dimensions = array<i32: 1>} : vector<16x7xi32>
    %c4_i32 = arith.constant 4 : i32
    %634 = vector.broadcast %c4_i32 : i32 to vector<16x7xi32>
    %635 = arith.cmpi slt, %633, %634 : vector<16x7xi32>
    %cst_133 = arith.constant 1.000000e+00 : f32
    %636 = vector.shape_cast %632 : vector<16x1xf32> to vector<16x1xf32>
    %637 = vector.broadcast %636 : vector<16x1xf32> to vector<16x7xf32>
    %638 = vector.broadcast %cst_133 : f32 to vector<16x7xf32>
    %639 = arith.select %635, %637, %638 : vector<16x7xi1>, vector<16x7xf32>
    %640 = arith.divf %627, %639 : vector<16x7xf32>
    %c0_134 = arith.constant 0 : index
    %c0_135 = arith.constant 0 : index
    %c0_136 = arith.constant 0 : index
    %641 = vector.load %arg38[%c0_134, %c0_135, %c0_136] : memref<2x16x7xf32, #tpu.memory_space<vmem>>, vector<1x16x7xf32>
    %642 = vector.shape_cast %641 : vector<1x16x7xf32> to vector<16x7xf32>
    %643 = vector.shape_cast %640 : vector<16x7xf32> to vector<1x16x7xf32>
    tpu.vector_store %arg38[%c0_134, %c0_135, %c0_136], %643 {strides = array<i32>} : memref<2x16x7xf32, #tpu.memory_space<vmem>>, vector<1x16x7xf32>,
    %c0_137 = arith.constant 0 : index
    %c0_138 = arith.constant 0 : index
    %644 = vector.load %arg12[%c0_137, %c0_138] : memref<7x96xf32, #tpu.memory_space<vmem>>, vector<7x96xf32>
    %c0_139 = arith.constant 0 : index
    %c0_140 = arith.constant 0 : index
    %645 = vector.load %arg13[%c0_139, %c0_140] : memref<32x96xf32, #tpu.memory_space<vmem>>, vector<32x96xf32>
    %c0_141 = arith.constant 0 : index
    %c0_142 = arith.constant 0 : index
    %646 = vector.load %arg14[%c0_141, %c0_142] : memref<1x96xf32, #tpu.memory_space<vmem>>, vector<1x96xf32>
    %cst_143 = arith.constant dense<0.000000e+00> : vector<32x96xf32>
    %647 = tpu.matmul %1, %644, %cst_143 {dimension_numbers = #tpu.dot_dimension_numbers<[1], [0], [0], [1], [0, 0, 1, 1], [], []>} : vector<32x7xf32>, vector<7x96xf32>, vector<32x96xf32> -> vector<32x96xf32>
    %648 = vector.broadcast %646 : vector<1x96xf32> to vector<32x96xf32>
    %649 = arith.addf %647, %648 : vector<32x96xf32>
    %cst_144 = arith.constant 0.000000e+00 : f32
    %650 = vector.broadcast %cst_144 : f32 to vector<4x32xf32>
    %651 = vector.extract_strided_slice %649 {offsets = [0, 0], sizes = [4, 96], strides = [1, 1]} : vector<32x96xf32> to vector<4x96xf32>
    %cst_145 = arith.constant dense<0.000000e+00> : vector<4x96xf32>
    %652 = tpu.matmul %650, %645, %cst_145 {dimension_numbers = #tpu.dot_dimension_numbers<[1], [0], [0], [1], [0, 0, 1, 1], [], []>} : vector<4x32xf32>, vector<32x96xf32>, vector<4x96xf32> -> vector<4x96xf32>
    %653 = vector.extract_strided_slice %651 {offsets = [0, 0], sizes = [4, 32], strides = [1, 1]} : vector<4x96xf32> to vector<4x32xf32>
    %654 = vector.extract_strided_slice %652 {offsets = [0, 0], sizes = [4, 32], strides = [1, 1]} : vector<4x96xf32> to vector<4x32xf32>
    %655 = arith.addf %653, %654 : vector<4x32xf32>
    %656 = arith.negf %655 : vector<4x32xf32>
    %657 = math.exp %656 : vector<4x32xf32>
    %cst_146 = arith.constant 1.000000e+00 : f32
    %658 = vector.broadcast %cst_146 : f32 to vector<4x32xf32>
    %659 = arith.addf %658, %657 : vector<4x32xf32>
    %660 = arith.divf %658, %659 : vector<4x32xf32>
    %661 = vector.extract_strided_slice %651 {offsets = [0, 32], sizes = [4, 32], strides = [1, 1]} : vector<4x96xf32> to vector<4x32xf32>
    %662 = vector.extract_strided_slice %652 {offsets = [0, 32], sizes = [4, 32], strides = [1, 1]} : vector<4x96xf32> to vector<4x32xf32>
    %663 = arith.addf %661, %662 : vector<4x32xf32>
    %664 = arith.negf %663 : vector<4x32xf32>
    %665 = math.exp %664 : vector<4x32xf32>
    %cst_147 = arith.constant 1.000000e+00 : f32
    %666 = vector.broadcast %cst_147 : f32 to vector<4x32xf32>
    %667 = arith.addf %666, %665 : vector<4x32xf32>
    %668 = arith.divf %666, %667 : vector<4x32xf32>
    %669 = vector.extract_strided_slice %651 {offsets = [0, 64], sizes = [4, 32], strides = [1, 1]} : vector<4x96xf32> to vector<4x32xf32>
    %670 = vector.extract_strided_slice %652 {offsets = [0, 64], sizes = [4, 32], strides = [1, 1]} : vector<4x96xf32> to vector<4x32xf32>
    %671 = arith.mulf %668, %670 : vector<4x32xf32>
    %672 = arith.addf %669, %671 : vector<4x32xf32>
    %673 = math.tanh %672 : vector<4x32xf32>
    %cst_148 = arith.constant 1.000000e+00 : f32
    %674 = vector.broadcast %cst_148 : f32 to vector<4x32xf32>
    %675 = arith.subf %674, %660 : vector<4x32xf32>
    %676 = arith.mulf %675, %673 : vector<4x32xf32>
    %677 = arith.mulf %660, %650 : vector<4x32xf32>
    %678 = arith.addf %676, %677 : vector<4x32xf32>
    %679 = vector.extract_strided_slice %649 {offsets = [4, 0], sizes = [4, 96], strides = [1, 1]} : vector<32x96xf32> to vector<4x96xf32>
    %cst_149 = arith.constant dense<0.000000e+00> : vector<4x96xf32>
    %680 = tpu.matmul %678, %645, %cst_149 {dimension_numbers = #tpu.dot_dimension_numbers<[1], [0], [0], [1], [0, 0, 1, 1], [], []>} : vector<4x32xf32>, vector<32x96xf32>, vector<4x96xf32> -> vector<4x96xf32>
    %681 = vector.extract_strided_slice %679 {offsets = [0, 0], sizes = [4, 32], strides = [1, 1]} : vector<4x96xf32> to vector<4x32xf32>
    %682 = vector.extract_strided_slice %680 {offsets = [0, 0], sizes = [4, 32], strides = [1, 1]} : vector<4x96xf32> to vector<4x32xf32>
    %683 = arith.addf %681, %682 : vector<4x32xf32>
    %684 = arith.negf %683 : vector<4x32xf32>
    %685 = math.exp %684 : vector<4x32xf32>
    %cst_150 = arith.constant 1.000000e+00 : f32
    %686 = vector.broadcast %cst_150 : f32 to vector<4x32xf32>
    %687 = arith.addf %686, %685 : vector<4x32xf32>
    %688 = arith.divf %686, %687 : vector<4x32xf32>
    %689 = vector.extract_strided_slice %679 {offsets = [0, 32], sizes = [4, 32], strides = [1, 1]} : vector<4x96xf32> to vector<4x32xf32>
    %690 = vector.extract_strided_slice %680 {offsets = [0, 32], sizes = [4, 32], strides = [1, 1]} : vector<4x96xf32> to vector<4x32xf32>
    %691 = arith.addf %689, %690 : vector<4x32xf32>
    %692 = arith.negf %691 : vector<4x32xf32>
    %693 = math.exp %692 : vector<4x32xf32>
    %cst_151 = arith.constant 1.000000e+00 : f32
    %694 = vector.broadcast %cst_151 : f32 to vector<4x32xf32>
    %695 = arith.addf %694, %693 : vector<4x32xf32>
    %696 = arith.divf %694, %695 : vector<4x32xf32>
    %697 = vector.extract_strided_slice %679 {offsets = [0, 64], sizes = [4, 32], strides = [1, 1]} : vector<4x96xf32> to vector<4x32xf32>
    %698 = vector.extract_strided_slice %680 {offsets = [0, 64], sizes = [4, 32], strides = [1, 1]} : vector<4x96xf32> to vector<4x32xf32>
    %699 = arith.mulf %696, %698 : vector<4x32xf32>
    %700 = arith.addf %697, %699 : vector<4x32xf32>
    %701 = math.tanh %700 : vector<4x32xf32>
    %cst_152 = arith.constant 1.000000e+00 : f32
    %702 = vector.broadcast %cst_152 : f32 to vector<4x32xf32>
    %703 = arith.subf %702, %688 : vector<4x32xf32>
    %704 = arith.mulf %703, %701 : vector<4x32xf32>
    %705 = arith.mulf %688, %678 : vector<4x32xf32>
    %706 = arith.addf %704, %705 : vector<4x32xf32>
    %707 = vector.extract_strided_slice %649 {offsets = [8, 0], sizes = [4, 96], strides = [1, 1]} : vector<32x96xf32> to vector<4x96xf32>
    %cst_153 = arith.constant dense<0.000000e+00> : vector<4x96xf32>
    %708 = tpu.matmul %706, %645, %cst_153 {dimension_numbers = #tpu.dot_dimension_numbers<[1], [0], [0], [1], [0, 0, 1, 1], [], []>} : vector<4x32xf32>, vector<32x96xf32>, vector<4x96xf32> -> vector<4x96xf32>
    %709 = vector.extract_strided_slice %707 {offsets = [0, 0], sizes = [4, 32], strides = [1, 1]} : vector<4x96xf32> to vector<4x32xf32>
    %710 = vector.extract_strided_slice %708 {offsets = [0, 0], sizes = [4, 32], strides = [1, 1]} : vector<4x96xf32> to vector<4x32xf32>
    %711 = arith.addf %709, %710 : vector<4x32xf32>
    %712 = arith.negf %711 : vector<4x32xf32>
    %713 = math.exp %712 : vector<4x32xf32>
    %cst_154 = arith.constant 1.000000e+00 : f32
    %714 = vector.broadcast %cst_154 : f32 to vector<4x32xf32>
    %715 = arith.addf %714, %713 : vector<4x32xf32>
    %716 = arith.divf %714, %715 : vector<4x32xf32>
    %717 = vector.extract_strided_slice %707 {offsets = [0, 32], sizes = [4, 32], strides = [1, 1]} : vector<4x96xf32> to vector<4x32xf32>
    %718 = vector.extract_strided_slice %708 {offsets = [0, 32], sizes = [4, 32], strides = [1, 1]} : vector<4x96xf32> to vector<4x32xf32>
    %719 = arith.addf %717, %718 : vector<4x32xf32>
    %720 = arith.negf %719 : vector<4x32xf32>
    %721 = math.exp %720 : vector<4x32xf32>
    %cst_155 = arith.constant 1.000000e+00 : f32
    %722 = vector.broadcast %cst_155 : f32 to vector<4x32xf32>
    %723 = arith.addf %722, %721 : vector<4x32xf32>
    %724 = arith.divf %722, %723 : vector<4x32xf32>
    %725 = vector.extract_strided_slice %707 {offsets = [0, 64], sizes = [4, 32], strides = [1, 1]} : vector<4x96xf32> to vector<4x32xf32>
    %726 = vector.extract_strided_slice %708 {offsets = [0, 64], sizes = [4, 32], strides = [1, 1]} : vector<4x96xf32> to vector<4x32xf32>
    %727 = arith.mulf %724, %726 : vector<4x32xf32>
    %728 = arith.addf %725, %727 : vector<4x32xf32>
    %729 = math.tanh %728 : vector<4x32xf32>
    %cst_156 = arith.constant 1.000000e+00 : f32
    %730 = vector.broadcast %cst_156 : f32 to vector<4x32xf32>
    %731 = arith.subf %730, %716 : vector<4x32xf32>
    %732 = arith.mulf %731, %729 : vector<4x32xf32>
    %733 = arith.mulf %716, %706 : vector<4x32xf32>
    %734 = arith.addf %732, %733 : vector<4x32xf32>
    %735 = vector.extract_strided_slice %649 {offsets = [12, 0], sizes = [4, 96], strides = [1, 1]} : vector<32x96xf32> to vector<4x96xf32>
    %cst_157 = arith.constant dense<0.000000e+00> : vector<4x96xf32>
    %736 = tpu.matmul %734, %645, %cst_157 {dimension_numbers = #tpu.dot_dimension_numbers<[1], [0], [0], [1], [0, 0, 1, 1], [], []>} : vector<4x32xf32>, vector<32x96xf32>, vector<4x96xf32> -> vector<4x96xf32>
    %737 = vector.extract_strided_slice %735 {offsets = [0, 0], sizes = [4, 32], strides = [1, 1]} : vector<4x96xf32> to vector<4x32xf32>
    %738 = vector.extract_strided_slice %736 {offsets = [0, 0], sizes = [4, 32], strides = [1, 1]} : vector<4x96xf32> to vector<4x32xf32>
    %739 = arith.addf %737, %738 : vector<4x32xf32>
    %740 = arith.negf %739 : vector<4x32xf32>
    %741 = math.exp %740 : vector<4x32xf32>
    %cst_158 = arith.constant 1.000000e+00 : f32
    %742 = vector.broadcast %cst_158 : f32 to vector<4x32xf32>
    %743 = arith.addf %742, %741 : vector<4x32xf32>
    %744 = arith.divf %742, %743 : vector<4x32xf32>
    %745 = vector.extract_strided_slice %735 {offsets = [0, 32], sizes = [4, 32], strides = [1, 1]} : vector<4x96xf32> to vector<4x32xf32>
    %746 = vector.extract_strided_slice %736 {offsets = [0, 32], sizes = [4, 32], strides = [1, 1]} : vector<4x96xf32> to vector<4x32xf32>
    %747 = arith.addf %745, %746 : vector<4x32xf32>
    %748 = arith.negf %747 : vector<4x32xf32>
    %749 = math.exp %748 : vector<4x32xf32>
    %cst_159 = arith.constant 1.000000e+00 : f32
    %750 = vector.broadcast %cst_159 : f32 to vector<4x32xf32>
    %751 = arith.addf %750, %749 : vector<4x32xf32>
    %752 = arith.divf %750, %751 : vector<4x32xf32>
    %753 = vector.extract_strided_slice %735 {offsets = [0, 64], sizes = [4, 32], strides = [1, 1]} : vector<4x96xf32> to vector<4x32xf32>
    %754 = vector.extract_strided_slice %736 {offsets = [0, 64], sizes = [4, 32], strides = [1, 1]} : vector<4x96xf32> to vector<4x32xf32>
    %755 = arith.mulf %752, %754 : vector<4x32xf32>
    %756 = arith.addf %753, %755 : vector<4x32xf32>
    %757 = math.tanh %756 : vector<4x32xf32>
    %cst_160 = arith.constant 1.000000e+00 : f32
    %758 = vector.broadcast %cst_160 : f32 to vector<4x32xf32>
    %759 = arith.subf %758, %744 : vector<4x32xf32>
    %760 = arith.mulf %759, %757 : vector<4x32xf32>
    %761 = arith.mulf %744, %734 : vector<4x32xf32>
    %762 = arith.addf %760, %761 : vector<4x32xf32>
    %763 = vector.extract_strided_slice %649 {offsets = [16, 0], sizes = [4, 96], strides = [1, 1]} : vector<32x96xf32> to vector<4x96xf32>
    %cst_161 = arith.constant dense<0.000000e+00> : vector<4x96xf32>
    %764 = tpu.matmul %762, %645, %cst_161 {dimension_numbers = #tpu.dot_dimension_numbers<[1], [0], [0], [1], [0, 0, 1, 1], [], []>} : vector<4x32xf32>, vector<32x96xf32>, vector<4x96xf32> -> vector<4x96xf32>
    %765 = vector.extract_strided_slice %763 {offsets = [0, 0], sizes = [4, 32], strides = [1, 1]} : vector<4x96xf32> to vector<4x32xf32>
    %766 = vector.extract_strided_slice %764 {offsets = [0, 0], sizes = [4, 32], strides = [1, 1]} : vector<4x96xf32> to vector<4x32xf32>
    %767 = arith.addf %765, %766 : vector<4x32xf32>
    %768 = arith.negf %767 : vector<4x32xf32>
    %769 = math.exp %768 : vector<4x32xf32>
    %cst_162 = arith.constant 1.000000e+00 : f32
    %770 = vector.broadcast %cst_162 : f32 to vector<4x32xf32>
    %771 = arith.addf %770, %769 : vector<4x32xf32>
    %772 = arith.divf %770, %771 : vector<4x32xf32>
    %773 = vector.extract_strided_slice %763 {offsets = [0, 32], sizes = [4, 32], strides = [1, 1]} : vector<4x96xf32> to vector<4x32xf32>
    %774 = vector.extract_strided_slice %764 {offsets = [0, 32], sizes = [4, 32], strides = [1, 1]} : vector<4x96xf32> to vector<4x32xf32>
    %775 = arith.addf %773, %774 : vector<4x32xf32>
    %776 = arith.negf %775 : vector<4x32xf32>
    %777 = math.exp %776 : vector<4x32xf32>
    %cst_163 = arith.constant 1.000000e+00 : f32
    %778 = vector.broadcast %cst_163 : f32 to vector<4x32xf32>
    %779 = arith.addf %778, %777 : vector<4x32xf32>
    %780 = arith.divf %778, %779 : vector<4x32xf32>
    %781 = vector.extract_strided_slice %763 {offsets = [0, 64], sizes = [4, 32], strides = [1, 1]} : vector<4x96xf32> to vector<4x32xf32>
    %782 = vector.extract_strided_slice %764 {offsets = [0, 64], sizes = [4, 32], strides = [1, 1]} : vector<4x96xf32> to vector<4x32xf32>
    %783 = arith.mulf %780, %782 : vector<4x32xf32>
    %784 = arith.addf %781, %783 : vector<4x32xf32>
    %785 = math.tanh %784 : vector<4x32xf32>
    %cst_164 = arith.constant 1.000000e+00 : f32
    %786 = vector.broadcast %cst_164 : f32 to vector<4x32xf32>
    %787 = arith.subf %786, %772 : vector<4x32xf32>
    %788 = arith.mulf %787, %785 : vector<4x32xf32>
    %789 = arith.mulf %772, %762 : vector<4x32xf32>
    %790 = arith.addf %788, %789 : vector<4x32xf32>
    %791 = vector.extract_strided_slice %649 {offsets = [20, 0], sizes = [4, 96], strides = [1, 1]} : vector<32x96xf32> to vector<4x96xf32>
    %cst_165 = arith.constant dense<0.000000e+00> : vector<4x96xf32>
    %792 = tpu.matmul %790, %645, %cst_165 {dimension_numbers = #tpu.dot_dimension_numbers<[1], [0], [0], [1], [0, 0, 1, 1], [], []>} : vector<4x32xf32>, vector<32x96xf32>, vector<4x96xf32> -> vector<4x96xf32>
    %793 = vector.extract_strided_slice %791 {offsets = [0, 0], sizes = [4, 32], strides = [1, 1]} : vector<4x96xf32> to vector<4x32xf32>
    %794 = vector.extract_strided_slice %792 {offsets = [0, 0], sizes = [4, 32], strides = [1, 1]} : vector<4x96xf32> to vector<4x32xf32>
    %795 = arith.addf %793, %794 : vector<4x32xf32>
    %796 = arith.negf %795 : vector<4x32xf32>
    %797 = math.exp %796 : vector<4x32xf32>
    %cst_166 = arith.constant 1.000000e+00 : f32
    %798 = vector.broadcast %cst_166 : f32 to vector<4x32xf32>
    %799 = arith.addf %798, %797 : vector<4x32xf32>
    %800 = arith.divf %798, %799 : vector<4x32xf32>
    %801 = vector.extract_strided_slice %791 {offsets = [0, 32], sizes = [4, 32], strides = [1, 1]} : vector<4x96xf32> to vector<4x32xf32>
    %802 = vector.extract_strided_slice %792 {offsets = [0, 32], sizes = [4, 32], strides = [1, 1]} : vector<4x96xf32> to vector<4x32xf32>
    %803 = arith.addf %801, %802 : vector<4x32xf32>
    %804 = arith.negf %803 : vector<4x32xf32>
    %805 = math.exp %804 : vector<4x32xf32>
    %cst_167 = arith.constant 1.000000e+00 : f32
    %806 = vector.broadcast %cst_167 : f32 to vector<4x32xf32>
    %807 = arith.addf %806, %805 : vector<4x32xf32>
    %808 = arith.divf %806, %807 : vector<4x32xf32>
    %809 = vector.extract_strided_slice %791 {offsets = [0, 64], sizes = [4, 32], strides = [1, 1]} : vector<4x96xf32> to vector<4x32xf32>
    %810 = vector.extract_strided_slice %792 {offsets = [0, 64], sizes = [4, 32], strides = [1, 1]} : vector<4x96xf32> to vector<4x32xf32>
    %811 = arith.mulf %808, %810 : vector<4x32xf32>
    %812 = arith.addf %809, %811 : vector<4x32xf32>
    %813 = math.tanh %812 : vector<4x32xf32>
    %cst_168 = arith.constant 1.000000e+00 : f32
    %814 = vector.broadcast %cst_168 : f32 to vector<4x32xf32>
    %815 = arith.subf %814, %800 : vector<4x32xf32>
    %816 = arith.mulf %815, %813 : vector<4x32xf32>
    %817 = arith.mulf %800, %790 : vector<4x32xf32>
    %818 = arith.addf %816, %817 : vector<4x32xf32>
    %819 = vector.extract_strided_slice %649 {offsets = [24, 0], sizes = [4, 96], strides = [1, 1]} : vector<32x96xf32> to vector<4x96xf32>
    %cst_169 = arith.constant dense<0.000000e+00> : vector<4x96xf32>
    %820 = tpu.matmul %818, %645, %cst_169 {dimension_numbers = #tpu.dot_dimension_numbers<[1], [0], [0], [1], [0, 0, 1, 1], [], []>} : vector<4x32xf32>, vector<32x96xf32>, vector<4x96xf32> -> vector<4x96xf32>
    %821 = vector.extract_strided_slice %819 {offsets = [0, 0], sizes = [4, 32], strides = [1, 1]} : vector<4x96xf32> to vector<4x32xf32>
    %822 = vector.extract_strided_slice %820 {offsets = [0, 0], sizes = [4, 32], strides = [1, 1]} : vector<4x96xf32> to vector<4x32xf32>
    %823 = arith.addf %821, %822 : vector<4x32xf32>
    %824 = arith.negf %823 : vector<4x32xf32>
    %825 = math.exp %824 : vector<4x32xf32>
    %cst_170 = arith.constant 1.000000e+00 : f32
    %826 = vector.broadcast %cst_170 : f32 to vector<4x32xf32>
    %827 = arith.addf %826, %825 : vector<4x32xf32>
    %828 = arith.divf %826, %827 : vector<4x32xf32>
    %829 = vector.extract_strided_slice %819 {offsets = [0, 32], sizes = [4, 32], strides = [1, 1]} : vector<4x96xf32> to vector<4x32xf32>
    %830 = vector.extract_strided_slice %820 {offsets = [0, 32], sizes = [4, 32], strides = [1, 1]} : vector<4x96xf32> to vector<4x32xf32>
    %831 = arith.addf %829, %830 : vector<4x32xf32>
    %832 = arith.negf %831 : vector<4x32xf32>
    %833 = math.exp %832 : vector<4x32xf32>
    %cst_171 = arith.constant 1.000000e+00 : f32
    %834 = vector.broadcast %cst_171 : f32 to vector<4x32xf32>
    %835 = arith.addf %834, %833 : vector<4x32xf32>
    %836 = arith.divf %834, %835 : vector<4x32xf32>
    %837 = vector.extract_strided_slice %819 {offsets = [0, 64], sizes = [4, 32], strides = [1, 1]} : vector<4x96xf32> to vector<4x32xf32>
    %838 = vector.extract_strided_slice %820 {offsets = [0, 64], sizes = [4, 32], strides = [1, 1]} : vector<4x96xf32> to vector<4x32xf32>
    %839 = arith.mulf %836, %838 : vector<4x32xf32>
    %840 = arith.addf %837, %839 : vector<4x32xf32>
    %841 = math.tanh %840 : vector<4x32xf32>
    %cst_172 = arith.constant 1.000000e+00 : f32
    %842 = vector.broadcast %cst_172 : f32 to vector<4x32xf32>
    %843 = arith.subf %842, %828 : vector<4x32xf32>
    %844 = arith.mulf %843, %841 : vector<4x32xf32>
    %845 = arith.mulf %828, %818 : vector<4x32xf32>
    %846 = arith.addf %844, %845 : vector<4x32xf32>
    %847 = vector.extract_strided_slice %649 {offsets = [28, 0], sizes = [4, 96], strides = [1, 1]} : vector<32x96xf32> to vector<4x96xf32>
    %cst_173 = arith.constant dense<0.000000e+00> : vector<4x96xf32>
    %848 = tpu.matmul %846, %645, %cst_173 {dimension_numbers = #tpu.dot_dimension_numbers<[1], [0], [0], [1], [0, 0, 1, 1], [], []>} : vector<4x32xf32>, vector<32x96xf32>, vector<4x96xf32> -> vector<4x96xf32>
    %849 = vector.extract_strided_slice %847 {offsets = [0, 0], sizes = [4, 32], strides = [1, 1]} : vector<4x96xf32> to vector<4x32xf32>
    %850 = vector.extract_strided_slice %848 {offsets = [0, 0], sizes = [4, 32], strides = [1, 1]} : vector<4x96xf32> to vector<4x32xf32>
    %851 = arith.addf %849, %850 : vector<4x32xf32>
    %852 = arith.negf %851 : vector<4x32xf32>
    %853 = math.exp %852 : vector<4x32xf32>
    %cst_174 = arith.constant 1.000000e+00 : f32
    %854 = vector.broadcast %cst_174 : f32 to vector<4x32xf32>
    %855 = arith.addf %854, %853 : vector<4x32xf32>
    %856 = arith.divf %854, %855 : vector<4x32xf32>
    %857 = vector.extract_strided_slice %847 {offsets = [0, 32], sizes = [4, 32], strides = [1, 1]} : vector<4x96xf32> to vector<4x32xf32>
    %858 = vector.extract_strided_slice %848 {offsets = [0, 32], sizes = [4, 32], strides = [1, 1]} : vector<4x96xf32> to vector<4x32xf32>
    %859 = arith.addf %857, %858 : vector<4x32xf32>
    %860 = arith.negf %859 : vector<4x32xf32>
    %861 = math.exp %860 : vector<4x32xf32>
    %cst_175 = arith.constant 1.000000e+00 : f32
    %862 = vector.broadcast %cst_175 : f32 to vector<4x32xf32>
    %863 = arith.addf %862, %861 : vector<4x32xf32>
    %864 = arith.divf %862, %863 : vector<4x32xf32>
    %865 = vector.extract_strided_slice %847 {offsets = [0, 64], sizes = [4, 32], strides = [1, 1]} : vector<4x96xf32> to vector<4x32xf32>
    %866 = vector.extract_strided_slice %848 {offsets = [0, 64], sizes = [4, 32], strides = [1, 1]} : vector<4x96xf32> to vector<4x32xf32>
    %867 = arith.mulf %864, %866 : vector<4x32xf32>
    %868 = arith.addf %865, %867 : vector<4x32xf32>
    %869 = math.tanh %868 : vector<4x32xf32>
    %cst_176 = arith.constant 1.000000e+00 : f32
    %870 = vector.broadcast %cst_176 : f32 to vector<4x32xf32>
    %871 = arith.subf %870, %856 : vector<4x32xf32>
    %872 = arith.mulf %871, %869 : vector<4x32xf32>
    %873 = arith.mulf %856, %846 : vector<4x32xf32>
    %874 = arith.addf %872, %873 : vector<4x32xf32>
    %c0_177 = arith.constant 0 : index
    %c0_178 = arith.constant 0 : index
    %875 = vector.load %arg15[%c0_177, %c0_178] : memref<39x128xf32, #tpu.memory_space<vmem>>, vector<39x128xf32>
    %c0_179 = arith.constant 0 : index
    %c0_180 = arith.constant 0 : index
    %876 = vector.load %arg16[%c0_179, %c0_180] : memref<1x128xf32, #tpu.memory_space<vmem>>, vector<1x128xf32>
    %c0_181 = arith.constant 0 : index
    %c0_182 = arith.constant 0 : index
    %877 = vector.load %arg17[%c0_181, %c0_182] : memref<32x7xf32, #tpu.memory_space<vmem>>, vector<32x7xf32>
    %c0_183 = arith.constant 0 : index
    %c0_184 = arith.constant 0 : index
    %878 = vector.load %arg18[%c0_183, %c0_184] : memref<1x7xf32, #tpu.memory_space<vmem>>, vector<1x7xf32>
    %879 = vector.shape_cast %876 : vector<1x128xf32> to vector<1x128xf32>
    %880 = vector.broadcast %879 : vector<1x128xf32> to vector<4x128xf32>
    %881 = vector.shape_cast %878 : vector<1x7xf32> to vector<1x7xf32>
    %882 = vector.broadcast %881 : vector<1x7xf32> to vector<4x7xf32>
    %883 = tpu.concatenate %2, %874 in 1 : vector<4x7xf32>, vector<4x32xf32> -> vector<4x39xf32>
    %cst_185 = arith.constant dense<0.000000e+00> : vector<4x128xf32>
    %884 = tpu.matmul %883, %875, %cst_185 {dimension_numbers = #tpu.dot_dimension_numbers<[1], [0], [0], [1], [0, 0, 1, 1], [], []>} : vector<4x39xf32>, vector<39x128xf32>, vector<4x128xf32> -> vector<4x128xf32>
    %885 = arith.addf %884, %880 : vector<4x128xf32>
    %886 = vector.extract_strided_slice %885 {offsets = [0, 0], sizes = [4, 32], strides = [1, 1]} : vector<4x128xf32> to vector<4x32xf32>
    %887 = arith.negf %886 : vector<4x32xf32>
    %888 = math.exp %887 : vector<4x32xf32>
    %cst_186 = arith.constant 1.000000e+00 : f32
    %889 = vector.broadcast %cst_186 : f32 to vector<4x32xf32>
    %890 = arith.addf %889, %888 : vector<4x32xf32>
    %891 = arith.divf %889, %890 : vector<4x32xf32>
    %892 = vector.extract_strided_slice %885 {offsets = [0, 32], sizes = [4, 32], strides = [1, 1]} : vector<4x128xf32> to vector<4x32xf32>
    %893 = arith.negf %892 : vector<4x32xf32>
    %894 = math.exp %893 : vector<4x32xf32>
    %cst_187 = arith.constant 1.000000e+00 : f32
    %895 = vector.broadcast %cst_187 : f32 to vector<4x32xf32>
    %896 = arith.addf %895, %894 : vector<4x32xf32>
    %897 = arith.divf %895, %896 : vector<4x32xf32>
    %898 = vector.extract_strided_slice %885 {offsets = [0, 64], sizes = [4, 32], strides = [1, 1]} : vector<4x128xf32> to vector<4x32xf32>
    %899 = vector.extract_strided_slice %885 {offsets = [0, 96], sizes = [4, 32], strides = [1, 1]} : vector<4x128xf32> to vector<4x32xf32>
    %900 = arith.mulf %897, %899 : vector<4x32xf32>
    %901 = arith.addf %898, %900 : vector<4x32xf32>
    %902 = math.tanh %901 : vector<4x32xf32>
    %cst_188 = arith.constant 1.000000e+00 : f32
    %903 = vector.broadcast %cst_188 : f32 to vector<4x32xf32>
    %904 = arith.subf %903, %891 : vector<4x32xf32>
    %905 = arith.mulf %904, %902 : vector<4x32xf32>
    %906 = arith.mulf %891, %874 : vector<4x32xf32>
    %907 = arith.addf %905, %906 : vector<4x32xf32>
    %cst_189 = arith.constant dense<0.000000e+00> : vector<4x7xf32>
    %908 = tpu.matmul %907, %877, %cst_189 {dimension_numbers = #tpu.dot_dimension_numbers<[1], [0], [0], [1], [0, 0, 1, 1], [], []>} : vector<4x32xf32>, vector<32x7xf32>, vector<4x7xf32> -> vector<4x7xf32>
    %909 = arith.addf %908, %882 : vector<4x7xf32>
    %910 = tpu.concatenate %909, %907 in 1 : vector<4x7xf32>, vector<4x32xf32> -> vector<4x39xf32>
    %cst_190 = arith.constant dense<0.000000e+00> : vector<4x128xf32>
    %911 = tpu.matmul %910, %875, %cst_190 {dimension_numbers = #tpu.dot_dimension_numbers<[1], [0], [0], [1], [0, 0, 1, 1], [], []>} : vector<4x39xf32>, vector<39x128xf32>, vector<4x128xf32> -> vector<4x128xf32>
    %912 = arith.addf %911, %880 : vector<4x128xf32>
    %913 = vector.extract_strided_slice %912 {offsets = [0, 0], sizes = [4, 32], strides = [1, 1]} : vector<4x128xf32> to vector<4x32xf32>
    %914 = arith.negf %913 : vector<4x32xf32>
    %915 = math.exp %914 : vector<4x32xf32>
    %cst_191 = arith.constant 1.000000e+00 : f32
    %916 = vector.broadcast %cst_191 : f32 to vector<4x32xf32>
    %917 = arith.addf %916, %915 : vector<4x32xf32>
    %918 = arith.divf %916, %917 : vector<4x32xf32>
    %919 = vector.extract_strided_slice %912 {offsets = [0, 32], sizes = [4, 32], strides = [1, 1]} : vector<4x128xf32> to vector<4x32xf32>
    %920 = arith.negf %919 : vector<4x32xf32>
    %921 = math.exp %920 : vector<4x32xf32>
    %cst_192 = arith.constant 1.000000e+00 : f32
    %922 = vector.broadcast %cst_192 : f32 to vector<4x32xf32>
    %923 = arith.addf %922, %921 : vector<4x32xf32>
    %924 = arith.divf %922, %923 : vector<4x32xf32>
    %925 = vector.extract_strided_slice %912 {offsets = [0, 64], sizes = [4, 32], strides = [1, 1]} : vector<4x128xf32> to vector<4x32xf32>
    %926 = vector.extract_strided_slice %912 {offsets = [0, 96], sizes = [4, 32], strides = [1, 1]} : vector<4x128xf32> to vector<4x32xf32>
    %927 = arith.mulf %924, %926 : vector<4x32xf32>
    %928 = arith.addf %925, %927 : vector<4x32xf32>
    %929 = math.tanh %928 : vector<4x32xf32>
    %cst_193 = arith.constant 1.000000e+00 : f32
    %930 = vector.broadcast %cst_193 : f32 to vector<4x32xf32>
    %931 = arith.subf %930, %918 : vector<4x32xf32>
    %932 = arith.mulf %931, %929 : vector<4x32xf32>
    %933 = arith.mulf %918, %907 : vector<4x32xf32>
    %934 = arith.addf %932, %933 : vector<4x32xf32>
    %cst_194 = arith.constant dense<0.000000e+00> : vector<4x7xf32>
    %935 = tpu.matmul %934, %877, %cst_194 {dimension_numbers = #tpu.dot_dimension_numbers<[1], [0], [0], [1], [0, 0, 1, 1], [], []>} : vector<4x32xf32>, vector<32x7xf32>, vector<4x7xf32> -> vector<4x7xf32>
    %936 = arith.addf %935, %882 : vector<4x7xf32>
    %937 = tpu.concatenate %936, %934 in 1 : vector<4x7xf32>, vector<4x32xf32> -> vector<4x39xf32>
    %cst_195 = arith.constant dense<0.000000e+00> : vector<4x128xf32>
    %938 = tpu.matmul %937, %875, %cst_195 {dimension_numbers = #tpu.dot_dimension_numbers<[1], [0], [0], [1], [0, 0, 1, 1], [], []>} : vector<4x39xf32>, vector<39x128xf32>, vector<4x128xf32> -> vector<4x128xf32>
    %939 = arith.addf %938, %880 : vector<4x128xf32>
    %940 = vector.extract_strided_slice %939 {offsets = [0, 0], sizes = [4, 32], strides = [1, 1]} : vector<4x128xf32> to vector<4x32xf32>
    %941 = arith.negf %940 : vector<4x32xf32>
    %942 = math.exp %941 : vector<4x32xf32>
    %cst_196 = arith.constant 1.000000e+00 : f32
    %943 = vector.broadcast %cst_196 : f32 to vector<4x32xf32>
    %944 = arith.addf %943, %942 : vector<4x32xf32>
    %945 = arith.divf %943, %944 : vector<4x32xf32>
    %946 = vector.extract_strided_slice %939 {offsets = [0, 32], sizes = [4, 32], strides = [1, 1]} : vector<4x128xf32> to vector<4x32xf32>
    %947 = arith.negf %946 : vector<4x32xf32>
    %948 = math.exp %947 : vector<4x32xf32>
    %cst_197 = arith.constant 1.000000e+00 : f32
    %949 = vector.broadcast %cst_197 : f32 to vector<4x32xf32>
    %950 = arith.addf %949, %948 : vector<4x32xf32>
    %951 = arith.divf %949, %950 : vector<4x32xf32>
    %952 = vector.extract_strided_slice %939 {offsets = [0, 64], sizes = [4, 32], strides = [1, 1]} : vector<4x128xf32> to vector<4x32xf32>
    %953 = vector.extract_strided_slice %939 {offsets = [0, 96], sizes = [4, 32], strides = [1, 1]} : vector<4x128xf32> to vector<4x32xf32>
    %954 = arith.mulf %951, %953 : vector<4x32xf32>
    %955 = arith.addf %952, %954 : vector<4x32xf32>
    %956 = math.tanh %955 : vector<4x32xf32>
    %cst_198 = arith.constant 1.000000e+00 : f32
    %957 = vector.broadcast %cst_198 : f32 to vector<4x32xf32>
    %958 = arith.subf %957, %945 : vector<4x32xf32>
    %959 = arith.mulf %958, %956 : vector<4x32xf32>
    %960 = arith.mulf %945, %934 : vector<4x32xf32>
    %961 = arith.addf %959, %960 : vector<4x32xf32>
    %cst_199 = arith.constant dense<0.000000e+00> : vector<4x7xf32>
    %962 = tpu.matmul %961, %877, %cst_199 {dimension_numbers = #tpu.dot_dimension_numbers<[1], [0], [0], [1], [0, 0, 1, 1], [], []>} : vector<4x32xf32>, vector<32x7xf32>, vector<4x7xf32> -> vector<4x7xf32>
    %963 = arith.addf %962, %882 : vector<4x7xf32>
    %964 = tpu.concatenate %963, %961 in 1 : vector<4x7xf32>, vector<4x32xf32> -> vector<4x39xf32>
    %cst_200 = arith.constant dense<0.000000e+00> : vector<4x128xf32>
    %965 = tpu.matmul %964, %875, %cst_200 {dimension_numbers = #tpu.dot_dimension_numbers<[1], [0], [0], [1], [0, 0, 1, 1], [], []>} : vector<4x39xf32>, vector<39x128xf32>, vector<4x128xf32> -> vector<4x128xf32>
    %966 = arith.addf %965, %880 : vector<4x128xf32>
    %967 = vector.extract_strided_slice %966 {offsets = [0, 0], sizes = [4, 32], strides = [1, 1]} : vector<4x128xf32> to vector<4x32xf32>
    %968 = arith.negf %967 : vector<4x32xf32>
    %969 = math.exp %968 : vector<4x32xf32>
    %cst_201 = arith.constant 1.000000e+00 : f32
    %970 = vector.broadcast %cst_201 : f32 to vector<4x32xf32>
    %971 = arith.addf %970, %969 : vector<4x32xf32>
    %972 = arith.divf %970, %971 : vector<4x32xf32>
    %973 = vector.extract_strided_slice %966 {offsets = [0, 32], sizes = [4, 32], strides = [1, 1]} : vector<4x128xf32> to vector<4x32xf32>
    %974 = arith.negf %973 : vector<4x32xf32>
    %975 = math.exp %974 : vector<4x32xf32>
    %cst_202 = arith.constant 1.000000e+00 : f32
    %976 = vector.broadcast %cst_202 : f32 to vector<4x32xf32>
    %977 = arith.addf %976, %975 : vector<4x32xf32>
    %978 = arith.divf %976, %977 : vector<4x32xf32>
    %979 = vector.extract_strided_slice %966 {offsets = [0, 64], sizes = [4, 32], strides = [1, 1]} : vector<4x128xf32> to vector<4x32xf32>
    %980 = vector.extract_strided_slice %966 {offsets = [0, 96], sizes = [4, 32], strides = [1, 1]} : vector<4x128xf32> to vector<4x32xf32>
    %981 = arith.mulf %978, %980 : vector<4x32xf32>
    %982 = arith.addf %979, %981 : vector<4x32xf32>
    %983 = math.tanh %982 : vector<4x32xf32>
    %cst_203 = arith.constant 1.000000e+00 : f32
    %984 = vector.broadcast %cst_203 : f32 to vector<4x32xf32>
    %985 = arith.subf %984, %972 : vector<4x32xf32>
    %986 = arith.mulf %985, %983 : vector<4x32xf32>
    %987 = arith.mulf %972, %961 : vector<4x32xf32>
    %988 = arith.addf %986, %987 : vector<4x32xf32>
    %cst_204 = arith.constant dense<0.000000e+00> : vector<4x7xf32>
    %989 = tpu.matmul %988, %877, %cst_204 {dimension_numbers = #tpu.dot_dimension_numbers<[1], [0], [0], [1], [0, 0, 1, 1], [], []>} : vector<4x32xf32>, vector<32x7xf32>, vector<4x7xf32> -> vector<4x7xf32>
    %990 = arith.addf %989, %882 : vector<4x7xf32>
    %991 = tpu.concatenate %909, %936, %963, %990 in 0 : vector<4x7xf32>, vector<4x7xf32>, vector<4x7xf32>, vector<4x7xf32> -> vector<16x7xf32>
    %992 = vector.extract_strided_slice %991 {offsets = [0, 0], sizes = [16, 4], strides = [1, 1]} : vector<16x7xf32> to vector<16x4xf32>
    %993 = arith.mulf %992, %992 : vector<16x4xf32>
    %cst_205 = arith.constant dense<0.000000e+00> : vector<16xf32>
    %994 = vector.multi_reduction <add>, %993, %cst_205 [1] : vector<16x4xf32> to vector<16xf32>
    %995 = vector.shape_cast %994 : vector<16xf32> to vector<16x1xf32>
    %996 = math.sqrt %995 : vector<16x1xf32>
    %997 = tpu.iota {dimensions = array<i32: 1>} : vector<16x7xi32>
    %c4_i32_206 = arith.constant 4 : i32
    %998 = vector.broadcast %c4_i32_206 : i32 to vector<16x7xi32>
    %999 = arith.cmpi slt, %997, %998 : vector<16x7xi32>
    %cst_207 = arith.constant 1.000000e+00 : f32
    %1000 = vector.shape_cast %996 : vector<16x1xf32> to vector<16x1xf32>
    %1001 = vector.broadcast %1000 : vector<16x1xf32> to vector<16x7xf32>
    %1002 = vector.broadcast %cst_207 : f32 to vector<16x7xf32>
    %1003 = arith.select %999, %1001, %1002 : vector<16x7xi1>, vector<16x7xf32>
    %1004 = arith.divf %991, %1003 : vector<16x7xf32>
    %c1 = arith.constant 1 : index
    %c0_208 = arith.constant 0 : index
    %c0_209 = arith.constant 0 : index
    %1005 = vector.load %arg38[%c1, %c0_208, %c0_209] : memref<2x16x7xf32, #tpu.memory_space<vmem>>, vector<1x16x7xf32>
    %1006 = vector.shape_cast %1005 : vector<1x16x7xf32> to vector<16x7xf32>
    %1007 = vector.shape_cast %1004 : vector<16x7xf32> to vector<1x16x7xf32>
    tpu.vector_store %arg38[%c1, %c0_208, %c0_209], %1007 {strides = array<i32>} : memref<2x16x7xf32, #tpu.memory_space<vmem>>, vector<1x16x7xf32>,
    %c0_210 = arith.constant 0 : index
    %c0_211 = arith.constant 0 : index
    %1008 = vector.load %arg25[%c0_210, %c0_211] : memref<7x96xf32, #tpu.memory_space<vmem>>, vector<7x96xf32>
    %c0_212 = arith.constant 0 : index
    %c0_213 = arith.constant 0 : index
    %1009 = vector.load %arg26[%c0_212, %c0_213] : memref<32x96xf32, #tpu.memory_space<vmem>>, vector<32x96xf32>
    %c0_214 = arith.constant 0 : index
    %c0_215 = arith.constant 0 : index
    %1010 = vector.load %arg27[%c0_214, %c0_215] : memref<1x96xf32, #tpu.memory_space<vmem>>, vector<1x96xf32>
    %cst_216 = arith.constant dense<0.000000e+00> : vector<32x96xf32>
    %1011 = tpu.matmul %1, %1008, %cst_216 {dimension_numbers = #tpu.dot_dimension_numbers<[1], [0], [0], [1], [0, 0, 1, 1], [], []>} : vector<32x7xf32>, vector<7x96xf32>, vector<32x96xf32> -> vector<32x96xf32>
    %1012 = vector.broadcast %1010 : vector<1x96xf32> to vector<32x96xf32>
    %1013 = arith.addf %1011, %1012 : vector<32x96xf32>
    %cst_217 = arith.constant 0.000000e+00 : f32
    %1014 = vector.broadcast %cst_217 : f32 to vector<4x32xf32>
    %1015 = vector.extract_strided_slice %1013 {offsets = [0, 0], sizes = [4, 96], strides = [1, 1]} : vector<32x96xf32> to vector<4x96xf32>
    %cst_218 = arith.constant dense<0.000000e+00> : vector<4x96xf32>
    %1016 = tpu.matmul %1014, %1009, %cst_218 {dimension_numbers = #tpu.dot_dimension_numbers<[1], [0], [0], [1], [0, 0, 1, 1], [], []>} : vector<4x32xf32>, vector<32x96xf32>, vector<4x96xf32> -> vector<4x96xf32>
    %1017 = vector.extract_strided_slice %1015 {offsets = [0, 0], sizes = [4, 32], strides = [1, 1]} : vector<4x96xf32> to vector<4x32xf32>
    %1018 = vector.extract_strided_slice %1016 {offsets = [0, 0], sizes = [4, 32], strides = [1, 1]} : vector<4x96xf32> to vector<4x32xf32>
    %1019 = arith.addf %1017, %1018 : vector<4x32xf32>
    %1020 = arith.negf %1019 : vector<4x32xf32>
    %1021 = math.exp %1020 : vector<4x32xf32>
    %cst_219 = arith.constant 1.000000e+00 : f32
    %1022 = vector.broadcast %cst_219 : f32 to vector<4x32xf32>
    %1023 = arith.addf %1022, %1021 : vector<4x32xf32>
    %1024 = arith.divf %1022, %1023 : vector<4x32xf32>
    %1025 = vector.extract_strided_slice %1015 {offsets = [0, 32], sizes = [4, 32], strides = [1, 1]} : vector<4x96xf32> to vector<4x32xf32>
    %1026 = vector.extract_strided_slice %1016 {offsets = [0, 32], sizes = [4, 32], strides = [1, 1]} : vector<4x96xf32> to vector<4x32xf32>
    %1027 = arith.addf %1025, %1026 : vector<4x32xf32>
    %1028 = arith.negf %1027 : vector<4x32xf32>
    %1029 = math.exp %1028 : vector<4x32xf32>
    %cst_220 = arith.constant 1.000000e+00 : f32
    %1030 = vector.broadcast %cst_220 : f32 to vector<4x32xf32>
    %1031 = arith.addf %1030, %1029 : vector<4x32xf32>
    %1032 = arith.divf %1030, %1031 : vector<4x32xf32>
    %1033 = vector.extract_strided_slice %1015 {offsets = [0, 64], sizes = [4, 32], strides = [1, 1]} : vector<4x96xf32> to vector<4x32xf32>
    %1034 = vector.extract_strided_slice %1016 {offsets = [0, 64], sizes = [4, 32], strides = [1, 1]} : vector<4x96xf32> to vector<4x32xf32>
    %1035 = arith.mulf %1032, %1034 : vector<4x32xf32>
    %1036 = arith.addf %1033, %1035 : vector<4x32xf32>
    %1037 = math.tanh %1036 : vector<4x32xf32>
    %cst_221 = arith.constant 1.000000e+00 : f32
    %1038 = vector.broadcast %cst_221 : f32 to vector<4x32xf32>
    %1039 = arith.subf %1038, %1024 : vector<4x32xf32>
    %1040 = arith.mulf %1039, %1037 : vector<4x32xf32>
    %1041 = arith.mulf %1024, %1014 : vector<4x32xf32>
    %1042 = arith.addf %1040, %1041 : vector<4x32xf32>
    %1043 = vector.extract_strided_slice %1013 {offsets = [4, 0], sizes = [4, 96], strides = [1, 1]} : vector<32x96xf32> to vector<4x96xf32>
    %cst_222 = arith.constant dense<0.000000e+00> : vector<4x96xf32>
    %1044 = tpu.matmul %1042, %1009, %cst_222 {dimension_numbers = #tpu.dot_dimension_numbers<[1], [0], [0], [1], [0, 0, 1, 1], [], []>} : vector<4x32xf32>, vector<32x96xf32>, vector<4x96xf32> -> vector<4x96xf32>
    %1045 = vector.extract_strided_slice %1043 {offsets = [0, 0], sizes = [4, 32], strides = [1, 1]} : vector<4x96xf32> to vector<4x32xf32>
    %1046 = vector.extract_strided_slice %1044 {offsets = [0, 0], sizes = [4, 32], strides = [1, 1]} : vector<4x96xf32> to vector<4x32xf32>
    %1047 = arith.addf %1045, %1046 : vector<4x32xf32>
    %1048 = arith.negf %1047 : vector<4x32xf32>
    %1049 = math.exp %1048 : vector<4x32xf32>
    %cst_223 = arith.constant 1.000000e+00 : f32
    %1050 = vector.broadcast %cst_223 : f32 to vector<4x32xf32>
    %1051 = arith.addf %1050, %1049 : vector<4x32xf32>
    %1052 = arith.divf %1050, %1051 : vector<4x32xf32>
    %1053 = vector.extract_strided_slice %1043 {offsets = [0, 32], sizes = [4, 32], strides = [1, 1]} : vector<4x96xf32> to vector<4x32xf32>
    %1054 = vector.extract_strided_slice %1044 {offsets = [0, 32], sizes = [4, 32], strides = [1, 1]} : vector<4x96xf32> to vector<4x32xf32>
    %1055 = arith.addf %1053, %1054 : vector<4x32xf32>
    %1056 = arith.negf %1055 : vector<4x32xf32>
    %1057 = math.exp %1056 : vector<4x32xf32>
    %cst_224 = arith.constant 1.000000e+00 : f32
    %1058 = vector.broadcast %cst_224 : f32 to vector<4x32xf32>
    %1059 = arith.addf %1058, %1057 : vector<4x32xf32>
    %1060 = arith.divf %1058, %1059 : vector<4x32xf32>
    %1061 = vector.extract_strided_slice %1043 {offsets = [0, 64], sizes = [4, 32], strides = [1, 1]} : vector<4x96xf32> to vector<4x32xf32>
    %1062 = vector.extract_strided_slice %1044 {offsets = [0, 64], sizes = [4, 32], strides = [1, 1]} : vector<4x96xf32> to vector<4x32xf32>
    %1063 = arith.mulf %1060, %1062 : vector<4x32xf32>
    %1064 = arith.addf %1061, %1063 : vector<4x32xf32>
    %1065 = math.tanh %1064 : vector<4x32xf32>
    %cst_225 = arith.constant 1.000000e+00 : f32
    %1066 = vector.broadcast %cst_225 : f32 to vector<4x32xf32>
    %1067 = arith.subf %1066, %1052 : vector<4x32xf32>
    %1068 = arith.mulf %1067, %1065 : vector<4x32xf32>
    %1069 = arith.mulf %1052, %1042 : vector<4x32xf32>
    %1070 = arith.addf %1068, %1069 : vector<4x32xf32>
    %1071 = vector.extract_strided_slice %1013 {offsets = [8, 0], sizes = [4, 96], strides = [1, 1]} : vector<32x96xf32> to vector<4x96xf32>
    %cst_226 = arith.constant dense<0.000000e+00> : vector<4x96xf32>
    %1072 = tpu.matmul %1070, %1009, %cst_226 {dimension_numbers = #tpu.dot_dimension_numbers<[1], [0], [0], [1], [0, 0, 1, 1], [], []>} : vector<4x32xf32>, vector<32x96xf32>, vector<4x96xf32> -> vector<4x96xf32>
    %1073 = vector.extract_strided_slice %1071 {offsets = [0, 0], sizes = [4, 32], strides = [1, 1]} : vector<4x96xf32> to vector<4x32xf32>
    %1074 = vector.extract_strided_slice %1072 {offsets = [0, 0], sizes = [4, 32], strides = [1, 1]} : vector<4x96xf32> to vector<4x32xf32>
    %1075 = arith.addf %1073, %1074 : vector<4x32xf32>
    %1076 = arith.negf %1075 : vector<4x32xf32>
    %1077 = math.exp %1076 : vector<4x32xf32>
    %cst_227 = arith.constant 1.000000e+00 : f32
    %1078 = vector.broadcast %cst_227 : f32 to vector<4x32xf32>
    %1079 = arith.addf %1078, %1077 : vector<4x32xf32>
    %1080 = arith.divf %1078, %1079 : vector<4x32xf32>
    %1081 = vector.extract_strided_slice %1071 {offsets = [0, 32], sizes = [4, 32], strides = [1, 1]} : vector<4x96xf32> to vector<4x32xf32>
    %1082 = vector.extract_strided_slice %1072 {offsets = [0, 32], sizes = [4, 32], strides = [1, 1]} : vector<4x96xf32> to vector<4x32xf32>
    %1083 = arith.addf %1081, %1082 : vector<4x32xf32>
    %1084 = arith.negf %1083 : vector<4x32xf32>
    %1085 = math.exp %1084 : vector<4x32xf32>
    %cst_228 = arith.constant 1.000000e+00 : f32
    %1086 = vector.broadcast %cst_228 : f32 to vector<4x32xf32>
    %1087 = arith.addf %1086, %1085 : vector<4x32xf32>
    %1088 = arith.divf %1086, %1087 : vector<4x32xf32>
    %1089 = vector.extract_strided_slice %1071 {offsets = [0, 64], sizes = [4, 32], strides = [1, 1]} : vector<4x96xf32> to vector<4x32xf32>
    %1090 = vector.extract_strided_slice %1072 {offsets = [0, 64], sizes = [4, 32], strides = [1, 1]} : vector<4x96xf32> to vector<4x32xf32>
    %1091 = arith.mulf %1088, %1090 : vector<4x32xf32>
    %1092 = arith.addf %1089, %1091 : vector<4x32xf32>
    %1093 = math.tanh %1092 : vector<4x32xf32>
    %cst_229 = arith.constant 1.000000e+00 : f32
    %1094 = vector.broadcast %cst_229 : f32 to vector<4x32xf32>
    %1095 = arith.subf %1094, %1080 : vector<4x32xf32>
    %1096 = arith.mulf %1095, %1093 : vector<4x32xf32>
    %1097 = arith.mulf %1080, %1070 : vector<4x32xf32>
    %1098 = arith.addf %1096, %1097 : vector<4x32xf32>
    %1099 = vector.extract_strided_slice %1013 {offsets = [12, 0], sizes = [4, 96], strides = [1, 1]} : vector<32x96xf32> to vector<4x96xf32>
    %cst_230 = arith.constant dense<0.000000e+00> : vector<4x96xf32>
    %1100 = tpu.matmul %1098, %1009, %cst_230 {dimension_numbers = #tpu.dot_dimension_numbers<[1], [0], [0], [1], [0, 0, 1, 1], [], []>} : vector<4x32xf32>, vector<32x96xf32>, vector<4x96xf32> -> vector<4x96xf32>
    %1101 = vector.extract_strided_slice %1099 {offsets = [0, 0], sizes = [4, 32], strides = [1, 1]} : vector<4x96xf32> to vector<4x32xf32>
    %1102 = vector.extract_strided_slice %1100 {offsets = [0, 0], sizes = [4, 32], strides = [1, 1]} : vector<4x96xf32> to vector<4x32xf32>
    %1103 = arith.addf %1101, %1102 : vector<4x32xf32>
    %1104 = arith.negf %1103 : vector<4x32xf32>
    %1105 = math.exp %1104 : vector<4x32xf32>
    %cst_231 = arith.constant 1.000000e+00 : f32
    %1106 = vector.broadcast %cst_231 : f32 to vector<4x32xf32>
    %1107 = arith.addf %1106, %1105 : vector<4x32xf32>
    %1108 = arith.divf %1106, %1107 : vector<4x32xf32>
    %1109 = vector.extract_strided_slice %1099 {offsets = [0, 32], sizes = [4, 32], strides = [1, 1]} : vector<4x96xf32> to vector<4x32xf32>
    %1110 = vector.extract_strided_slice %1100 {offsets = [0, 32], sizes = [4, 32], strides = [1, 1]} : vector<4x96xf32> to vector<4x32xf32>
    %1111 = arith.addf %1109, %1110 : vector<4x32xf32>
    %1112 = arith.negf %1111 : vector<4x32xf32>
    %1113 = math.exp %1112 : vector<4x32xf32>
    %cst_232 = arith.constant 1.000000e+00 : f32
    %1114 = vector.broadcast %cst_232 : f32 to vector<4x32xf32>
    %1115 = arith.addf %1114, %1113 : vector<4x32xf32>
    %1116 = arith.divf %1114, %1115 : vector<4x32xf32>
    %1117 = vector.extract_strided_slice %1099 {offsets = [0, 64], sizes = [4, 32], strides = [1, 1]} : vector<4x96xf32> to vector<4x32xf32>
    %1118 = vector.extract_strided_slice %1100 {offsets = [0, 64], sizes = [4, 32], strides = [1, 1]} : vector<4x96xf32> to vector<4x32xf32>
    %1119 = arith.mulf %1116, %1118 : vector<4x32xf32>
    %1120 = arith.addf %1117, %1119 : vector<4x32xf32>
    %1121 = math.tanh %1120 : vector<4x32xf32>
    %cst_233 = arith.constant 1.000000e+00 : f32
    %1122 = vector.broadcast %cst_233 : f32 to vector<4x32xf32>
    %1123 = arith.subf %1122, %1108 : vector<4x32xf32>
    %1124 = arith.mulf %1123, %1121 : vector<4x32xf32>
    %1125 = arith.mulf %1108, %1098 : vector<4x32xf32>
    %1126 = arith.addf %1124, %1125 : vector<4x32xf32>
    %1127 = vector.extract_strided_slice %1013 {offsets = [16, 0], sizes = [4, 96], strides = [1, 1]} : vector<32x96xf32> to vector<4x96xf32>
    %cst_234 = arith.constant dense<0.000000e+00> : vector<4x96xf32>
    %1128 = tpu.matmul %1126, %1009, %cst_234 {dimension_numbers = #tpu.dot_dimension_numbers<[1], [0], [0], [1], [0, 0, 1, 1], [], []>} : vector<4x32xf32>, vector<32x96xf32>, vector<4x96xf32> -> vector<4x96xf32>
    %1129 = vector.extract_strided_slice %1127 {offsets = [0, 0], sizes = [4, 32], strides = [1, 1]} : vector<4x96xf32> to vector<4x32xf32>
    %1130 = vector.extract_strided_slice %1128 {offsets = [0, 0], sizes = [4, 32], strides = [1, 1]} : vector<4x96xf32> to vector<4x32xf32>
    %1131 = arith.addf %1129, %1130 : vector<4x32xf32>
    %1132 = arith.negf %1131 : vector<4x32xf32>
    %1133 = math.exp %1132 : vector<4x32xf32>
    %cst_235 = arith.constant 1.000000e+00 : f32
    %1134 = vector.broadcast %cst_235 : f32 to vector<4x32xf32>
    %1135 = arith.addf %1134, %1133 : vector<4x32xf32>
    %1136 = arith.divf %1134, %1135 : vector<4x32xf32>
    %1137 = vector.extract_strided_slice %1127 {offsets = [0, 32], sizes = [4, 32], strides = [1, 1]} : vector<4x96xf32> to vector<4x32xf32>
    %1138 = vector.extract_strided_slice %1128 {offsets = [0, 32], sizes = [4, 32], strides = [1, 1]} : vector<4x96xf32> to vector<4x32xf32>
    %1139 = arith.addf %1137, %1138 : vector<4x32xf32>
    %1140 = arith.negf %1139 : vector<4x32xf32>
    %1141 = math.exp %1140 : vector<4x32xf32>
    %cst_236 = arith.constant 1.000000e+00 : f32
    %1142 = vector.broadcast %cst_236 : f32 to vector<4x32xf32>
    %1143 = arith.addf %1142, %1141 : vector<4x32xf32>
    %1144 = arith.divf %1142, %1143 : vector<4x32xf32>
    %1145 = vector.extract_strided_slice %1127 {offsets = [0, 64], sizes = [4, 32], strides = [1, 1]} : vector<4x96xf32> to vector<4x32xf32>
    %1146 = vector.extract_strided_slice %1128 {offsets = [0, 64], sizes = [4, 32], strides = [1, 1]} : vector<4x96xf32> to vector<4x32xf32>
    %1147 = arith.mulf %1144, %1146 : vector<4x32xf32>
    %1148 = arith.addf %1145, %1147 : vector<4x32xf32>
    %1149 = math.tanh %1148 : vector<4x32xf32>
    %cst_237 = arith.constant 1.000000e+00 : f32
    %1150 = vector.broadcast %cst_237 : f32 to vector<4x32xf32>
    %1151 = arith.subf %1150, %1136 : vector<4x32xf32>
    %1152 = arith.mulf %1151, %1149 : vector<4x32xf32>
    %1153 = arith.mulf %1136, %1126 : vector<4x32xf32>
    %1154 = arith.addf %1152, %1153 : vector<4x32xf32>
    %1155 = vector.extract_strided_slice %1013 {offsets = [20, 0], sizes = [4, 96], strides = [1, 1]} : vector<32x96xf32> to vector<4x96xf32>
    %cst_238 = arith.constant dense<0.000000e+00> : vector<4x96xf32>
    %1156 = tpu.matmul %1154, %1009, %cst_238 {dimension_numbers = #tpu.dot_dimension_numbers<[1], [0], [0], [1], [0, 0, 1, 1], [], []>} : vector<4x32xf32>, vector<32x96xf32>, vector<4x96xf32> -> vector<4x96xf32>
    %1157 = vector.extract_strided_slice %1155 {offsets = [0, 0], sizes = [4, 32], strides = [1, 1]} : vector<4x96xf32> to vector<4x32xf32>
    %1158 = vector.extract_strided_slice %1156 {offsets = [0, 0], sizes = [4, 32], strides = [1, 1]} : vector<4x96xf32> to vector<4x32xf32>
    %1159 = arith.addf %1157, %1158 : vector<4x32xf32>
    %1160 = arith.negf %1159 : vector<4x32xf32>
    %1161 = math.exp %1160 : vector<4x32xf32>
    %cst_239 = arith.constant 1.000000e+00 : f32
    %1162 = vector.broadcast %cst_239 : f32 to vector<4x32xf32>
    %1163 = arith.addf %1162, %1161 : vector<4x32xf32>
    %1164 = arith.divf %1162, %1163 : vector<4x32xf32>
    %1165 = vector.extract_strided_slice %1155 {offsets = [0, 32], sizes = [4, 32], strides = [1, 1]} : vector<4x96xf32> to vector<4x32xf32>
    %1166 = vector.extract_strided_slice %1156 {offsets = [0, 32], sizes = [4, 32], strides = [1, 1]} : vector<4x96xf32> to vector<4x32xf32>
    %1167 = arith.addf %1165, %1166 : vector<4x32xf32>
    %1168 = arith.negf %1167 : vector<4x32xf32>
    %1169 = math.exp %1168 : vector<4x32xf32>
    %cst_240 = arith.constant 1.000000e+00 : f32
    %1170 = vector.broadcast %cst_240 : f32 to vector<4x32xf32>
    %1171 = arith.addf %1170, %1169 : vector<4x32xf32>
    %1172 = arith.divf %1170, %1171 : vector<4x32xf32>
    %1173 = vector.extract_strided_slice %1155 {offsets = [0, 64], sizes = [4, 32], strides = [1, 1]} : vector<4x96xf32> to vector<4x32xf32>
    %1174 = vector.extract_strided_slice %1156 {offsets = [0, 64], sizes = [4, 32], strides = [1, 1]} : vector<4x96xf32> to vector<4x32xf32>
    %1175 = arith.mulf %1172, %1174 : vector<4x32xf32>
    %1176 = arith.addf %1173, %1175 : vector<4x32xf32>
    %1177 = math.tanh %1176 : vector<4x32xf32>
    %cst_241 = arith.constant 1.000000e+00 : f32
    %1178 = vector.broadcast %cst_241 : f32 to vector<4x32xf32>
    %1179 = arith.subf %1178, %1164 : vector<4x32xf32>
    %1180 = arith.mulf %1179, %1177 : vector<4x32xf32>
    %1181 = arith.mulf %1164, %1154 : vector<4x32xf32>
    %1182 = arith.addf %1180, %1181 : vector<4x32xf32>
    %1183 = vector.extract_strided_slice %1013 {offsets = [24, 0], sizes = [4, 96], strides = [1, 1]} : vector<32x96xf32> to vector<4x96xf32>
    %cst_242 = arith.constant dense<0.000000e+00> : vector<4x96xf32>
    %1184 = tpu.matmul %1182, %1009, %cst_242 {dimension_numbers = #tpu.dot_dimension_numbers<[1], [0], [0], [1], [0, 0, 1, 1], [], []>} : vector<4x32xf32>, vector<32x96xf32>, vector<4x96xf32> -> vector<4x96xf32>
    %1185 = vector.extract_strided_slice %1183 {offsets = [0, 0], sizes = [4, 32], strides = [1, 1]} : vector<4x96xf32> to vector<4x32xf32>
    %1186 = vector.extract_strided_slice %1184 {offsets = [0, 0], sizes = [4, 32], strides = [1, 1]} : vector<4x96xf32> to vector<4x32xf32>
    %1187 = arith.addf %1185, %1186 : vector<4x32xf32>
    %1188 = arith.negf %1187 : vector<4x32xf32>
    %1189 = math.exp %1188 : vector<4x32xf32>
    %cst_243 = arith.constant 1.000000e+00 : f32
    %1190 = vector.broadcast %cst_243 : f32 to vector<4x32xf32>
    %1191 = arith.addf %1190, %1189 : vector<4x32xf32>
    %1192 = arith.divf %1190, %1191 : vector<4x32xf32>
    %1193 = vector.extract_strided_slice %1183 {offsets = [0, 32], sizes = [4, 32], strides = [1, 1]} : vector<4x96xf32> to vector<4x32xf32>
    %1194 = vector.extract_strided_slice %1184 {offsets = [0, 32], sizes = [4, 32], strides = [1, 1]} : vector<4x96xf32> to vector<4x32xf32>
    %1195 = arith.addf %1193, %1194 : vector<4x32xf32>
    %1196 = arith.negf %1195 : vector<4x32xf32>
    %1197 = math.exp %1196 : vector<4x32xf32>
    %cst_244 = arith.constant 1.000000e+00 : f32
    %1198 = vector.broadcast %cst_244 : f32 to vector<4x32xf32>
    %1199 = arith.addf %1198, %1197 : vector<4x32xf32>
    %1200 = arith.divf %1198, %1199 : vector<4x32xf32>
    %1201 = vector.extract_strided_slice %1183 {offsets = [0, 64], sizes = [4, 32], strides = [1, 1]} : vector<4x96xf32> to vector<4x32xf32>
    %1202 = vector.extract_strided_slice %1184 {offsets = [0, 64], sizes = [4, 32], strides = [1, 1]} : vector<4x96xf32> to vector<4x32xf32>
    %1203 = arith.mulf %1200, %1202 : vector<4x32xf32>
    %1204 = arith.addf %1201, %1203 : vector<4x32xf32>
    %1205 = math.tanh %1204 : vector<4x32xf32>
    %cst_245 = arith.constant 1.000000e+00 : f32
    %1206 = vector.broadcast %cst_245 : f32 to vector<4x32xf32>
    %1207 = arith.subf %1206, %1192 : vector<4x32xf32>
    %1208 = arith.mulf %1207, %1205 : vector<4x32xf32>
    %1209 = arith.mulf %1192, %1182 : vector<4x32xf32>
    %1210 = arith.addf %1208, %1209 : vector<4x32xf32>
    %1211 = vector.extract_strided_slice %1013 {offsets = [28, 0], sizes = [4, 96], strides = [1, 1]} : vector<32x96xf32> to vector<4x96xf32>
    %cst_246 = arith.constant dense<0.000000e+00> : vector<4x96xf32>
    %1212 = tpu.matmul %1210, %1009, %cst_246 {dimension_numbers = #tpu.dot_dimension_numbers<[1], [0], [0], [1], [0, 0, 1, 1], [], []>} : vector<4x32xf32>, vector<32x96xf32>, vector<4x96xf32> -> vector<4x96xf32>
    %1213 = vector.extract_strided_slice %1211 {offsets = [0, 0], sizes = [4, 32], strides = [1, 1]} : vector<4x96xf32> to vector<4x32xf32>
    %1214 = vector.extract_strided_slice %1212 {offsets = [0, 0], sizes = [4, 32], strides = [1, 1]} : vector<4x96xf32> to vector<4x32xf32>
    %1215 = arith.addf %1213, %1214 : vector<4x32xf32>
    %1216 = arith.negf %1215 : vector<4x32xf32>
    %1217 = math.exp %1216 : vector<4x32xf32>
    %cst_247 = arith.constant 1.000000e+00 : f32
    %1218 = vector.broadcast %cst_247 : f32 to vector<4x32xf32>
    %1219 = arith.addf %1218, %1217 : vector<4x32xf32>
    %1220 = arith.divf %1218, %1219 : vector<4x32xf32>
    %1221 = vector.extract_strided_slice %1211 {offsets = [0, 32], sizes = [4, 32], strides = [1, 1]} : vector<4x96xf32> to vector<4x32xf32>
    %1222 = vector.extract_strided_slice %1212 {offsets = [0, 32], sizes = [4, 32], strides = [1, 1]} : vector<4x96xf32> to vector<4x32xf32>
    %1223 = arith.addf %1221, %1222 : vector<4x32xf32>
    %1224 = arith.negf %1223 : vector<4x32xf32>
    %1225 = math.exp %1224 : vector<4x32xf32>
    %cst_248 = arith.constant 1.000000e+00 : f32
    %1226 = vector.broadcast %cst_248 : f32 to vector<4x32xf32>
    %1227 = arith.addf %1226, %1225 : vector<4x32xf32>
    %1228 = arith.divf %1226, %1227 : vector<4x32xf32>
    %1229 = vector.extract_strided_slice %1211 {offsets = [0, 64], sizes = [4, 32], strides = [1, 1]} : vector<4x96xf32> to vector<4x32xf32>
    %1230 = vector.extract_strided_slice %1212 {offsets = [0, 64], sizes = [4, 32], strides = [1, 1]} : vector<4x96xf32> to vector<4x32xf32>
    %1231 = arith.mulf %1228, %1230 : vector<4x32xf32>
    %1232 = arith.addf %1229, %1231 : vector<4x32xf32>
    %1233 = math.tanh %1232 : vector<4x32xf32>
    %cst_249 = arith.constant 1.000000e+00 : f32
    %1234 = vector.broadcast %cst_249 : f32 to vector<4x32xf32>
    %1235 = arith.subf %1234, %1220 : vector<4x32xf32>
    %1236 = arith.mulf %1235, %1233 : vector<4x32xf32>
    %1237 = arith.mulf %1220, %1210 : vector<4x32xf32>
    %1238 = arith.addf %1236, %1237 : vector<4x32xf32>
    %c0_250 = arith.constant 0 : index
    %c0_251 = arith.constant 0 : index
    %1239 = vector.load %arg41[%c0_250, %c0_251] : memref<4x32xf32, #tpu.memory_space<vmem>>, vector<4x32xf32>
    tpu.vector_store %arg41[%c0_250, %c0_251], %1238 {strides = array<i32>} : memref<4x32xf32, #tpu.memory_space<vmem>>, vector<4x32xf32>,
    %c0_252 = arith.constant 0 : index
    %c0_253 = arith.constant 0 : index
    %1240 = vector.load %arg12[%c0_252, %c0_253] : memref<7x96xf32, #tpu.memory_space<vmem>>, vector<7x96xf32>
    %c0_254 = arith.constant 0 : index
    %c0_255 = arith.constant 0 : index
    %1241 = vector.load %arg13[%c0_254, %c0_255] : memref<32x96xf32, #tpu.memory_space<vmem>>, vector<32x96xf32>
    %c0_256 = arith.constant 0 : index
    %c0_257 = arith.constant 0 : index
    %1242 = vector.load %arg14[%c0_256, %c0_257] : memref<1x96xf32, #tpu.memory_space<vmem>>, vector<1x96xf32>
    %cst_258 = arith.constant dense<0.000000e+00> : vector<48x96xf32>
    %1243 = tpu.matmul %0, %1240, %cst_258 {dimension_numbers = #tpu.dot_dimension_numbers<[1], [0], [0], [1], [0, 0, 1, 1], [], []>} : vector<48x7xf32>, vector<7x96xf32>, vector<48x96xf32> -> vector<48x96xf32>
    %1244 = vector.broadcast %1242 : vector<1x96xf32> to vector<48x96xf32>
    %1245 = arith.addf %1243, %1244 : vector<48x96xf32>
    %cst_259 = arith.constant 0.000000e+00 : f32
    %1246 = vector.broadcast %cst_259 : f32 to vector<6x32xf32>
    %cst_260 = arith.constant 0.000000e+00 : f32
    %1247 = vector.broadcast %cst_260 : f32 to vector<6x32xf32>
    %1248 = vector.extract_strided_slice %1245 {offsets = [0, 0], sizes = [6, 96], strides = [1, 1]} : vector<48x96xf32> to vector<6x96xf32>
    %cst_261 = arith.constant dense<0.000000e+00> : vector<6x96xf32>
    %1249 = tpu.matmul %1246, %1241, %cst_261 {dimension_numbers = #tpu.dot_dimension_numbers<[1], [0], [0], [1], [0, 0, 1, 1], [], []>} : vector<6x32xf32>, vector<32x96xf32>, vector<6x96xf32> -> vector<6x96xf32>
    %1250 = vector.extract_strided_slice %1248 {offsets = [0, 0], sizes = [6, 32], strides = [1, 1]} : vector<6x96xf32> to vector<6x32xf32>
    %1251 = vector.extract_strided_slice %1249 {offsets = [0, 0], sizes = [6, 32], strides = [1, 1]} : vector<6x96xf32> to vector<6x32xf32>
    %1252 = arith.addf %1250, %1251 : vector<6x32xf32>
    %1253 = arith.negf %1252 : vector<6x32xf32>
    %1254 = math.exp %1253 : vector<6x32xf32>
    %cst_262 = arith.constant 1.000000e+00 : f32
    %1255 = vector.broadcast %cst_262 : f32 to vector<6x32xf32>
    %1256 = arith.addf %1255, %1254 : vector<6x32xf32>
    %1257 = arith.divf %1255, %1256 : vector<6x32xf32>
    %1258 = vector.extract_strided_slice %1248 {offsets = [0, 32], sizes = [6, 32], strides = [1, 1]} : vector<6x96xf32> to vector<6x32xf32>
    %1259 = vector.extract_strided_slice %1249 {offsets = [0, 32], sizes = [6, 32], strides = [1, 1]} : vector<6x96xf32> to vector<6x32xf32>
    %1260 = arith.addf %1258, %1259 : vector<6x32xf32>
    %1261 = arith.negf %1260 : vector<6x32xf32>
    %1262 = math.exp %1261 : vector<6x32xf32>
    %cst_263 = arith.constant 1.000000e+00 : f32
    %1263 = vector.broadcast %cst_263 : f32 to vector<6x32xf32>
    %1264 = arith.addf %1263, %1262 : vector<6x32xf32>
    %1265 = arith.divf %1263, %1264 : vector<6x32xf32>
    %1266 = vector.extract_strided_slice %1248 {offsets = [0, 64], sizes = [6, 32], strides = [1, 1]} : vector<6x96xf32> to vector<6x32xf32>
    %1267 = vector.extract_strided_slice %1249 {offsets = [0, 64], sizes = [6, 32], strides = [1, 1]} : vector<6x96xf32> to vector<6x32xf32>
    %1268 = arith.mulf %1265, %1267 : vector<6x32xf32>
    %1269 = arith.addf %1266, %1268 : vector<6x32xf32>
    %1270 = math.tanh %1269 : vector<6x32xf32>
    %cst_264 = arith.constant 1.000000e+00 : f32
    %1271 = vector.broadcast %cst_264 : f32 to vector<6x32xf32>
    %1272 = arith.subf %1271, %1257 : vector<6x32xf32>
    %1273 = arith.mulf %1272, %1270 : vector<6x32xf32>
    %1274 = arith.mulf %1257, %1246 : vector<6x32xf32>
    %1275 = arith.addf %1273, %1274 : vector<6x32xf32>
    %1276 = arith.addf %1247, %1275 : vector<6x32xf32>
    %1277 = vector.extract_strided_slice %1245 {offsets = [6, 0], sizes = [6, 96], strides = [1, 1]} : vector<48x96xf32> to vector<6x96xf32>
    %cst_265 = arith.constant dense<0.000000e+00> : vector<6x96xf32>
    %1278 = tpu.matmul %1275, %1241, %cst_265 {dimension_numbers = #tpu.dot_dimension_numbers<[1], [0], [0], [1], [0, 0, 1, 1], [], []>} : vector<6x32xf32>, vector<32x96xf32>, vector<6x96xf32> -> vector<6x96xf32>
    %1279 = vector.extract_strided_slice %1277 {offsets = [0, 0], sizes = [6, 32], strides = [1, 1]} : vector<6x96xf32> to vector<6x32xf32>
    %1280 = vector.extract_strided_slice %1278 {offsets = [0, 0], sizes = [6, 32], strides = [1, 1]} : vector<6x96xf32> to vector<6x32xf32>
    %1281 = arith.addf %1279, %1280 : vector<6x32xf32>
    %1282 = arith.negf %1281 : vector<6x32xf32>
    %1283 = math.exp %1282 : vector<6x32xf32>
    %cst_266 = arith.constant 1.000000e+00 : f32
    %1284 = vector.broadcast %cst_266 : f32 to vector<6x32xf32>
    %1285 = arith.addf %1284, %1283 : vector<6x32xf32>
    %1286 = arith.divf %1284, %1285 : vector<6x32xf32>
    %1287 = vector.extract_strided_slice %1277 {offsets = [0, 32], sizes = [6, 32], strides = [1, 1]} : vector<6x96xf32> to vector<6x32xf32>
    %1288 = vector.extract_strided_slice %1278 {offsets = [0, 32], sizes = [6, 32], strides = [1, 1]} : vector<6x96xf32> to vector<6x32xf32>
    %1289 = arith.addf %1287, %1288 : vector<6x32xf32>
    %1290 = arith.negf %1289 : vector<6x32xf32>
    %1291 = math.exp %1290 : vector<6x32xf32>
    %cst_267 = arith.constant 1.000000e+00 : f32
    %1292 = vector.broadcast %cst_267 : f32 to vector<6x32xf32>
    %1293 = arith.addf %1292, %1291 : vector<6x32xf32>
    %1294 = arith.divf %1292, %1293 : vector<6x32xf32>
    %1295 = vector.extract_strided_slice %1277 {offsets = [0, 64], sizes = [6, 32], strides = [1, 1]} : vector<6x96xf32> to vector<6x32xf32>
    %1296 = vector.extract_strided_slice %1278 {offsets = [0, 64], sizes = [6, 32], strides = [1, 1]} : vector<6x96xf32> to vector<6x32xf32>
    %1297 = arith.mulf %1294, %1296 : vector<6x32xf32>
    %1298 = arith.addf %1295, %1297 : vector<6x32xf32>
    %1299 = math.tanh %1298 : vector<6x32xf32>
    %cst_268 = arith.constant 1.000000e+00 : f32
    %1300 = vector.broadcast %cst_268 : f32 to vector<6x32xf32>
    %1301 = arith.subf %1300, %1286 : vector<6x32xf32>
    %1302 = arith.mulf %1301, %1299 : vector<6x32xf32>
    %1303 = arith.mulf %1286, %1275 : vector<6x32xf32>
    %1304 = arith.addf %1302, %1303 : vector<6x32xf32>
    %1305 = arith.addf %1276, %1304 : vector<6x32xf32>
    %1306 = vector.extract_strided_slice %1245 {offsets = [12, 0], sizes = [6, 96], strides = [1, 1]} : vector<48x96xf32> to vector<6x96xf32>
    %cst_269 = arith.constant dense<0.000000e+00> : vector<6x96xf32>
    %1307 = tpu.matmul %1304, %1241, %cst_269 {dimension_numbers = #tpu.dot_dimension_numbers<[1], [0], [0], [1], [0, 0, 1, 1], [], []>} : vector<6x32xf32>, vector<32x96xf32>, vector<6x96xf32> -> vector<6x96xf32>
    %1308 = vector.extract_strided_slice %1306 {offsets = [0, 0], sizes = [6, 32], strides = [1, 1]} : vector<6x96xf32> to vector<6x32xf32>
    %1309 = vector.extract_strided_slice %1307 {offsets = [0, 0], sizes = [6, 32], strides = [1, 1]} : vector<6x96xf32> to vector<6x32xf32>
    %1310 = arith.addf %1308, %1309 : vector<6x32xf32>
    %1311 = arith.negf %1310 : vector<6x32xf32>
    %1312 = math.exp %1311 : vector<6x32xf32>
    %cst_270 = arith.constant 1.000000e+00 : f32
    %1313 = vector.broadcast %cst_270 : f32 to vector<6x32xf32>
    %1314 = arith.addf %1313, %1312 : vector<6x32xf32>
    %1315 = arith.divf %1313, %1314 : vector<6x32xf32>
    %1316 = vector.extract_strided_slice %1306 {offsets = [0, 32], sizes = [6, 32], strides = [1, 1]} : vector<6x96xf32> to vector<6x32xf32>
    %1317 = vector.extract_strided_slice %1307 {offsets = [0, 32], sizes = [6, 32], strides = [1, 1]} : vector<6x96xf32> to vector<6x32xf32>
    %1318 = arith.addf %1316, %1317 : vector<6x32xf32>
    %1319 = arith.negf %1318 : vector<6x32xf32>
    %1320 = math.exp %1319 : vector<6x32xf32>
    %cst_271 = arith.constant 1.000000e+00 : f32
    %1321 = vector.broadcast %cst_271 : f32 to vector<6x32xf32>
    %1322 = arith.addf %1321, %1320 : vector<6x32xf32>
    %1323 = arith.divf %1321, %1322 : vector<6x32xf32>
    %1324 = vector.extract_strided_slice %1306 {offsets = [0, 64], sizes = [6, 32], strides = [1, 1]} : vector<6x96xf32> to vector<6x32xf32>
    %1325 = vector.extract_strided_slice %1307 {offsets = [0, 64], sizes = [6, 32], strides = [1, 1]} : vector<6x96xf32> to vector<6x32xf32>
    %1326 = arith.mulf %1323, %1325 : vector<6x32xf32>
    %1327 = arith.addf %1324, %1326 : vector<6x32xf32>
    %1328 = math.tanh %1327 : vector<6x32xf32>
    %cst_272 = arith.constant 1.000000e+00 : f32
    %1329 = vector.broadcast %cst_272 : f32 to vector<6x32xf32>
    %1330 = arith.subf %1329, %1315 : vector<6x32xf32>
    %1331 = arith.mulf %1330, %1328 : vector<6x32xf32>
    %1332 = arith.mulf %1315, %1304 : vector<6x32xf32>
    %1333 = arith.addf %1331, %1332 : vector<6x32xf32>
    %1334 = arith.addf %1305, %1333 : vector<6x32xf32>
    %1335 = vector.extract_strided_slice %1245 {offsets = [18, 0], sizes = [6, 96], strides = [1, 1]} : vector<48x96xf32> to vector<6x96xf32>
    %cst_273 = arith.constant dense<0.000000e+00> : vector<6x96xf32>
    %1336 = tpu.matmul %1333, %1241, %cst_273 {dimension_numbers = #tpu.dot_dimension_numbers<[1], [0], [0], [1], [0, 0, 1, 1], [], []>} : vector<6x32xf32>, vector<32x96xf32>, vector<6x96xf32> -> vector<6x96xf32>
    %1337 = vector.extract_strided_slice %1335 {offsets = [0, 0], sizes = [6, 32], strides = [1, 1]} : vector<6x96xf32> to vector<6x32xf32>
    %1338 = vector.extract_strided_slice %1336 {offsets = [0, 0], sizes = [6, 32], strides = [1, 1]} : vector<6x96xf32> to vector<6x32xf32>
    %1339 = arith.addf %1337, %1338 : vector<6x32xf32>
    %1340 = arith.negf %1339 : vector<6x32xf32>
    %1341 = math.exp %1340 : vector<6x32xf32>
    %cst_274 = arith.constant 1.000000e+00 : f32
    %1342 = vector.broadcast %cst_274 : f32 to vector<6x32xf32>
    %1343 = arith.addf %1342, %1341 : vector<6x32xf32>
    %1344 = arith.divf %1342, %1343 : vector<6x32xf32>
    %1345 = vector.extract_strided_slice %1335 {offsets = [0, 32], sizes = [6, 32], strides = [1, 1]} : vector<6x96xf32> to vector<6x32xf32>
    %1346 = vector.extract_strided_slice %1336 {offsets = [0, 32], sizes = [6, 32], strides = [1, 1]} : vector<6x96xf32> to vector<6x32xf32>
    %1347 = arith.addf %1345, %1346 : vector<6x32xf32>
    %1348 = arith.negf %1347 : vector<6x32xf32>
    %1349 = math.exp %1348 : vector<6x32xf32>
    %cst_275 = arith.constant 1.000000e+00 : f32
    %1350 = vector.broadcast %cst_275 : f32 to vector<6x32xf32>
    %1351 = arith.addf %1350, %1349 : vector<6x32xf32>
    %1352 = arith.divf %1350, %1351 : vector<6x32xf32>
    %1353 = vector.extract_strided_slice %1335 {offsets = [0, 64], sizes = [6, 32], strides = [1, 1]} : vector<6x96xf32> to vector<6x32xf32>
    %1354 = vector.extract_strided_slice %1336 {offsets = [0, 64], sizes = [6, 32], strides = [1, 1]} : vector<6x96xf32> to vector<6x32xf32>
    %1355 = arith.mulf %1352, %1354 : vector<6x32xf32>
    %1356 = arith.addf %1353, %1355 : vector<6x32xf32>
    %1357 = math.tanh %1356 : vector<6x32xf32>
    %cst_276 = arith.constant 1.000000e+00 : f32
    %1358 = vector.broadcast %cst_276 : f32 to vector<6x32xf32>
    %1359 = arith.subf %1358, %1344 : vector<6x32xf32>
    %1360 = arith.mulf %1359, %1357 : vector<6x32xf32>
    %1361 = arith.mulf %1344, %1333 : vector<6x32xf32>
    %1362 = arith.addf %1360, %1361 : vector<6x32xf32>
    %1363 = arith.addf %1334, %1362 : vector<6x32xf32>
    %1364 = vector.extract_strided_slice %1245 {offsets = [24, 0], sizes = [6, 96], strides = [1, 1]} : vector<48x96xf32> to vector<6x96xf32>
    %cst_277 = arith.constant dense<0.000000e+00> : vector<6x96xf32>
    %1365 = tpu.matmul %1362, %1241, %cst_277 {dimension_numbers = #tpu.dot_dimension_numbers<[1], [0], [0], [1], [0, 0, 1, 1], [], []>} : vector<6x32xf32>, vector<32x96xf32>, vector<6x96xf32> -> vector<6x96xf32>
    %1366 = vector.extract_strided_slice %1364 {offsets = [0, 0], sizes = [6, 32], strides = [1, 1]} : vector<6x96xf32> to vector<6x32xf32>
    %1367 = vector.extract_strided_slice %1365 {offsets = [0, 0], sizes = [6, 32], strides = [1, 1]} : vector<6x96xf32> to vector<6x32xf32>
    %1368 = arith.addf %1366, %1367 : vector<6x32xf32>
    %1369 = arith.negf %1368 : vector<6x32xf32>
    %1370 = math.exp %1369 : vector<6x32xf32>
    %cst_278 = arith.constant 1.000000e+00 : f32
    %1371 = vector.broadcast %cst_278 : f32 to vector<6x32xf32>
    %1372 = arith.addf %1371, %1370 : vector<6x32xf32>
    %1373 = arith.divf %1371, %1372 : vector<6x32xf32>
    %1374 = vector.extract_strided_slice %1364 {offsets = [0, 32], sizes = [6, 32], strides = [1, 1]} : vector<6x96xf32> to vector<6x32xf32>
    %1375 = vector.extract_strided_slice %1365 {offsets = [0, 32], sizes = [6, 32], strides = [1, 1]} : vector<6x96xf32> to vector<6x32xf32>
    %1376 = arith.addf %1374, %1375 : vector<6x32xf32>
    %1377 = arith.negf %1376 : vector<6x32xf32>
    %1378 = math.exp %1377 : vector<6x32xf32>
    %cst_279 = arith.constant 1.000000e+00 : f32
    %1379 = vector.broadcast %cst_279 : f32 to vector<6x32xf32>
    %1380 = arith.addf %1379, %1378 : vector<6x32xf32>
    %1381 = arith.divf %1379, %1380 : vector<6x32xf32>
    %1382 = vector.extract_strided_slice %1364 {offsets = [0, 64], sizes = [6, 32], strides = [1, 1]} : vector<6x96xf32> to vector<6x32xf32>
    %1383 = vector.extract_strided_slice %1365 {offsets = [0, 64], sizes = [6, 32], strides = [1, 1]} : vector<6x96xf32> to vector<6x32xf32>
    %1384 = arith.mulf %1381, %1383 : vector<6x32xf32>
    %1385 = arith.addf %1382, %1384 : vector<6x32xf32>
    %1386 = math.tanh %1385 : vector<6x32xf32>
    %cst_280 = arith.constant 1.000000e+00 : f32
    %1387 = vector.broadcast %cst_280 : f32 to vector<6x32xf32>
    %1388 = arith.subf %1387, %1373 : vector<6x32xf32>
    %1389 = arith.mulf %1388, %1386 : vector<6x32xf32>
    %1390 = arith.mulf %1373, %1362 : vector<6x32xf32>
    %1391 = arith.addf %1389, %1390 : vector<6x32xf32>
    %1392 = arith.addf %1363, %1391 : vector<6x32xf32>
    %1393 = vector.extract_strided_slice %1245 {offsets = [30, 0], sizes = [6, 96], strides = [1, 1]} : vector<48x96xf32> to vector<6x96xf32>
    %cst_281 = arith.constant dense<0.000000e+00> : vector<6x96xf32>
    %1394 = tpu.matmul %1391, %1241, %cst_281 {dimension_numbers = #tpu.dot_dimension_numbers<[1], [0], [0], [1], [0, 0, 1, 1], [], []>} : vector<6x32xf32>, vector<32x96xf32>, vector<6x96xf32> -> vector<6x96xf32>
    %1395 = vector.extract_strided_slice %1393 {offsets = [0, 0], sizes = [6, 32], strides = [1, 1]} : vector<6x96xf32> to vector<6x32xf32>
    %1396 = vector.extract_strided_slice %1394 {offsets = [0, 0], sizes = [6, 32], strides = [1, 1]} : vector<6x96xf32> to vector<6x32xf32>
    %1397 = arith.addf %1395, %1396 : vector<6x32xf32>
    %1398 = arith.negf %1397 : vector<6x32xf32>
    %1399 = math.exp %1398 : vector<6x32xf32>
    %cst_282 = arith.constant 1.000000e+00 : f32
    %1400 = vector.broadcast %cst_282 : f32 to vector<6x32xf32>
    %1401 = arith.addf %1400, %1399 : vector<6x32xf32>
    %1402 = arith.divf %1400, %1401 : vector<6x32xf32>
    %1403 = vector.extract_strided_slice %1393 {offsets = [0, 32], sizes = [6, 32], strides = [1, 1]} : vector<6x96xf32> to vector<6x32xf32>
    %1404 = vector.extract_strided_slice %1394 {offsets = [0, 32], sizes = [6, 32], strides = [1, 1]} : vector<6x96xf32> to vector<6x32xf32>
    %1405 = arith.addf %1403, %1404 : vector<6x32xf32>
    %1406 = arith.negf %1405 : vector<6x32xf32>
    %1407 = math.exp %1406 : vector<6x32xf32>
    %cst_283 = arith.constant 1.000000e+00 : f32
    %1408 = vector.broadcast %cst_283 : f32 to vector<6x32xf32>
    %1409 = arith.addf %1408, %1407 : vector<6x32xf32>
    %1410 = arith.divf %1408, %1409 : vector<6x32xf32>
    %1411 = vector.extract_strided_slice %1393 {offsets = [0, 64], sizes = [6, 32], strides = [1, 1]} : vector<6x96xf32> to vector<6x32xf32>
    %1412 = vector.extract_strided_slice %1394 {offsets = [0, 64], sizes = [6, 32], strides = [1, 1]} : vector<6x96xf32> to vector<6x32xf32>
    %1413 = arith.mulf %1410, %1412 : vector<6x32xf32>
    %1414 = arith.addf %1411, %1413 : vector<6x32xf32>
    %1415 = math.tanh %1414 : vector<6x32xf32>
    %cst_284 = arith.constant 1.000000e+00 : f32
    %1416 = vector.broadcast %cst_284 : f32 to vector<6x32xf32>
    %1417 = arith.subf %1416, %1402 : vector<6x32xf32>
    %1418 = arith.mulf %1417, %1415 : vector<6x32xf32>
    %1419 = arith.mulf %1402, %1391 : vector<6x32xf32>
    %1420 = arith.addf %1418, %1419 : vector<6x32xf32>
    %1421 = arith.addf %1392, %1420 : vector<6x32xf32>
    %1422 = vector.extract_strided_slice %1245 {offsets = [36, 0], sizes = [6, 96], strides = [1, 1]} : vector<48x96xf32> to vector<6x96xf32>
    %cst_285 = arith.constant dense<0.000000e+00> : vector<6x96xf32>
    %1423 = tpu.matmul %1420, %1241, %cst_285 {dimension_numbers = #tpu.dot_dimension_numbers<[1], [0], [0], [1], [0, 0, 1, 1], [], []>} : vector<6x32xf32>, vector<32x96xf32>, vector<6x96xf32> -> vector<6x96xf32>
    %1424 = vector.extract_strided_slice %1422 {offsets = [0, 0], sizes = [6, 32], strides = [1, 1]} : vector<6x96xf32> to vector<6x32xf32>
    %1425 = vector.extract_strided_slice %1423 {offsets = [0, 0], sizes = [6, 32], strides = [1, 1]} : vector<6x96xf32> to vector<6x32xf32>
    %1426 = arith.addf %1424, %1425 : vector<6x32xf32>
    %1427 = arith.negf %1426 : vector<6x32xf32>
    %1428 = math.exp %1427 : vector<6x32xf32>
    %cst_286 = arith.constant 1.000000e+00 : f32
    %1429 = vector.broadcast %cst_286 : f32 to vector<6x32xf32>
    %1430 = arith.addf %1429, %1428 : vector<6x32xf32>
    %1431 = arith.divf %1429, %1430 : vector<6x32xf32>
    %1432 = vector.extract_strided_slice %1422 {offsets = [0, 32], sizes = [6, 32], strides = [1, 1]} : vector<6x96xf32> to vector<6x32xf32>
    %1433 = vector.extract_strided_slice %1423 {offsets = [0, 32], sizes = [6, 32], strides = [1, 1]} : vector<6x96xf32> to vector<6x32xf32>
    %1434 = arith.addf %1432, %1433 : vector<6x32xf32>
    %1435 = arith.negf %1434 : vector<6x32xf32>
    %1436 = math.exp %1435 : vector<6x32xf32>
    %cst_287 = arith.constant 1.000000e+00 : f32
    %1437 = vector.broadcast %cst_287 : f32 to vector<6x32xf32>
    %1438 = arith.addf %1437, %1436 : vector<6x32xf32>
    %1439 = arith.divf %1437, %1438 : vector<6x32xf32>
    %1440 = vector.extract_strided_slice %1422 {offsets = [0, 64], sizes = [6, 32], strides = [1, 1]} : vector<6x96xf32> to vector<6x32xf32>
    %1441 = vector.extract_strided_slice %1423 {offsets = [0, 64], sizes = [6, 32], strides = [1, 1]} : vector<6x96xf32> to vector<6x32xf32>
    %1442 = arith.mulf %1439, %1441 : vector<6x32xf32>
    %1443 = arith.addf %1440, %1442 : vector<6x32xf32>
    %1444 = math.tanh %1443 : vector<6x32xf32>
    %cst_288 = arith.constant 1.000000e+00 : f32
    %1445 = vector.broadcast %cst_288 : f32 to vector<6x32xf32>
    %1446 = arith.subf %1445, %1431 : vector<6x32xf32>
    %1447 = arith.mulf %1446, %1444 : vector<6x32xf32>
    %1448 = arith.mulf %1431, %1420 : vector<6x32xf32>
    %1449 = arith.addf %1447, %1448 : vector<6x32xf32>
    %1450 = arith.addf %1421, %1449 : vector<6x32xf32>
    %1451 = vector.extract_strided_slice %1245 {offsets = [42, 0], sizes = [6, 96], strides = [1, 1]} : vector<48x96xf32> to vector<6x96xf32>
    %cst_289 = arith.constant dense<0.000000e+00> : vector<6x96xf32>
    %1452 = tpu.matmul %1449, %1241, %cst_289 {dimension_numbers = #tpu.dot_dimension_numbers<[1], [0], [0], [1], [0, 0, 1, 1], [], []>} : vector<6x32xf32>, vector<32x96xf32>, vector<6x96xf32> -> vector<6x96xf32>
    %1453 = vector.extract_strided_slice %1451 {offsets = [0, 0], sizes = [6, 32], strides = [1, 1]} : vector<6x96xf32> to vector<6x32xf32>
    %1454 = vector.extract_strided_slice %1452 {offsets = [0, 0], sizes = [6, 32], strides = [1, 1]} : vector<6x96xf32> to vector<6x32xf32>
    %1455 = arith.addf %1453, %1454 : vector<6x32xf32>
    %1456 = arith.negf %1455 : vector<6x32xf32>
    %1457 = math.exp %1456 : vector<6x32xf32>
    %cst_290 = arith.constant 1.000000e+00 : f32
    %1458 = vector.broadcast %cst_290 : f32 to vector<6x32xf32>
    %1459 = arith.addf %1458, %1457 : vector<6x32xf32>
    %1460 = arith.divf %1458, %1459 : vector<6x32xf32>
    %1461 = vector.extract_strided_slice %1451 {offsets = [0, 32], sizes = [6, 32], strides = [1, 1]} : vector<6x96xf32> to vector<6x32xf32>
    %1462 = vector.extract_strided_slice %1452 {offsets = [0, 32], sizes = [6, 32], strides = [1, 1]} : vector<6x96xf32> to vector<6x32xf32>
    %1463 = arith.addf %1461, %1462 : vector<6x32xf32>
    %1464 = arith.negf %1463 : vector<6x32xf32>
    %1465 = math.exp %1464 : vector<6x32xf32>
    %cst_291 = arith.constant 1.000000e+00 : f32
    %1466 = vector.broadcast %cst_291 : f32 to vector<6x32xf32>
    %1467 = arith.addf %1466, %1465 : vector<6x32xf32>
    %1468 = arith.divf %1466, %1467 : vector<6x32xf32>
    %1469 = vector.extract_strided_slice %1451 {offsets = [0, 64], sizes = [6, 32], strides = [1, 1]} : vector<6x96xf32> to vector<6x32xf32>
    %1470 = vector.extract_strided_slice %1452 {offsets = [0, 64], sizes = [6, 32], strides = [1, 1]} : vector<6x96xf32> to vector<6x32xf32>
    %1471 = arith.mulf %1468, %1470 : vector<6x32xf32>
    %1472 = arith.addf %1469, %1471 : vector<6x32xf32>
    %1473 = math.tanh %1472 : vector<6x32xf32>
    %cst_292 = arith.constant 1.000000e+00 : f32
    %1474 = vector.broadcast %cst_292 : f32 to vector<6x32xf32>
    %1475 = arith.subf %1474, %1460 : vector<6x32xf32>
    %1476 = arith.mulf %1475, %1473 : vector<6x32xf32>
    %1477 = arith.mulf %1460, %1449 : vector<6x32xf32>
    %1478 = arith.addf %1476, %1477 : vector<6x32xf32>
    %1479 = arith.addf %1450, %1478 : vector<6x32xf32>
    %cst_293 = arith.constant 1.250000e-01 : f32
    %1480 = vector.broadcast %cst_293 : f32 to vector<6x32xf32>
    %1481 = arith.mulf %1479, %1480 : vector<6x32xf32>
    %c0_294 = arith.constant 0 : index
    %c0_295 = arith.constant 0 : index
    %1482 = vector.load %arg3[%c0_294, %c0_295] : memref<4x56xf32, #tpu.memory_space<vmem>>, vector<4x56xf32>
    %c0_296 = arith.constant 0 : index
    %c0_297 = arith.constant 0 : index
    %1483 = vector.load %arg23[%c0_296, %c0_297] : memref<56x32xf32, #tpu.memory_space<vmem>>, vector<56x32xf32>
    %cst_298 = arith.constant dense<0.000000e+00> : vector<4x32xf32>
    %1484 = tpu.matmul %1482, %1483, %cst_298 {dimension_numbers = #tpu.dot_dimension_numbers<[1], [0], [0], [1], [0, 0, 1, 1], [], []>} : vector<4x56xf32>, vector<56x32xf32>, vector<4x32xf32> -> vector<4x32xf32>
    %c0_299 = arith.constant 0 : index
    %c0_300 = arith.constant 0 : index
    %1485 = vector.load %arg4[%c0_299, %c0_300] : memref<6x56xf32, #tpu.memory_space<vmem>>, vector<6x56xf32>
    %c0_301 = arith.constant 0 : index
    %c0_302 = arith.constant 0 : index
    %1486 = vector.load %arg24[%c0_301, %c0_302] : memref<56x32xf32, #tpu.memory_space<vmem>>, vector<56x32xf32>
    %cst_303 = arith.constant dense<0.000000e+00> : vector<6x32xf32>
    %1487 = tpu.matmul %1485, %1486, %cst_303 {dimension_numbers = #tpu.dot_dimension_numbers<[1], [0], [0], [1], [0, 0, 1, 1], [], []>} : vector<6x56xf32>, vector<56x32xf32>, vector<6x32xf32> -> vector<6x32xf32>
    %1488 = tpu.transpose %1487, [1, 0] : vector<6x32xf32> -> vector<32x6xf32>
    %cst_304 = arith.constant dense<0.000000e+00> : vector<4x6xf32>
    %1489 = tpu.matmul %1484, %1488, %cst_304 {dimension_numbers = #tpu.dot_dimension_numbers<[1], [0], [0], [1], [0, 0, 1, 1], [], []>} : vector<4x32xf32>, vector<32x6xf32>, vector<4x6xf32> -> vector<4x6xf32>
    %cst_305 = arith.constant 0.176776692 : f32
    %1490 = vector.broadcast %cst_305 : f32 to vector<4x6xf32>
    %1491 = arith.mulf %1489, %1490 : vector<4x6xf32>
    %cst_306 = arith.constant dense<0xFF800000> : vector<4xf32>
    %1492 = vector.multi_reduction <maximumf>, %1491, %cst_306 [1] : vector<4x6xf32> to vector<4xf32>
    %1493 = vector.shape_cast %1492 : vector<4xf32> to vector<4x1xf32>
    %1494 = vector.broadcast %1493 : vector<4x1xf32> to vector<4x6xf32>
    %1495 = arith.subf %1491, %1494 : vector<4x6xf32>
    %1496 = math.exp %1495 : vector<4x6xf32>
    %cst_307 = arith.constant dense<0.000000e+00> : vector<4xf32>
    %1497 = vector.multi_reduction <add>, %1496, %cst_307 [1] : vector<4x6xf32> to vector<4xf32>
    %1498 = vector.shape_cast %1497 : vector<4xf32> to vector<4x1xf32>
    %1499 = tpu.reciprocal %1498 {approx = true} : vector<4x1xf32> -> vector<4x1xf32>
    %1500 = vector.broadcast %1499 : vector<4x1xf32> to vector<4x6xf32>
    %1501 = arith.mulf %1496, %1500 : vector<4x6xf32>
    %cst_308 = arith.constant dense<0.000000e+00> : vector<4x32xf32>
    %1502 = tpu.matmul %1501, %1481, %cst_308 {dimension_numbers = #tpu.dot_dimension_numbers<[1], [0], [0], [1], [0, 0, 1, 1], [], []>} : vector<4x6xf32>, vector<6x32xf32>, vector<4x32xf32> -> vector<4x32xf32>
    %c0_309 = arith.constant 0 : index
    %c0_310 = arith.constant 0 : index
    %1503 = vector.load %arg28[%c0_309, %c0_310] : memref<32x32xf32, #tpu.memory_space<vmem>>, vector<32x32xf32>
    %cst_311 = arith.constant dense<0.000000e+00> : vector<4x32xf32>
    %1504 = tpu.matmul %1238, %1503, %cst_311 {dimension_numbers = #tpu.dot_dimension_numbers<[1], [0], [0], [1], [0, 0, 1, 1], [], []>} : vector<4x32xf32>, vector<32x32xf32>, vector<4x32xf32> -> vector<4x32xf32>
    %c0_312 = arith.constant 0 : index
    %c0_313 = arith.constant 0 : index
    %1505 = vector.load %arg30[%c0_312, %c0_313] : memref<32x32xf32, #tpu.memory_space<vmem>>, vector<32x32xf32>
    %cst_314 = arith.constant dense<0.000000e+00> : vector<4x32xf32>
    %1506 = tpu.matmul %1502, %1505, %cst_314 {dimension_numbers = #tpu.dot_dimension_numbers<[1], [0], [0], [1], [0, 0, 1, 1], [], []>} : vector<4x32xf32>, vector<32x32xf32>, vector<4x32xf32> -> vector<4x32xf32>
    %1507 = arith.addf %1504, %1506 : vector<4x32xf32>
    %c0_315 = arith.constant 0 : index
    %c0_316 = arith.constant 0 : index
    %1508 = vector.load %arg31[%c0_315, %c0_316] : memref<1x32xf32, #tpu.memory_space<vmem>>, vector<1x32xf32>
    %1509 = vector.broadcast %1508 : vector<1x32xf32> to vector<4x32xf32>
    %1510 = arith.addf %1507, %1509 : vector<4x32xf32>
    %c0_317 = arith.constant 0 : index
    %c0_318 = arith.constant 0 : index
    %1511 = vector.load %arg2[%c0_317, %c0_318] : memref<1x16xf32, #tpu.memory_space<vmem>>, vector<1x16xf32>
    %1512 = arith.mulf %277, %1511 : vector<1x16xf32>
    %1513 = arith.addf %258, %1512 : vector<1x16xf32>
    %c0_319 = arith.constant 0 : index
    %c0_320 = arith.constant 0 : index
    %1514 = vector.load %arg29[%c0_319, %c0_320] : memref<16x32xf32, #tpu.memory_space<vmem>>, vector<16x32xf32>
    %cst_321 = arith.constant dense<0.000000e+00> : vector<1x32xf32>
    %1515 = tpu.matmul %1513, %1514, %cst_321 {dimension_numbers = #tpu.dot_dimension_numbers<[1], [0], [0], [1], [0, 0, 1, 1], [], []>} : vector<1x16xf32>, vector<16x32xf32>, vector<1x32xf32> -> vector<1x32xf32>
    %1516 = vector.broadcast %1515 : vector<1x32xf32> to vector<4x32xf32>
    %1517 = arith.addf %1510, %1516 : vector<4x32xf32>
    %1518 = math.tanh %1517 : vector<4x32xf32>
    %c0_322 = arith.constant 0 : index
    %c0_323 = arith.constant 0 : index
    %1519 = vector.load %arg32[%c0_322, %c0_323] : memref<39x128xf32, #tpu.memory_space<vmem>>, vector<39x128xf32>
    %c0_324 = arith.constant 0 : index
    %c0_325 = arith.constant 0 : index
    %1520 = vector.load %arg33[%c0_324, %c0_325] : memref<1x128xf32, #tpu.memory_space<vmem>>, vector<1x128xf32>
    %c0_326 = arith.constant 0 : index
    %c0_327 = arith.constant 0 : index
    %1521 = vector.load %arg34[%c0_326, %c0_327] : memref<32x14xf32, #tpu.memory_space<vmem>>, vector<32x14xf32>
    %c0_328 = arith.constant 0 : index
    %c0_329 = arith.constant 0 : index
    %1522 = vector.load %arg35[%c0_328, %c0_329] : memref<1x14xf32, #tpu.memory_space<vmem>>, vector<1x14xf32>
    %1523 = vector.shape_cast %1520 : vector<1x128xf32> to vector<1x128xf32>
    %1524 = vector.broadcast %1523 : vector<1x128xf32> to vector<4x128xf32>
    %1525 = vector.shape_cast %1522 : vector<1x14xf32> to vector<1x14xf32>
    %1526 = vector.broadcast %1525 : vector<1x14xf32> to vector<4x14xf32>
    %1527 = tpu.concatenate %2, %1518 in 1 : vector<4x7xf32>, vector<4x32xf32> -> vector<4x39xf32>
    %cst_330 = arith.constant dense<0.000000e+00> : vector<4x128xf32>
    %1528 = tpu.matmul %1527, %1519, %cst_330 {dimension_numbers = #tpu.dot_dimension_numbers<[1], [0], [0], [1], [0, 0, 1, 1], [], []>} : vector<4x39xf32>, vector<39x128xf32>, vector<4x128xf32> -> vector<4x128xf32>
    %1529 = arith.addf %1528, %1524 : vector<4x128xf32>
    %1530 = vector.extract_strided_slice %1529 {offsets = [0, 0], sizes = [4, 32], strides = [1, 1]} : vector<4x128xf32> to vector<4x32xf32>
    %1531 = arith.negf %1530 : vector<4x32xf32>
    %1532 = math.exp %1531 : vector<4x32xf32>
    %cst_331 = arith.constant 1.000000e+00 : f32
    %1533 = vector.broadcast %cst_331 : f32 to vector<4x32xf32>
    %1534 = arith.addf %1533, %1532 : vector<4x32xf32>
    %1535 = arith.divf %1533, %1534 : vector<4x32xf32>
    %1536 = vector.extract_strided_slice %1529 {offsets = [0, 32], sizes = [4, 32], strides = [1, 1]} : vector<4x128xf32> to vector<4x32xf32>
    %1537 = arith.negf %1536 : vector<4x32xf32>
    %1538 = math.exp %1537 : vector<4x32xf32>
    %cst_332 = arith.constant 1.000000e+00 : f32
    %1539 = vector.broadcast %cst_332 : f32 to vector<4x32xf32>
    %1540 = arith.addf %1539, %1538 : vector<4x32xf32>
    %1541 = arith.divf %1539, %1540 : vector<4x32xf32>
    %1542 = vector.extract_strided_slice %1529 {offsets = [0, 64], sizes = [4, 32], strides = [1, 1]} : vector<4x128xf32> to vector<4x32xf32>
    %1543 = vector.extract_strided_slice %1529 {offsets = [0, 96], sizes = [4, 32], strides = [1, 1]} : vector<4x128xf32> to vector<4x32xf32>
    %1544 = arith.mulf %1541, %1543 : vector<4x32xf32>
    %1545 = arith.addf %1542, %1544 : vector<4x32xf32>
    %1546 = math.tanh %1545 : vector<4x32xf32>
    %cst_333 = arith.constant 1.000000e+00 : f32
    %1547 = vector.broadcast %cst_333 : f32 to vector<4x32xf32>
    %1548 = arith.subf %1547, %1535 : vector<4x32xf32>
    %1549 = arith.mulf %1548, %1546 : vector<4x32xf32>
    %1550 = arith.mulf %1535, %1518 : vector<4x32xf32>
    %1551 = arith.addf %1549, %1550 : vector<4x32xf32>
    %cst_334 = arith.constant dense<0.000000e+00> : vector<4x14xf32>
    %1552 = tpu.matmul %1551, %1521, %cst_334 {dimension_numbers = #tpu.dot_dimension_numbers<[1], [0], [0], [1], [0, 0, 1, 1], [], []>} : vector<4x32xf32>, vector<32x14xf32>, vector<4x14xf32> -> vector<4x14xf32>
    %1553 = arith.addf %1552, %1526 : vector<4x14xf32>
    %1554 = vector.extract_strided_slice %1553 {offsets = [0, 0], sizes = [4, 7], strides = [1, 1]} : vector<4x14xf32> to vector<4x7xf32>
    %1555 = tpu.concatenate %1554, %1551 in 1 : vector<4x7xf32>, vector<4x32xf32> -> vector<4x39xf32>
    %cst_335 = arith.constant dense<0.000000e+00> : vector<4x128xf32>
    %1556 = tpu.matmul %1555, %1519, %cst_335 {dimension_numbers = #tpu.dot_dimension_numbers<[1], [0], [0], [1], [0, 0, 1, 1], [], []>} : vector<4x39xf32>, vector<39x128xf32>, vector<4x128xf32> -> vector<4x128xf32>
    %1557 = arith.addf %1556, %1524 : vector<4x128xf32>
    %1558 = vector.extract_strided_slice %1557 {offsets = [0, 0], sizes = [4, 32], strides = [1, 1]} : vector<4x128xf32> to vector<4x32xf32>
    %1559 = arith.negf %1558 : vector<4x32xf32>
    %1560 = math.exp %1559 : vector<4x32xf32>
    %cst_336 = arith.constant 1.000000e+00 : f32
    %1561 = vector.broadcast %cst_336 : f32 to vector<4x32xf32>
    %1562 = arith.addf %1561, %1560 : vector<4x32xf32>
    %1563 = arith.divf %1561, %1562 : vector<4x32xf32>
    %1564 = vector.extract_strided_slice %1557 {offsets = [0, 32], sizes = [4, 32], strides = [1, 1]} : vector<4x128xf32> to vector<4x32xf32>
    %1565 = arith.negf %1564 : vector<4x32xf32>
    %1566 = math.exp %1565 : vector<4x32xf32>
    %cst_337 = arith.constant 1.000000e+00 : f32
    %1567 = vector.broadcast %cst_337 : f32 to vector<4x32xf32>
    %1568 = arith.addf %1567, %1566 : vector<4x32xf32>
    %1569 = arith.divf %1567, %1568 : vector<4x32xf32>
    %1570 = vector.extract_strided_slice %1557 {offsets = [0, 64], sizes = [4, 32], strides = [1, 1]} : vector<4x128xf32> to vector<4x32xf32>
    %1571 = vector.extract_strided_slice %1557 {offsets = [0, 96], sizes = [4, 32], strides = [1, 1]} : vector<4x128xf32> to vector<4x32xf32>
    %1572 = arith.mulf %1569, %1571 : vector<4x32xf32>
    %1573 = arith.addf %1570, %1572 : vector<4x32xf32>
    %1574 = math.tanh %1573 : vector<4x32xf32>
    %cst_338 = arith.constant 1.000000e+00 : f32
    %1575 = vector.broadcast %cst_338 : f32 to vector<4x32xf32>
    %1576 = arith.subf %1575, %1563 : vector<4x32xf32>
    %1577 = arith.mulf %1576, %1574 : vector<4x32xf32>
    %1578 = arith.mulf %1563, %1551 : vector<4x32xf32>
    %1579 = arith.addf %1577, %1578 : vector<4x32xf32>
    %cst_339 = arith.constant dense<0.000000e+00> : vector<4x14xf32>
    %1580 = tpu.matmul %1579, %1521, %cst_339 {dimension_numbers = #tpu.dot_dimension_numbers<[1], [0], [0], [1], [0, 0, 1, 1], [], []>} : vector<4x32xf32>, vector<32x14xf32>, vector<4x14xf32> -> vector<4x14xf32>
    %1581 = arith.addf %1580, %1526 : vector<4x14xf32>
    %1582 = vector.extract_strided_slice %1581 {offsets = [0, 0], sizes = [4, 7], strides = [1, 1]} : vector<4x14xf32> to vector<4x7xf32>
    %1583 = tpu.concatenate %1582, %1579 in 1 : vector<4x7xf32>, vector<4x32xf32> -> vector<4x39xf32>
    %cst_340 = arith.constant dense<0.000000e+00> : vector<4x128xf32>
    %1584 = tpu.matmul %1583, %1519, %cst_340 {dimension_numbers = #tpu.dot_dimension_numbers<[1], [0], [0], [1], [0, 0, 1, 1], [], []>} : vector<4x39xf32>, vector<39x128xf32>, vector<4x128xf32> -> vector<4x128xf32>
    %1585 = arith.addf %1584, %1524 : vector<4x128xf32>
    %1586 = vector.extract_strided_slice %1585 {offsets = [0, 0], sizes = [4, 32], strides = [1, 1]} : vector<4x128xf32> to vector<4x32xf32>
    %1587 = arith.negf %1586 : vector<4x32xf32>
    %1588 = math.exp %1587 : vector<4x32xf32>
    %cst_341 = arith.constant 1.000000e+00 : f32
    %1589 = vector.broadcast %cst_341 : f32 to vector<4x32xf32>
    %1590 = arith.addf %1589, %1588 : vector<4x32xf32>
    %1591 = arith.divf %1589, %1590 : vector<4x32xf32>
    %1592 = vector.extract_strided_slice %1585 {offsets = [0, 32], sizes = [4, 32], strides = [1, 1]} : vector<4x128xf32> to vector<4x32xf32>
    %1593 = arith.negf %1592 : vector<4x32xf32>
    %1594 = math.exp %1593 : vector<4x32xf32>
    %cst_342 = arith.constant 1.000000e+00 : f32
    %1595 = vector.broadcast %cst_342 : f32 to vector<4x32xf32>
    %1596 = arith.addf %1595, %1594 : vector<4x32xf32>
    %1597 = arith.divf %1595, %1596 : vector<4x32xf32>
    %1598 = vector.extract_strided_slice %1585 {offsets = [0, 64], sizes = [4, 32], strides = [1, 1]} : vector<4x128xf32> to vector<4x32xf32>
    %1599 = vector.extract_strided_slice %1585 {offsets = [0, 96], sizes = [4, 32], strides = [1, 1]} : vector<4x128xf32> to vector<4x32xf32>
    %1600 = arith.mulf %1597, %1599 : vector<4x32xf32>
    %1601 = arith.addf %1598, %1600 : vector<4x32xf32>
    %1602 = math.tanh %1601 : vector<4x32xf32>
    %cst_343 = arith.constant 1.000000e+00 : f32
    %1603 = vector.broadcast %cst_343 : f32 to vector<4x32xf32>
    %1604 = arith.subf %1603, %1591 : vector<4x32xf32>
    %1605 = arith.mulf %1604, %1602 : vector<4x32xf32>
    %1606 = arith.mulf %1591, %1579 : vector<4x32xf32>
    %1607 = arith.addf %1605, %1606 : vector<4x32xf32>
    %cst_344 = arith.constant dense<0.000000e+00> : vector<4x14xf32>
    %1608 = tpu.matmul %1607, %1521, %cst_344 {dimension_numbers = #tpu.dot_dimension_numbers<[1], [0], [0], [1], [0, 0, 1, 1], [], []>} : vector<4x32xf32>, vector<32x14xf32>, vector<4x14xf32> -> vector<4x14xf32>
    %1609 = arith.addf %1608, %1526 : vector<4x14xf32>
    %1610 = vector.extract_strided_slice %1609 {offsets = [0, 0], sizes = [4, 7], strides = [1, 1]} : vector<4x14xf32> to vector<4x7xf32>
    %1611 = tpu.concatenate %1610, %1607 in 1 : vector<4x7xf32>, vector<4x32xf32> -> vector<4x39xf32>
    %cst_345 = arith.constant dense<0.000000e+00> : vector<4x128xf32>
    %1612 = tpu.matmul %1611, %1519, %cst_345 {dimension_numbers = #tpu.dot_dimension_numbers<[1], [0], [0], [1], [0, 0, 1, 1], [], []>} : vector<4x39xf32>, vector<39x128xf32>, vector<4x128xf32> -> vector<4x128xf32>
    %1613 = arith.addf %1612, %1524 : vector<4x128xf32>
    %1614 = vector.extract_strided_slice %1613 {offsets = [0, 0], sizes = [4, 32], strides = [1, 1]} : vector<4x128xf32> to vector<4x32xf32>
    %1615 = arith.negf %1614 : vector<4x32xf32>
    %1616 = math.exp %1615 : vector<4x32xf32>
    %cst_346 = arith.constant 1.000000e+00 : f32
    %1617 = vector.broadcast %cst_346 : f32 to vector<4x32xf32>
    %1618 = arith.addf %1617, %1616 : vector<4x32xf32>
    %1619 = arith.divf %1617, %1618 : vector<4x32xf32>
    %1620 = vector.extract_strided_slice %1613 {offsets = [0, 32], sizes = [4, 32], strides = [1, 1]} : vector<4x128xf32> to vector<4x32xf32>
    %1621 = arith.negf %1620 : vector<4x32xf32>
    %1622 = math.exp %1621 : vector<4x32xf32>
    %cst_347 = arith.constant 1.000000e+00 : f32
    %1623 = vector.broadcast %cst_347 : f32 to vector<4x32xf32>
    %1624 = arith.addf %1623, %1622 : vector<4x32xf32>
    %1625 = arith.divf %1623, %1624 : vector<4x32xf32>
    %1626 = vector.extract_strided_slice %1613 {offsets = [0, 64], sizes = [4, 32], strides = [1, 1]} : vector<4x128xf32> to vector<4x32xf32>
    %1627 = vector.extract_strided_slice %1613 {offsets = [0, 96], sizes = [4, 32], strides = [1, 1]} : vector<4x128xf32> to vector<4x32xf32>
    %1628 = arith.mulf %1625, %1627 : vector<4x32xf32>
    %1629 = arith.addf %1626, %1628 : vector<4x32xf32>
    %1630 = math.tanh %1629 : vector<4x32xf32>
    %cst_348 = arith.constant 1.000000e+00 : f32
    %1631 = vector.broadcast %cst_348 : f32 to vector<4x32xf32>
    %1632 = arith.subf %1631, %1619 : vector<4x32xf32>
    %1633 = arith.mulf %1632, %1630 : vector<4x32xf32>
    %1634 = arith.mulf %1619, %1607 : vector<4x32xf32>
    %1635 = arith.addf %1633, %1634 : vector<4x32xf32>
    %cst_349 = arith.constant dense<0.000000e+00> : vector<4x14xf32>
    %1636 = tpu.matmul %1635, %1521, %cst_349 {dimension_numbers = #tpu.dot_dimension_numbers<[1], [0], [0], [1], [0, 0, 1, 1], [], []>} : vector<4x32xf32>, vector<32x14xf32>, vector<4x14xf32> -> vector<4x14xf32>
    %1637 = arith.addf %1636, %1526 : vector<4x14xf32>
    %1638 = tpu.concatenate %1553, %1581, %1609, %1637 in 0 : vector<4x14xf32>, vector<4x14xf32>, vector<4x14xf32>, vector<4x14xf32> -> vector<16x14xf32>
    %1639 = vector.extract_strided_slice %1638 {offsets = [0, 0], sizes = [16, 7], strides = [1, 1]} : vector<16x14xf32> to vector<16x7xf32>
    %1640 = vector.extract_strided_slice %1638 {offsets = [0, 7], sizes = [16, 7], strides = [1, 1]} : vector<16x14xf32> to vector<16x7xf32>
    %cst_350 = arith.constant 0.000000e+00 : f32
    %1641 = vector.broadcast %cst_350 : f32 to vector<16x7xf32>
    %1642 = arith.maximumf %1640, %1641 : vector<16x7xf32>
    %1643 = vector.broadcast %cst_350 : f32 to vector<16x7xf32>
    %1644 = arith.subf %1640, %1643 : vector<16x7xf32>
    %1645 = arith.cmpf one, %1644, %1644 : vector<16x7xf32>
    %1646 = vector.broadcast %cst_350 : f32 to vector<16x7xf32>
    %1647 = arith.addf %1640, %1646 : vector<16x7xf32>
    %1648 = math.absf %1644 : vector<16x7xf32>
    %cst_351 = arith.constant 0.000000e+00 : f32
    %1649 = vector.broadcast %cst_351 : f32 to vector<16x7xf32>
    %1650 = arith.subf %1649, %1648 : vector<16x7xf32>
    %1651 = math.exp %1650 : vector<16x7xf32>
    %1652 = math.log1p %1651 : vector<16x7xf32>
    %1653 = arith.addf %1642, %1652 : vector<16x7xf32>
    %1654 = arith.select %1645, %1647, %1653 : vector<16x7xi1>, vector<16x7xf32>
    %cst_352 = arith.constant 0.899999976 : f32
    %1655 = vector.broadcast %cst_352 : f32 to vector<16x7xf32>
    %1656 = arith.mulf %1655, %1654 : vector<16x7xf32>
    %cst_353 = arith.constant 1.000000e-01 : f32
    %1657 = vector.broadcast %cst_353 : f32 to vector<16x7xf32>
    %1658 = arith.addf %1657, %1656 : vector<16x7xf32>
    %1659 = vector.extract_strided_slice %1639 {offsets = [0, 0], sizes = [16, 4], strides = [1, 1]} : vector<16x7xf32> to vector<16x4xf32>
    %1660 = arith.mulf %1659, %1659 : vector<16x4xf32>
    %cst_354 = arith.constant dense<0.000000e+00> : vector<16xf32>
    %1661 = vector.multi_reduction <add>, %1660, %cst_354 [1] : vector<16x4xf32> to vector<16xf32>
    %1662 = vector.shape_cast %1661 : vector<16xf32> to vector<16x1xf32>
    %1663 = math.sqrt %1662 : vector<16x1xf32>
    %1664 = tpu.iota {dimensions = array<i32: 1>} : vector<16x7xi32>
    %c4_i32_355 = arith.constant 4 : i32
    %1665 = vector.broadcast %c4_i32_355 : i32 to vector<16x7xi32>
    %1666 = arith.cmpi slt, %1664, %1665 : vector<16x7xi32>
    %cst_356 = arith.constant 1.000000e+00 : f32
    %1667 = vector.shape_cast %1663 : vector<16x1xf32> to vector<16x1xf32>
    %1668 = vector.broadcast %1667 : vector<16x1xf32> to vector<16x7xf32>
    %1669 = vector.broadcast %cst_356 : f32 to vector<16x7xf32>
    %1670 = arith.select %1666, %1668, %1669 : vector<16x7xi1>, vector<16x7xf32>
    %1671 = arith.divf %1639, %1670 : vector<16x7xf32>
    %1672 = arith.divf %1658, %1670 : vector<16x7xf32>
    %c0_357 = arith.constant 0 : index
    %c0_358 = arith.constant 0 : index
    %c0_359 = arith.constant 0 : index
    %1673 = vector.load %arg39[%c0_357, %c0_358, %c0_359] : memref<1x16x7xf32, #tpu.memory_space<vmem>>, vector<1x16x7xf32>
    %1674 = vector.shape_cast %1673 : vector<1x16x7xf32> to vector<16x7xf32>
    %1675 = vector.shape_cast %1671 : vector<16x7xf32> to vector<1x16x7xf32>
    tpu.vector_store %arg39[%c0_357, %c0_358, %c0_359], %1675 {strides = array<i32>} : memref<1x16x7xf32, #tpu.memory_space<vmem>>, vector<1x16x7xf32>,
    %c0_360 = arith.constant 0 : index
    %c0_361 = arith.constant 0 : index
    %c0_362 = arith.constant 0 : index
    %1676 = vector.load %arg40[%c0_360, %c0_361, %c0_362] : memref<1x16x7xf32, #tpu.memory_space<vmem>>, vector<1x16x7xf32>
    %1677 = vector.shape_cast %1676 : vector<1x16x7xf32> to vector<16x7xf32>
    %1678 = vector.shape_cast %1672 : vector<16x7xf32> to vector<1x16x7xf32>
    tpu.vector_store %arg40[%c0_360, %c0_361, %c0_362], %1678 {strides = array<i32>} : memref<1x16x7xf32, #tpu.memory_space<vmem>>, vector<1x16x7xf32>,
    return
  }
}

</mosaic_0001>

<bundles_post_ra>
// kernel: social_process_forward.1
= control target key start
LH: loop header
LB: loop body
LE: loop exit
PB: predicated region body
PF: predicated region fallthrough
CT: control target
= control target key end

     0   :  { %s10813_s6 = smov 1   ;;  %s10814_s10 = smov 2   ;;  %s12430_s0 = inlined_call_operand.smem [shape: u32[42], index: -1, kind: input, shape index: {}] }
   0x1   :  { %s10879_s5 = sld [smem:[%s12430_s0]]   ;;  %s10815_s14 = smov 3  }
   0x2   :  { %s10884_s9 = sld [smem:[%s12430_s0 + %s10813_s6]]   ;;  %s10816_s18 = smov 4  }
   0x3   :  { %s10889_s13 = sld [smem:[%s12430_s0 + %s10814_s10]]   ;;  %s10817_s22 = smov 5  }
   0x4   :  { %s10894_s17 = sld [smem:[%s12430_s0 + %s10815_s14]]   ;;  %s10818_s26 = smov 6  }
   0x5   :  { %s10899_s21 = sld [smem:[%s12430_s0 + %s10816_s18]]   ;;  %s10819_s30 = smov 7  }
   0x6   :  { %s10904_s25 = sld [smem:[%s12430_s0 + %s10817_s22]]   ;;  %s10820_s4 = smov 8  }
   0x7   :  { %s10909_s29 = sld [smem:[%s12430_s0 + %s10818_s26]]   ;;  %s10821_s10 = smov 9  }
   0x8   :  { %s10914_s3 = sld [smem:[%s12430_s0 + %s10819_s30]]   ;;  %s10822_s15 = smov 10  }
   0x9   :  { %12446 = sst [smem:[#allocation13_spill]] %s10889_s13  ;;  %s10823_s20 = smov 11  }
   0xa   :  { %12447 = sst [smem:[#allocation14_spill]] %s10894_s17  ;;  %s10824_s26 = smov 12  }
   0xb   :  { %12448 = sst [smem:[#allocation15_spill]] %s10899_s21  ;;  %s10825_s1 = smov 13  }
   0xc   :  { %s10919_s8 = sld [smem:[%s12430_s0 + %s10820_s4]]   ;;  %s10826_s7 = smov 14  }
   0xd   :  { %s10924_s14 = sld [smem:[%s12430_s0 + %s10821_s10]]   ;;  %s10828_s22 = smov 16  }
   0xe   :  { %s10929_s19 = sld [smem:[%s12430_s0 + %s10822_s15]]   ;;  %s10827_s15 = smov 15  }
   0xf   :  { %s10934_s24 = sld [smem:[%s12430_s0 + %s10823_s20]]   ;;  %s10829_s28 = smov 17  }
  0x10   :  { %s10939_s30 = sld [smem:[%s12430_s0 + %s10824_s26]]  }
  0x11   :  { %s10944_s6 = sld [smem:[%s12430_s0 + %s10825_s1]]  }
  0x12   :  { %s10949_s12 = sld [smem:[%s12430_s0 + %s10826_s7]]   ;;  %s10830_s7 = smov 18  }
  0x13   :  { %s10954_s20 = sld [smem:[%s12430_s0 + %s10827_s15]]   ;;  %s10831_s15 = smov 19  }
  0x14   :  { %s10959_s27 = sld [smem:[%s12430_s0 + %s10828_s22]]   ;;  %s10832_s22 = smov 20  }
  0x15   :  { %s10964_s4 = sld [smem:[%s12430_s0 + %s10829_s28]]   ;;  %s10833_s28 = smov 21  }
  0x16   :  { %12449 = sst [smem:[#allocation16_spill]] %s10939_s30 }
  0x17   :  { %s10969_s13 = sld [smem:[%s12430_s0 + %s10830_s7]]   ;;  %s10834_s7 = smov 22  }
  0x18   :  { %12450 = sst [smem:[#allocation17_spill]] %s10949_s12 }
  0x19   :  { %12451 = sst [smem:[#allocation18_spill]] %s10954_s20 }
  0x1a   :  { %12452 = sst [smem:[#allocation19_spill]] %s10959_s27 }
  0x1b   :  { %12453 = sst [smem:[#allocation20_spill]] %s10964_s4 }
  0x1c   :  { %s10974_s21 = sld [smem:[%s12430_s0 + %s10831_s15]]   ;;  %s10835_s15 = smov 23  }
  0x1d   :  { %12454 = sst [smem:[#allocation21_spill]] %s10969_s13 }
  0x1e   :  { %s10979_s17 = sld [smem:[%s12430_s0 + %s10832_s22]]   ;;  %s10836_s22 = smov 24  }
  0x1f   :  { %s10984_s4 = sld [smem:[%s12430_s0 + %s10833_s28]]   ;;  %s10837_s28 = smov 25  }
  0x20   :  { %s10989_s13 = sld [smem:[%s12430_s0 + %s10834_s7]]   ;;  %s10838_s7 = smov 26  }
  0x21   :  { %s10994_s27 = sld [smem:[%s12430_s0 + %s10835_s15]]   ;;  %s10839_s15 = smov 27  }
  0x22   :  { %s10999_s20 = sld [smem:[%s12430_s0 + %s10836_s22]]   ;;  %s10840_s22 = smov 28  }
  0x23   :  { %s11004_s12 = sld [smem:[%s12430_s0 + %s10837_s28]]   ;;  %s10841_s28 = smov 29  }
  0x24   :  { %s11009_s30 = sld [smem:[%s12430_s0 + %s10838_s7]]   ;;  %s10842_s7 = smov 30  }
  0x27   :  { %12455 = sst [smem:[#allocation22_spill]] %s10994_s27 }
  0x28   :  { %12456 = sst [smem:[#allocation23_spill]] %s10999_s20 }
  0x29   :  { %12457 = sst [smem:[#allocation24_spill]] %s11004_s12 }
  0x2a   :  { %12458 = sst [smem:[#allocation25_spill]] %s11009_s30 }
  0x2b   :  { %s11014_s27 = sld [smem:[%s12430_s0 + %s10839_s15]]   ;;  %s10843_s15 = smov 31  }
  0x2c   :  { %s11019_s20 = sld [smem:[%s12430_s0 + %s10840_s22]]   ;;  %s10844_s22 = smov 32  }
  0x2d   :  { %s11024_s12 = sld [smem:[%s12430_s0 + %s10841_s28]]   ;;  %s10845_s28 = smov 33  }
  0x2e   :  { %s11029_s30 = sld [smem:[%s12430_s0 + %s10842_s7]]   ;;  %s10846_s7 = smov 34  }
  0x31   :  { %12459 = sst [smem:[#allocation26_spill]] %s11014_s27 }
  0x32   :  { %12460 = sst [smem:[#allocation27_spill]] %s11019_s20 }
  0x33   :  { %12461 = sst [smem:[#allocation28_spill]] %s11024_s12 }
  0x34   :  { %12462 = sst [smem:[#allocation29_spill]] %s11029_s30 }
  0x35   :  { %s11034_s27 = sld [smem:[%s12430_s0 + %s10843_s15]]   ;;  %s10847_s15 = smov 35  }
  0x36   :  { %s11039_s20 = sld [smem:[%s12430_s0 + %s10844_s22]]   ;;  %s10848_s22 = smov 36  }
  0x37   :  { %s11044_s12 = sld [smem:[%s12430_s0 + %s10845_s28]]   ;;  %s10849_s28 = smov 37  }
  0x38   :  { %s11049_s30 = sld [smem:[%s12430_s0 + %s10846_s7]]   ;;  %s10850_s7 = smov 38  }
  0x3b   :  { %12463 = sst [smem:[#allocation30_spill]] %s11034_s27 }
  0x3c   :  { %12464 = sst [smem:[#allocation31_spill]] %s11039_s20 }
  0x3d   :  { %12465 = sst [smem:[#allocation32_spill]] %s11044_s12 }
  0x3e   :  { %12466 = sst [smem:[#allocation33_spill]] %s11049_s30 }
  0x3f   :  { %s11054_s27 = sld [smem:[%s12430_s0 + %s10847_s15]]   ;;  %s10851_s15 = smov 39  }
  0x40   :  { %s11059_s20 = sld [smem:[%s12430_s0 + %s10848_s22]]   ;;  %s10852_s22 = smov 40  }
  0x41   :  { %s11064_s12 = sld [smem:[%s12430_s0 + %s10849_s28]]   ;;  %s10853_s28 = smov 41  }
  0x42   :  { %s11069_s30 = sld [smem:[%s12430_s0 + %s10850_s7]]  }
  0x45   :  { %12467 = sst [smem:[#allocation34_spill]] %s11054_s27 }
  0x46   :  { %12468 = sst [smem:[#allocation35_spill]] %s11059_s20 }
  0x47   :  { %12469 = sst [smem:[#allocation36_spill]] %s11064_s12 }
  0x48   :  { %s11074_s27 = sld [smem:[%s12430_s0 + %s10851_s15]]  }
  0x49   :  { %s11079_s20 = sld [smem:[%s12430_s0 + %s10852_s22]]  }
  0x4a   :  { %s11084_s12 = sld [smem:[%s12430_s0 + %s10853_s28]]  }
  0x4b   :  { %89 = vsyncpa [#allocation3], 0 }
  0x4c   :  { %90 = vsyncpa [#allocation5], 0  ;;  %v175_v0 = vld [vmem:[%s10909_s29] sm:$0xff]  ;;  %v176_v1 = vld [vmem:[%s10909_s29 + $0x8] sm:$0xff]  ;;  %vm205_vm0 = vcmask 1046528   ;;  %v10854_v3 = vmov 0.0|0.0  }
  0x4d   :  { %v174_v2 = vld [vmem:[%s10904_s25] sm:$0x7f]  ;;  %9788 = vmatprep.subr.bf16.mxu1 %v10854_v3  ;;  %v11090_v4 = vpack.c.bf16 %v176_v1, %v175_v0  ;;  %vm186_vm1 = vcmask 56320   ;;  %v165_v6 = vld [vmem:[%s10879_s5 + $0x8] sm:$0xff]  ;;  %v177_v7 = vld [vmem:[%s10909_s29 + $0x10] sm:$0xff] }
  0x4e   :  { %8919 = vmatprep.subr.msk.mxu0 %vm205_vm0, %v174_v2  ;;  %v164_v5 = vld [vmem:[%s10879_s5] sm:$0xff]  ;;  %v178_v8 = vld [vmem:[%s10909_s29 + $0x18] sm:$0xff] }
  0x4f   :  { %8920 = vmatpush3.msk.msra.mxu0 %vm205_vm0, %v174_v2  ;;  %8921 = vmatprep.mubr.msk.f32.mxu0 %vm186_vm1, %v164_v5 }
  0x50   :  { %91 = vsyncpa [#allocation8], 0  ;;  %9790 = vmatpush3.bf16.msra.mxu1 %v11090_v4  ;;  %8922 = vmatmul.mubr.msk.f32.vlgmr.msra.gmra.mrb[0].mxu0 %vm186_vm1, %v165_v6  ;;  %v11101_v9 = vpack.c.bf16 %v178_v8, %v177_v7  ;;  %vm10855_vm2 = vmmov 0   ;;  %v10856_v10 = vmov 0.0   ;;  %s10857_s0 = smov 96   ;;  %s10858_s29 = smov 32  }
  0x51   :  { %9791 = vmatprep.subr.bf16.mxu1 %v10854_v3  ;;  %8938 = vmatprep.mubr.msk.f32.mxu1 %vm10855_vm2, %v10856_v10  ;;  %v11122_v15 = vld [vmem:[%s10914_s3] ss:$0 sm:$0xff]  ;;  %v166_v24 = vld [vmem:[%s10879_s5 + $0x10] sm:$0xff]  ;;  %v167_v25 = vld [vmem:[%s10879_s5 + $0x18] sm:$0xff]  ;;  %s10859_s7 = smov 64   ;;  %vm304_vm3 = vcmask 261120  }
  0x52   :  { %9794 = vmatprep.subr.bf16.mxu0 %v10854_v3  ;;  %v168_v26 = vld [vmem:[%s10879_s5 + $0x20] sm:$0xff]  ;;  %8924 = vmatprep.mubr.msk.f32.mxu0 %vm186_vm1, %v166_v24  ;;  %v169_v27 = vld [vmem:[%s10879_s5 + $0x28] sm:$0xff]  ;;  %vm532_vm4 = vcmask 1041408   ;;  %vm656_vm5 = vcmask 1045504   ;;  %vm668_vm6 = vcmask 1043456   ;;  %vm1256_vm7 = vcmask 259072  }
  0x53   :  { %9796 = vmatpush3.bf16.msra.mxu0 %v11090_v4  ;;  %vm1443_vm8 = vcmask 122880   ;;  %vm2403_vm9 = vcmask 318464   ;;  %s12478_s10 = sld [smem:[#allocation26_spill]]  ;;  %s12481_s11 = sld [smem:[#allocation23_spill]]  ;;  %vm6802_vm10 = vcmask 457728   ;;  %vm7034_vm11 = vcmask 44032  }
  0x54   :  { %9793 = vmatpush3.bf16.msra.mxu1 %v11101_v9  ;;  %9797 = vmatprep.subr.bf16.mxu0 %v10854_v3  ;;  %s12482_s15 = sld [smem:[#allocation15_spill]]  ;;  %s12483_s16 = sld [smem:[#allocation29_spill]]  ;;  %vm7046_vm12 = vcmask 48128   ;;  %vm7303_vm15 = vcmask 130048  }
  0x55   :  { %9800 = vmatprep.subr.bf16.mxu1 %v10854_v3  ;;  %8925 = vmatmul.mubr.msk.f32.gmra.mrb[2].mxu0 %vm186_vm1, %v167_v25  ;;  %s12484_s18 = sld [smem:[#allocation13_spill]]  ;;  %s10861_s22 = smov 16  }
  0x56   :  { %8927 = vmatprep.mubr.msk.f32.mxu0 %vm186_vm1, %v168_v26  ;;  %s12485_s23 = sld [smem:[#allocation27_spill]]  ;;  %s12486_s26 = sld [smem:[#allocation28_spill]] }
  0x57   :  { %8939 = vmatmul.mubr.f32.vlgmr.msra.gmra.mrb[0].mxu1 %v10856_v10  ;;  %9799 = vmatpush3.bf16.msra.mxu0 %v11101_v9  ;;  %s10862_s28 = smov 112   ;;  %s12487_s1 = sld [smem:[#allocation31_spill]] }
  0x58   :  { %9802 = vmatpush3.bf16.msra.mxu1 %v11090_v4  ;;  %8960 = vmatprep.mubr.msk.f32.mxu1 %vm10855_vm2, %v10856_v10  ;;  %s12488_s2 = sld [smem:[#allocation30_spill]] }
  0x59   :  { %9803 = vmatprep.subr.bf16.mxu1 %v10854_v3  ;;  %9806 = vmatprep.subr.bf16.mxu0 %v10854_v3 }
  0x5a   :  { %8928 = vmatmul.mubr.msk.f32.gmra.mrb[4].mxu0 %vm186_vm1, %v169_v27 }
  0x5b   :  { %8949 = vmatprep.mubr.msk.f32.mxu0 %vm10855_vm2, %v10856_v10 }
  0x5c   :  { %9805 = vmatpush3.bf16.msra.mxu1 %v11101_v9 }
  0x5d   :  { %9812 = vmatprep.subr.bf16.mxu1 %v10854_v3 }
 0x123   :  { %v8923_v11 = vpop.f32.mrb[0].mxu0 }
 0x124   :  { %v275_v12 = vpop.f32.mrb[1].mxu0  ;;  %v11161_v43 = vadd.f32 %v8923_v11, %v11122_v15 }
 0x125   :  { %v11125_v16 = vadd.f32 %v11122_v15, %v275_v12 }
 0x128   :  { %v11141_v31 = vpop.f32.mrb[2].mxu0 }
 0x129   :  { %v11143_v32 = vpop.f32.mrb[3].mxu0 }
 0x12a   :  { %v374_v13 = vpop.f32.mrb[0].mxu1  ;;  %v11184_v24 = vadd.f32 %v11122_v15, %v11143_v32 }
 0x12b   :  { %386 = vrot.lane.b32.xlu0 %v374_v13, %s10857_s0  ;;  %v8940_v14 = vpop.f32.mrb[1].mxu1  ;;  %v378_v17 = vadd.f32 %v374_v13, %v11125_v16 }
 0x12d   :  { %v8337_v18 = vmul.f32 -1.442695, %v378_v17  ;;  %v11145_v33 = vpop.f32.mrb[4].mxu0 }
 0x12e   :  { %v11147_v34 = vpop.f32.mrb[5].mxu0 }
 0x12f   :  { %10275 = vpow2.f32 %v8337_v18 }
 0x139   :  { %v10276_v19 = vpop.eup %10275 }
 0x13a   :  { %v382_v20 = vadd.f32 1.0, %v10276_v19 }
 0x13c   :  { %10277 = vrcp.f32 %v382_v20 }
 0x146   :  { %v10278_v21 = vpop.eup %10277 }
 0x147   :  { %v396_v35 = vsub.f32 1.0, %v10278_v21  ;;  %v402_v37 = vmul.f32 0.0, %v10278_v21 }
 0x19d   :  { %v387_v22 = vpop.permute.xlu0 %386 }
 0x19e   :  { %v389_v23 = vmul.f32 %v10278_v21, %v387_v22 }
 0x1a0   :  { %391 = vrot.lane.b32.xlu0 %v389_v23, %s10858_s29 }
 0x212   :  { %v392_v28 = vpop.permute.xlu0 %391 }
 0x213   :  { %v394_v29 = vadd.f32 %v392_v28, %v11125_v16 }
 0x215   :  { %10279 = vtanh.f32 %v394_v29 }
 0x21f   :  { %v10280_v30 = vpop.eup %10279 }
 0x220   :  { %398 = vrot.lane.b32.xlu1 %v10280_v30, %s10859_s7 }
 0x292   :  { %v399_v36 = vpop.permute.xlu1 %398 }
 0x293   :  { %v401_v38 = vmul.f32 %v399_v36, %v396_v35 }
 0x295   :  { %v11149_v39 = vadd.f32 %v402_v37, %v401_v38 }
 0x297   :  { %8950 = vmatmul.mubr.msk.f32.vlgmr.msra.gmra.mrb[6].mxu0 %vm304_vm3, %v11149_v39  ;;  %v524_v0 = vrot.slane %v11149_v39, 2 }
 0x298   :  { %9808 = vmatpush3.bf16.msra.mxu0 %v11090_v4  ;;  %8971 = vmatprep.mubr.msk.f32.mxu0 %vm10855_vm2, %v10856_v10 }
 0x299   :  { %9809 = vmatprep.subr.bf16.mxu0 %v10854_v3 }
 0x29c   :  { %9811 = vmatpush3.bf16.msra.mxu0 %v11101_v9 }
 0x29d   :  { %9818 = vmatprep.subr.bf16.mxu0 %v10854_v3 }
 0x36a   :  { %v474_v40 = vpop.f32.mrb[6].mxu0 }
 0x36b   :  { %v479_v41 = vrot.slane %v474_v40, 2  ;;  %v8951_v42 = vpop.f32.mrb[7].mxu0 }
 0x36d   :  { %495 = vrot.lane.b32.xlu1 %v479_v41, %s10857_s0  ;;  %v481_v44 = vadd.f32 %v479_v41, %v11125_v16  ;;  %v482_v45 = vadd.f32 %v479_v41, %v11161_v43 }
 0x36f   :  { %v8339_v46 = vmul.f32 -1.442695, %v481_v44  ;;  %v8340_v47 = vmul.f32 -1.442695, %v482_v45 }
 0x371   :  { %10281 = vpow2.f32 %v8339_v46 }
 0x372   :  { %10283 = vpow2.f32 %v8340_v47 }
 0x37b   :  { %v10282_v48 = vpop.eup %10281 }
 0x37c   :  { %v10284_v49 = vpop.eup %10283  ;;  %v489_v50 = vadd.f32 1.0, %v10282_v48 }
 0x37d   :  { %v490_v51 = vadd.f32 1.0, %v10284_v49 }
 0x37e   :  { %10285 = vrcp.f32 %v489_v50 }
 0x37f   :  { %10287 = vrcp.f32 %v490_v51 }
 0x388   :  { %v10286_v52 = vpop.eup %10285 }
 0x389   :  { %v10288_v53 = vpop.eup %10287  ;;  %v512_v2 = vsub.f32 1.0, %v10286_v52  ;;  %v526_v8 = vmul.f32 %v10286_v52, %v524_v0 }
 0x38a   :  { %v513_v63 = vsub.f32 1.0, %v10288_v53  ;;  %v527_v5 = vmul.f32 %v10288_v53, %v524_v0 }
 0x3df   :  { %v496_v54 = vpop.permute.xlu1 %495 }
 0x3e0   :  { %v498_v55 = vmul.f32 %v10286_v52, %v496_v54  ;;  %v499_v56 = vmul.f32 %v10288_v53, %v496_v54 }
 0x3e2   :  { %504 = vrot.lane.b32.xlu1 %v499_v56, %s10858_s29  ;;  %502 = vrot.lane.b32.xlu0 %v498_v55, %s10858_s29 }
 0x454   :  { %v505_v57 = vpop.permute.xlu1 %504  ;;  %v503_v58 = vpop.permute.xlu0 %502 }
 0x455   :  { %v509_v59 = vadd.f32 %v505_v57, %v11161_v43  ;;  %v508_v60 = vadd.f32 %v503_v58, %v11125_v16 }
 0x457   :  { %10289 = vtanh.f32 %v509_v59 }
 0x458   :  { %10291 = vtanh.f32 %v508_v60 }
 0x461   :  { %v10290_v61 = vpop.eup %10289 }
 0x462   :  { %v10292_v62 = vpop.eup %10291  ;;  %518 = vrot.lane.b32.xlu1 %v10290_v61, %s10859_s7 }
 0x463   :  { %516 = vrot.lane.b32.xlu0 %v10292_v62, %s10859_s7 }
 0x4d4   :  { %v519_v1 = vpop.permute.xlu1 %518 }
 0x4d5   :  { %v523_v6 = vmul.f32 %v519_v1, %v513_v63  ;;  %v517_v7 = vpop.permute.xlu0 %516 }
 0x4d6   :  { %v522_v11 = vmul.f32 %v517_v7, %v512_v2 }
 0x4d7   :  { %v529_v12 = vadd.f32 %v527_v5, %v523_v6 }
 0x4d8   :  { %v528_v13 = vadd.f32 %v526_v8, %v522_v11 }
 0x4d9   :  { %v534_v14 = vrot.slane %v529_v12, 6  ;;  %v658_v16 = vrot.slane %v529_v12, 2 }
 0x4da   :  { %v533_v17 = vrot.slane %v528_v13, 6  ;;  %v657_v18 = vrot.slane %v528_v13, 2 }
 0x4dc   :  { %v535_v19 = vsel %vm532_vm4, %v533_v17, %v534_v14  ;;  %v659_v20 = vsel %vm656_vm5, %v657_v18, %v658_v16 }
 0x4dd   :  { %8961 = vmatmul.mubr.msk.f32.vlgmr.msra.gmra.mrb[2].mxu1 %vm304_vm3, %v535_v19  ;;  %v537_v62 = vadd.f32 %v535_v19, %v11149_v39 }
 0x4de   :  { %9814 = vmatpush3.bf16.msra.mxu1 %v11090_v4  ;;  %8982 = vmatprep.mubr.msk.f32.mxu1 %vm10855_vm2, %v10856_v10 }
 0x4df   :  { %9815 = vmatprep.subr.bf16.mxu1 %v10854_v3 }
 0x4e2   :  { %9817 = vmatpush3.bf16.msra.mxu1 %v11101_v9 }
 0x4e3   :  { %9824 = vmatprep.subr.bf16.mxu1 %v10854_v3 }
 0x5b0   :  { %v606_v21 = vpop.f32.mrb[2].mxu1 }
 0x5b1   :  { %v611_v22 = vrot.slane %v606_v21, 4  ;;  %v8962_v23 = vpop.f32.mrb[3].mxu1 }
 0x5b3   :  { %627 = vrot.lane.b32.xlu0 %v611_v22, %s10857_s0  ;;  %v613_v25 = vadd.f32 %v611_v22, %v11161_v43  ;;  %v614_v26 = vadd.f32 %v611_v22, %v11184_v24 }
 0x5b5   :  { %v8342_v27 = vmul.f32 -1.442695, %v613_v25  ;;  %v8343_v28 = vmul.f32 -1.442695, %v614_v26 }
 0x5b7   :  { %10293 = vpow2.f32 %v8342_v27  ;;  %v291_v27 = vadd.f32 %v11141_v31, %v11122_v15 }
 0x5b8   :  { %10295 = vpow2.f32 %v8343_v28 }
 0x5c1   :  { %v10294_v29 = vpop.eup %10293 }
 0x5c2   :  { %v10296_v30 = vpop.eup %10295  ;;  %v621_v35 = vadd.f32 1.0, %v10294_v29 }
 0x5c3   :  { %v622_v36 = vadd.f32 1.0, %v10296_v30 }
 0x5c4   :  { %10297 = vrcp.f32 %v621_v35 }
 0x5c5   :  { %10299 = vrcp.f32 %v622_v36 }
 0x5ce   :  { %v10298_v37 = vpop.eup %10297 }
 0x5cf   :  { %v10300_v38 = vpop.eup %10299  ;;  %v644_v51 = vsub.f32 1.0, %v10298_v37  ;;  %v662_v55 = vmul.f32 %v10298_v37, %v659_v20 }
 0x5d0   :  { %v645_v49 = vsub.f32 1.0, %v10300_v38  ;;  %v663_v52 = vmul.f32 %v10300_v38, %v658_v16 }
 0x625   :  { %v628_v40 = vpop.permute.xlu0 %627 }
 0x626   :  { %v630_v41 = vmul.f32 %v10298_v37, %v628_v40  ;;  %v631_v32 = vmul.f32 %v10300_v38, %v628_v40 }
 0x628   :  { %636 = vrot.lane.b32.xlu0 %v631_v32, %s10858_s29  ;;  %634 = vrot.lane.b32.xlu1 %v630_v41, %s10858_s29 }
 0x69a   :  { %v637_v42 = vpop.permute.xlu0 %636  ;;  %v635_v44 = vpop.permute.xlu1 %634 }
 0x69b   :  { %v641_v45 = vadd.f32 %v637_v42, %v11184_v24  ;;  %v640_v46 = vadd.f32 %v635_v44, %v11161_v43 }
 0x69d   :  { %10301 = vtanh.f32 %v641_v45 }
 0x69e   :  { %10303 = vtanh.f32 %v640_v46 }
 0x6a7   :  { %v10302_v47 = vpop.eup %10301 }
 0x6a8   :  { %v10304_v48 = vpop.eup %10303  ;;  %650 = vrot.lane.b32.xlu0 %v10302_v47, %s10859_s7 }
 0x6a9   :  { %648 = vrot.lane.b32.xlu1 %v10304_v48, %s10859_s7 }
 0x71a   :  { %v651_v50 = vpop.permute.xlu0 %650 }
 0x71b   :  { %v655_v53 = vmul.f32 %v651_v50, %v645_v49  ;;  %v649_v54 = vpop.permute.xlu1 %648 }
 0x71c   :  { %v654_v56 = vmul.f32 %v649_v54, %v644_v51 }
 0x71d   :  { %v665_v57 = vadd.f32 %v663_v52, %v655_v53  ;;  %v11231_v52 = vadd.f32 %v11122_v15, %v11147_v34 }
 0x71e   :  { %v664_v58 = vadd.f32 %v662_v55, %v654_v56 }
 0x71f   :  { %v670_v59 = vrot.slane %v665_v57, 4  ;;  %v773_v43 = vrot.slane %v665_v57, 2 }
 0x720   :  { %v669_v60 = vrot.slane %v664_v58, 4  ;;  %v772_v61 = vrot.slane %v664_v58, 2 }
 0x722   :  { %v671_v63 = vsel %vm668_vm6, %v669_v60, %v670_v59  ;;  %v774_v0 = vsel %vm656_vm5, %v772_v61, %v773_v43 }
 0x723   :  { %v673_v1 = vadd.f32 %v671_v63, %v537_v62  ;;  %8972 = vmatmul.mubr.msk.f32.vlgmr.msra.gmra.mrb[8].mxu0 %vm304_vm3, %v671_v63 }
 0x724   :  { %9820 = vmatpush3.bf16.msra.mxu0 %v11090_v4  ;;  %8993 = vmatprep.mubr.msk.f32.mxu0 %vm10855_vm2, %v10856_v10 }
 0x725   :  { %9821 = vmatprep.subr.bf16.mxu0 %v10854_v3 }
 0x728   :  { %9823 = vmatpush3.bf16.msra.mxu0 %v11101_v9 }
 0x729   :  { %9830 = vmatprep.subr.bf16.mxu0 %v10854_v3 }
 0x7f6   :  { %v742_v2 = vpop.f32.mrb[8].mxu0 }
 0x7f7   :  { %v747_v39 = vrot.slane %v742_v2, 6  ;;  %v8973_v5 = vpop.f32.mrb[9].mxu0 }
 0x7f9   :  { %756 = vrot.lane.b32.xlu1 %v747_v39, %s10857_s0  ;;  %v749_v6 = vadd.f32 %v747_v39, %v11184_v24 }
 0x7fb   :  { %v8345_v7 = vmul.f32 -1.442695, %v749_v6 }
 0x7fd   :  { %10305 = vpow2.f32 %v8345_v7 }
 0x807   :  { %v10306_v8 = vpop.eup %10305 }
 0x808   :  { %v753_v11 = vadd.f32 1.0, %v10306_v8 }
 0x80a   :  { %10307 = vrcp.f32 %v753_v11 }
 0x814   :  { %v10308_v12 = vpop.eup %10307 }
 0x815   :  { %v766_v19 = vsub.f32 1.0, %v10308_v12  ;;  %v776_v21 = vmul.f32 %v10308_v12, %v774_v0 }
 0x86b   :  { %v757_v13 = vpop.permute.xlu1 %756 }
 0x86c   :  { %v759_v14 = vmul.f32 %v10308_v12, %v757_v13 }
 0x86e   :  { %761 = vrot.lane.b32.xlu0 %v759_v14, %s10858_s29 }
 0x8e0   :  { %v762_v16 = vpop.permute.xlu0 %761 }
 0x8e1   :  { %v764_v17 = vadd.f32 %v762_v16, %v11184_v24 }
 0x8e3   :  { %10309 = vtanh.f32 %v764_v17 }
 0x8ed   :  { %v10310_v18 = vpop.eup %10309 }
 0x8ee   :  { %768 = vrot.lane.b32.xlu1 %v10310_v18, %s10859_s7 }
 0x960   :  { %v769_v20 = vpop.permute.xlu1 %768 }
 0x961   :  { %v771_v22 = vmul.f32 %v769_v20, %v766_v19 }
 0x963   :  { %v777_v23 = vadd.f32 %v776_v21, %v771_v22 }
 0x965   :  { %v779_v25 = vrot.slane %v777_v23, 2 }
 0x967   :  { %8983 = vmatmul.mubr.msk.f32.vlgmr.msra.gmra.mrb[4].mxu1 %vm304_vm3, %v779_v25  ;;  %v781_v46 = vadd.f32 %v779_v25, %v673_v1 }
 0x968   :  { %9826 = vmatpush3.bf16.msra.mxu1 %v11090_v4  ;;  %9004 = vmatprep.mubr.msk.f32.mxu1 %vm10855_vm2, %v10856_v10 }
 0x969   :  { %9827 = vmatprep.subr.bf16.mxu1 %v10854_v3 }
 0x96c   :  { %9829 = vmatpush3.bf16.msra.mxu1 %v11101_v9 }
 0x96d   :  { %9836 = vmatprep.subr.bf16.mxu1 %v10854_v3 }
 0xa3a   :  { %v850_v24 = vpop.f32.mrb[4].mxu1 }
 0xa3b   :  { %862 = vrot.lane.b32.xlu0 %v850_v24, %s10857_s0  ;;  %v8984_v26 = vpop.f32.mrb[5].mxu1  ;;  %v854_v28 = vadd.f32 %v850_v24, %v291_v27 }
 0xa3d   :  { %v8347_v29 = vmul.f32 -1.442695, %v854_v28 }
 0xa3f   :  { %10311 = vpow2.f32 %v8347_v29 }
 0xa49   :  { %v10312_v30 = vpop.eup %10311 }
 0xa4a   :  { %v858_v35 = vadd.f32 1.0, %v10312_v30 }
 0xa4c   :  { %10313 = vrcp.f32 %v858_v35  ;;  %v11247_v35 = vadd.f32 %v11145_v33, %v11122_v15 }
 0xa56   :  { %v10314_v36 = vpop.eup %10313 }
 0xa57   :  { %v872_v42 = vsub.f32 1.0, %v10314_v36  ;;  %v878_v31 = vmul.f32 %v10314_v36, %v779_v25 }
 0xaad   :  { %v863_v37 = vpop.permute.xlu0 %862 }
 0xaae   :  { %v865_v38 = vmul.f32 %v10314_v36, %v863_v37 }
 0xab0   :  { %867 = vrot.lane.b32.xlu1 %v865_v38, %s10858_s29 }
 0xb22   :  { %v868_v40 = vpop.permute.xlu1 %867 }
 0xb23   :  { %v870_v41 = vadd.f32 %v868_v40, %v291_v27 }
 0xb25   :  { %10315 = vtanh.f32 %v870_v41 }
 0xb2f   :  { %v10316_v32 = vpop.eup %10315 }
 0xb30   :  { %874 = vrot.lane.b32.xlu0 %v10316_v32, %s10859_s7 }
 0xba2   :  { %v875_v44 = vpop.permute.xlu0 %874 }
 0xba3   :  { %v877_v45 = vmul.f32 %v875_v44, %v872_v42 }
 0xba5   :  { %v879_v47 = vadd.f32 %v878_v31, %v877_v45 }
 0xba7   :  { %v880_v48 = vadd.f32 %v879_v47, %v781_v46  ;;  %8994 = vmatmul.mubr.msk.f32.vlgmr.msra.gmra.mrb[10].mxu0 %vm304_vm3, %v879_v47  ;;  %v1000_v8 = vrot.slane %v879_v47, 2 }
 0xba8   :  { %9832 = vmatpush3.bf16.msra.mxu0 %v11090_v4  ;;  %9015 = vmatprep.mubr.msk.f32.mxu0 %vm10855_vm2, %v10856_v10 }
 0xba9   :  { %9833 = vmatprep.subr.bf16.mxu0 %v10854_v3 }
 0xbac   :  { %9835 = vmatpush3.bf16.msra.mxu0 %v11101_v9 }
 0xbad   :  { %9842 = vmatprep.subr.bf16.mxu0 %v10854_v3 }
 0xc7a   :  { %v950_v49 = vpop.f32.mrb[10].mxu0 }
 0xc7b   :  { %v955_v50 = vrot.slane %v950_v49, 2  ;;  %v8995_v51 = vpop.f32.mrb[11].mxu0 }
 0xc7d   :  { %971 = vrot.lane.b32.xlu1 %v955_v50, %s10857_s0  ;;  %v957_v53 = vadd.f32 %v955_v50, %v291_v27  ;;  %v958_v54 = vadd.f32 %v955_v50, %v11231_v52 }
 0xc7f   :  { %v8349_v55 = vmul.f32 -1.442695, %v957_v53  ;;  %v8350_v56 = vmul.f32 -1.442695, %v958_v54 }
 0xc81   :  { %10317 = vpow2.f32 %v8349_v55 }
 0xc82   :  { %10319 = vpow2.f32 %v8350_v56 }
 0xc8b   :  { %v10318_v57 = vpop.eup %10317 }
 0xc8c   :  { %v10320_v58 = vpop.eup %10319  ;;  %v965_v59 = vadd.f32 1.0, %v10318_v57 }
 0xc8d   :  { %v966_v43 = vadd.f32 1.0, %v10320_v58 }
 0xc8e   :  { %10321 = vrcp.f32 %v965_v59 }
 0xc8f   :  { %10323 = vrcp.f32 %v966_v43 }
 0xc98   :  { %v10322_v60 = vpop.eup %10321 }
 0xc99   :  { %v10324_v61 = vpop.eup %10323  ;;  %v988_v12 = vsub.f32 1.0, %v10322_v60  ;;  %v1002_v17 = vmul.f32 %v10322_v60, %v1000_v8 }
 0xc9a   :  { %v989_v7 = vsub.f32 1.0, %v10324_v61  ;;  %v1003_v13 = vmul.f32 %v10324_v61, %v1000_v8 }
 0xcef   :  { %v972_v62 = vpop.permute.xlu1 %971 }
 0xcf0   :  { %v974_v63 = vmul.f32 %v10322_v60, %v972_v62  ;;  %v975_v0 = vmul.f32 %v10324_v61, %v972_v62 }
 0xcf2   :  { %980 = vrot.lane.b32.xlu1 %v975_v0, %s10858_s29  ;;  %978 = vrot.lane.b32.xlu0 %v974_v63, %s10858_s29 }
 0xd64   :  { %v981_v34 = vpop.permute.xlu1 %980  ;;  %v979_v1 = vpop.permute.xlu0 %978 }
 0xd65   :  { %v985_v2 = vadd.f32 %v981_v34, %v11231_v52  ;;  %v984_v39 = vadd.f32 %v979_v1, %v291_v27 }
 0xd67   :  { %10325 = vtanh.f32 %v985_v2 }
 0xd68   :  { %10327 = vtanh.f32 %v984_v39 }
 0xd71   :  { %v10326_v5 = vpop.eup %10325 }
 0xd72   :  { %v10328_v6 = vpop.eup %10327  ;;  %994 = vrot.lane.b32.xlu1 %v10326_v5, %s10859_s7 }
 0xd73   :  { %992 = vrot.lane.b32.xlu0 %v10328_v6, %s10859_s7 }
 0xde4   :  { %v995_v11 = vpop.permute.xlu1 %994 }
 0xde5   :  { %v999_v14 = vmul.f32 %v995_v11, %v989_v7  ;;  %v993_v16 = vpop.permute.xlu0 %992 }
 0xde6   :  { %v998_v18 = vmul.f32 %v993_v16, %v988_v12 }
 0xde7   :  { %v1005_v19 = vadd.f32 %v1003_v13, %v999_v14 }
 0xde8   :  { %v1004_v20 = vadd.f32 %v1002_v17, %v998_v18 }
 0xde9   :  { %v1009_v21 = vrot.slane %v1005_v19, 6  ;;  %v1132_v22 = vrot.slane %v1005_v19, 2 }
 0xdea   :  { %v1008_v23 = vrot.slane %v1004_v20, 6  ;;  %v1131_v25 = vrot.slane %v1004_v20, 2 }
 0xdec   :  { %v1010_v24 = vsel %vm532_vm4, %v1008_v23, %v1009_v21  ;;  %v1133_v26 = vsel %vm656_vm5, %v1131_v25, %v1132_v22  ;;  %v1267_v23 = vld [vmem:[%s10974_s21 + $0x8] sm:$0xff] }
 0xded   :  { %v1012_v27 = vadd.f32 %v1010_v24, %v880_v48  ;;  %9005 = vmatmul.mubr.msk.f32.vlgmr.msra.gmra.mrb[6].mxu1 %vm304_vm3, %v1010_v24  ;;  %v1268_v24 = vld [vmem:[%s10974_s21 + $0x10] sm:$0xff] }
 0xdee   :  { %9026 = vmatprep.mubr.msk.f32.mxu1 %vm10855_vm2, %v10856_v10 }
 0xec0   :  { %v1081_v28 = vpop.f32.mrb[6].mxu1 }
 0xec1   :  { %v1086_v29 = vrot.slane %v1081_v28, 4  ;;  %v9006_v30 = vpop.f32.mrb[7].mxu1  ;;  %v1450_v28 = vld [vmem:[%s10904_s25] sm:$0x7f]  ;;  %s12472_s25 = sld [smem:[#allocation18_spill]] }
 0xec3   :  { %1102 = vrot.lane.b32.xlu0 %v1086_v29, %s10857_s0  ;;  %v1088_v36 = vadd.f32 %v1086_v29, %v11231_v52  ;;  %v1089_v37 = vadd.f32 %v1086_v29, %v11247_v35 }
 0xec5   :  { %v8352_v38 = vmul.f32 -1.442695, %v1088_v36  ;;  %v8353_v40 = vmul.f32 -1.442695, %v1089_v37 }
 0xec7   :  { %10329 = vpow2.f32 %v8352_v38 }
 0xec8   :  { %10331 = vpow2.f32 %v8353_v40 }
 0xed1   :  { %v10330_v41 = vpop.eup %10329 }
 0xed2   :  { %v10332_v32 = vpop.eup %10331  ;;  %v1096_v42 = vadd.f32 1.0, %v10330_v41 }
 0xed3   :  { %v1097_v44 = vadd.f32 1.0, %v10332_v32 }
 0xed4   :  { %10333 = vrcp.f32 %v1096_v42 }
 0xed5   :  { %10335 = vrcp.f32 %v1097_v44 }
 0xede   :  { %v10334_v31 = vpop.eup %10333 }
 0xedf   :  { %v10336_v45 = vpop.eup %10335  ;;  %v1119_v57 = vsub.f32 1.0, %v10334_v31  ;;  %v1136_v60 = vmul.f32 %v10334_v31, %v1133_v26  ;;  %v1269_v26 = vld [vmem:[%s10974_s21 + $0x18] sm:$0xff] }
 0xee0   :  { %v1120_v55 = vsub.f32 1.0, %v10336_v45  ;;  %v1137_v58 = vmul.f32 %v10336_v45, %v1132_v22  ;;  %v1266_v22 = vld [vmem:[%s10974_s21] sm:$0xff]  ;;  %s12471_s21 = sld [smem:[#allocation17_spill]] }
 0xee1   :  { %v9837_v25 = vpack.c.bf16 %v1267_v23, %v1266_v22 }
 0xee3   :  { %9838 = vmatpush3.bf16.msra.mxu1 %v9837_v25 }
 0xee4   :  { %9839 = vmatprep.subr.bf16.mxu1 %v10854_v3 }
 0xf35   :  { %v1103_v46 = vpop.permute.xlu0 %1102 }
 0xf36   :  { %v1105_v47 = vmul.f32 %v10334_v31, %v1103_v46  ;;  %v1106_v33 = vmul.f32 %v10336_v45, %v1103_v46 }
 0xf38   :  { %1111 = vrot.lane.b32.xlu0 %v1106_v33, %s10858_s29  ;;  %1109 = vrot.lane.b32.xlu1 %v1105_v47, %s10858_s29 }
 0xfaa   :  { %v1112_v48 = vpop.permute.xlu0 %1111  ;;  %v1110_v49 = vpop.permute.xlu1 %1109 }
 0xfab   :  { %v1116_v50 = vadd.f32 %v1112_v48, %v11247_v35  ;;  %v1115_v51 = vadd.f32 %v1110_v49, %v11231_v52  ;;  %v11275_v48 = vld [vmem:[%s10884_s9] sm:$0xff]  ;;  %v11282_v49 = vld [vmem:[%s10884_s9 + $0x8] sm:$0xff] }
 0xfad   :  { %10337 = vtanh.f32 %v1116_v50  ;;  %v11286_v50 = vld [vmem:[%s10884_s9 + $0x10] sm:$0xff] }
 0xfae   :  { %10339 = vtanh.f32 %v1115_v51  ;;  %v11294_v51 = vld [vmem:[%s10884_s9 + $0x18] sm:$0xff] }
 0xfb7   :  { %v10338_v53 = vpop.eup %10337 }
 0xfb8   :  { %v10340_v54 = vpop.eup %10339  ;;  %1125 = vrot.lane.b32.xlu0 %v10338_v53, %s10859_s7  ;;  %v1345_v53 = vld [vmem:[%s10984_s4] sm:$0xff] }
 0xfb9   :  { %1123 = vrot.lane.b32.xlu1 %v10340_v54, %s10859_s7  ;;  %v1346_v54 = vld [vmem:[%s10984_s4 + $0x8] sm:$0xff] }
0x102a   :  { %v1126_v56 = vpop.permute.xlu0 %1125 }
0x102b   :  { %v1130_v59 = vmul.f32 %v1126_v56, %v1120_v55  ;;  %v1124_v43 = vpop.permute.xlu1 %1123  ;;  %v9843_v55 = vpack.c.bf16 %v1346_v54, %v1345_v53  ;;  %v1347_v56 = vld [vmem:[%s10984_s4 + $0x10] sm:$0xff] }
0x102c   :  { %v1129_v61 = vmul.f32 %v1124_v43, %v1119_v57  ;;  %v1348_v57 = vld [vmem:[%s10984_s4 + $0x18] sm:$0xff]  ;;  %s12477_s4 = sld [smem:[#allocation24_spill]] }
0x102d   :  { %v1139_v62 = vadd.f32 %v1137_v58, %v1130_v59  ;;  %v9846_v58 = vpack.c.bf16 %v1348_v57, %v1347_v56  ;;  %v1270_v59 = vld [vmem:[%s10979_s17] sm:$0x1]  ;;  %s12470_s17 = sld [smem:[#allocation16_spill]] }
0x102e   :  { %v1138_v63 = vadd.f32 %v1136_v60, %v1129_v61 }
0x102f   :  { %v1143_v0 = vrot.slane %v1139_v62, 4  ;;  %v1246_v52 = vrot.slane %v1139_v62, 2 }
0x1030   :  { %v1142_v34 = vrot.slane %v1138_v63, 4  ;;  %v1245_v1 = vrot.slane %v1138_v63, 2 }
0x1032   :  { %v1144_v2 = vsel %vm668_vm6, %v1142_v34, %v1143_v0  ;;  %v1247_v39 = vsel %vm656_vm5, %v1245_v1, %v1246_v52 }
0x1033   :  { %v1146_v5 = vadd.f32 %v1144_v2, %v1012_v27  ;;  %9016 = vmatmul.mubr.msk.f32.vlgmr.msra.gmra.mrb[12].mxu0 %vm304_vm3, %v1144_v2  ;;  %v9840_v27 = vpack.c.bf16 %v1269_v26, %v1268_v24 }
0x1034   :  { %9037 = vmatprep.mubr.msk.f32.mxu0 %vm10855_vm2, %v10856_v10  ;;  %9844 = vmatpush3.bf16.msra.mxu0 %v9843_v55 }
0x1035   :  { %9841 = vmatpush3.bf16.msra.mxu1 %v9840_v27  ;;  %9845 = vmatprep.subr.bf16.mxu0 %v10854_v3 }
0x1036   :  { %9040 = vmatprep.subr.msk.mxu1 %vm205_vm0, %v1450_v28 }
0x1038   :  { %9847 = vmatpush3.bf16.msra.mxu0 %v9846_v58 }
0x1039   :  { %9854 = vmatprep.subr.bf16.mxu0 %v10854_v3 }
0x1106   :  { %v1215_v6 = vpop.f32.mrb[12].mxu0 }
0x1107   :  { %v1220_v7 = vrot.slane %v1215_v6, 6  ;;  %v9017_v8 = vpop.f32.mrb[13].mxu0 }
0x1109   :  { %1229 = vrot.lane.b32.xlu1 %v1220_v7, %s10857_s0  ;;  %v1222_v11 = vadd.f32 %v1220_v7, %v11247_v35 }
0x110b   :  { %v8355_v12 = vmul.f32 -1.442695, %v1222_v11 }
0x110d   :  { %10341 = vpow2.f32 %v8355_v12 }
0x1117   :  { %v10342_v13 = vpop.eup %10341 }
0x1118   :  { %v1226_v14 = vadd.f32 1.0, %v10342_v13 }
0x111a   :  { %10343 = vrcp.f32 %v1226_v14  ;;  %v1349_v14 = vld [vmem:[%s10989_s13] sm:$0x1]  ;;  %s10860_s13 = smov 7  }
0x1124   :  { %v10344_v16 = vpop.eup %10343 }
0x1125   :  { %v1239_v29 = vsub.f32 1.0, %v10344_v16 }
0x117b   :  { %v1230_v17 = vpop.permute.xlu1 %1229 }
0x117c   :  { %v1232_v18 = vmul.f32 %v10344_v16, %v1230_v17 }
0x117e   :  { %1234 = vrot.lane.b32.xlu0 %v1232_v18, %s10858_s29 }
0x11f0   :  { %v1235_v19 = vpop.permute.xlu0 %1234 }
0x11f1   :  { %v1237_v20 = vadd.f32 %v1235_v19, %v11247_v35  ;;  %v1249_v35 = vmul.f32 %v10344_v16, %v1247_v39 }
0x11f3   :  { %10345 = vtanh.f32 %v1237_v20 }
0x11fd   :  { %v10346_v21 = vpop.eup %10345 }
0x11fe   :  { %1241 = vrot.lane.b32.xlu1 %v10346_v21, %s10859_s7 }
0x1270   :  { %v1242_v30 = vpop.permute.xlu1 %1241 }
0x1271   :  { %v1244_v36 = vmul.f32 %v1242_v30, %v1239_v29 }
0x1273   :  { %v1250_v37 = vadd.f32 %v1249_v35, %v1244_v36 }
0x1275   :  { %v1252_v38 = vrot.slane %v1250_v37, 2 }
0x1277   :  { %v1254_v40 = vadd.f32 %v1252_v38, %v1146_v5 }
0x1279   :  { %v1255_v41 = vmul.f32 0.125, %v1254_v40 }
0x127b   :  { %v1257_v32 = vsel %vm1256_vm7, %v1255_v41, 0.0 }
0x127c   :  { %v1258_v42 = vrot.slane %v1257_v32, 4 }
0x127e   :  { %v1259_v44 = vadd.f32 %v1258_v42, %v1257_v32 }
0x1280   :  { %v1260_v31 = vrot.slane %v1259_v44, 2 }
0x1282   :  { %v1261_v45 = vadd.f32 %v1260_v31, %v1259_v44 }
0x1284   :  { %v1262_v46 = vrot.slane %v1261_v45, 1 }
0x1286   :  { %v1263_v47 = vadd.f32 %v1262_v46, %v1261_v45 }
0x1288   :  { %v1265_v33 = vmul.f32 0.16666667, %v1263_v47 }
0x128a   :  { %9027 = vmatmul.mubr.msk.f32.vlgmr.msra.gmra.mrb[8].mxu1 %vm304_vm3, %v1265_v33 }
0x128b   :  { %9041 = vmatpush3.msk.msra.mxu1 %vm205_vm0, %v1450_v28  ;;  %9042 = vmatprep.mubr.msk.f32.mxu1 %vm186_vm1, %v11275_v48 }
0x128c   :  { %9848 = vmatprep.subr.bf16.mxu1 %v10854_v3 }
0x128e   :  { %9043 = vmatmul.mubr.msk.f32.vlgmr.msra.gmra.mrb[10].mxu1 %vm186_vm1, %v11282_v49 }
0x128f   :  { %9850 = vmatpush3.bf16.msra.mxu1 %v11090_v4  ;;  %9045 = vmatprep.mubr.msk.f32.mxu1 %vm186_vm1, %v11286_v50 }
0x1290   :  { %9851 = vmatprep.subr.bf16.mxu1 %v10854_v3 }
0x1292   :  { %9046 = vmatmul.mubr.msk.f32.gmra.mrb[12].mxu1 %vm186_vm1, %v11294_v51 }
0x1293   :  { %9853 = vmatpush3.bf16.msra.mxu1 %v11101_v9  ;;  %9056 = vmatprep.mubr.msk.f32.mxu1 %vm10855_vm2, %v10856_v10 }
0x1294   :  { %9860 = vmatprep.subr.bf16.mxu1 %v10854_v3 }
0x1296   :  { %9057 = vmatmul.mubr.f32.vlgmr.msra.gmra.mrb[14].mxu1 %v10856_v10 }
0x1297   :  { %9862 = vmatpush3.bf16.msra.mxu1 %v11090_v4  ;;  %9078 = vmatprep.mubr.msk.f32.mxu1 %vm10855_vm2, %v10856_v10 }
0x1298   :  { %9863 = vmatprep.subr.bf16.mxu1 %v10854_v3 }
0x129b   :  { %9865 = vmatpush3.bf16.msra.mxu1 %v11101_v9 }
0x129c   :  { %9872 = vmatprep.subr.bf16.mxu1 %v10854_v3 }
0x135d   :  { %v1340_v43 = vpop.f32.mrb[8].mxu1 }
0x135e   :  { %v1341_v60 = vadd.f32 %v1340_v43, %v1270_v59  ;;  %v9028_v61 = vpop.f32.mrb[9].mxu1 }
0x1360   :  { %10347 = vtanh.f32 %v1341_v60 }
0x1361   :  { %v11317_v62 = vpop.f32.mrb[10].mxu1 }
0x1362   :  { %v1543_v63 = vpop.f32.mrb[11].mxu1  ;;  %v1549_v57 = vadd.f32 %v11317_v62, %v11122_v15 }
0x1363   :  { %v1544_v39 = vadd.f32 %v11122_v15, %v1543_v63 }
0x1365   :  { %v11319_v0 = vpop.f32.mrb[12].mxu1 }
0x1366   :  { %v11321_v52 = vpop.f32.mrb[13].mxu1 }
0x1369   :  { %v1628_v34 = vpop.f32.mrb[14].mxu1 }
0x136a   :  { %v10348_v1 = vpop.eup %10347  ;;  %1640 = vrot.lane.b32.xlu0 %v1628_v34, %s10857_s0  ;;  %v9058_v2 = vpop.f32.mrb[15].mxu1  ;;  %v1632_v5 = vadd.f32 %v1628_v34, %v1544_v39 }
0x136b   :  { %9038 = vmatmul.mubr.msk.f32.vlgmr.msra.gmra.mrb[14].mxu0 %vm304_vm3, %v10348_v1 }
0x136c   :  { %9856 = vmatpush3.bf16.msra.mxu0 %v11090_v4  ;;  %9067 = vmatprep.mubr.msk.f32.mxu0 %vm10855_vm2, %v10856_v10  ;;  %v8364_v6 = vmul.f32 -1.442695, %v1632_v5 }
0x136d   :  { %9857 = vmatprep.subr.bf16.mxu0 %v10854_v3 }
0x136e   :  { %10349 = vpow2.f32 %v8364_v6 }
0x1370   :  { %9859 = vmatpush3.bf16.msra.mxu0 %v11101_v9 }
0x1371   :  { %9866 = vmatprep.subr.bf16.mxu0 %v10854_v3 }
0x1378   :  { %v10350_v7 = vpop.eup %10349 }
0x1379   :  { %v1636_v8 = vadd.f32 1.0, %v10350_v7 }
0x137b   :  { %10351 = vrcp.f32 %v1636_v8 }
0x1385   :  { %v10352_v11 = vpop.eup %10351 }
0x1386   :  { %v1650_v22 = vsub.f32 1.0, %v10352_v11  ;;  %v1656_v25 = vmul.f32 0.0, %v10352_v11 }
0x13dc   :  { %v1641_v12 = vpop.permute.xlu0 %1640 }
0x13dd   :  { %v1643_v13 = vmul.f32 %v10352_v11, %v1641_v12 }
0x13df   :  { %1645 = vrot.lane.b32.xlu1 %v1643_v13, %s10858_s29 }
0x143e   :  { %v1419_v16 = vpop.f32.mrb[14].mxu0 }
0x143f   :  { %v11334_v17 = vadd.f32 %v1419_v16, %v1349_v14  ;;  %v9039_v18 = vpop.f32.mrb[15].mxu0 }
0x1441   :  { %1444 = vst.msk [vmem:[#allocation2] sm:$0x1] %vm1443_vm8, %v11334_v17  ;;  %vm1424_vm14 = vcmp.ne.f32.partialorder %v11334_v17, %v11334_v17 }
0x1451   :  { %v1646_v19 = vpop.permute.xlu1 %1645 }
0x1452   :  { %v1648_v20 = vadd.f32 %v1646_v19, %v1544_v39 }
0x1454   :  { %10353 = vtanh.f32 %v1648_v20 }
0x145e   :  { %v10354_v21 = vpop.eup %10353 }
0x145f   :  { %1652 = vrot.lane.b32.xlu0 %v10354_v21, %s10859_s7 }
0x14d1   :  { %v1653_v23 = vpop.permute.xlu0 %1652 }
0x14d2   :  { %v1655_v24 = vmul.f32 %v1653_v23, %v1650_v22 }
0x14d4   :  { %v1657_v26 = vadd.f32 %v1656_v25, %v1655_v24 }
0x14d6   :  { %9068 = vmatmul.mubr.msk.f32.vlgmr.msra.gmra.mrb[16].mxu0 %vm304_vm3, %v1657_v26  ;;  %v1757_v31 = vrot.slane %v1657_v26, 4 }
0x14d7   :  { %9868 = vmatpush3.bf16.msra.mxu0 %v11090_v4  ;;  %9089 = vmatprep.mubr.msk.f32.mxu0 %vm10855_vm2, %v10856_v10 }
0x14d8   :  { %9869 = vmatprep.subr.bf16.mxu0 %v10854_v3 }
0x14db   :  { %9871 = vmatpush3.bf16.msra.mxu0 %v11101_v9 }
0x14dc   :  { %9878 = vmatprep.subr.bf16.mxu0 %v10854_v3 }
0x15a9   :  { %v1727_v27 = vpop.f32.mrb[16].mxu0 }
0x15aa   :  { %v1732_v28 = vrot.slane %v1727_v27, 4  ;;  %v9069_v29 = vpop.f32.mrb[17].mxu0 }
0x15ac   :  { %1741 = vrot.lane.b32.xlu1 %v1732_v28, %s10857_s0  ;;  %v1734_v30 = vadd.f32 %v1732_v28, %v1544_v39 }
0x15ae   :  { %v8366_v35 = vmul.f32 -1.442695, %v1734_v30 }
0x15b0   :  { %10355 = vpow2.f32 %v8366_v35 }
0x15ba   :  { %v10356_v36 = vpop.eup %10355 }
0x15bb   :  { %v1738_v37 = vadd.f32 1.0, %v10356_v36 }
0x15bd   :  { %10357 = vrcp.f32 %v1738_v37 }
0x15c7   :  { %v10358_v38 = vpop.eup %10357 }
0x15c8   :  { %v1751_v45 = vsub.f32 1.0, %v10358_v38  ;;  %v1759_v47 = vmul.f32 %v10358_v38, %v1757_v31 }
0x161e   :  { %v1742_v40 = vpop.permute.xlu1 %1741 }
0x161f   :  { %v1744_v41 = vmul.f32 %v10358_v38, %v1742_v40  ;;  %v10683_v38 = vld [vmem:[%s10914_s3] ss:$0 sm:$0xff]  ;;  %s12473_s3 = sld [smem:[#allocation19_spill]] }
0x1620   :  { %v1554_v40 = vadd.f32 %v10683_v38, %v11321_v52 }
0x1621   :  { %1746 = vrot.lane.b32.xlu0 %v1744_v41, %s10858_s29 }
0x1693   :  { %v1747_v32 = vpop.permute.xlu0 %1746 }
0x1694   :  { %v1749_v42 = vadd.f32 %v1747_v32, %v1544_v39 }
0x1696   :  { %10359 = vtanh.f32 %v1749_v42 }
0x16a0   :  { %v10360_v44 = vpop.eup %10359 }
0x16a1   :  { %1753 = vrot.lane.b32.xlu1 %v10360_v44, %s10859_s7 }
0x1713   :  { %v1754_v46 = vpop.permute.xlu1 %1753 }
0x1714   :  { %v1756_v33 = vmul.f32 %v1754_v46, %v1751_v45 }
0x1716   :  { %v1760_v53 = vadd.f32 %v1759_v47, %v1756_v33 }
0x1718   :  { %v1762_v54 = vrot.slane %v1760_v53, 4 }
0x171a   :  { %9079 = vmatmul.mubr.msk.f32.vlgmr.msra.gmra.mrb[16].mxu1 %vm304_vm3, %v1762_v54 }
0x171b   :  { %9874 = vmatpush3.bf16.msra.mxu1 %v11090_v4  ;;  %9100 = vmatprep.mubr.msk.f32.mxu1 %vm10855_vm2, %v10856_v10 }
0x171c   :  { %9875 = vmatprep.subr.bf16.mxu1 %v10854_v3 }
0x171f   :  { %9877 = vmatpush3.bf16.msra.mxu1 %v11101_v9 }
0x1720   :  { %9884 = vmatprep.subr.bf16.mxu1 %v10854_v3 }
0x17ed   :  { %v1831_v55 = vpop.f32.mrb[16].mxu1 }
0x17ee   :  { %1843 = vrot.lane.b32.xlu0 %v1831_v55, %s10857_s0  ;;  %v9080_v56 = vpop.f32.mrb[17].mxu1  ;;  %v1835_v58 = vadd.f32 %v1831_v55, %v1549_v57 }
0x17f0   :  { %v8368_v59 = vmul.f32 -1.442695, %v1835_v58 }
0x17f2   :  { %10361 = vpow2.f32 %v8368_v59 }
0x17fc   :  { %v10362_v43 = vpop.eup %10361 }
0x17fd   :  { %v1839_v60 = vadd.f32 1.0, %v10362_v43 }
0x17ff   :  { %10363 = vrcp.f32 %v1839_v60 }
0x1809   :  { %v10364_v61 = vpop.eup %10363 }
0x180a   :  { %v1853_v5 = vsub.f32 1.0, %v10364_v61  ;;  %v1860_v15 = vmul.f32 %v10364_v61, %v1762_v54 }
0x1860   :  { %v1844_v63 = vpop.permute.xlu0 %1843 }
0x1861   :  { %v1846_v34 = vmul.f32 %v10364_v61, %v1844_v63 }
0x1863   :  { %1848 = vrot.lane.b32.xlu1 %v1846_v34, %s10858_s29 }
0x18d5   :  { %v1849_v1 = vpop.permute.xlu1 %1848 }
0x18d6   :  { %v1851_v2 = vadd.f32 %v1849_v1, %v1549_v57 }
0x18d8   :  { %10365 = vtanh.f32 %v1851_v2 }
0x18e2   :  { %v10366_v39 = vpop.eup %10365 }
0x18e3   :  { %1855 = vrot.lane.b32.xlu0 %v10366_v39, %s10859_s7 }
0x1955   :  { %v1856_v6 = vpop.permute.xlu0 %1855 }
0x1956   :  { %v1858_v62 = vmul.f32 %v1856_v6, %v1853_v5 }
0x1958   :  { %v1861_v7 = vadd.f32 %v1860_v15, %v1858_v62 }
0x195a   :  { %9090 = vmatmul.mubr.msk.f32.vlgmr.msra.gmra.mrb[18].mxu0 %vm304_vm3, %v1861_v7  ;;  %v1961_v24 = vrot.slane %v1861_v7, 4 }
0x195b   :  { %9880 = vmatpush3.bf16.msra.mxu0 %v11090_v4  ;;  %9111 = vmatprep.mubr.msk.f32.mxu0 %vm10855_vm2, %v10856_v10 }
0x195c   :  { %9881 = vmatprep.subr.bf16.mxu0 %v10854_v3 }
0x195f   :  { %9883 = vmatpush3.bf16.msra.mxu0 %v11101_v9 }
0x1960   :  { %9890 = vmatprep.subr.bf16.mxu0 %v10854_v3 }
0x1a2d   :  { %v1931_v8 = vpop.f32.mrb[18].mxu0 }
0x1a2e   :  { %v1936_v11 = vrot.slane %v1931_v8, 4  ;;  %v9091_v12 = vpop.f32.mrb[19].mxu0 }
0x1a30   :  { %1945 = vrot.lane.b32.xlu1 %v1936_v11, %s10857_s0  ;;  %v1938_v13 = vadd.f32 %v1936_v11, %v1549_v57 }
0x1a32   :  { %v8370_v14 = vmul.f32 -1.442695, %v1938_v13 }
0x1a34   :  { %10367 = vpow2.f32 %v8370_v14 }
0x1a3e   :  { %v10368_v16 = vpop.eup %10367 }
0x1a3f   :  { %v1942_v18 = vadd.f32 1.0, %v10368_v16  ;;  %v1559_v16 = vadd.f32 %v10683_v38, %v11319_v0 }
0x1a41   :  { %10369 = vrcp.f32 %v1942_v18 }
0x1a4b   :  { %v10370_v19 = vpop.eup %10369 }
0x1a4c   :  { %v1955_v26 = vsub.f32 1.0, %v10370_v19  ;;  %v1963_v28 = vmul.f32 %v10370_v19, %v1961_v24 }
0x1aa2   :  { %v1946_v20 = vpop.permute.xlu1 %1945 }
0x1aa3   :  { %v1948_v21 = vmul.f32 %v10370_v19, %v1946_v20 }
0x1aa5   :  { %1950 = vrot.lane.b32.xlu0 %v1948_v21, %s10858_s29 }
0x1b17   :  { %v1951_v22 = vpop.permute.xlu0 %1950 }
0x1b18   :  { %v1953_v23 = vadd.f32 %v1951_v22, %v1549_v57 }
0x1b1a   :  { %10371 = vtanh.f32 %v1953_v23 }
0x1b24   :  { %v10372_v25 = vpop.eup %10371 }
0x1b25   :  { %1957 = vrot.lane.b32.xlu1 %v10372_v25, %s10859_s7 }
0x1b97   :  { %v1958_v27 = vpop.permute.xlu1 %1957 }
0x1b98   :  { %v1960_v29 = vmul.f32 %v1958_v27, %v1955_v26 }
0x1b9a   :  { %v1964_v30 = vadd.f32 %v1963_v28, %v1960_v29 }
0x1b9c   :  { %v1966_v35 = vrot.slane %v1964_v30, 4 }
0x1b9e   :  { %9101 = vmatmul.mubr.msk.f32.vlgmr.msra.gmra.mrb[18].mxu1 %vm304_vm3, %v1966_v35 }
0x1b9f   :  { %9886 = vmatpush3.bf16.msra.mxu1 %v11090_v4  ;;  %9122 = vmatprep.mubr.msk.f32.mxu1 %vm10855_vm2, %v10856_v10 }
0x1ba0   :  { %9887 = vmatprep.subr.bf16.mxu1 %v10854_v3 }
0x1ba3   :  { %9889 = vmatpush3.bf16.msra.mxu1 %v11101_v9 }
0x1ba4   :  { %9896 = vmatprep.subr.bf16.mxu1 %v10854_v3 }
0x1c71   :  { %v2035_v36 = vpop.f32.mrb[18].mxu1 }
0x1c72   :  { %2047 = vrot.lane.b32.xlu0 %v2035_v36, %s10857_s0  ;;  %v9102_v37 = vpop.f32.mrb[19].mxu1  ;;  %v2039_v41 = vadd.f32 %v2035_v36, %v1554_v40 }
0x1c74   :  { %v8372_v32 = vmul.f32 -1.442695, %v2039_v41 }
0x1c76   :  { %10373 = vpow2.f32 %v8372_v32 }
0x1c80   :  { %v10374_v42 = vpop.eup %10373 }
0x1c81   :  { %v2043_v44 = vadd.f32 1.0, %v10374_v42 }
0x1c83   :  { %10375 = vrcp.f32 %v2043_v44 }
0x1c8d   :  { %v10376_v31 = vpop.eup %10375 }
0x1c8e   :  { %v2057_v54 = vsub.f32 1.0, %v10376_v31  ;;  %v2064_v52 = vmul.f32 %v10376_v31, %v1966_v35 }
0x1ce4   :  { %v2048_v45 = vpop.permute.xlu0 %2047 }
0x1ce5   :  { %v2050_v46 = vmul.f32 %v10376_v31, %v2048_v45 }
0x1ce7   :  { %2052 = vrot.lane.b32.xlu1 %v2050_v46, %s10858_s29 }
0x1d59   :  { %v2053_v47 = vpop.permute.xlu1 %2052 }
0x1d5a   :  { %v2055_v33 = vadd.f32 %v2053_v47, %v1554_v40 }
0x1d5c   :  { %10377 = vtanh.f32 %v2055_v33  ;;  %v2373_v33 = vld [vmem:[%s10919_s8] sm:$0xff] }
0x1d66   :  { %v10378_v53 = vpop.eup %10377 }
0x1d67   :  { %2059 = vrot.lane.b32.xlu0 %v10378_v53, %s10859_s7  ;;  %v2374_v53 = vld [vmem:[%s10919_s8 + $0x8] sm:$0xff] }
0x1dd9   :  { %v2060_v55 = vpop.permute.xlu0 %2059 }
0x1dda   :  { %v2062_v56 = vmul.f32 %v2060_v55, %v2057_v54  ;;  %v2375_v54 = vld [vmem:[%s10919_s8 + $0x10] sm:$0xff]  ;;  %v11408_v55 = vpack.c.bf16 %v2374_v53, %v2373_v33 }
0x1ddc   :  { %v2065_v57 = vadd.f32 %v2064_v52, %v2062_v56  ;;  %v2376_v52 = vld [vmem:[%s10919_s8 + $0x18] sm:$0xff] }
0x1ddd   :  { %v11412_v56 = vpack.c.bf16 %v2376_v52, %v2375_v54 }
0x1dde   :  { %9112 = vmatmul.mubr.msk.f32.vlgmr.msra.gmra.mrb[20].mxu0 %vm304_vm3, %v2065_v57  ;;  %v2165_v6 = vrot.slane %v2065_v57, 4 }
0x1ddf   :  { %9892 = vmatpush3.bf16.msra.mxu0 %v11090_v4  ;;  %9133 = vmatprep.mubr.msk.f32.mxu0 %vm10855_vm2, %v10856_v10 }
0x1de0   :  { %9893 = vmatprep.subr.bf16.mxu0 %v10854_v3 }
0x1de3   :  { %9895 = vmatpush3.bf16.msra.mxu0 %v11101_v9 }
0x1de4   :  { %9902 = vmatprep.subr.bf16.mxu0 %v10854_v3 }
0x1eb1   :  { %v2135_v58 = vpop.f32.mrb[20].mxu0 }
0x1eb2   :  { %v2140_v59 = vrot.slane %v2135_v58, 4  ;;  %v9113_v43 = vpop.f32.mrb[21].mxu0  ;;  %v11419_v58 = vld [vmem:[%s10919_s8 + $0x20] sm:$0x7f]  ;;  %s12474_s8 = sld [smem:[#allocation20_spill]] }
0x1eb4   :  { %2149 = vrot.lane.b32.xlu1 %v2140_v59, %s10857_s0  ;;  %v2142_v60 = vadd.f32 %v2140_v59, %v1554_v40 }
0x1eb6   :  { %v8374_v61 = vmul.f32 -1.442695, %v2142_v60 }
0x1eb8   :  { %10379 = vpow2.f32 %v8374_v61 }
0x1ec2   :  { %v10380_v63 = vpop.eup %10379 }
0x1ec3   :  { %v2146_v34 = vadd.f32 1.0, %v10380_v63 }
0x1ec5   :  { %10381 = vrcp.f32 %v2146_v34 }
0x1ecf   :  { %v10382_v4 = vpop.eup %10381 }
0x1ed0   :  { %v2159_v15 = vsub.f32 1.0, %v10382_v4  ;;  %v2167_v7 = vmul.f32 %v10382_v4, %v2165_v6 }
0x1f26   :  { %v2150_v1 = vpop.permute.xlu1 %2149 }
0x1f27   :  { %v2152_v2 = vmul.f32 %v10382_v4, %v2150_v1 }
0x1f29   :  { %2154 = vrot.lane.b32.xlu0 %v2152_v2, %s10858_s29 }
0x1f9b   :  { %v2155_v39 = vpop.permute.xlu0 %2154 }
0x1f9c   :  { %v2157_v9 = vadd.f32 %v2155_v39, %v1554_v40  ;;  %v11431_v39 = vld [vmem:[%s10924_s14] ss:$0 sm:$0xff]  ;;  %s12475_s14 = sld [smem:[#allocation21_spill]] }
0x1f9e   :  { %10383 = vtanh.f32 %v2157_v9 }
0x1fa8   :  { %v10384_v5 = vpop.eup %10383 }
0x1fa9   :  { %2161 = vrot.lane.b32.xlu1 %v10384_v5, %s10859_s7 }
0x201b   :  { %v2162_v62 = vpop.permute.xlu1 %2161 }
0x201c   :  { %v2164_v8 = vmul.f32 %v2162_v62, %v2159_v15 }
0x201e   :  { %v2168_v11 = vadd.f32 %v2167_v7, %v2164_v8 }
0x2020   :  { %v2170_v12 = vrot.slane %v2168_v11, 4 }
0x2022   :  { %9123 = vmatmul.mubr.msk.f32.vlgmr.msra.gmra.mrb[20].mxu1 %vm304_vm3, %v2170_v12 }
0x2023   :  { %9146 = vmatprep.mubr.msk.f32.mxu1 %vm10855_vm2, %v10856_v10  ;;  %9898 = vmatpush3.bf16.msra.mxu1 %v11408_v55 }
0x2024   :  { %9899 = vmatprep.subr.bf16.mxu1 %v10854_v3 }
0x2027   :  { %9901 = vmatpush3.bf16.msra.mxu1 %v11412_v56 }
0x2028   :  { %9144 = vmatprep.subr.mxu1 %v10856_v10 }
0x202b   :  { %9145 = vmatpush3.msk.msra.mxu1 %vm205_vm0, %v11419_v58 }
0x202c   :  { %9914 = vmatprep.subr.bf16.mxu1 %v10854_v3 }
0x20f5   :  { %v2239_v13 = vpop.f32.mrb[20].mxu1 }
0x20f6   :  { %2251 = vrot.lane.b32.xlu0 %v2239_v13, %s10857_s0  ;;  %v9124_v14 = vpop.f32.mrb[21].mxu1  ;;  %v2243_v18 = vadd.f32 %v2239_v13, %v1559_v16  ;;  %v2379_v13 = vld [vmem:[%s10929_s19] sm:$0xff] }
0x20f7   :  { %v2380_v14 = vld [vmem:[%s10929_s19 + $0x8] sm:$0xff] }
0x20f8   :  { %v8376_v19 = vmul.f32 -1.442695, %v2243_v18  ;;  %v2381_v18 = vld [vmem:[%s10929_s19 + $0x10] sm:$0xff] }
0x20fa   :  { %10385 = vpow2.f32 %v8376_v19  ;;  %v2382_v19 = vld [vmem:[%s10929_s19 + $0x18] sm:$0xff]  ;;  %s12476_s19 = sld [smem:[#allocation25_spill]] }
0x2104   :  { %v10386_v20 = vpop.eup %10385 }
0x2105   :  { %v2247_v21 = vadd.f32 1.0, %v10386_v20 }
0x2107   :  { %10387 = vrcp.f32 %v2247_v21  ;;  %v11446_v21 = vpack.c.bf16 %v2382_v19, %v2381_v18 }
0x2111   :  { %v10388_v22 = vpop.eup %10387 }
0x2112   :  { %v2261_v28 = vsub.f32 1.0, %v10388_v22  ;;  %v2268_v0 = vmul.f32 %v10388_v22, %v2170_v12 }
0x2168   :  { %v2252_v23 = vpop.permute.xlu0 %2251 }
0x2169   :  { %v2254_v25 = vmul.f32 %v10388_v22, %v2252_v23 }
0x216b   :  { %2256 = vrot.lane.b32.xlu1 %v2254_v25, %s10858_s29 }
0x21dd   :  { %v2257_v24 = vpop.permute.xlu1 %2256 }
0x21de   :  { %v2259_v26 = vadd.f32 %v2257_v24, %v1559_v16 }
0x21e0   :  { %10389 = vtanh.f32 %v2259_v26 }
0x21ea   :  { %v10390_v27 = vpop.eup %10389 }
0x21eb   :  { %2263 = vrot.lane.b32.xlu0 %v10390_v27, %s10859_s7 }
0x225d   :  { %v2264_v29 = vpop.permute.xlu0 %2263 }
0x225e   :  { %v2266_v30 = vmul.f32 %v2264_v29, %v2261_v28 }
0x2260   :  { %v2269_v35 = vadd.f32 %v2268_v0, %v2266_v30  ;;  %v11465_v0 = vld [vmem:[%s10934_s24] ss:$0 sm:$0xff] }
0x2262   :  { %9134 = vmatmul.mubr.msk.f32.vlgmr.msra.gmra.mrb[22].mxu0 %vm304_vm3, %v2269_v35  ;;  %v2369_v59 = vrot.slane %v2269_v35, 4 }
0x2263   :  { %9157 = vmatprep.mubr.msk.f32.mxu0 %vm10855_vm2, %v10856_v10 }
0x2335   :  { %v2339_v36 = vpop.f32.mrb[22].mxu0 }
0x2336   :  { %v2344_v37 = vrot.slane %v2339_v36, 4  ;;  %v9135_v38 = vpop.f32.mrb[23].mxu0 }
0x2338   :  { %2353 = vrot.lane.b32.xlu1 %v2344_v37, %s10857_s0  ;;  %v2346_v40 = vadd.f32 %v2344_v37, %v1559_v16 }
0x233a   :  { %v8378_v41 = vmul.f32 -1.442695, %v2346_v40 }
0x233c   :  { %10391 = vpow2.f32 %v8378_v41 }
0x2346   :  { %v10392_v32 = vpop.eup %10391 }
0x2347   :  { %v2350_v42 = vadd.f32 1.0, %v10392_v32 }
0x2349   :  { %10393 = vrcp.f32 %v2350_v42 }
0x2353   :  { %v10394_v44 = vpop.eup %10393 }
0x2354   :  { %v2363_v43 = vsub.f32 1.0, %v10394_v44  ;;  %v2371_v61 = vmul.f32 %v10394_v44, %v2369_v59 }
0x23aa   :  { %v2354_v31 = vpop.permute.xlu1 %2353 }
0x23ab   :  { %v2356_v45 = vmul.f32 %v10394_v44, %v2354_v31 }
0x23ad   :  { %2358 = vrot.lane.b32.xlu0 %v2356_v45, %s10858_s29 }
0x241f   :  { %v2359_v46 = vpop.permute.xlu0 %2358 }
0x2420   :  { %v2361_v47 = vadd.f32 %v2359_v46, %v1559_v16  ;;  %v11438_v16 = vpack.c.bf16 %v2380_v14, %v2379_v13 }
0x2422   :  { %10395 = vtanh.f32 %v2361_v47  ;;  %9904 = vmatpush3.bf16.msra.mxu0 %v11438_v16 }
0x2423   :  { %9905 = vmatprep.subr.bf16.mxu0 %v10854_v3 }
0x2426   :  { %9907 = vmatpush3.bf16.msra.mxu0 %v11446_v21 }
0x2427   :  { %9908 = vmatprep.subr.bf16.mxu0 %v10854_v3 }
0x242c   :  { %v10396_v57 = vpop.eup %10395 }
0x242d   :  { %2365 = vrot.lane.b32.xlu1 %v10396_v57, %s10859_s7 }
0x249f   :  { %v2366_v60 = vpop.permute.xlu1 %2365 }
0x24a0   :  { %v2368_v63 = vmul.f32 %v2366_v60, %v2363_v43 }
0x24a2   :  { %v2372_v34 = vadd.f32 %v2371_v61, %v2368_v63 }
0x24a4   :  { %2397 = vrot.lane.b32.xlu0 %v2372_v34, %s10860_s13  ;;  %v2502_v25 = vrot.slane %v2372_v34, 4 }
0x2516   :  { %v2398_v4 = vpop.permute.xlu0 %2397 }
0x2517   :  { %v2400_v1 = vsel %vm186_vm1, %v11294_v51, %v2398_v4 }
0x2518   :  { %v2402_v2 = vrot.slane %v2400_v1, 4 }
0x251a   :  { %9147 = vmatmul.mubr.msk.f32.vlgmr.msra.gmra.mrb[22].mxu1 %vm2403_vm9, %v2402_v2 }
0x251b   :  { %9181 = vmatprep.mubr.msk.f32.mxu1 %vm10855_vm2, %v10856_v10  ;;  %9916 = vmatpush3.bf16.msra.mxu1 %v11438_v16 }
0x251c   :  { %9917 = vmatprep.subr.bf16.mxu1 %v10854_v3 }
0x251f   :  { %9919 = vmatpush3.bf16.msra.mxu1 %v11446_v21 }
0x2520   :  { %9920 = vmatprep.subr.bf16.mxu1 %v10854_v3 }
0x25ed   :  { %v2475_v9 = vpop.f32.mrb[22].mxu1 }
0x25ee   :  { %v2476_v5 = vadd.f32 %v11431_v39, %v2475_v9  ;;  %v9148_v6 = vpop.f32.mrb[23].mxu1 }
0x25f0   :  { %2486 = vrot.lane.b32.xlu1 %v2476_v5, %s10859_s7  ;;  %v8383_v15 = vmul.f32 -1.442695, %v2476_v5 }
0x25f2   :  { %10397 = vpow2.f32 %v8383_v15 }
0x25fc   :  { %v10398_v62 = vpop.eup %10397 }
0x25fd   :  { %v2482_v7 = vadd.f32 1.0, %v10398_v62 }
0x25ff   :  { %10399 = vrcp.f32 %v2482_v7 }
0x2609   :  { %v10400_v8 = vpop.eup %10399 }
0x260a   :  { %v2496_v24 = vsub.f32 1.0, %v10400_v8  ;;  %v2504_v28 = vmul.f32 %v10400_v8, %v2502_v25 }
0x2662   :  { %v2487_v11 = vpop.permute.xlu1 %2486 }
0x2663   :  { %v2489_v12 = vmul.f32 %v10400_v8, %v2487_v11 }
0x2665   :  { %2491 = vrot.lane.b32.xlu0 %v2489_v12, %s10858_s29 }
0x26d7   :  { %v2492_v20 = vpop.permute.xlu0 %2491 }
0x26d8   :  { %v2494_v22 = vadd.f32 %v2492_v20, %v2476_v5 }
0x26da   :  { %10401 = vtanh.f32 %v2494_v22 }
0x26e4   :  { %v10402_v23 = vpop.eup %10401 }
0x26e5   :  { %2498 = vrot.lane.b32.xlu1 %v10402_v23, %s10859_s7 }
0x2757   :  { %v2499_v26 = vpop.permute.xlu1 %2498 }
0x2758   :  { %v2501_v27 = vmul.f32 %v2499_v26, %v2496_v24 }
0x275a   :  { %v2505_v29 = vadd.f32 %v2504_v28, %v2501_v27 }
0x275c   :  { %2579 = vrot.lane.b32.xlu0 %v2505_v29, %s10860_s13  ;;  %9158 = vmatmul.mubr.msk.f32.vlgmr.msra.gmra.mrb[24].mxu0 %vm304_vm3, %v2505_v29 }
0x275d   :  { %9910 = vmatpush3.bf16.msra.mxu0 %v11408_v55  ;;  %9170 = vmatprep.mubr.msk.f32.mxu0 %vm10855_vm2, %v10856_v10 }
0x275e   :  { %9911 = vmatprep.subr.bf16.mxu0 %v10854_v3 }
0x2761   :  { %9913 = vmatpush3.bf16.msra.mxu0 %v11412_v56 }
0x2762   :  { %9168 = vmatprep.subr.mxu0 %v10856_v10 }
0x2765   :  { %9169 = vmatpush3.msk.msra.mxu0 %vm205_vm0, %v11419_v58 }
0x2766   :  { %9926 = vmatprep.subr.bf16.mxu0 %v10854_v3 }
0x27ce   :  { %v2580_v37 = vpop.permute.xlu0 %2579 }
0x282f   :  { %v2575_v30 = vpop.f32.mrb[24].mxu0 }
0x2830   :  { %v11468_v35 = vadd.f32 %v11465_v0, %v2575_v30  ;;  %v9159_v36 = vpop.f32.mrb[25].mxu0 }
0x2832   :  { %v2582_v38 = vsel %vm186_vm1, %v11468_v35, %v2580_v37  ;;  %v3147_v37 = vld [vmem:[%s10944_s6] sm:$0xff] }
0x2833   :  { %9171 = vmatmul.mubr.msk.f32.vlgmr.msra.gmra.mrb[26].mxu0 %vm2403_vm9, %v2582_v38  ;;  %v3148_v38 = vld [vmem:[%s10944_s6 + $0x8] sm:$0xff] }
0x2834   :  { %9928 = vmatpush3.bf16.msra.mxu0 %v11438_v16  ;;  %9205 = vmatprep.mubr.msk.f32.mxu0 %vm10855_vm2, %v10856_v10 }
0x2835   :  { %9929 = vmatprep.subr.bf16.mxu0 %v10854_v3 }
0x2838   :  { %9931 = vmatpush3.bf16.msra.mxu0 %v11446_v21 }
0x2839   :  { %9932 = vmatprep.subr.bf16.mxu0 %v10854_v3 }
0x2906   :  { %v2652_v40 = vpop.f32.mrb[26].mxu0 }
0x2907   :  { %v2653_v41 = vadd.f32 %v11431_v39, %v2652_v40  ;;  %v9172_v32 = vpop.f32.mrb[27].mxu0  ;;  %v3149_v40 = vld [vmem:[%s10944_s6 + $0x10] sm:$0xff] }
0x2909   :  { %2663 = vrot.lane.b32.xlu1 %v2653_v41, %s10859_s7  ;;  %v8387_v42 = vmul.f32 -1.442695, %v2653_v41 }
0x290b   :  { %10403 = vpow2.f32 %v8387_v42 }
0x2915   :  { %v10404_v44 = vpop.eup %10403 }
0x2916   :  { %v2659_v31 = vadd.f32 1.0, %v10404_v44 }
0x2918   :  { %10405 = vrcp.f32 %v2659_v31  ;;  %v3146_v31 = vld [vmem:[%s12470_s17] sm:$0x7f] }
0x2922   :  { %v10406_v45 = vpop.eup %10405 }
0x2923   :  { %v2673_v52 = vsub.f32 1.0, %v10406_v45  ;;  %v2679_v59 = vmul.f32 %v10406_v45, %v2505_v29 }
0x297b   :  { %v2664_v46 = vpop.permute.xlu1 %2663 }
0x297c   :  { %v2666_v47 = vmul.f32 %v10406_v45, %v2664_v46 }
0x297e   :  { %2668 = vrot.lane.b32.xlu0 %v2666_v47, %s10858_s29 }
0x29f0   :  { %v2669_v33 = vpop.permute.xlu0 %2668 }
0x29f1   :  { %v2671_v53 = vadd.f32 %v2669_v33, %v2653_v41  ;;  %v11534_v41 = vpack.c.bf16 %v3148_v38, %v3147_v37 }
0x29f3   :  { %10407 = vtanh.f32 %v2671_v53 }
0x29fd   :  { %v10408_v54 = vpop.eup %10407 }
0x29fe   :  { %2675 = vrot.lane.b32.xlu1 %v10408_v54, %s10859_s7 }
0x2a70   :  { %v2676_v57 = vpop.permute.xlu1 %2675 }
0x2a71   :  { %v2678_v43 = vmul.f32 %v2676_v57, %v2673_v52 }
0x2a73   :  { %v2680_v60 = vadd.f32 %v2679_v59, %v2678_v43  ;;  %v11574_v59 = vld [vmem:[%s12471_s21] ss:$0 sm:$0xff] }
0x2a75   :  { %2754 = vrot.lane.b32.xlu0 %v2680_v60, %s10860_s13  ;;  %9182 = vmatmul.mubr.msk.f32.vlgmr.msra.gmra.mrb[24].mxu1 %vm304_vm3, %v2680_v60 }
0x2a76   :  { %9922 = vmatpush3.bf16.msra.mxu1 %v11408_v55  ;;  %9194 = vmatprep.mubr.msk.f32.mxu1 %vm10855_vm2, %v10856_v10 }
0x2a77   :  { %9923 = vmatprep.subr.bf16.mxu1 %v10854_v3 }
0x2a7a   :  { %9925 = vmatpush3.bf16.msra.mxu1 %v11412_v56 }
0x2a7b   :  { %9192 = vmatprep.subr.mxu1 %v10856_v10 }
0x2a7e   :  { %9193 = vmatpush3.msk.msra.mxu1 %vm205_vm0, %v11419_v58 }
0x2a7f   :  { %9938 = vmatprep.subr.bf16.mxu1 %v10854_v3 }
0x2ae7   :  { %v2755_v4 = vpop.permute.xlu0 %2754 }
0x2b48   :  { %v2750_v61 = vpop.f32.mrb[24].mxu1 }
0x2b49   :  { %v11495_v63 = vadd.f32 %v11465_v0, %v2750_v61  ;;  %v9183_v34 = vpop.f32.mrb[25].mxu1 }
0x2b4b   :  { %v2757_v1 = vsel %vm186_vm1, %v11495_v63, %v2755_v4 }
0x2b4c   :  { %9195 = vmatmul.mubr.msk.f32.vlgmr.msra.gmra.mrb[26].mxu1 %vm2403_vm9, %v2757_v1 }
0x2b4d   :  { %9940 = vmatpush3.bf16.msra.mxu1 %v11438_v16  ;;  %9229 = vmatprep.mubr.msk.f32.mxu1 %vm10855_vm2, %v10856_v10 }
0x2b4e   :  { %9941 = vmatprep.subr.bf16.mxu1 %v10854_v3 }
0x2b51   :  { %9943 = vmatpush3.bf16.msra.mxu1 %v11446_v21 }
0x2b52   :  { %9232 = vmatprep.subr.msk.mxu1 %vm205_vm0, %v3146_v31 }
0x2c1f   :  { %v2827_v2 = vpop.f32.mrb[26].mxu1 }
0x2c20   :  { %v2828_v9 = vadd.f32 %v11431_v39, %v2827_v2  ;;  %v9196_v5 = vpop.f32.mrb[27].mxu1 }
0x2c22   :  { %2838 = vrot.lane.b32.xlu1 %v2828_v9, %s10859_s7  ;;  %v8391_v6 = vmul.f32 -1.442695, %v2828_v9 }
0x2c24   :  { %10409 = vpow2.f32 %v8391_v6 }
0x2c2e   :  { %v10410_v15 = vpop.eup %10409 }
0x2c2f   :  { %v2834_v62 = vadd.f32 1.0, %v10410_v15 }
0x2c31   :  { %10411 = vrcp.f32 %v2834_v62 }
0x2c3b   :  { %v10412_v7 = vpop.eup %10411 }
0x2c3c   :  { %v2848_v16 = vsub.f32 1.0, %v10412_v7  ;;  %v2854_v19 = vmul.f32 %v10412_v7, %v2680_v60 }
0x2c94   :  { %v2839_v8 = vpop.permute.xlu1 %2838 }
0x2c95   :  { %v2841_v11 = vmul.f32 %v10412_v7, %v2839_v8 }
0x2c97   :  { %2843 = vrot.lane.b32.xlu0 %v2841_v11, %s10858_s29 }
0x2d09   :  { %v2844_v12 = vpop.permute.xlu0 %2843 }
0x2d0a   :  { %v2846_v13 = vadd.f32 %v2844_v12, %v2828_v9 }
0x2d0c   :  { %10413 = vtanh.f32 %v2846_v13 }
0x2d16   :  { %v10414_v14 = vpop.eup %10413 }
0x2d17   :  { %2850 = vrot.lane.b32.xlu1 %v10414_v14, %s10859_s7 }
0x2d89   :  { %v2851_v18 = vpop.permute.xlu1 %2850 }
0x2d8a   :  { %v2853_v20 = vmul.f32 %v2851_v18, %v2848_v16 }
0x2d8c   :  { %v2855_v21 = vadd.f32 %v2854_v19, %v2853_v20 }
0x2d8e   :  { %2929 = vrot.lane.b32.xlu0 %v2855_v21, %s10860_s13  ;;  %9206 = vmatmul.mubr.msk.f32.vlgmr.msra.gmra.mrb[28].mxu0 %vm304_vm3, %v2855_v21 }
0x2d8f   :  { %9934 = vmatpush3.bf16.msra.mxu0 %v11408_v55  ;;  %9218 = vmatprep.mubr.msk.f32.mxu0 %vm10855_vm2, %v10856_v10 }
0x2d90   :  { %9935 = vmatprep.subr.bf16.mxu0 %v10854_v3 }
0x2d93   :  { %9937 = vmatpush3.bf16.msra.mxu0 %v11412_v56 }
0x2d94   :  { %9216 = vmatprep.subr.mxu0 %v10856_v10 }
0x2d97   :  { %9217 = vmatpush3.msk.msra.mxu0 %vm205_vm0, %v11419_v58 }
0x2d98   :  { %9944 = vmatprep.subr.bf16.mxu0 %v10854_v3 }
0x2e00   :  { %v2930_v55 = vpop.permute.xlu0 %2929 }
0x2e61   :  { %v2925_v22 = vpop.f32.mrb[28].mxu0 }
0x2e62   :  { %v11521_v23 = vadd.f32 %v11465_v0, %v2925_v22  ;;  %v9207_v25 = vpop.f32.mrb[29].mxu0 }
0x2e64   :  { %v2932_v24 = vsel %vm186_vm1, %v11521_v23, %v2930_v55 }
0x2e65   :  { %9219 = vmatmul.mubr.msk.f32.vlgmr.msra.gmra.mrb[30].mxu0 %vm2403_vm9, %v2932_v24 }
0x2e66   :  { %9248 = vmatprep.mubr.msk.f32.mxu0 %vm10855_vm2, %v10856_v10  ;;  %9946 = vmatpush3.bf16.msra.mxu0 %v11534_v41 }
0x2e67   :  { %9947 = vmatprep.subr.bf16.mxu0 %v10854_v3 }
0x2f38   :  { %v3002_v56 = vpop.f32.mrb[30].mxu0 }
0x2f39   :  { %v3003_v58 = vadd.f32 %v11431_v39, %v3002_v56  ;;  %v9220_v26 = vpop.f32.mrb[31].mxu0  ;;  %v3150_v39 = vld [vmem:[%s10944_s6 + $0x18] sm:$0xff] }
0x2f3a   :  { %v11538_v32 = vpack.c.bf16 %v3150_v39, %v3149_v40 }
0x2f3b   :  { %3013 = vrot.lane.b32.xlu1 %v3003_v58, %s10859_s7  ;;  %v8395_v27 = vmul.f32 -1.442695, %v3003_v58 }
0x2f3c   :  { %9949 = vmatpush3.bf16.msra.mxu0 %v11538_v32 }
0x2f3d   :  { %10415 = vpow2.f32 %v8395_v27  ;;  %9956 = vmatprep.subr.bf16.mxu0 %v10854_v3 }
0x2f3f   :  { %9249 = vmatmul.mubr.f32.vlgmr.msra.gmra.mrb[32].mxu0 %v10856_v10 }
0x2f40   :  { %9958 = vmatpush3.bf16.msra.mxu0 %v11534_v41  ;;  %9270 = vmatprep.mubr.msk.f32.mxu0 %vm10855_vm2, %v10856_v10 }
0x2f41   :  { %9959 = vmatprep.subr.bf16.mxu0 %v10854_v3 }
0x2f44   :  { %9961 = vmatpush3.bf16.msra.mxu0 %v11538_v32 }
0x2f45   :  { %9968 = vmatprep.subr.bf16.mxu0 %v10854_v3 }
0x2f47   :  { %v10416_v28 = vpop.eup %10415 }
0x2f48   :  { %v3009_v29 = vadd.f32 1.0, %v10416_v28 }
0x2f4a   :  { %10417 = vrcp.f32 %v3009_v29 }
0x2f54   :  { %v10418_v0 = vpop.eup %10417 }
0x2f55   :  { %v3023_v33 = vsub.f32 1.0, %v10418_v0  ;;  %v3029_v54 = vmul.f32 %v10418_v0, %v2855_v21 }
0x2fad   :  { %v3014_v30 = vpop.permute.xlu1 %3013 }
0x2fae   :  { %v3016_v36 = vmul.f32 %v10418_v0, %v3014_v30 }
0x2fb0   :  { %3018 = vrot.lane.b32.xlu0 %v3016_v36, %s10858_s29 }
0x3012   :  { %v3312_v46 = vpop.f32.mrb[32].mxu0 }
0x3013   :  { %v9250_v47 = vpop.f32.mrb[33].mxu0  ;;  %3324 = vrot.lane.b32.xlu0 %v3312_v46, %s10857_s0 }
0x3022   :  { %v3019_v42 = vpop.permute.xlu0 %3018 }
0x3023   :  { %v3021_v44 = vadd.f32 %v3019_v42, %v3003_v58 }
0x3025   :  { %10419 = vtanh.f32 %v3021_v44 }
0x302f   :  { %v10420_v45 = vpop.eup %10419 }
0x3030   :  { %3025 = vrot.lane.b32.xlu1 %v10420_v45, %s10859_s7 }
0x3085   :  { %v3325_v1 = vpop.permute.xlu0 %3324 }
0x30a2   :  { %v3026_v53 = vpop.permute.xlu1 %3025 }
0x30a3   :  { %v3028_v52 = vmul.f32 %v3026_v53, %v3023_v33 }
0x30a5   :  { %v3030_v57 = vadd.f32 %v3029_v54, %v3028_v52 }
0x30a7   :  { %9230 = vmatmul.mubr.msk.f32.vlgmr.msra.gmra.mrb[28].mxu1 %vm304_vm3, %v3030_v57 }
0x30a8   :  { %9233 = vmatpush3.msk.msra.mxu1 %vm205_vm0, %v3146_v31  ;;  %9234 = vmatprep.mubr.msk.f32.mxu1 %vm186_vm1, %v11275_v48 }
0x30a9   :  { %9950 = vmatprep.subr.bf16.mxu1 %v10854_v3 }
0x30ab   :  { %9235 = vmatmul.mubr.msk.f32.vlgmr.msra.gmra.mrb[30].mxu1 %vm186_vm1, %v11282_v49 }
0x30ac   :  { %9952 = vmatpush3.bf16.msra.mxu1 %v11534_v41  ;;  %9237 = vmatprep.mubr.msk.f32.mxu1 %vm186_vm1, %v11286_v50 }
0x30ad   :  { %9953 = vmatprep.subr.bf16.mxu1 %v10854_v3 }
0x30af   :  { %9238 = vmatmul.mubr.msk.f32.gmra.mrb[32].mxu1 %vm186_vm1, %v11294_v51 }
0x30b0   :  { %9955 = vmatpush3.bf16.msra.mxu1 %v11538_v32  ;;  %9259 = vmatprep.mubr.msk.f32.mxu1 %vm10855_vm2, %v10856_v10 }
0x30b1   :  { %9962 = vmatprep.subr.bf16.mxu1 %v10854_v3 }
0x317a   :  { %v11571_v48 = vpop.f32.mrb[28].mxu1 }
0x317b   :  { %v9231_v49 = vpop.f32.mrb[29].mxu1 }
0x317e   :  { %v11576_v43 = vpop.f32.mrb[30].mxu1 }
0x317f   :  { %v3227_v50 = vpop.f32.mrb[31].mxu1  ;;  %v3233_v42 = vadd.f32 %v11576_v43, %v11574_v59 }
0x3180   :  { %v3228_v60 = vadd.f32 %v11574_v59, %v3227_v50 }
0x3182   :  { %v3316_v61 = vadd.f32 %v3312_v46, %v3228_v60  ;;  %v11580_v15 = vpop.f32.mrb[32].mxu1 }
0x3183   :  { %v11582_v62 = vpop.f32.mrb[33].mxu1 }
0x3184   :  { %v8403_v34 = vmul.f32 -1.442695, %v3316_v61 }
0x3186   :  { %10421 = vpow2.f32 %v8403_v34 }
0x3190   :  { %v10422_v51 = vpop.eup %10421 }
0x3191   :  { %v3320_v4 = vadd.f32 1.0, %v10422_v51 }
0x3193   :  { %10423 = vrcp.f32 %v3320_v4 }
0x319d   :  { %v10424_v2 = vpop.eup %10423 }
0x319e   :  { %v3327_v9 = vmul.f32 %v10424_v2, %v3325_v1  ;;  %v3334_v8 = vsub.f32 1.0, %v10424_v2  ;;  %v3340_v12 = vmul.f32 0.0, %v10424_v2 }
0x31a0   :  { %3329 = vrot.lane.b32.xlu1 %v3327_v9, %s10858_s29 }
0x3212   :  { %v3330_v5 = vpop.permute.xlu1 %3329 }
0x3213   :  { %v3332_v6 = vadd.f32 %v3330_v5, %v3228_v60 }
0x3215   :  { %10425 = vtanh.f32 %v3332_v6 }
0x321f   :  { %v10426_v7 = vpop.eup %10425 }
0x3220   :  { %3336 = vrot.lane.b32.xlu0 %v10426_v7, %s10859_s7 }
0x3292   :  { %v3337_v11 = vpop.permute.xlu0 %3336 }
0x3293   :  { %v3339_v13 = vmul.f32 %v3337_v11, %v3334_v8 }
0x3295   :  { %v3341_v14 = vadd.f32 %v3340_v12, %v3339_v13 }
0x3297   :  { %9260 = vmatmul.mubr.msk.f32.vlgmr.msra.gmra.mrb[34].mxu1 %vm304_vm3, %v3341_v14  ;;  %v3441_v28 = vrot.slane %v3341_v14, 4 }
0x3298   :  { %9964 = vmatpush3.bf16.msra.mxu1 %v11534_v41  ;;  %9281 = vmatprep.mubr.msk.f32.mxu1 %vm10855_vm2, %v10856_v10 }
0x3299   :  { %9965 = vmatprep.subr.bf16.mxu1 %v10854_v3 }
0x329c   :  { %9967 = vmatpush3.bf16.msra.mxu1 %v11538_v32 }
0x329d   :  { %9974 = vmatprep.subr.bf16.mxu1 %v10854_v3 }
0x336a   :  { %v3411_v16 = vpop.f32.mrb[34].mxu1 }
0x336b   :  { %v3416_v18 = vrot.slane %v3411_v16, 4  ;;  %v9261_v19 = vpop.f32.mrb[35].mxu1 }
0x336d   :  { %3425 = vrot.lane.b32.xlu1 %v3416_v18, %s10857_s0  ;;  %v3418_v20 = vadd.f32 %v3416_v18, %v3228_v60 }
0x336f   :  { %v8405_v21 = vmul.f32 -1.442695, %v3418_v20 }
0x3371   :  { %10427 = vpow2.f32 %v8405_v21 }
0x337b   :  { %v10428_v22 = vpop.eup %10427 }
0x337c   :  { %v3422_v25 = vadd.f32 1.0, %v10428_v22 }
0x337e   :  { %10429 = vrcp.f32 %v3422_v25 }
0x3388   :  { %v10430_v55 = vpop.eup %10429 }
0x3389   :  { %v3435_v29 = vsub.f32 1.0, %v10430_v55  ;;  %v3443_v30 = vmul.f32 %v10430_v55, %v3441_v28 }
0x33df   :  { %v3426_v24 = vpop.permute.xlu1 %3425 }
0x33e0   :  { %v3428_v56 = vmul.f32 %v10430_v55, %v3426_v24  ;;  %v3238_v24 = vadd.f32 %v11574_v59, %v11582_v62 }
0x33e2   :  { %3430 = vrot.lane.b32.xlu0 %v3428_v56, %s10858_s29 }
0x3454   :  { %v3431_v58 = vpop.permute.xlu0 %3430 }
0x3455   :  { %v3433_v26 = vadd.f32 %v3431_v58, %v3228_v60 }
0x3457   :  { %10431 = vtanh.f32 %v3433_v26 }
0x3461   :  { %v10432_v27 = vpop.eup %10431 }
0x3462   :  { %3437 = vrot.lane.b32.xlu1 %v10432_v27, %s10859_s7 }
0x34d4   :  { %v3438_v0 = vpop.permute.xlu1 %3437 }
0x34d5   :  { %v3440_v36 = vmul.f32 %v3438_v0, %v3435_v29 }
0x34d7   :  { %v3444_v37 = vadd.f32 %v3443_v30, %v3440_v36 }
0x34d9   :  { %v3446_v38 = vrot.slane %v3444_v37, 4 }
0x34db   :  { %9271 = vmatmul.mubr.msk.f32.vlgmr.msra.gmra.mrb[34].mxu0 %vm304_vm3, %v3446_v38 }
0x34dc   :  { %9970 = vmatpush3.bf16.msra.mxu0 %v11534_v41  ;;  %9292 = vmatprep.mubr.msk.f32.mxu0 %vm10855_vm2, %v10856_v10 }
0x34dd   :  { %9971 = vmatprep.subr.bf16.mxu0 %v10854_v3 }
0x34e0   :  { %9973 = vmatpush3.bf16.msra.mxu0 %v11538_v32 }
0x34e1   :  { %9980 = vmatprep.subr.bf16.mxu0 %v10854_v3 }
0x35ae   :  { %v3515_v40 = vpop.f32.mrb[34].mxu0 }
0x35af   :  { %3527 = vrot.lane.b32.xlu0 %v3515_v40, %s10857_s0  ;;  %v9272_v39 = vpop.f32.mrb[35].mxu0  ;;  %v3519_v44 = vadd.f32 %v3515_v40, %v3233_v42 }
0x35b1   :  { %v8407_v31 = vmul.f32 -1.442695, %v3519_v44 }
0x35b3   :  { %10433 = vpow2.f32 %v8407_v31 }
0x35bd   :  { %v10434_v45 = vpop.eup %10433 }
0x35be   :  { %v3523_v46 = vadd.f32 1.0, %v10434_v45 }
0x35c0   :  { %10435 = vrcp.f32 %v3523_v46 }
0x35ca   :  { %v10436_v47 = vpop.eup %10435 }
0x35cb   :  { %v3537_v49 = vsub.f32 1.0, %v10436_v47  ;;  %v3544_v43 = vmul.f32 %v10436_v47, %v3446_v38 }
0x3621   :  { %v3528_v33 = vpop.permute.xlu0 %3527 }
0x3622   :  { %v3530_v53 = vmul.f32 %v10436_v47, %v3528_v33 }
0x3624   :  { %3532 = vrot.lane.b32.xlu1 %v3530_v53, %s10858_s29 }
0x3696   :  { %v3533_v54 = vpop.permute.xlu1 %3532 }
0x3697   :  { %v3535_v52 = vadd.f32 %v3533_v54, %v3233_v42 }
0x3699   :  { %10437 = vtanh.f32 %v3535_v52 }
0x36a3   :  { %v10438_v57 = vpop.eup %10437 }
0x36a4   :  { %3539 = vrot.lane.b32.xlu0 %v10438_v57, %s10859_s7 }
0x3716   :  { %v3540_v50 = vpop.permute.xlu0 %3539 }
0x3717   :  { %v3542_v60 = vmul.f32 %v3540_v50, %v3537_v49 }
0x3719   :  { %v3545_v61 = vadd.f32 %v3544_v43, %v3542_v60 }
0x371b   :  { %9282 = vmatmul.mubr.msk.f32.vlgmr.msra.gmra.mrb[36].mxu1 %vm304_vm3, %v3545_v61  ;;  %v3645_v14 = vrot.slane %v3545_v61, 4 }
0x371c   :  { %9976 = vmatpush3.bf16.msra.mxu1 %v11534_v41  ;;  %9303 = vmatprep.mubr.msk.f32.mxu1 %vm10855_vm2, %v10856_v10 }
0x371d   :  { %9977 = vmatprep.subr.bf16.mxu1 %v10854_v3 }
0x3720   :  { %9979 = vmatpush3.bf16.msra.mxu1 %v11538_v32 }
0x3721   :  { %9986 = vmatprep.subr.bf16.mxu1 %v10854_v3 }
0x37ee   :  { %v3615_v34 = vpop.f32.mrb[36].mxu1 }
0x37ef   :  { %v3620_v51 = vrot.slane %v3615_v34, 4  ;;  %v9283_v4 = vpop.f32.mrb[37].mxu1 }
0x37f1   :  { %3629 = vrot.lane.b32.xlu1 %v3620_v51, %s10857_s0  ;;  %v3622_v1 = vadd.f32 %v3620_v51, %v3233_v42 }
0x37f3   :  { %v8409_v2 = vmul.f32 -1.442695, %v3622_v1 }
0x37f5   :  { %10439 = vpow2.f32 %v8409_v2 }
0x37ff   :  { %v10440_v9 = vpop.eup %10439 }
0x3800   :  { %v3626_v5 = vadd.f32 1.0, %v10440_v9  ;;  %v3243_v9 = vadd.f32 %v11580_v15, %v11574_v59 }
0x3802   :  { %10441 = vrcp.f32 %v3626_v5 }
0x380c   :  { %v10442_v6 = vpop.eup %10441 }
0x380d   :  { %v3639_v16 = vsub.f32 1.0, %v10442_v6  ;;  %v3647_v19 = vmul.f32 %v10442_v6, %v3645_v14 }
0x3863   :  { %v3630_v7 = vpop.permute.xlu1 %3629 }
0x3864   :  { %v3632_v8 = vmul.f32 %v10442_v6, %v3630_v7 }
0x3866   :  { %3634 = vrot.lane.b32.xlu0 %v3632_v8, %s10858_s29 }
0x38d8   :  { %v3635_v11 = vpop.permute.xlu0 %3634 }
0x38d9   :  { %v3637_v12 = vadd.f32 %v3635_v11, %v3233_v42 }
0x38db   :  { %10443 = vtanh.f32 %v3637_v12 }
0x38e5   :  { %v10444_v13 = vpop.eup %10443 }
0x38e6   :  { %3641 = vrot.lane.b32.xlu1 %v10444_v13, %s10859_s7 }
0x3958   :  { %v3642_v18 = vpop.permute.xlu1 %3641 }
0x3959   :  { %v3644_v20 = vmul.f32 %v3642_v18, %v3639_v16 }
0x395b   :  { %v3648_v21 = vadd.f32 %v3647_v19, %v3644_v20 }
0x395d   :  { %v3650_v22 = vrot.slane %v3648_v21, 4 }
0x395f   :  { %9293 = vmatmul.mubr.msk.f32.vlgmr.msra.gmra.mrb[36].mxu0 %vm304_vm3, %v3650_v22 }
0x3960   :  { %9982 = vmatpush3.bf16.msra.mxu0 %v11534_v41  ;;  %9314 = vmatprep.mubr.msk.f32.mxu0 %vm10855_vm2, %v10856_v10 }
0x3961   :  { %9983 = vmatprep.subr.bf16.mxu0 %v10854_v3 }
0x3964   :  { %9985 = vmatpush3.bf16.msra.mxu0 %v11538_v32 }
0x3965   :  { %9992 = vmatprep.subr.bf16.mxu0 %v10854_v3 }
0x3a32   :  { %v3719_v25 = vpop.f32.mrb[36].mxu0 }
0x3a33   :  { %3731 = vrot.lane.b32.xlu0 %v3719_v25, %s10857_s0  ;;  %v9294_v55 = vpop.f32.mrb[37].mxu0  ;;  %v3723_v56 = vadd.f32 %v3719_v25, %v3238_v24 }
0x3a35   :  { %v8411_v58 = vmul.f32 -1.442695, %v3723_v56 }
0x3a37   :  { %10445 = vpow2.f32 %v8411_v58 }
0x3a41   :  { %v10446_v26 = vpop.eup %10445 }
0x3a42   :  { %v3727_v27 = vadd.f32 1.0, %v10446_v26 }
0x3a44   :  { %10447 = vrcp.f32 %v3727_v27 }
0x3a4e   :  { %v10448_v28 = vpop.eup %10447 }
0x3a4f   :  { %v3741_v38 = vsub.f32 1.0, %v10448_v28  ;;  %v3748_v62 = vmul.f32 %v10448_v28, %v3650_v22 }
0x3aa5   :  { %v3732_v29 = vpop.permute.xlu0 %3731 }
0x3aa6   :  { %v3734_v0 = vmul.f32 %v10448_v28, %v3732_v29 }
0x3aa8   :  { %3736 = vrot.lane.b32.xlu1 %v3734_v0, %s10858_s29 }
0x3b1a   :  { %v3737_v30 = vpop.permute.xlu1 %3736 }
0x3b1b   :  { %v3739_v36 = vadd.f32 %v3737_v30, %v3238_v24 }
0x3b1d   :  { %10449 = vtanh.f32 %v3739_v36  ;;  %v4057_v36 = vld [vmem:[%s12472_s25] sm:$0xff] }
0x3b27   :  { %v10450_v37 = vpop.eup %10449 }
0x3b28   :  { %3743 = vrot.lane.b32.xlu0 %v10450_v37, %s10859_s7  ;;  %v4058_v37 = vld [vmem:[%s12472_s25 + $0x8] sm:$0xff] }
0x3b9a   :  { %v3744_v40 = vpop.permute.xlu0 %3743 }
0x3b9b   :  { %v3746_v39 = vmul.f32 %v3744_v40, %v3741_v38  ;;  %v4059_v38 = vld [vmem:[%s12472_s25 + $0x10] sm:$0xff]  ;;  %v11655_v40 = vpack.c.bf16 %v4058_v37, %v4057_v36 }
0x3b9d   :  { %v3749_v42 = vadd.f32 %v3748_v62, %v3746_v39  ;;  %v4060_v62 = vld [vmem:[%s12472_s25 + $0x18] sm:$0xff] }
0x3b9e   :  { %v11659_v39 = vpack.c.bf16 %v4060_v62, %v4059_v38 }
0x3b9f   :  { %9304 = vmatmul.mubr.msk.f32.vlgmr.msra.gmra.mrb[38].mxu1 %vm304_vm3, %v3749_v42  ;;  %v3849_v50 = vrot.slane %v3749_v42, 4 }
0x3ba0   :  { %9988 = vmatpush3.bf16.msra.mxu1 %v11534_v41  ;;  %9325 = vmatprep.mubr.msk.f32.mxu1 %vm10855_vm2, %v10856_v10 }
0x3ba1   :  { %9989 = vmatprep.subr.bf16.mxu1 %v10854_v3 }
0x3ba4   :  { %9991 = vmatpush3.bf16.msra.mxu1 %v11538_v32 }
0x3ba5   :  { %9998 = vmatprep.subr.bf16.mxu1 %v10854_v3 }
0x3c72   :  { %v3819_v44 = vpop.f32.mrb[38].mxu1 }
0x3c73   :  { %v3824_v31 = vrot.slane %v3819_v44, 4  ;;  %v9305_v45 = vpop.f32.mrb[39].mxu1  ;;  %v11666_v44 = vld [vmem:[%s12472_s25 + $0x20] sm:$0x7f] }
0x3c75   :  { %3833 = vrot.lane.b32.xlu1 %v3824_v31, %s10857_s0  ;;  %v3826_v46 = vadd.f32 %v3824_v31, %v3238_v24 }
0x3c77   :  { %v8413_v47 = vmul.f32 -1.442695, %v3826_v46 }
0x3c79   :  { %10451 = vpow2.f32 %v8413_v47 }
0x3c83   :  { %v10452_v33 = vpop.eup %10451 }
0x3c84   :  { %v3830_v53 = vadd.f32 1.0, %v10452_v33 }
0x3c86   :  { %10453 = vrcp.f32 %v3830_v53 }
0x3c90   :  { %v10454_v41 = vpop.eup %10453 }
0x3c91   :  { %v3843_v43 = vsub.f32 1.0, %v10454_v41  ;;  %v3851_v61 = vmul.f32 %v10454_v41, %v3849_v50 }
0x3ce7   :  { %v3834_v54 = vpop.permute.xlu1 %3833 }
0x3ce8   :  { %v3836_v52 = vmul.f32 %v10454_v41, %v3834_v54  ;;  %v11673_v54 = vld [vmem:[%s10884_s9 + $0x18] sm:$0xff] }
0x3cea   :  { %3838 = vrot.lane.b32.xlu0 %v3836_v52, %s10858_s29 }
0x3d5c   :  { %v3839_v57 = vpop.permute.xlu0 %3838 }
0x3d5d   :  { %v3841_v32 = vadd.f32 %v3839_v57, %v3238_v24 }
0x3d5f   :  { %10455 = vtanh.f32 %v3841_v32  ;;  %v11688_v32 = vld [vmem:[%s12473_s3] ss:$0 sm:$0xff] }
0x3d69   :  { %v10456_v49 = vpop.eup %10455 }
0x3d6a   :  { %3845 = vrot.lane.b32.xlu1 %v10456_v49, %s10859_s7 }
0x3ddc   :  { %v3846_v60 = vpop.permute.xlu1 %3845 }
0x3ddd   :  { %v3848_v34 = vmul.f32 %v3846_v60, %v3843_v43 }
0x3ddf   :  { %v3852_v51 = vadd.f32 %v3851_v61, %v3848_v34 }
0x3de1   :  { %v3854_v4 = vrot.slane %v3852_v51, 4 }
0x3de3   :  { %9315 = vmatmul.mubr.msk.f32.vlgmr.msra.gmra.mrb[38].mxu0 %vm304_vm3, %v3854_v4 }
0x3de4   :  { %9338 = vmatprep.mubr.msk.f32.mxu0 %vm10855_vm2, %v10856_v10  ;;  %9994 = vmatpush3.bf16.msra.mxu0 %v11655_v40 }
0x3de5   :  { %9995 = vmatprep.subr.bf16.mxu0 %v10854_v3 }
0x3de8   :  { %9997 = vmatpush3.bf16.msra.mxu0 %v11659_v39 }
0x3de9   :  { %9336 = vmatprep.subr.mxu0 %v10856_v10 }
0x3dec   :  { %9337 = vmatpush3.msk.msra.mxu0 %vm205_vm0, %v11666_v44 }
0x3ded   :  { %10004 = vmatprep.subr.bf16.mxu0 %v10854_v3 }
0x3eb6   :  { %v3923_v1 = vpop.f32.mrb[38].mxu0 }
0x3eb7   :  { %3935 = vrot.lane.b32.xlu0 %v3923_v1, %s10857_s0  ;;  %v9316_v2 = vpop.f32.mrb[39].mxu0  ;;  %v3927_v5 = vadd.f32 %v3923_v1, %v3243_v9 }
0x3eb8   :  { %v4063_v2 = vld [vmem:[%s12474_s8] sm:$0xff] }
0x3eb9   :  { %v8415_v6 = vmul.f32 -1.442695, %v3927_v5 }
0x3ebb   :  { %10457 = vpow2.f32 %v8415_v6  ;;  %v4065_v6 = vld [vmem:[%s12474_s8 + $0x10] sm:$0xff] }
0x3ec5   :  { %v10458_v7 = vpop.eup %10457 }
0x3ec6   :  { %v3931_v8 = vadd.f32 1.0, %v10458_v7  ;;  %v4066_v7 = vld [vmem:[%s12474_s8 + $0x18] sm:$0xff] }
0x3ec8   :  { %10459 = vrcp.f32 %v3931_v8 }
0x3ed2   :  { %v10460_v11 = vpop.eup %10459 }
0x3ed3   :  { %v3945_v19 = vsub.f32 1.0, %v10460_v11  ;;  %v3952_v59 = vmul.f32 %v10460_v11, %v3854_v4 }
0x3f29   :  { %v3936_v12 = vpop.permute.xlu0 %3935 }
0x3f2a   :  { %v3938_v13 = vmul.f32 %v10460_v11, %v3936_v12  ;;  %v11701_v11 = vpack.c.bf16 %v4066_v7, %v4065_v6 }
0x3f2c   :  { %3940 = vrot.lane.b32.xlu1 %v3938_v13, %s10858_s29 }
0x3f9e   :  { %v3941_v14 = vpop.permute.xlu1 %3940 }
0x3f9f   :  { %v3943_v16 = vadd.f32 %v3941_v14, %v3243_v9 }
0x3fa1   :  { %10461 = vtanh.f32 %v3943_v16 }
0x3fab   :  { %v10462_v18 = vpop.eup %10461 }
0x3fac   :  { %3947 = vrot.lane.b32.xlu0 %v10462_v18, %s10859_s7 }
0x401e   :  { %v3948_v20 = vpop.permute.xlu0 %3947 }
0x401f   :  { %v3950_v15 = vmul.f32 %v3948_v20, %v3945_v19 }
0x4021   :  { %v3953_v21 = vadd.f32 %v3952_v59, %v3950_v15  ;;  %v11715_v15 = vld [vmem:[%s12475_s14] ss:$0 sm:$0xff] }
0x4023   :  { %9326 = vmatmul.mubr.msk.f32.vlgmr.msra.gmra.mrb[40].mxu1 %vm304_vm3, %v3953_v21  ;;  %v4053_v31 = vrot.slane %v3953_v21, 4 }
0x4024   :  { %9349 = vmatprep.mubr.msk.f32.mxu1 %vm10855_vm2, %v10856_v10 }
0x40f6   :  { %v4023_v22 = vpop.f32.mrb[40].mxu1 }
0x40f7   :  { %v4028_v25 = vrot.slane %v4023_v22, 4  ;;  %v9327_v55 = vpop.f32.mrb[41].mxu1 }
0x40f9   :  { %4037 = vrot.lane.b32.xlu1 %v4028_v25, %s10857_s0  ;;  %v4030_v24 = vadd.f32 %v4028_v25, %v3243_v9 }
0x40fb   :  { %v8417_v56 = vmul.f32 -1.442695, %v4030_v24 }
0x40fd   :  { %10463 = vpow2.f32 %v8417_v56 }
0x4107   :  { %v10464_v58 = vpop.eup %10463 }
0x4108   :  { %v4034_v26 = vadd.f32 1.0, %v10464_v58 }
0x410a   :  { %10465 = vrcp.f32 %v4034_v26 }
0x4114   :  { %v10466_v27 = vpop.eup %10465 }
0x4115   :  { %v4047_v45 = vsub.f32 1.0, %v10466_v27  ;;  %v4055_v47 = vmul.f32 %v10466_v27, %v4053_v31 }
0x416b   :  { %v4038_v28 = vpop.permute.xlu1 %4037 }
0x416c   :  { %v4040_v29 = vmul.f32 %v10466_v27, %v4038_v28 }
0x416e   :  { %4042 = vrot.lane.b32.xlu0 %v4040_v29, %s10858_s29 }
0x41e0   :  { %v4043_v0 = vpop.permute.xlu0 %4042 }
0x41e1   :  { %v4045_v30 = vadd.f32 %v4043_v0, %v3243_v9  ;;  %v4064_v9 = vld [vmem:[%s12474_s8 + $0x8] sm:$0xff] }
0x41e2   :  { %v11695_v5 = vpack.c.bf16 %v4064_v9, %v4063_v2 }
0x41e3   :  { %10467 = vtanh.f32 %v4045_v30 }
0x41e4   :  { %10000 = vmatpush3.bf16.msra.mxu1 %v11695_v5 }
0x41e5   :  { %10001 = vmatprep.subr.bf16.mxu1 %v10854_v3 }
0x41e8   :  { %10003 = vmatpush3.bf16.msra.mxu1 %v11701_v11 }
0x41e9   :  { %10010 = vmatprep.subr.bf16.mxu1 %v10854_v3 }
0x41ed   :  { %v10468_v42 = vpop.eup %10467 }
0x41ee   :  { %4049 = vrot.lane.b32.xlu1 %v10468_v42, %s10859_s7 }
0x4260   :  { %v4050_v46 = vpop.permute.xlu1 %4049 }
0x4261   :  { %v4052_v33 = vmul.f32 %v4050_v46, %v4047_v45 }
0x4263   :  { %v4056_v53 = vadd.f32 %v4055_v47, %v4052_v33 }
0x4265   :  { %4081 = vrot.lane.b32.xlu0 %v4056_v53, %s10860_s13  ;;  %v4185_v14 = vrot.slane %v4056_v53, 4 }
0x42d7   :  { %v4082_v41 = vpop.permute.xlu0 %4081 }
0x42d8   :  { %v4084_v52 = vsel %vm186_vm1, %v11673_v54, %v4082_v41 }
0x42d9   :  { %v4086_v57 = vrot.slane %v4084_v52, 4 }
0x42db   :  { %9339 = vmatmul.mubr.msk.f32.vlgmr.msra.gmra.mrb[40].mxu0 %vm2403_vm9, %v4086_v57 }
0x42dc   :  { %10006 = vmatpush3.bf16.msra.mxu0 %v11655_v40  ;;  %9362 = vmatprep.mubr.msk.f32.mxu0 %vm10855_vm2, %v10856_v10 }
0x42dd   :  { %10007 = vmatprep.subr.bf16.mxu0 %v10854_v3 }
0x42e0   :  { %10009 = vmatpush3.bf16.msra.mxu0 %v11659_v39 }
0x42e1   :  { %9360 = vmatprep.subr.mxu0 %v10856_v10 }
0x42e4   :  { %9361 = vmatpush3.msk.msra.mxu0 %vm205_vm0, %v11666_v44 }
0x42e5   :  { %10022 = vmatprep.subr.bf16.mxu0 %v10854_v3 }
0x43ae   :  { %v4158_v49 = vpop.f32.mrb[40].mxu0 }
0x43af   :  { %v4159_v50 = vadd.f32 %v11688_v32, %v4158_v49  ;;  %v9340_v43 = vpop.f32.mrb[41].mxu0 }
0x43b1   :  { %4169 = vrot.lane.b32.xlu1 %v4159_v50, %s10859_s7  ;;  %v8422_v60 = vmul.f32 -1.442695, %v4159_v50 }
0x43b3   :  { %10469 = vpow2.f32 %v8422_v60 }
0x43bd   :  { %v10470_v61 = vpop.eup %10469 }
0x43be   :  { %v4165_v34 = vadd.f32 1.0, %v10470_v61 }
0x43c0   :  { %10471 = vrcp.f32 %v4165_v34 }
0x43ca   :  { %v10472_v51 = vpop.eup %10471 }
0x43cb   :  { %v4179_v16 = vsub.f32 1.0, %v10472_v51  ;;  %v4187_v19 = vmul.f32 %v10472_v51, %v4185_v14 }
0x4423   :  { %v4170_v4 = vpop.permute.xlu1 %4169 }
0x4424   :  { %v4172_v1 = vmul.f32 %v10472_v51, %v4170_v4 }
0x4426   :  { %4174 = vrot.lane.b32.xlu0 %v4172_v1, %s10858_s29 }
0x4498   :  { %v4175_v8 = vpop.permute.xlu0 %4174 }
0x4499   :  { %v4177_v12 = vadd.f32 %v4175_v8, %v4159_v50 }
0x449b   :  { %10473 = vtanh.f32 %v4177_v12 }
0x44a5   :  { %v10474_v13 = vpop.eup %10473 }
0x44a6   :  { %4181 = vrot.lane.b32.xlu1 %v10474_v13, %s10859_s7 }
0x4518   :  { %v4182_v18 = vpop.permute.xlu1 %4181 }
0x4519   :  { %v4184_v20 = vmul.f32 %v4182_v18, %v4179_v16 }
0x451b   :  { %v4188_v59 = vadd.f32 %v4187_v19, %v4184_v20 }
0x451d   :  { %4262 = vrot.lane.b32.xlu0 %v4188_v59, %s10860_s13  ;;  %9350 = vmatmul.mubr.msk.f32.vlgmr.msra.gmra.mrb[42].mxu1 %vm304_vm3, %v4188_v59 }
0x451e   :  { %10012 = vmatpush3.bf16.msra.mxu1 %v11695_v5  ;;  %9373 = vmatprep.mubr.msk.f32.mxu1 %vm10855_vm2, %v10856_v10 }
0x451f   :  { %10013 = vmatprep.subr.bf16.mxu1 %v10854_v3 }
0x4522   :  { %10015 = vmatpush3.bf16.msra.mxu1 %v11701_v11 }
0x4523   :  { %10016 = vmatprep.subr.bf16.mxu1 %v10854_v3 }
0x458f   :  { %v4263_v55 = vpop.permute.xlu0 %4262 }
0x45f0   :  { %v4258_v21 = vpop.f32.mrb[42].mxu1 }
0x45f1   :  { %v11718_v22 = vadd.f32 %v11715_v15, %v4258_v21  ;;  %v9351_v25 = vpop.f32.mrb[43].mxu1 }
0x45f3   :  { %v4265_v24 = vsel %vm186_vm1, %v11718_v22, %v4263_v55 }
0x45f4   :  { %9363 = vmatmul.mubr.msk.f32.vlgmr.msra.gmra.mrb[42].mxu0 %vm2403_vm9, %v4265_v24  ;;  %v4827_v24 = vld [vmem:[%s12476_s19] sm:$0xff] }
0x45f5   :  { %10024 = vmatpush3.bf16.msra.mxu0 %v11695_v5  ;;  %9397 = vmatprep.mubr.msk.f32.mxu0 %vm10855_vm2, %v10856_v10 }
0x45f6   :  { %10025 = vmatprep.subr.bf16.mxu0 %v10854_v3 }
0x45f9   :  { %10027 = vmatpush3.bf16.msra.mxu0 %v11701_v11 }
0x45fa   :  { %10028 = vmatprep.subr.bf16.mxu0 %v10854_v3 }
0x46c7   :  { %v4335_v56 = vpop.f32.mrb[42].mxu0 }
0x46c8   :  { %v4336_v58 = vadd.f32 %v11688_v32, %v4335_v56  ;;  %v9364_v26 = vpop.f32.mrb[43].mxu0  ;;  %v4828_v56 = vld [vmem:[%s12476_s19 + $0x8] sm:$0xff] }
0x46c9   :  { %v11784_v26 = vpack.c.bf16 %v4828_v56, %v4827_v24 }
0x46ca   :  { %4346 = vrot.lane.b32.xlu1 %v4336_v58, %s10859_s7  ;;  %v8426_v27 = vmul.f32 -1.442695, %v4336_v58 }
0x46cc   :  { %10475 = vpow2.f32 %v8426_v27 }
0x46d6   :  { %v10476_v28 = vpop.eup %10475 }
0x46d7   :  { %v4342_v29 = vadd.f32 1.0, %v10476_v28 }
0x46d9   :  { %10477 = vrcp.f32 %v4342_v29 }
0x46e3   :  { %v10478_v0 = vpop.eup %10477 }
0x46e4   :  { %v4356_v42 = vsub.f32 1.0, %v10478_v0  ;;  %v4362_v45 = vmul.f32 %v10478_v0, %v4188_v59 }
0x473c   :  { %v4347_v30 = vpop.permute.xlu1 %4346 }
0x473d   :  { %v4349_v36 = vmul.f32 %v10478_v0, %v4347_v30  ;;  %v4826_v0 = vld [vmem:[%s12477_s4] sm:$0x7f] }
0x473f   :  { %4351 = vrot.lane.b32.xlu0 %v4349_v36, %s10858_s29 }
0x47b1   :  { %v4352_v37 = vpop.permute.xlu0 %4351 }
0x47b2   :  { %v4354_v38 = vadd.f32 %v4352_v37, %v4336_v58  ;;  %v4829_v58 = vld [vmem:[%s12476_s19 + $0x10] sm:$0xff] }
0x47b4   :  { %10479 = vtanh.f32 %v4354_v38 }
0x47be   :  { %v10480_v62 = vpop.eup %10479 }
0x47bf   :  { %4358 = vrot.lane.b32.xlu1 %v10480_v62, %s10859_s7 }
0x4831   :  { %v4359_v31 = vpop.permute.xlu1 %4358 }
0x4832   :  { %v4361_v46 = vmul.f32 %v4359_v31, %v4356_v42 }
0x4834   :  { %v4363_v47 = vadd.f32 %v4362_v45, %v4361_v46  ;;  %v10685_v46 = vld [vmem:[%s10884_s9] sm:$0xff] }
0x4836   :  { %4437 = vrot.lane.b32.xlu0 %v4363_v47, %s10860_s13  ;;  %9374 = vmatmul.mubr.msk.f32.vlgmr.msra.gmra.mrb[44].mxu1 %vm304_vm3, %v4363_v47 }
0x4837   :  { %10018 = vmatpush3.bf16.msra.mxu1 %v11655_v40  ;;  %9386 = vmatprep.mubr.msk.f32.mxu1 %vm10855_vm2, %v10856_v10 }
0x4838   :  { %10019 = vmatprep.subr.bf16.mxu1 %v10854_v3 }
0x483b   :  { %10021 = vmatpush3.bf16.msra.mxu1 %v11659_v39 }
0x483c   :  { %9384 = vmatprep.subr.mxu1 %v10856_v10 }
0x483f   :  { %9385 = vmatpush3.msk.msra.mxu1 %vm205_vm0, %v11666_v44 }
0x4840   :  { %10034 = vmatprep.subr.bf16.mxu1 %v10854_v3 }
0x48a8   :  { %v4438_v52 = vpop.permute.xlu0 %4437 }
0x4909   :  { %v4433_v33 = vpop.f32.mrb[44].mxu1 }
0x490a   :  { %v11745_v53 = vadd.f32 %v11715_v15, %v4433_v33  ;;  %v9375_v41 = vpop.f32.mrb[45].mxu1  ;;  %v10687_v33 = vld [vmem:[%s10884_s9 + $0x10] sm:$0xff] }
0x490c   :  { %v4440_v57 = vsel %vm186_vm1, %v11745_v53, %v4438_v52 }
0x490d   :  { %9387 = vmatmul.mubr.msk.f32.vlgmr.msra.gmra.mrb[46].mxu1 %vm2403_vm9, %v4440_v57  ;;  %v11824_v57 = vld [vmem:[%s12478_s10] ss:$0 sm:$0xff] }
0x490e   :  { %10036 = vmatpush3.bf16.msra.mxu1 %v11695_v5  ;;  %9421 = vmatprep.mubr.msk.f32.mxu1 %vm10855_vm2, %v10856_v10 }
0x490f   :  { %10037 = vmatprep.subr.bf16.mxu1 %v10854_v3 }
0x4912   :  { %10039 = vmatpush3.bf16.msra.mxu1 %v11701_v11 }
0x4913   :  { %9424 = vmatprep.subr.msk.mxu1 %vm205_vm0, %v4826_v0 }
0x49e0   :  { %v4510_v49 = vpop.f32.mrb[46].mxu1 }
0x49e1   :  { %v4511_v50 = vadd.f32 %v11688_v32, %v4510_v49  ;;  %v9388_v43 = vpop.f32.mrb[47].mxu1 }
0x49e3   :  { %4521 = vrot.lane.b32.xlu1 %v4511_v50, %s10859_s7  ;;  %v8430_v60 = vmul.f32 -1.442695, %v4511_v50 }
0x49e5   :  { %10481 = vpow2.f32 %v8430_v60 }
0x49ef   :  { %v10482_v61 = vpop.eup %10481 }
0x49f0   :  { %v4517_v34 = vadd.f32 1.0, %v10482_v61 }
0x49f2   :  { %10483 = vrcp.f32 %v4517_v34 }
0x49fc   :  { %v10484_v51 = vpop.eup %10483 }
0x49fd   :  { %v4531_v6 = vsub.f32 1.0, %v10484_v51  ;;  %v4537_v8 = vmul.f32 %v10484_v51, %v4363_v47  ;;  %v10686_v47 = vld [vmem:[%s10884_s9 + $0x8] sm:$0xff] }
0x4a55   :  { %v4522_v4 = vpop.permute.xlu1 %4521 }
0x4a56   :  { %v4524_v1 = vmul.f32 %v10484_v51, %v4522_v4 }
0x4a58   :  { %4526 = vrot.lane.b32.xlu0 %v4524_v1, %s10858_s29 }
0x4aca   :  { %v4527_v2 = vpop.permute.xlu0 %4526 }
0x4acb   :  { %v4529_v9 = vadd.f32 %v4527_v2, %v4511_v50 }
0x4acd   :  { %10485 = vtanh.f32 %v4529_v9 }
0x4ad7   :  { %v10486_v5 = vpop.eup %10485 }
0x4ad8   :  { %4533 = vrot.lane.b32.xlu1 %v10486_v5, %s10859_s7 }
0x4b4a   :  { %v4534_v7 = vpop.permute.xlu1 %4533 }
0x4b4b   :  { %v4536_v11 = vmul.f32 %v4534_v7, %v4531_v6 }
0x4b4d   :  { %v4538_v12 = vadd.f32 %v4537_v8, %v4536_v11 }
0x4b4f   :  { %4612 = vrot.lane.b32.xlu0 %v4538_v12, %s10860_s13  ;;  %9398 = vmatmul.mubr.msk.f32.vlgmr.msra.gmra.mrb[44].mxu0 %vm304_vm3, %v4538_v12 }
0x4b50   :  { %10030 = vmatpush3.bf16.msra.mxu0 %v11655_v40  ;;  %9410 = vmatprep.mubr.msk.f32.mxu0 %vm10855_vm2, %v10856_v10 }
0x4b51   :  { %10031 = vmatprep.subr.bf16.mxu0 %v10854_v3 }
0x4b54   :  { %10033 = vmatpush3.bf16.msra.mxu0 %v11659_v39 }
0x4b55   :  { %9408 = vmatprep.subr.mxu0 %v10856_v10 }
0x4b58   :  { %9409 = vmatpush3.msk.msra.mxu0 %vm205_vm0, %v11666_v44 }
0x4b59   :  { %10040 = vmatprep.subr.bf16.mxu0 %v10854_v3 }
0x4bc1   :  { %v4613_v40 = vpop.permute.xlu0 %4612 }
0x4c22   :  { %v4608_v13 = vpop.f32.mrb[44].mxu0 }
0x4c23   :  { %v11771_v14 = vadd.f32 %v11715_v15, %v4608_v13  ;;  %v9399_v16 = vpop.f32.mrb[45].mxu0 }
0x4c25   :  { %v4615_v18 = vsel %vm186_vm1, %v11771_v14, %v4613_v40 }
0x4c26   :  { %9411 = vmatmul.mubr.msk.f32.vlgmr.msra.gmra.mrb[46].mxu0 %vm2403_vm9, %v4615_v18 }
0x4c27   :  { %9440 = vmatprep.mubr.msk.f32.mxu0 %vm10855_vm2, %v10856_v10  ;;  %10042 = vmatpush3.bf16.msra.mxu0 %v11784_v26 }
0x4c28   :  { %10043 = vmatprep.subr.bf16.mxu0 %v10854_v3 }
0x4cf9   :  { %v4685_v39 = vpop.f32.mrb[46].mxu0 }
0x4cfa   :  { %v4686_v44 = vadd.f32 %v11688_v32, %v4685_v39  ;;  %v9412_v19 = vpop.f32.mrb[47].mxu0  ;;  %v4830_v32 = vld [vmem:[%s12476_s19 + $0x18] sm:$0xff] }
0x4cfb   :  { %v11788_v27 = vpack.c.bf16 %v4830_v32, %v4829_v58 }
0x4cfc   :  { %4696 = vrot.lane.b32.xlu1 %v4686_v44, %s10859_s7  ;;  %v8434_v20 = vmul.f32 -1.442695, %v4686_v44 }
0x4cfd   :  { %10045 = vmatpush3.bf16.msra.mxu0 %v11788_v27 }
0x4cfe   :  { %10487 = vpow2.f32 %v8434_v20  ;;  %10052 = vmatprep.subr.bf16.mxu0 %v10854_v3 }
0x4d00   :  { %9441 = vmatmul.mubr.f32.vlgmr.msra.gmra.mrb[48].mxu0 %v10856_v10 }
0x4d01   :  { %10054 = vmatpush3.bf16.msra.mxu0 %v11784_v26  ;;  %9462 = vmatprep.mubr.msk.f32.mxu0 %vm10855_vm2, %v10856_v10 }
0x4d02   :  { %10055 = vmatprep.subr.bf16.mxu0 %v10854_v3 }
0x4d05   :  { %10057 = vmatpush3.bf16.msra.mxu0 %v11788_v27 }
0x4d06   :  { %10064 = vmatprep.subr.bf16.mxu0 %v10854_v3 }
0x4d08   :  { %v10488_v59 = vpop.eup %10487 }
0x4d09   :  { %v4692_v15 = vadd.f32 1.0, %v10488_v59 }
0x4d0b   :  { %10489 = vrcp.f32 %v4692_v15 }
0x4d15   :  { %v10490_v21 = vpop.eup %10489 }
0x4d16   :  { %v4706_v38 = vsub.f32 1.0, %v10490_v21  ;;  %v4712_v42 = vmul.f32 %v10490_v21, %v4538_v12 }
0x4d6e   :  { %v4697_v25 = vpop.permute.xlu1 %4696 }
0x4d6f   :  { %v4699_v55 = vmul.f32 %v10490_v21, %v4697_v25 }
0x4d71   :  { %4701 = vrot.lane.b32.xlu0 %v4699_v55, %s10858_s29 }
0x4dd3   :  { %v4992_v36 = vpop.f32.mrb[48].mxu0 }
0x4dd4   :  { %v9442_v37 = vpop.f32.mrb[49].mxu0  ;;  %5004 = vrot.lane.b32.xlu0 %v4992_v36, %s10857_s0 }
0x4de3   :  { %v4702_v28 = vpop.permute.xlu0 %4701 }
0x4de4   :  { %v4704_v29 = vadd.f32 %v4702_v28, %v4686_v44 }
0x4de6   :  { %10491 = vtanh.f32 %v4704_v29 }
0x4df0   :  { %v10492_v30 = vpop.eup %10491 }
0x4df1   :  { %4708 = vrot.lane.b32.xlu1 %v10492_v30, %s10859_s7 }
0x4e46   :  { %v5005_v51 = vpop.permute.xlu0 %5004 }
0x4e63   :  { %v4709_v62 = vpop.permute.xlu1 %4708 }
0x4e64   :  { %v4711_v31 = vmul.f32 %v4709_v62, %v4706_v38 }
0x4e66   :  { %v4713_v45 = vadd.f32 %v4712_v42, %v4711_v31 }
0x4e68   :  { %9422 = vmatmul.mubr.msk.f32.vlgmr.msra.gmra.mrb[48].mxu1 %vm304_vm3, %v4713_v45 }
0x4e69   :  { %9425 = vmatpush3.msk.msra.mxu1 %vm205_vm0, %v4826_v0  ;;  %9426 = vmatprep.mubr.msk.f32.mxu1 %vm186_vm1, %v10685_v46 }
0x4e6a   :  { %10046 = vmatprep.subr.bf16.mxu1 %v10854_v3 }
0x4e6c   :  { %9427 = vmatmul.mubr.msk.f32.vlgmr.msra.gmra.mrb[50].mxu1 %vm186_vm1, %v10686_v47 }
0x4e6d   :  { %10048 = vmatpush3.bf16.msra.mxu1 %v11784_v26  ;;  %9429 = vmatprep.mubr.msk.f32.mxu1 %vm186_vm1, %v10687_v33 }
0x4e6e   :  { %10049 = vmatprep.subr.bf16.mxu1 %v10854_v3 }
0x4e70   :  { %9430 = vmatmul.mubr.msk.f32.gmra.mrb[52].mxu1 %vm186_vm1, %v11673_v54 }
0x4e71   :  { %10051 = vmatpush3.bf16.msra.mxu1 %v11788_v27  ;;  %9451 = vmatprep.mubr.msk.f32.mxu1 %vm10855_vm2, %v10856_v10 }
0x4e72   :  { %10058 = vmatprep.subr.bf16.mxu1 %v10854_v3 }
0x4f3b   :  { %v11821_v41 = vpop.f32.mrb[48].mxu1 }
0x4f3c   :  { %v9423_v52 = vpop.f32.mrb[49].mxu1 }
0x4f3f   :  { %v11826_v49 = vpop.f32.mrb[50].mxu1 }
0x4f40   :  { %v4907_v50 = vpop.f32.mrb[51].mxu1  ;;  %v4913_v62 = vadd.f32 %v11826_v49, %v11824_v57 }
0x4f41   :  { %v4908_v43 = vadd.f32 %v11824_v57, %v4907_v50 }
0x4f43   :  { %v4996_v60 = vadd.f32 %v4992_v36, %v4908_v43  ;;  %v11830_v5 = vpop.f32.mrb[52].mxu1 }
0x4f44   :  { %v11832_v6 = vpop.f32.mrb[53].mxu1 }
0x4f45   :  { %v8444_v61 = vmul.f32 -1.442695, %v4996_v60 }
0x4f47   :  { %10493 = vpow2.f32 %v8444_v61 }
0x4f51   :  { %v10494_v54 = vpop.eup %10493 }
0x4f52   :  { %v5000_v34 = vadd.f32 1.0, %v10494_v54 }
0x4f54   :  { %10495 = vrcp.f32 %v5000_v34 }
0x4f5e   :  { %v10496_v4 = vpop.eup %10495 }
0x4f5f   :  { %v5007_v1 = vmul.f32 %v10496_v4, %v5005_v51  ;;  %v5014_v8 = vsub.f32 1.0, %v10496_v4  ;;  %v5020_v12 = vmul.f32 0.0, %v10496_v4 }
0x4f61   :  { %5009 = vrot.lane.b32.xlu1 %v5007_v1, %s10858_s29 }
0x4fd3   :  { %v5010_v2 = vpop.permute.xlu1 %5009 }
0x4fd4   :  { %v5012_v9 = vadd.f32 %v5010_v2, %v4908_v43 }
0x4fd6   :  { %10497 = vtanh.f32 %v5012_v9 }
0x4fe0   :  { %v10498_v7 = vpop.eup %10497 }
0x4fe1   :  { %5016 = vrot.lane.b32.xlu0 %v10498_v7, %s10859_s7 }
0x5053   :  { %v5017_v11 = vpop.permute.xlu0 %5016 }
0x5054   :  { %v5019_v13 = vmul.f32 %v5017_v11, %v5014_v8 }
0x5056   :  { %v5021_v16 = vadd.f32 %v5020_v12, %v5019_v13 }
0x5058   :  { %9452 = vmatmul.mubr.msk.f32.vlgmr.msra.gmra.mrb[54].mxu1 %vm304_vm3, %v5021_v16  ;;  %v5121_v58 = vrot.slane %v5021_v16, 4 }
0x5059   :  { %10060 = vmatpush3.bf16.msra.mxu1 %v11784_v26  ;;  %9473 = vmatprep.mubr.msk.f32.mxu1 %vm10855_vm2, %v10856_v10 }
0x505a   :  { %10061 = vmatprep.subr.bf16.mxu1 %v10854_v3 }
0x505d   :  { %10063 = vmatpush3.bf16.msra.mxu1 %v11788_v27 }
0x505e   :  { %10070 = vmatprep.subr.bf16.mxu1 %v10854_v3 }
0x512b   :  { %v5091_v40 = vpop.f32.mrb[54].mxu1 }
0x512c   :  { %v5096_v18 = vrot.slane %v5091_v40, 4  ;;  %v9453_v39 = vpop.f32.mrb[55].mxu1 }
0x512e   :  { %5105 = vrot.lane.b32.xlu1 %v5096_v18, %s10857_s0  ;;  %v5098_v44 = vadd.f32 %v5096_v18, %v4908_v43 }
0x5130   :  { %v8446_v19 = vmul.f32 -1.442695, %v5098_v44 }
0x5132   :  { %10499 = vpow2.f32 %v8446_v19 }
0x513c   :  { %v10500_v20 = vpop.eup %10499 }
0x513d   :  { %v5102_v59 = vadd.f32 1.0, %v10500_v20 }
0x513f   :  { %10501 = vrcp.f32 %v5102_v59 }
0x5149   :  { %v10502_v15 = vpop.eup %10501 }
0x514a   :  { %v5115_v32 = vsub.f32 1.0, %v10502_v15  ;;  %v5123_v29 = vmul.f32 %v10502_v15, %v5121_v58 }
0x51a0   :  { %v5106_v21 = vpop.permute.xlu1 %5105 }
0x51a1   :  { %v5108_v25 = vmul.f32 %v10502_v15, %v5106_v21 }
0x51a3   :  { %5110 = vrot.lane.b32.xlu0 %v5108_v25, %s10858_s29 }
0x5215   :  { %v5111_v55 = vpop.permute.xlu0 %5110 }
0x5216   :  { %v5113_v24 = vadd.f32 %v5111_v55, %v4908_v43 }
0x5218   :  { %10503 = vtanh.f32 %v5113_v24 }
0x5222   :  { %v10504_v56 = vpop.eup %10503 }
0x5223   :  { %5117 = vrot.lane.b32.xlu1 %v10504_v56, %s10859_s7  ;;  %v4918_v56 = vadd.f32 %v11824_v57, %v11832_v6 }
0x5295   :  { %v5118_v28 = vpop.permute.xlu1 %5117 }
0x5296   :  { %v5120_v0 = vmul.f32 %v5118_v28, %v5115_v32 }
0x5298   :  { %v5124_v30 = vadd.f32 %v5123_v29, %v5120_v0 }
0x529a   :  { %v5126_v36 = vrot.slane %v5124_v30, 4 }
0x529c   :  { %9463 = vmatmul.mubr.msk.f32.vlgmr.msra.gmra.mrb[50].mxu0 %vm304_vm3, %v5126_v36 }
0x529d   :  { %10066 = vmatpush3.bf16.msra.mxu0 %v11784_v26  ;;  %9484 = vmatprep.mubr.msk.f32.mxu0 %vm10855_vm2, %v10856_v10 }
0x529e   :  { %10067 = vmatprep.subr.bf16.mxu0 %v10854_v3 }
0x52a1   :  { %10069 = vmatpush3.bf16.msra.mxu0 %v11788_v27 }
0x52a2   :  { %10076 = vmatprep.subr.bf16.mxu0 %v10854_v3 }
0x536f   :  { %v5195_v37 = vpop.f32.mrb[50].mxu0 }
0x5370   :  { %5207 = vrot.lane.b32.xlu0 %v5195_v37, %s10857_s0  ;;  %v9464_v38 = vpop.f32.mrb[51].mxu0  ;;  %v5199_v42 = vadd.f32 %v5195_v37, %v4913_v62 }
0x5372   :  { %v8448_v31 = vmul.f32 -1.442695, %v5199_v42 }
0x5374   :  { %10505 = vpow2.f32 %v8448_v31 }
0x537e   :  { %v10506_v45 = vpop.eup %10505 }
0x537f   :  { %v5203_v46 = vadd.f32 1.0, %v10506_v45 }
0x5381   :  { %10507 = vrcp.f32 %v5203_v46 }
0x538b   :  { %v10508_v47 = vpop.eup %10507 }
0x538c   :  { %v5217_v61 = vsub.f32 1.0, %v10508_v47  ;;  %v5224_v49 = vmul.f32 %v10508_v47, %v5126_v36 }
0x53e2   :  { %v5208_v33 = vpop.permute.xlu0 %5207 }
0x53e3   :  { %v5210_v52 = vmul.f32 %v10508_v47, %v5208_v33 }
0x53e5   :  { %5212 = vrot.lane.b32.xlu1 %v5210_v52, %s10858_s29 }
0x5457   :  { %v5213_v50 = vpop.permute.xlu1 %5212 }
0x5458   :  { %v5215_v43 = vadd.f32 %v5213_v50, %v4913_v62 }
0x545a   :  { %10509 = vtanh.f32 %v5215_v43 }
0x5464   :  { %v10510_v60 = vpop.eup %10509 }
0x5465   :  { %5219 = vrot.lane.b32.xlu0 %v10510_v60, %s10859_s7 }
0x54d7   :  { %v5220_v54 = vpop.permute.xlu0 %5219 }
0x54d8   :  { %v5222_v34 = vmul.f32 %v5220_v54, %v5217_v61 }
0x54da   :  { %v5225_v51 = vadd.f32 %v5224_v49, %v5222_v34 }
0x54dc   :  { %9474 = vmatmul.mubr.msk.f32.vlgmr.msra.gmra.mrb[56].mxu1 %vm304_vm3, %v5225_v51  ;;  %v5325_v44 = vrot.slane %v5225_v51, 4 }
0x54dd   :  { %10072 = vmatpush3.bf16.msra.mxu1 %v11784_v26  ;;  %9495 = vmatprep.mubr.msk.f32.mxu1 %vm10855_vm2, %v10856_v10 }
0x54de   :  { %10073 = vmatprep.subr.bf16.mxu1 %v10854_v3 }
0x54e1   :  { %10075 = vmatpush3.bf16.msra.mxu1 %v11788_v27 }
0x54e2   :  { %10082 = vmatprep.subr.bf16.mxu1 %v10854_v3 }
0x55af   :  { %v5295_v4 = vpop.f32.mrb[56].mxu1 }
0x55b0   :  { %v5300_v1 = vrot.slane %v5295_v4, 4  ;;  %v9475_v2 = vpop.f32.mrb[57].mxu1 }
0x55b2   :  { %5309 = vrot.lane.b32.xlu1 %v5300_v1, %s10857_s0  ;;  %v5302_v9 = vadd.f32 %v5300_v1, %v4913_v62 }
0x55b4   :  { %v8450_v7 = vmul.f32 -1.442695, %v5302_v9 }
0x55b6   :  { %10511 = vpow2.f32 %v8450_v7 }
0x55c0   :  { %v10512_v8 = vpop.eup %10511 }
0x55c1   :  { %v5306_v11 = vadd.f32 1.0, %v10512_v8 }
0x55c3   :  { %10513 = vrcp.f32 %v5306_v11 }
0x55cd   :  { %v10514_v12 = vpop.eup %10513 }
0x55ce   :  { %v5319_v19 = vsub.f32 1.0, %v10514_v12  ;;  %v5327_v59 = vmul.f32 %v10514_v12, %v5325_v44 }
0x5624   :  { %v5310_v13 = vpop.permute.xlu1 %5309 }
0x5625   :  { %v5312_v16 = vmul.f32 %v10514_v12, %v5310_v13  ;;  %v10688_v12 = vld [vmem:[%s10879_s5] sm:$0xff] }
0x5627   :  { %5314 = vrot.lane.b32.xlu0 %v5312_v16, %s10858_s29 }
0x5699   :  { %v5315_v40 = vpop.permute.xlu0 %5314 }
0x569a   :  { %v5317_v18 = vadd.f32 %v5315_v40, %v4913_v62  ;;  %v11894_v40 = vadd.f32 %v11830_v5, %v11824_v57  ;;  %v5740_v5 = vld [vmem:[%s10944_s6] sm:$0xff] }
0x569c   :  { %10515 = vtanh.f32 %v5317_v18 }
0x56a6   :  { %v10516_v39 = vpop.eup %10515 }
0x56a7   :  { %5321 = vrot.lane.b32.xlu1 %v10516_v39, %s10859_s7 }
0x5719   :  { %v5322_v20 = vpop.permute.xlu1 %5321 }
0x571a   :  { %v5324_v15 = vmul.f32 %v5322_v20, %v5319_v19 }
0x571c   :  { %v5328_v21 = vadd.f32 %v5327_v59, %v5324_v15 }
0x571e   :  { %v5330_v25 = vrot.slane %v5328_v21, 4 }
0x5720   :  { %9485 = vmatmul.mubr.msk.f32.vlgmr.msra.gmra.mrb[52].mxu0 %vm304_vm3, %v5330_v25 }
0x5721   :  { %10078 = vmatpush3.bf16.msra.mxu0 %v11784_v26  ;;  %9506 = vmatprep.mubr.msk.f32.mxu0 %vm10855_vm2, %v10856_v10 }
0x5722   :  { %10079 = vmatprep.subr.bf16.mxu0 %v10854_v3 }
0x5725   :  { %10081 = vmatpush3.bf16.msra.mxu0 %v11788_v27 }
0x57f3   :  { %v5399_v55 = vpop.f32.mrb[52].mxu0 }
0x57f4   :  { %5411 = vrot.lane.b32.xlu0 %v5399_v55, %s10857_s0  ;;  %v9486_v24 = vpop.f32.mrb[53].mxu0  ;;  %v5403_v58 = vadd.f32 %v5399_v55, %v4918_v56  ;;  %v5739_v55 = vld [vmem:[%s12470_s17] sm:$0x7f]  ;;  %s12490_s17 = sld [smem:[#allocation33_spill]] }
0x57f5   :  { %9520 = vmatprep.subr.msk.mxu0 %vm205_vm0, %v5739_v55 }
0x57f6   :  { %v8452_v32 = vmul.f32 -1.442695, %v5403_v58  ;;  %v5742_v58 = vld [vmem:[%s10944_s6 + $0x10] sm:$0xff] }
0x57f8   :  { %10517 = vpow2.f32 %v8452_v32  ;;  %v5743_v32 = vld [vmem:[%s10944_s6 + $0x18] sm:$0xff] }
0x5802   :  { %v10518_v28 = vpop.eup %10517 }
0x5803   :  { %v5407_v29 = vadd.f32 1.0, %v10518_v28  ;;  %v10690_v28 = vld [vmem:[%s10879_s5 + $0x10] sm:$0xff] }
0x5805   :  { %10519 = vrcp.f32 %v5407_v29 }
0x580f   :  { %v10520_v0 = vpop.eup %10519 }
0x5810   :  { %v5421_v42 = vsub.f32 1.0, %v10520_v0  ;;  %v5428_v6 = vmul.f32 %v10520_v0, %v5330_v25  ;;  %v5741_v25 = vld [vmem:[%s10944_s6 + $0x8] sm:$0xff]  ;;  %s12480_s6 = sld [smem:[#allocation14_spill]] }
0x5811   :  { %v11903_v24 = vpack.c.bf16 %v5741_v25, %v5740_v5 }
0x5866   :  { %v5412_v30 = vpop.permute.xlu0 %5411 }
0x5867   :  { %v5414_v36 = vmul.f32 %v10520_v0, %v5412_v30  ;;  %v11915_v0 = vpack.c.bf16 %v5743_v32, %v5742_v58  ;;  %v10691_v30 = vld [vmem:[%s10879_s5 + $0x18] sm:$0xff] }
0x5869   :  { %5416 = vrot.lane.b32.xlu1 %v5414_v36, %s10858_s29  ;;  %v10692_v36 = vld [vmem:[%s10879_s5 + $0x20] sm:$0xff] }
0x58db   :  { %v5417_v37 = vpop.permute.xlu1 %5416 }
0x58dc   :  { %v5419_v38 = vadd.f32 %v5417_v37, %v4918_v56  ;;  %v10693_v37 = vld [vmem:[%s10879_s5 + $0x28] sm:$0xff] }
0x58de   :  { %10521 = vtanh.f32 %v5419_v38 }
0x58e8   :  { %v10522_v62 = vpop.eup %10521 }
0x58e9   :  { %5423 = vrot.lane.b32.xlu0 %v10522_v62, %s10859_s7 }
0x595b   :  { %v5424_v31 = vpop.permute.xlu0 %5423 }
0x595c   :  { %v5426_v45 = vmul.f32 %v5424_v31, %v5421_v42 }
0x595e   :  { %v5429_v46 = vadd.f32 %v5428_v6, %v5426_v45 }
0x5960   :  { %9496 = vmatmul.mubr.msk.f32.vlgmr.msra.gmra.mrb[58].mxu1 %vm304_vm3, %v5429_v46  ;;  %v5529_v4 = vrot.slane %v5429_v46, 4 }
0x5961   :  { %10084 = vmatpush3.bf16.msra.mxu1 %v11784_v26  ;;  %9517 = vmatprep.mubr.msk.f32.mxu1 %vm10855_vm2, %v10856_v10 }
0x5962   :  { %10085 = vmatprep.subr.bf16.mxu1 %v10854_v3 }
0x5965   :  { %10087 = vmatpush3.bf16.msra.mxu1 %v11788_v27 }
0x5966   :  { %10088 = vmatprep.subr.bf16.mxu1 %v10854_v3 }
0x5a33   :  { %v5499_v47 = vpop.f32.mrb[58].mxu1 }
0x5a34   :  { %v5504_v33 = vrot.slane %v5499_v47, 4  ;;  %v9497_v52 = vpop.f32.mrb[59].mxu1 }
0x5a36   :  { %5513 = vrot.lane.b32.xlu1 %v5504_v33, %s10857_s0  ;;  %v5506_v50 = vadd.f32 %v5504_v33, %v4918_v56 }
0x5a38   :  { %v8454_v43 = vmul.f32 -1.442695, %v5506_v50 }
0x5a3a   :  { %10523 = vpow2.f32 %v8454_v43  ;;  %v11949_v43 = vld [vmem:[%s12471_s21] ss:$0 sm:$0xff] }
0x5a44   :  { %v10524_v60 = vpop.eup %10523 }
0x5a45   :  { %v5510_v61 = vadd.f32 1.0, %v10524_v60 }
0x5a47   :  { %10525 = vrcp.f32 %v5510_v61 }
0x5a51   :  { %v10526_v26 = vpop.eup %10525 }
0x5a52   :  { %v5523_v1 = vsub.f32 1.0, %v10526_v26  ;;  %v5531_v9 = vmul.f32 %v10526_v26, %v5529_v4 }
0x5aa8   :  { %v5514_v54 = vpop.permute.xlu1 %5513 }
0x5aa9   :  { %v5516_v49 = vmul.f32 %v10526_v26, %v5514_v54 }
0x5aab   :  { %5518 = vrot.lane.b32.xlu0 %v5516_v49, %s10858_s29 }
0x5b1d   :  { %v5519_v27 = vpop.permute.xlu0 %5518 }
0x5b1e   :  { %v5521_v34 = vadd.f32 %v5519_v27, %v4918_v56  ;;  %v10689_v56 = vld [vmem:[%s10879_s5 + $0x8] sm:$0xff]  ;;  %s12479_s5 = sld [smem:[#allocation22_spill]] }
0x5b20   :  { %10527 = vtanh.f32 %v5521_v34 }
0x5b2a   :  { %v10528_v51 = vpop.eup %10527 }
0x5b2b   :  { %5525 = vrot.lane.b32.xlu1 %v10528_v51, %s10859_s7 }
0x5b9d   :  { %v5526_v2 = vpop.permute.xlu1 %5525 }
0x5b9e   :  { %v5528_v7 = vmul.f32 %v5526_v2, %v5523_v1 }
0x5ba0   :  { %v5532_v8 = vadd.f32 %v5531_v9, %v5528_v7 }
0x5ba2   :  { %v5534_v11 = vrot.slane %v5532_v8, 4 }
0x5ba4   :  { %9507 = vmatmul.mubr.msk.f32.vlgmr.msra.gmra.mrb[54].mxu0 %vm304_vm3, %v5534_v11 }
0x5ba5   :  { %9522 = vmatprep.mubr.msk.f32.mxu0 %vm186_vm1, %v10688_v12  ;;  %9521 = vmatpush3.msk.msra.mxu0 %vm205_vm0, %v5739_v55 }
0x5ba6   :  { %10094 = vmatprep.subr.bf16.mxu0 %v10854_v3 }
0x5ba8   :  { %9523 = vmatmul.mubr.msk.f32.vlgmr.msra.gmra.mrb[56].mxu0 %vm186_vm1, %v10689_v56 }
0x5ba9   :  { %10096 = vmatpush3.bf16.msra.mxu0 %v11903_v24  ;;  %9525 = vmatprep.mubr.msk.f32.mxu0 %vm186_vm1, %v10690_v28 }
0x5baa   :  { %10097 = vmatprep.subr.bf16.mxu0 %v10854_v3 }
0x5bac   :  { %9526 = vmatmul.mubr.msk.f32.gmra.mrb[58].mxu0 %vm186_vm1, %v10691_v30 }
0x5bad   :  { %9528 = vmatprep.mubr.msk.f32.mxu0 %vm186_vm1, %v10692_v36  ;;  %10099 = vmatpush3.bf16.msra.mxu0 %v11915_v0 }
0x5bae   :  { %10106 = vmatprep.subr.bf16.mxu0 %v10854_v3 }
0x5bb0   :  { %9529 = vmatmul.mubr.msk.f32.gmra.mrb[60].mxu0 %vm186_vm1, %v10693_v37 }
0x5bb1   :  { %9550 = vmatprep.mubr.msk.f32.mxu0 %vm10855_vm2, %v10856_v10 }
0x5c77   :  { %v5603_v13 = vpop.f32.mrb[54].mxu0 }
0x5c78   :  { %5615 = vrot.lane.b32.xlu0 %v5603_v13, %s10857_s0  ;;  %v9508_v16 = vpop.f32.mrb[55].mxu0  ;;  %v5607_v18 = vadd.f32 %v5603_v13, %v11894_v40 }
0x5c7a   :  { %v8456_v39 = vmul.f32 -1.442695, %v5607_v18 }
0x5c7b   :  { %v9524_v45 = vpop.f32.mrb[56].mxu0 }
0x5c7c   :  { %10529 = vpow2.f32 %v8456_v39  ;;  %v5820_v46 = vpop.f32.mrb[57].mxu0 }
0x5c7d   :  { %v5821_v60 = vadd.f32 %v11949_v43, %v5820_v46 }
0x5c7f   :  { %v11953_v2 = vpop.f32.mrb[58].mxu0 }
0x5c80   :  { %v11955_v9 = vpop.f32.mrb[59].mxu0 }
0x5c83   :  { %v11957_v7 = vpop.f32.mrb[60].mxu0 }
0x5c84   :  { %v11959_v8 = vpop.f32.mrb[61].mxu0 }
0x5c86   :  { %v10530_v44 = vpop.eup %10529 }
0x5c87   :  { %v5611_v19 = vadd.f32 1.0, %v10530_v44 }
0x5c89   :  { %10531 = vrcp.f32 %v5611_v19 }
0x5c93   :  { %v10532_v20 = vpop.eup %10531 }
0x5c94   :  { %v5625_v38 = vsub.f32 1.0, %v10532_v20  ;;  %v5632_v42 = vmul.f32 %v10532_v20, %v5534_v11 }
0x5cea   :  { %v5616_v59 = vpop.permute.xlu0 %5615 }
0x5ceb   :  { %v5618_v15 = vmul.f32 %v10532_v20, %v5616_v59  ;;  %v11974_v59 = vadd.f32 %v9524_v45, %v11949_v43 }
0x5ced   :  { %5620 = vrot.lane.b32.xlu1 %v5618_v15, %s10858_s29 }
0x5d5f   :  { %v5621_v21 = vpop.permute.xlu1 %5620 }
0x5d60   :  { %v5623_v57 = vadd.f32 %v5621_v21, %v11894_v40 }
0x5d62   :  { %10533 = vtanh.f32 %v5623_v57 }
0x5d6c   :  { %v10534_v29 = vpop.eup %10533 }
0x5d6d   :  { %5627 = vrot.lane.b32.xlu0 %v10534_v29, %s10859_s7 }
0x5ddf   :  { %v5628_v62 = vpop.permute.xlu0 %5627 }
0x5de0   :  { %v5630_v31 = vmul.f32 %v5628_v62, %v5625_v38 }
0x5de2   :  { %v11928_v6 = vadd.f32 %v5632_v42, %v5630_v31 }
0x5de4   :  { %9518 = vmatmul.mubr.msk.f32.vlgmr.msra.gmra.mrb[60].mxu1 %vm304_vm3, %v11928_v6 }
0x5de5   :  { %10090 = vmatpush3.bf16.msra.mxu1 %v11903_v24  ;;  %9539 = vmatprep.mubr.msk.f32.mxu1 %vm10855_vm2, %v10856_v10 }
0x5de6   :  { %10091 = vmatprep.subr.bf16.mxu1 %v10854_v3 }
0x5de9   :  { %10093 = vmatpush3.bf16.msra.mxu1 %v11915_v0 }
0x5dea   :  { %10100 = vmatprep.subr.bf16.mxu1 %v10854_v3 }
0x5dec   :  { %9540 = vmatmul.mubr.f32.vlgmr.msra.gmra.mrb[62].mxu1 %v10856_v10 }
0x5ded   :  { %10102 = vmatpush3.bf16.msra.mxu1 %v11903_v24  ;;  %9561 = vmatprep.mubr.msk.f32.mxu1 %vm10855_vm2, %v10856_v10 }
0x5dee   :  { %10103 = vmatprep.subr.bf16.mxu1 %v10854_v3 }
0x5df1   :  { %10105 = vmatpush3.bf16.msra.mxu1 %v11915_v0 }
0x5df2   :  { %10112 = vmatprep.subr.bf16.mxu1 %v10854_v3 }
0x5eb7   :  { %v11945_v47 = vpop.f32.mrb[60].mxu1 }
0x5eb8   :  { %v9519_v33 = vpop.f32.mrb[61].mxu1 }
0x5ebf   :  { %v5915_v52 = vpop.f32.mrb[62].mxu1 }
0x5ec0   :  { %5927 = vrot.lane.b32.xlu1 %v5915_v52, %s10857_s0  ;;  %v9541_v50 = vpop.f32.mrb[63].mxu1  ;;  %v5919_v61 = vadd.f32 %v5915_v52, %v5821_v60 }
0x5ec2   :  { %v8467_v26 = vmul.f32 -1.442695, %v5919_v61 }
0x5ec4   :  { %10535 = vpow2.f32 %v8467_v26 }
0x5ece   :  { %v10536_v54 = vpop.eup %10535 }
0x5ecf   :  { %v5923_v49 = vadd.f32 1.0, %v10536_v54 }
0x5ed1   :  { %10537 = vrcp.f32 %v5923_v49 }
0x5edb   :  { %v10538_v27 = vpop.eup %10537 }
0x5edc   :  { %v5937_v12 = vsub.f32 1.0, %v10538_v27  ;;  %v5943_v16 = vmul.f32 0.0, %v10538_v27 }
0x5f32   :  { %v5928_v34 = vpop.permute.xlu1 %5927 }
0x5f33   :  { %v5930_v51 = vmul.f32 %v10538_v27, %v5928_v34 }
0x5f35   :  { %5932 = vrot.lane.b32.xlu0 %v5930_v51, %s10858_s29 }
0x5fa7   :  { %v5933_v4 = vpop.permute.xlu0 %5932 }
0x5fa8   :  { %v5935_v1 = vadd.f32 %v5933_v4, %v5821_v60 }
0x5faa   :  { %10539 = vtanh.f32 %v5935_v1 }
0x5fb4   :  { %v10540_v11 = vpop.eup %10539 }
0x5fb5   :  { %5939 = vrot.lane.b32.xlu1 %v10540_v11, %s10859_s7 }
0x6027   :  { %v5940_v13 = vpop.permute.xlu1 %5939 }
0x6028   :  { %v5942_v18 = vmul.f32 %v5940_v13, %v5937_v12 }
0x602a   :  { %v11962_v39 = vadd.f32 %v5943_v16, %v5942_v18 }
0x602c   :  { %9551 = vmatmul.mubr.msk.f32.vlgmr.msra.gmra.mrb[62].mxu0 %vm304_vm3, %v11962_v39  ;;  %v6065_v33 = vrot.slane %v11962_v39, 2 }
0x602d   :  { %10108 = vmatpush3.bf16.msra.mxu0 %v11903_v24  ;;  %9572 = vmatprep.mubr.msk.f32.mxu0 %vm10855_vm2, %v10856_v10 }
0x602e   :  { %10109 = vmatprep.subr.bf16.mxu0 %v10854_v3 }
0x6031   :  { %10111 = vmatpush3.bf16.msra.mxu0 %v11915_v0 }
0x6032   :  { %10118 = vmatprep.subr.bf16.mxu0 %v10854_v3 }
0x60ff   :  { %v6015_v44 = vpop.f32.mrb[62].mxu0 }
0x6100   :  { %v6020_v19 = vrot.slane %v6015_v44, 2  ;;  %v9552_v20 = vpop.f32.mrb[63].mxu0 }
0x6102   :  { %6036 = vrot.lane.b32.xlu0 %v6020_v19, %s10857_s0  ;;  %v6022_v15 = vadd.f32 %v6020_v19, %v5821_v60  ;;  %v6023_v21 = vadd.f32 %v6020_v19, %v11974_v59  ;;  %v11995_v19 = vadd.f32 %v11949_v43, %v11955_v9 }
0x6104   :  { %v8469_v57 = vmul.f32 -1.442695, %v6022_v15  ;;  %v8470_v5 = vmul.f32 -1.442695, %v6023_v21 }
0x6106   :  { %10541 = vpow2.f32 %v8469_v57 }
0x6107   :  { %10543 = vpow2.f32 %v8470_v5 }
0x6110   :  { %v10542_v25 = vpop.eup %10541 }
0x6111   :  { %v10544_v55 = vpop.eup %10543  ;;  %v6030_v56 = vadd.f32 1.0, %v10542_v25 }
0x6112   :  { %v6031_v58 = vadd.f32 1.0, %v10544_v55 }
0x6113   :  { %10545 = vrcp.f32 %v6030_v56 }
0x6114   :  { %10547 = vrcp.f32 %v6031_v58 }
0x611d   :  { %v10546_v32 = vpop.eup %10545 }
0x611e   :  { %v10548_v28 = vpop.eup %10547  ;;  %v6053_v50 = vsub.f32 1.0, %v10546_v32  ;;  %v6067_v49 = vmul.f32 %v10546_v32, %v6065_v33 }
0x611f   :  { %v6054_v46 = vsub.f32 1.0, %v10548_v28  ;;  %v6068_v61 = vmul.f32 %v10548_v28, %v6065_v33 }
0x6174   :  { %v6037_v29 = vpop.permute.xlu0 %6036 }
0x6175   :  { %v6039_v30 = vmul.f32 %v10546_v32, %v6037_v29  ;;  %v6040_v36 = vmul.f32 %v10548_v28, %v6037_v29 }
0x6177   :  { %6045 = vrot.lane.b32.xlu0 %v6040_v36, %s10858_s29  ;;  %6043 = vrot.lane.b32.xlu1 %v6039_v30, %s10858_s29 }
0x61e9   :  { %v6046_v37 = vpop.permute.xlu0 %6045  ;;  %v6044_v38 = vpop.permute.xlu1 %6043 }
0x61ea   :  { %v6050_v62 = vadd.f32 %v6046_v37, %v11974_v59  ;;  %v6049_v42 = vadd.f32 %v6044_v38, %v5821_v60 }
0x61ec   :  { %10549 = vtanh.f32 %v6050_v62 }
0x61ed   :  { %10551 = vtanh.f32 %v6049_v42 }
0x61f6   :  { %v10550_v31 = vpop.eup %10549 }
0x61f7   :  { %v10552_v45 = vpop.eup %10551  ;;  %6059 = vrot.lane.b32.xlu0 %v10550_v31, %s10859_s7 }
0x61f8   :  { %6057 = vrot.lane.b32.xlu1 %v10552_v45, %s10859_s7 }
0x6269   :  { %v6060_v52 = vpop.permute.xlu0 %6059 }
0x626a   :  { %v6064_v26 = vmul.f32 %v6060_v52, %v6054_v46  ;;  %v6058_v54 = vpop.permute.xlu1 %6057 }
0x626b   :  { %v6063_v27 = vmul.f32 %v6058_v54, %v6053_v50 }
0x626c   :  { %v6070_v34 = vadd.f32 %v6068_v61, %v6064_v26 }
0x626d   :  { %v6069_v60 = vadd.f32 %v6067_v49, %v6063_v27 }
0x626e   :  { %v6074_v51 = vrot.slane %v6070_v34, 6  ;;  %v6197_v4 = vrot.slane %v6070_v34, 2 }
0x626f   :  { %v6073_v1 = vrot.slane %v6069_v60, 6  ;;  %v6196_v11 = vrot.slane %v6069_v60, 2 }
0x6271   :  { %v6075_v12 = vsel %vm532_vm4, %v6073_v1, %v6074_v51  ;;  %v6198_v13 = vsel %vm656_vm5, %v6196_v11, %v6197_v4 }
0x6272   :  { %9562 = vmatmul.mubr.msk.f32.vlgmr.msra.gmra.mrb[64].mxu1 %vm304_vm3, %v6075_v12  ;;  %v6077_v51 = vadd.f32 %v6075_v12, %v11962_v39 }
0x6273   :  { %10114 = vmatpush3.bf16.msra.mxu1 %v11903_v24  ;;  %9583 = vmatprep.mubr.msk.f32.mxu1 %vm10855_vm2, %v10856_v10 }
0x6274   :  { %10115 = vmatprep.subr.bf16.mxu1 %v10854_v3 }
0x6277   :  { %10117 = vmatpush3.bf16.msra.mxu1 %v11915_v0 }
0x6278   :  { %10124 = vmatprep.subr.bf16.mxu1 %v10854_v3 }
0x6345   :  { %v6146_v16 = vpop.f32.mrb[64].mxu1 }
0x6346   :  { %v6151_v18 = vrot.slane %v6146_v16, 4  ;;  %v9563_v44 = vpop.f32.mrb[65].mxu1 }
0x6348   :  { %6167 = vrot.lane.b32.xlu1 %v6151_v18, %s10857_s0  ;;  %v6153_v20 = vadd.f32 %v6151_v18, %v11974_v59  ;;  %v6154_v15 = vadd.f32 %v6151_v18, %v11995_v19 }
0x634a   :  { %v8472_v21 = vmul.f32 -1.442695, %v6153_v20  ;;  %v8473_v57 = vmul.f32 -1.442695, %v6154_v15 }
0x634c   :  { %10553 = vpow2.f32 %v8472_v21 }
0x634d   :  { %10555 = vpow2.f32 %v8473_v57 }
0x6356   :  { %v10554_v5 = vpop.eup %10553 }
0x6357   :  { %v10556_v25 = vpop.eup %10555  ;;  %v6161_v55 = vadd.f32 1.0, %v10554_v5 }
0x6358   :  { %v6162_v56 = vadd.f32 1.0, %v10556_v25 }
0x6359   :  { %10557 = vrcp.f32 %v6161_v55 }
0x635a   :  { %10559 = vrcp.f32 %v6162_v56 }
0x6363   :  { %v10558_v58 = vpop.eup %10557 }
0x6364   :  { %v10560_v32 = vpop.eup %10559  ;;  %v6184_v46 = vsub.f32 1.0, %v10558_v58  ;;  %v6201_v61 = vmul.f32 %v10558_v58, %v6198_v13 }
0x6365   :  { %v6185_v31 = vsub.f32 1.0, %v10560_v32  ;;  %v6202_v33 = vmul.f32 %v10560_v32, %v6197_v4 }
0x63ba   :  { %v6168_v28 = vpop.permute.xlu1 %6167 }
0x63bb   :  { %v6170_v29 = vmul.f32 %v10558_v58, %v6168_v28  ;;  %v6171_v9 = vmul.f32 %v10560_v32, %v6168_v28 }
0x63bd   :  { %6176 = vrot.lane.b32.xlu1 %v6171_v9, %s10858_s29  ;;  %6174 = vrot.lane.b32.xlu0 %v6170_v29, %s10858_s29 }
0x642f   :  { %v6177_v30 = vpop.permute.xlu1 %6176  ;;  %v6175_v36 = vpop.permute.xlu0 %6174 }
0x6430   :  { %v6181_v37 = vadd.f32 %v6177_v30, %v11995_v19  ;;  %v6180_v38 = vadd.f32 %v6175_v36, %v11974_v59  ;;  %v5836_v36 = vadd.f32 %v11953_v2, %v11949_v43 }
0x6432   :  { %10561 = vtanh.f32 %v6181_v37 }
0x6433   :  { %10563 = vtanh.f32 %v6180_v38 }
0x643c   :  { %v10562_v62 = vpop.eup %10561 }
0x643d   :  { %v10564_v42 = vpop.eup %10563  ;;  %6190 = vrot.lane.b32.xlu1 %v10562_v62, %s10859_s7 }
0x643e   :  { %6188 = vrot.lane.b32.xlu0 %v10564_v42, %s10859_s7 }
0x64af   :  { %v6191_v45 = vpop.permute.xlu1 %6190 }
0x64b0   :  { %v6195_v52 = vmul.f32 %v6191_v45, %v6185_v31  ;;  %v6189_v50 = vpop.permute.xlu0 %6188 }
0x64b1   :  { %v6194_v26 = vmul.f32 %v6189_v50, %v6184_v46 }
0x64b2   :  { %v6204_v54 = vadd.f32 %v6202_v33, %v6195_v52 }
0x64b3   :  { %v6203_v49 = vadd.f32 %v6201_v61, %v6194_v26 }
0x64b4   :  { %v6208_v27 = vrot.slane %v6204_v54, 4  ;;  %v6311_v59 = vrot.slane %v6204_v54, 2 }
0x64b5   :  { %v6207_v34 = vrot.slane %v6203_v49, 4  ;;  %v6310_v60 = vrot.slane %v6203_v49, 2 }
0x64b7   :  { %v6209_v1 = vsel %vm668_vm6, %v6207_v34, %v6208_v27  ;;  %v6312_v11 = vsel %vm656_vm5, %v6310_v60, %v6311_v59 }
0x64b8   :  { %v6211_v16 = vadd.f32 %v6209_v1, %v6077_v51  ;;  %9573 = vmatmul.mubr.msk.f32.vlgmr.msra.gmra.mrb[64].mxu0 %vm304_vm3, %v6209_v1  ;;  %v12042_v1 = vadd.f32 %v11949_v43, %v11959_v8 }
0x64b9   :  { %10120 = vmatpush3.bf16.msra.mxu0 %v11903_v24  ;;  %9594 = vmatprep.mubr.msk.f32.mxu0 %vm10855_vm2, %v10856_v10 }
0x64ba   :  { %10121 = vmatprep.subr.bf16.mxu0 %v10854_v3 }
0x64bd   :  { %10123 = vmatpush3.bf16.msra.mxu0 %v11915_v0 }
0x64be   :  { %10130 = vmatprep.subr.bf16.mxu0 %v10854_v3 }
0x658b   :  { %v6280_v4 = vpop.f32.mrb[64].mxu0 }
0x658c   :  { %v6285_v39 = vrot.slane %v6280_v4, 6  ;;  %v9574_v12 = vpop.f32.mrb[65].mxu0 }
0x658e   :  { %6294 = vrot.lane.b32.xlu0 %v6285_v39, %s10857_s0  ;;  %v6287_v13 = vadd.f32 %v6285_v39, %v11995_v19 }
0x6590   :  { %v8475_v18 = vmul.f32 -1.442695, %v6287_v13 }
0x6592   :  { %10565 = vpow2.f32 %v8475_v18 }
0x659c   :  { %v10566_v44 = vpop.eup %10565 }
0x659d   :  { %v6291_v20 = vadd.f32 1.0, %v10566_v44 }
0x659f   :  { %10567 = vrcp.f32 %v6291_v20 }
0x65a9   :  { %v10568_v15 = vpop.eup %10567 }
0x65aa   :  { %v6304_v56 = vsub.f32 1.0, %v10568_v15  ;;  %v6314_v32 = vmul.f32 %v10568_v15, %v6312_v11 }
0x6600   :  { %v6295_v21 = vpop.permute.xlu0 %6294 }
0x6601   :  { %v6297_v57 = vmul.f32 %v10568_v15, %v6295_v21 }
0x6603   :  { %6299 = vrot.lane.b32.xlu1 %v6297_v57, %s10858_s29 }
0x6675   :  { %v6300_v5 = vpop.permute.xlu1 %6299 }
0x6676   :  { %v6302_v25 = vadd.f32 %v6300_v5, %v11995_v19 }
0x6678   :  { %10569 = vtanh.f32 %v6302_v25 }
0x6682   :  { %v10570_v55 = vpop.eup %10569 }
0x6683   :  { %6306 = vrot.lane.b32.xlu0 %v10570_v55, %s10859_s7 }
0x66f5   :  { %v6307_v58 = vpop.permute.xlu0 %6306 }
0x66f6   :  { %v6309_v28 = vmul.f32 %v6307_v58, %v6304_v56 }
0x66f8   :  { %v6315_v29 = vadd.f32 %v6314_v32, %v6309_v28 }
0x66fa   :  { %v6317_v9 = vrot.slane %v6315_v29, 2 }
0x66fc   :  { %9584 = vmatmul.mubr.msk.f32.vlgmr.msra.gmra.mrb[66].mxu1 %vm304_vm3, %v6317_v9  ;;  %v6319_v49 = vadd.f32 %v6317_v9, %v6211_v16 }
0x66fd   :  { %10126 = vmatpush3.bf16.msra.mxu1 %v11903_v24  ;;  %9605 = vmatprep.mubr.msk.f32.mxu1 %vm10855_vm2, %v10856_v10 }
0x66fe   :  { %10127 = vmatprep.subr.bf16.mxu1 %v10854_v3 }
0x6701   :  { %10129 = vmatpush3.bf16.msra.mxu1 %v11915_v0 }
0x6702   :  { %10136 = vmatprep.subr.bf16.mxu1 %v10854_v3 }
0x67cf   :  { %v6388_v19 = vpop.f32.mrb[66].mxu1 }
0x67d0   :  { %6400 = vrot.lane.b32.xlu1 %v6388_v19, %s10857_s0  ;;  %v9585_v30 = vpop.f32.mrb[67].mxu1  ;;  %v6392_v37 = vadd.f32 %v6388_v19, %v5836_v36 }
0x67d2   :  { %v8477_v38 = vmul.f32 -1.442695, %v6392_v37 }
0x67d4   :  { %10571 = vpow2.f32 %v8477_v38 }
0x67de   :  { %v10572_v62 = vpop.eup %10571 }
0x67df   :  { %v6396_v42 = vadd.f32 1.0, %v10572_v62 }
0x67e1   :  { %10573 = vrcp.f32 %v6396_v42 }
0x67eb   :  { %v10574_v31 = vpop.eup %10573 }
0x67ec   :  { %v6410_v61 = vsub.f32 1.0, %v10574_v31  ;;  %v6416_v2 = vmul.f32 %v10574_v31, %v6317_v9 }
0x6842   :  { %v6401_v45 = vpop.permute.xlu1 %6400 }
0x6843   :  { %v6403_v46 = vmul.f32 %v10574_v31, %v6401_v45 }
0x6845   :  { %6405 = vrot.lane.b32.xlu0 %v6403_v46, %s10858_s29 }
0x68b7   :  { %v6406_v33 = vpop.permute.xlu0 %6405 }
0x68b8   :  { %v6408_v52 = vadd.f32 %v6406_v33, %v5836_v36 }
0x68ba   :  { %10575 = vtanh.f32 %v6408_v52 }
0x68c4   :  { %v10576_v50 = vpop.eup %10575 }
0x68c5   :  { %6412 = vrot.lane.b32.xlu1 %v10576_v50, %s10859_s7 }
0x6937   :  { %v6413_v26 = vpop.permute.xlu1 %6412 }
0x6938   :  { %v6415_v54 = vmul.f32 %v6413_v26, %v6410_v61 }
0x693a   :  { %v6417_v27 = vadd.f32 %v6416_v2, %v6415_v54  ;;  %v12068_v54 = vadd.f32 %v11957_v7, %v11949_v43 }
0x693c   :  { %v6418_v59 = vadd.f32 %v6417_v27, %v6319_v49  ;;  %9595 = vmatmul.mubr.msk.f32.vlgmr.msra.gmra.mrb[66].mxu0 %vm304_vm3, %v6417_v27  ;;  %v6538_v32 = vrot.slane %v6417_v27, 2 }
0x693d   :  { %10132 = vmatpush3.bf16.msra.mxu0 %v11903_v24  ;;  %9616 = vmatprep.mubr.msk.f32.mxu0 %vm10855_vm2, %v10856_v10 }
0x693e   :  { %10133 = vmatprep.subr.bf16.mxu0 %v10854_v3 }
0x6941   :  { %10135 = vmatpush3.bf16.msra.mxu0 %v11915_v0 }
0x6942   :  { %10145 = vmatprep.subr.bf16.mxu0 %v10854_v3 }
0x6a0f   :  { %v6488_v34 = vpop.f32.mrb[66].mxu0 }
0x6a10   :  { %v6493_v60 = vrot.slane %v6488_v34, 2  ;;  %v9596_v51 = vpop.f32.mrb[67].mxu0 }
0x6a12   :  { %6509 = vrot.lane.b32.xlu0 %v6493_v60, %s10857_s0  ;;  %v6495_v11 = vadd.f32 %v6493_v60, %v5836_v36  ;;  %v6496_v24 = vadd.f32 %v6493_v60, %v12042_v1 }
0x6a14   :  { %v8479_v16 = vmul.f32 -1.442695, %v6495_v11  ;;  %v8480_v4 = vmul.f32 -1.442695, %v6496_v24 }
0x6a16   :  { %10577 = vpow2.f32 %v8479_v16 }
0x6a17   :  { %10579 = vpow2.f32 %v8480_v4 }
0x6a20   :  { %v10578_v39 = vpop.eup %10577 }
0x6a21   :  { %v10580_v0 = vpop.eup %10579  ;;  %v6503_v12 = vadd.f32 1.0, %v10578_v39 }
0x6a22   :  { %v6504_v13 = vadd.f32 1.0, %v10580_v0 }
0x6a23   :  { %10581 = vrcp.f32 %v6503_v12 }
0x6a24   :  { %10583 = vrcp.f32 %v6504_v13 }
0x6a2d   :  { %v10582_v18 = vpop.eup %10581 }
0x6a2e   :  { %v10584_v44 = vpop.eup %10583  ;;  %v6526_v29 = vsub.f32 1.0, %v10582_v18  ;;  %v6540_v37 = vmul.f32 %v10582_v18, %v6538_v32 }
0x6a2f   :  { %v6527_v58 = vsub.f32 1.0, %v10584_v44  ;;  %v6541_v9 = vmul.f32 %v10584_v44, %v6538_v32  ;;  %v6794_v32 = vld [vmem:[%s12480_s6] sm:$0xf] }
0x6a84   :  { %v6510_v20 = vpop.permute.xlu0 %6509 }
0x6a85   :  { %v6512_v15 = vmul.f32 %v10582_v18, %v6510_v20  ;;  %v6513_v21 = vmul.f32 %v10584_v44, %v6510_v20  ;;  %v6795_v44 = vld [vmem:[%s12479_s5] sm:$0xff]  ;;  %v6796_v20 = vld [vmem:[%s12479_s5 + $0x8] sm:$0xff] }
0x6a87   :  { %6518 = vrot.lane.b32.xlu0 %v6513_v21, %s10858_s29  ;;  %6516 = vrot.lane.b32.xlu1 %v6512_v15, %s10858_s29  ;;  %v10137_v15 = vpack.c.bf16 %v6796_v20, %v6795_v44 }
0x6af9   :  { %v6519_v8 = vpop.permute.xlu0 %6518  ;;  %v6517_v57 = vpop.permute.xlu1 %6516 }
0x6afa   :  { %v6523_v5 = vadd.f32 %v6519_v8, %v12042_v1  ;;  %v6522_v25 = vadd.f32 %v6517_v57, %v5836_v36  ;;  %v6797_v8 = vld [vmem:[%s12479_s5 + $0x10] sm:$0xff]  ;;  %v6798_v57 = vld [vmem:[%s12479_s5 + $0x18] sm:$0xff] }
0x6afc   :  { %10585 = vtanh.f32 %v6523_v5 }
0x6afd   :  { %10587 = vtanh.f32 %v6522_v25  ;;  %v10140_v25 = vpack.c.bf16 %v6798_v57, %v6797_v8 }
0x6b06   :  { %v10586_v55 = vpop.eup %10585 }
0x6b07   :  { %v10588_v56 = vpop.eup %10587  ;;  %6532 = vrot.lane.b32.xlu0 %v10586_v55, %s10859_s7  ;;  %v6800_v55 = vld [vmem:[%s12479_s5 + $0x28] sm:$0xff] }
0x6b08   :  { %6530 = vrot.lane.b32.xlu1 %v10588_v56, %s10859_s7 }
0x6b79   :  { %v6533_v28 = vpop.permute.xlu0 %6532 }
0x6b7a   :  { %v6537_v19 = vmul.f32 %v6533_v28, %v6527_v58  ;;  %v6531_v30 = vpop.permute.xlu1 %6530  ;;  %v6801_v58 = vld [vmem:[%s12479_s5 + $0x30] sm:$0xff] }
0x6b7b   :  { %v6536_v38 = vmul.f32 %v6531_v30, %v6526_v29 }
0x6b7c   :  { %v12050_v62 = vadd.f32 %v6541_v9, %v6537_v19 }
0x6b7d   :  { %v6542_v36 = vadd.f32 %v6540_v37, %v6536_v38 }
0x6b7e   :  { %v6547_v42 = vrot.slane %v12050_v62, 6  ;;  %v6670_v31 = vrot.slane %v12050_v62, 2  ;;  %v6880_v62 = vld [vmem:[%s12481_s11 + $0x18] sm:$0xff] }
0x6b7f   :  { %v6546_v45 = vrot.slane %v6542_v36, 6  ;;  %v6669_v46 = vrot.slane %v6542_v36, 2 }
0x6b81   :  { %v6548_v33 = vsel %vm532_vm4, %v6546_v45, %v6547_v42  ;;  %v12058_v52 = vsel %vm656_vm5, %v6669_v46, %v6670_v31  ;;  %v6877_v45 = vld [vmem:[%s12481_s11] sm:$0xff]  ;;  %v6878_v46 = vld [vmem:[%s12481_s11 + $0x8] sm:$0xff]  ;;  %vm5737_vm4 = vcmask 261124  }
0x6b82   :  { %v12060_v50 = vadd.f32 %v6548_v33, %v6418_v59  ;;  %9606 = vmatmul.mubr.msk.f32.vlgmr.msra.gmra.mrb[68].mxu1 %vm304_vm3, %v6548_v33 }
0x6b83   :  { %9633 = vmatprep.mubr.msk.f32.mxu1 %vm10855_vm2, %v10856_v10  ;;  %10138 = vmatpush3.bf16.msra.mxu1 %v10137_v15 }
0x6b84   :  { %10139 = vmatprep.subr.bf16.mxu1 %v10854_v3 }
0x6b87   :  { %10141 = vmatpush3.bf16.msra.mxu1 %v10140_v25 }
0x6b88   :  { %10142 = vmatprep.subr.bf16.mxu1 %v10854_v3 }
0x6c55   :  { %v6619_v61 = vpop.f32.mrb[68].mxu1 }
0x6c56   :  { %v6624_v26 = vrot.slane %v6619_v61, 4  ;;  %v9607_v2 = vpop.f32.mrb[69].mxu1 }
0x6c58   :  { %6640 = vrot.lane.b32.xlu1 %v6624_v26, %s10857_s0  ;;  %v6626_v49 = vadd.f32 %v6624_v26, %v12042_v1  ;;  %v6627_v27 = vadd.f32 %v6624_v26, %v12068_v54 }
0x6c5a   :  { %v8482_v59 = vmul.f32 -1.442695, %v6626_v49  ;;  %v8483_v34 = vmul.f32 -1.442695, %v6627_v27  ;;  %v10146_v27 = vpack.c.bf16 %v6878_v46, %v6877_v45 }
0x6c5c   :  { %10589 = vpow2.f32 %v8482_v59  ;;  %v6879_v59 = vld [vmem:[%s12481_s11 + $0x10] sm:$0xff] }
0x6c5d   :  { %10591 = vpow2.f32 %v8483_v34 }
0x6c66   :  { %v10590_v60 = vpop.eup %10589 }
0x6c67   :  { %v10592_v51 = vpop.eup %10591  ;;  %v6634_v11 = vadd.f32 1.0, %v10590_v60  ;;  %v10149_v60 = vpack.c.bf16 %v6880_v62, %v6879_v59 }
0x6c68   :  { %v6635_v24 = vadd.f32 1.0, %v10592_v51  ;;  %v6881_v51 = vld [vmem:[%s12481_s11 + $0x20] sm:$0xff] }
0x6c69   :  { %10593 = vrcp.f32 %v6634_v11  ;;  %v6882_v11 = vld [vmem:[%s12481_s11 + $0x28] sm:$0xff] }
0x6c6a   :  { %10595 = vrcp.f32 %v6635_v24  ;;  %v10152_v24 = vpack.c.bf16 %v6882_v11, %v6881_v51  ;;  %v8495_v51 = vld [vmem:[%s12484_s18] ss:$0 sm:$0xff] }
0x6c73   :  { %v10594_v16 = vpop.eup %10593 }
0x6c74   :  { %v10596_v4 = vpop.eup %10595  ;;  %v6657_v9 = vsub.f32 1.0, %v10594_v16  ;;  %v6674_v38 = vmul.f32 %v10594_v16, %v12058_v52 }
0x6c75   :  { %v6658_v28 = vsub.f32 1.0, %v10596_v4  ;;  %v6675_v19 = vmul.f32 %v10596_v4, %v6670_v31 }
0x6cca   :  { %v6641_v43 = vpop.permute.xlu1 %6640 }
0x6ccb   :  { %v6643_v7 = vmul.f32 %v10594_v16, %v6641_v43  ;;  %v6644_v39 = vmul.f32 %v10596_v4, %v6641_v43  ;;  %v6883_v16 = vld [vmem:[%s12481_s11 + $0x30] sm:$0xff] }
0x6ccd   :  { %6649 = vrot.lane.b32.xlu1 %v6644_v39, %s10858_s29  ;;  %6647 = vrot.lane.b32.xlu0 %v6643_v7, %s10858_s29 }
0x6d3f   :  { %v6650_v0 = vpop.permute.xlu1 %6649  ;;  %v6648_v12 = vpop.permute.xlu0 %6647 }
0x6d40   :  { %v6654_v13 = vadd.f32 %v6650_v0, %v12068_v54  ;;  %v6653_v18 = vadd.f32 %v6648_v12, %v12042_v1  ;;  %v6799_v1 = vld [vmem:[%s12479_s5 + $0x20] sm:$0xff] }
0x6d41   :  { %v10143_v56 = vpack.c.bf16 %v6800_v55, %v6799_v1 }
0x6d42   :  { %10597 = vtanh.f32 %v6654_v13 }
0x6d43   :  { %10599 = vtanh.f32 %v6653_v18  ;;  %10144 = vmatpush3.bf16.msra.mxu1 %v10143_v56 }
0x6d44   :  { %9631 = vmatprep.subr.mxu1 %v10856_v10 }
0x6d47   :  { %9632 = vmatpush3.msra.mxu1 %v6801_v58 }
0x6d48   :  { %9634 = vmatmul.mubr.msk.f32.vlgmr.msra.gmra.mrb[70].mxu1 %vm6802_vm10, %v6794_v32  ;;  %9653 = vmatprep.subr.mxu1 %v10856_v10 }
0x6d49   :  { %9655 = vmatprep.mubr.msk.f32.mxu1 %vm10855_vm2, %v10856_v10 }
0x6d4c   :  { %v10598_v21 = vpop.eup %10597 }
0x6d4d   :  { %v10600_v5 = vpop.eup %10599  ;;  %6663 = vrot.lane.b32.xlu1 %v10598_v21, %s10859_s7 }
0x6d4e   :  { %6661 = vrot.lane.b32.xlu0 %v10600_v5, %s10859_s7 }
0x6dbf   :  { %v6664_v29 = vpop.permute.xlu1 %6663 }
0x6dc0   :  { %v6668_v30 = vmul.f32 %v6664_v29, %v6658_v28  ;;  %v6662_v37 = vpop.permute.xlu0 %6661 }
0x6dc1   :  { %v6667_v36 = vmul.f32 %v6662_v37, %v6657_v9 }
0x6dc2   :  { %v6677_v42 = vadd.f32 %v6675_v19, %v6668_v30 }
0x6dc3   :  { %v6676_v33 = vadd.f32 %v6674_v38, %v6667_v36 }
0x6dc4   :  { %v6681_v61 = vrot.slane %v6677_v42, 4  ;;  %v6784_v26 = vrot.slane %v6677_v42, 2 }
0x6dc5   :  { %v6680_v2 = vrot.slane %v6676_v33, 4  ;;  %v6783_v49 = vrot.slane %v6676_v33, 2 }
0x6dc7   :  { %v6682_v31 = vsel %vm668_vm6, %v6680_v2, %v6681_v61  ;;  %v6785_v52 = vsel %vm656_vm5, %v6783_v49, %v6784_v26  ;;  %v5708_v61 = vrot.slane %v11945_v47, 4  ;;  %v7127_v47 = vld [vmem:[%s12483_s16] sm:$0xff] }
0x6dc8   :  { %v6684_v34 = vadd.f32 %v6682_v31, %v12060_v50  ;;  %9617 = vmatmul.mubr.msk.f32.vlgmr.msra.gmra.mrb[68].mxu0 %vm304_vm3, %v6682_v31  ;;  %v6876_v50 = vld [vmem:[%s12482_s15] sm:$0x3f] }
0x6dc9   :  { %10147 = vmatpush3.bf16.msra.mxu0 %v10146_v27  ;;  %9650 = vmatprep.mubr.msk.f32.mxu0 %vm10855_vm2, %v10856_v10  ;;  %v5710_v26 = vadd.f32 %v5708_v61, %v11894_v40 }
0x6dca   :  { %10148 = vmatprep.subr.bf16.mxu0 %v10854_v3 }
0x6dcb   :  { %v8458_v2 = vmul.f32 -1.442695, %v5710_v26  ;;  %v5733_v26 = vrot.slane %v11928_v6, 4 }
0x6dcd   :  { %10150 = vmatpush3.bf16.msra.mxu0 %v10149_v60  ;;  %v7129_v60 = vld [vmem:[%s12483_s16 + $0x10] sm:$0xff] }
0x6dce   :  { %10151 = vmatprep.subr.bf16.mxu0 %v10854_v3 }
0x6dd1   :  { %10153 = vmatpush3.bf16.msra.mxu0 %v10152_v24  ;;  %v7130_v24 = vld [vmem:[%s12483_s16 + $0x18] sm:$0xff] }
0x6dd2   :  { %9648 = vmatprep.subr.mxu0 %v10856_v10 }
0x6dd5   :  { %9649 = vmatpush3.msra.mxu0 %v6883_v16  ;;  %v10158_v16 = vpack.c.bf16 %v7130_v24, %v7129_v60  ;;  %v7386_v60 = vld [vmem:[%s12487_s1 + $0x18] sm:$0xff] }
0x6dd6   :  { %9651 = vmatmul.mubr.msk.f32.vlgmr.msra.gmra.mrb[70].mxu0 %vm6802_vm10, %v6876_v50  ;;  %10154 = vmatprep.subr.bf16.mxu0 %v10854_v3 }
0x6dd7   :  { %9671 = vmatprep.mubr.msk.f32.mxu0 %vm10855_vm2, %v10856_v10 }
0x6e1b   :  { %v6872_v4 = vpop.f32.mrb[70].mxu1 }
0x6e1c   :  { %v9635_v43 = vpop.f32.mrb[71].mxu1 }
0x6e1d   :  { %v1426_v43 = vand.u32 2147483647, %v11334_v17 }
0x6e9b   :  { %v6753_v7 = vpop.f32.mrb[68].mxu0 }
0x6e9c   :  { %v6758_v39 = vrot.slane %v6753_v7, 6  ;;  %v9618_v0 = vpop.f32.mrb[69].mxu0  ;;  %v1427_v7 = vsub.f32 0.0, %v1426_v43 }
0x6e9e   :  { %6767 = vrot.lane.b32.xlu0 %v6758_v39, %s10857_s0  ;;  %v6760_v18 = vadd.f32 %v6758_v39, %v12068_v54  ;;  %v1428_v39 = vmul.f32 1.442695, %v1427_v7 }
0x6ea0   :  { %v8485_v44 = vmul.f32 -1.442695, %v6760_v18 }
0x6ea2   :  { %10601 = vpow2.f32 %v8485_v44 }
0x6ea9   :  { %v6953_v12 = vpop.f32.mrb[70].mxu0 }
0x6eaa   :  { %v9652_v13 = vpop.f32.mrb[71].mxu0  ;;  %9654 = vmatpush3.xpose.msk.msra.mxu1 %vm304_vm3, %v6953_v12 }
0x6eab   :  { %9658 = vmatprep.subr.mxu1 %v10856_v10 }
0x6eac   :  { %v10602_v20 = vpop.eup %10601 }
0x6ead   :  { %9656 = vmatmul.mubr.msk.f32.vlgmr.msra.gmra.mrb[72].mxu1 %vm304_vm3, %v6872_v4  ;;  %v6764_v15 = vadd.f32 1.0, %v10602_v20 }
0x6eae   :  { %9660 = vmatprep.mubr.msk.f32.mxu1 %vm10855_vm2, %v10856_v10 }
0x6eaf   :  { %10603 = vrcp.f32 %v6764_v15 }
0x6eb9   :  { %v10604_v21 = vpop.eup %10603 }
0x6eba   :  { %v6777_v19 = vsub.f32 1.0, %v10604_v21  ;;  %v6787_v37 = vmul.f32 %v10604_v21, %v6785_v52 }
0x6f10   :  { %v6768_v8 = vpop.permute.xlu0 %6767 }
0x6f11   :  { %v6770_v57 = vmul.f32 %v10604_v21, %v6768_v8 }
0x6f13   :  { %6772 = vrot.lane.b32.xlu0 %v6770_v57, %s10858_s29  ;;  %v1423_v57 = vmax.f32 %v11334_v17, 0.0 }
0x6f80   :  { %v7029_v5 = vpop.f32.mrb[72].mxu1 }
0x6f81   :  { %v7033_v25 = vmul.f32 0.17677669, %v7029_v5  ;;  %v9657_v1 = vpop.f32.mrb[73].mxu1 }
0x6f82   :  { %v7123_v1 = vld [vmem:[%s12485_s23] sm:$0xff] }
0x6f83   :  { %v7035_v55 = vsel %vm7034_vm11, %v7033_v25, -inf }
0x6f84   :  { %7036 = vmax.xlane.f32.xlu1 %v7035_v55  ;;  %v7124_v55 = vld [vmem:[%s12485_s23 + $0x8] sm:$0xff] }
0x6f85   :  { %v6773_v56 = vpop.permute.xlu0 %6772 }
0x6f86   :  { %v6775_v58 = vadd.f32 %v6773_v56, %v12068_v54  ;;  %v10161_v56 = vpack.c.bf16 %v7124_v55, %v7123_v1 }
0x6f88   :  { %10605 = vtanh.f32 %v6775_v58 }
0x6f92   :  { %v10606_v32 = vpop.eup %10605 }
0x6f95   :  { %6779 = vrot.lane.b32.xlu1 %v10606_v32, %s10859_s7 }
0x7011   :  { %v7037_v28 = vpop.xlane.xlu1 %7036 }
0x7012   :  { %v7038_v29 = vsub.f32 %v7033_v25, %v7037_v28 }
0x7014   :  { %v7039_v9 = vmul.f32 1.442695, %v7038_v29  ;;  %v7125_v29 = vld [vmem:[%s12485_s23 + $0x10] sm:$0xff] }
0x7015   :  { %v6780_v30 = vpop.permute.xlu1 %6779 }
0x7016   :  { %10607 = vpow2.f32 %v7039_v9  ;;  %v6782_v38 = vmul.f32 %v6780_v30, %v6777_v19  ;;  %v7126_v9 = vld [vmem:[%s12485_s23 + $0x18] sm:$0xff] }
0x7017   :  { %10609 = vpow2.f32 %v8458_v2  ;;  %v10164_v19 = vpack.c.bf16 %v7126_v9, %v7125_v29 }
0x7018   :  { %v6788_v36 = vadd.f32 %v6787_v37, %v6782_v38 }
0x701a   :  { %v6790_v42 = vrot.slane %v6788_v36, 2 }
0x701c   :  { %v6792_v45 = vadd.f32 %v6790_v42, %v6684_v34  ;;  %v7128_v34 = vld [vmem:[%s12483_s16 + $0x8] sm:$0xff]  ;;  %v7301_v42 = vld [vmem:[%s12486_s26] sm:$0xff] }
0x701d   :  { %v10155_v11 = vpack.c.bf16 %v7128_v34, %v7127_v47  ;;  %v7384_v47 = vld [vmem:[%s12487_s1 + $0x8] sm:$0xff]  ;;  %v7385_v34 = vld [vmem:[%s12487_s1 + $0x10] sm:$0xff] }
0x701e   :  { %v6793_v46 = vmul.f32 0.125, %v6792_v45 }
0x701f   :  { %10156 = vmatpush3.bf16.msra.mxu0 %v10155_v11 }
0x7020   :  { %v10608_v33 = vpop.eup %10607  ;;  %9659 = vmatpush3.msk.msra.mxu1 %vm656_vm5, %v6793_v46  ;;  %10157 = vmatprep.subr.bf16.mxu0 %v10854_v3 }
0x7021   :  { %v7041_v54 = vsel %vm7034_vm11, %v10608_v33, 0.0  ;;  %10160 = vmatprep.subr.bf16.mxu1 %v10854_v3  ;;  %v10610_v49 = vpop.eup %10609 }
0x7022   :  { %7042 = vadd.xlane.f32.xlu0 %v7041_v54  ;;  %v5714_v27 = vadd.f32 1.0, %v10610_v49 }
0x7023   :  { %10159 = vmatpush3.bf16.msra.mxu0 %v10158_v16 }
0x7024   :  { %10611 = vrcp.f32 %v5714_v27  ;;  %10166 = vmatprep.subr.bf16.mxu0 %v10854_v3 }
0x702e   :  { %v12134_v62 = vpop.eup %10611 }
0x702f   :  { %v5727_v2 = vsub.f32 1.0, %v12134_v62  ;;  %v5735_v27 = vmul.f32 %v12134_v62, %v5733_v26 }
0x7038   :  { %5717 = vrot.lane.b32.xlu0 %v5708_v61, %s10857_s0  ;;  %s12489_s0 = sld [smem:[#allocation32_spill]] }
0x703e   :  { %v12206_v1 = vld [vmem:[%s12489_s0] ss:$0 sm:$0xff] }
0x70af   :  { %v7043_v59 = vpop.xlane.xlu0 %7042 }
0x70b0   :  { %10613 = vrcp.f32 %v7043_v59 }
0x70b1   :  { %10615 = vpow2.f32 %v1428_v39  ;;  %v8494_v39 = vld [vmem:[%s12488_s2] ss:$0 sm:$0xff] }
0x70b3   :  { %v5718_v31 = vpop.permute.xlu0 %5717 }
0x70b4   :  { %v5720_v52 = vmul.f32 %v12134_v62, %v5718_v31  ;;  %v12186_v62 = vpack.c.bf16 %v7386_v60, %v7385_v34 }
0x70b6   :  { %5722 = vrot.lane.b32.xlu1 %v5720_v52, %s10858_s29 }
0x70ba   :  { %v10614_v50 = vpop.eup %10613  ;;  %7292 = vrot.lane.b32.xlu1 %v8495_v51, %s10861_s22 }
0x70bb   :  { %v7045_v4 = vmul.f32 %v10614_v50, %v10608_v33  ;;  %v10616_v0 = vpop.eup %10615  ;;  %v3135_v50 = vlaneseq }
0x70bc   :  { %v1430_v12 = vadd.f32 1.0, %v10616_v0  ;;  %v1433_v13 = vmul.f32 -0.5, %v10616_v0  ;;  %v1436_v20 = vand.u32 2147483647, %v10616_v0 }
0x70bd   :  { %9661 = vmatmul.mubr.msk.f32.vlgmr.msra.gmra.mrb[74].mxu1 %vm7046_vm12, %v7045_v4  ;;  %v7378_v4 = vshrl.u32 %v3135_v50, 7 }
0x70be   :  { %9682 = vmatprep.mubr.msk.f32.mxu1 %vm10855_vm2, %v10856_v10  ;;  %10617 = vlog2.f32 %v1430_v12  ;;  %v1434_v44 = vadd.f32 1.0, %v1433_v13  ;;  %vm1437_vm13 = vcmp.lt.f32.partialorder %v1436_v20, 0.0004427343  ;;  %10162 = vmatpush3.bf16.msra.mxu1 %v10161_v56  ;;  %v12194_v20 = vld [vmem:[%s12487_s1 + $0x20] sm:$0x7f] }
0x70bf   :  { %10163 = vmatprep.subr.bf16.mxu1 %v10854_v3  ;;  %v7379_v43 = vsub.s32 0, %v7378_v4 }
0x70c0   :  { %v1435_v21 = vmul.f32 %v10616_v0, %v1434_v44 }
0x70c2   :  { %10165 = vmatpush3.bf16.msra.mxu1 %v10164_v19 }
0x70c3   :  { %10169 = vmatprep.subr.bf16.mxu1 %v10854_v3 }
0x70c8   :  { %v10618_v18 = vpop.eup %10617 }
0x70c9   :  { %v1432_v15 = vmul.f32 0.6931472, %v10618_v18 }
0x70cb   :  { %v1438_v8 = vsel %vm1437_vm13, %v1435_v21, %v1432_v15 }
0x70cc   :  { %v1439_v5 = vadd.f32 %v1438_v8, %v1423_v57  ;;  %v10694_v57 = vld [vmem:[%s10884_s9 + $0x18] sm:$0xff]  ;;  %s12491_s9 = sld [smem:[#allocation34_spill]] }
0x70ce   :  { %v1440_v25 = vsel %vm1424_vm14, %v11334_v17, %v1439_v5 }
0x70cf   :  { %v1441_v58 = vmul.f32 0.9, %v1440_v25 }
0x70d1   :  { %v12158_v30 = vadd.f32 0.1, %v1441_v58 }
0x7128   :  { %v5723_v32 = vpop.permute.xlu1 %5722 }
0x7129   :  { %v5725_v28 = vadd.f32 %v5723_v32, %v11894_v40  ;;  %v7302_v40 = vld [vmem:[%s12486_s26 + $0x8] sm:$0xff] }
0x712a   :  { %v10167_v45 = vpack.c.bf16 %v7302_v40, %v7301_v42  ;;  %v7391_v40 = vld [vmem:[%s12490_s17 + $0x10] sm:$0xff] }
0x712b   :  { %10619 = vtanh.f32 %v5725_v28 }
0x712c   :  { %v7293_v37 = vpop.permute.xlu1 %7292 }
0x712d   :  { %v7295_v38 = vmul.f32 %v7293_v37, %v12158_v30 }
0x712f   :  { %7297 = vrot.lane.b32.xlu1 %v7295_v38, %s10862_s28  ;;  %v7389_v38 = vld [vmem:[%s12490_s17] sm:$0xff] }
0x7135   :  { %v10620_v36 = vpop.eup %10619 }
0x7136   :  { %5729 = vrot.lane.b32.xlu0 %v10620_v36, %s10859_s7  ;;  %v7390_v36 = vld [vmem:[%s12490_s17 + $0x8] sm:$0xff] }
0x7137   :  { %v12213_v42 = vpack.c.bf16 %v7390_v36, %v7389_v38 }
0x7190   :  { %v7119_v46 = vpop.f32.mrb[74].mxu1 }
0x7191   :  { %v9662_v33 = vpop.f32.mrb[75].mxu1  ;;  %9672 = vmatmul.mubr.msk.f32.vlgmr.msra.gmra.mrb[72].mxu0 %vm304_vm3, %v7119_v46 }
0x7192   :  { %10168 = vmatpush3.bf16.msra.mxu0 %v10167_v45  ;;  %9689 = vmatprep.mubr.msk.f32.mxu0 %vm10855_vm2, %v10856_v10  ;;  %v7392_v45 = vld [vmem:[%s12490_s17 + $0x18] sm:$0xff] }
0x7193   :  { %10175 = vmatprep.subr.bf16.mxu0 %v10854_v3  ;;  %v12221_v33 = vpack.c.bf16 %v7392_v45, %v7391_v40 }
0x71a1   :  { %v7298_v54 = vpop.permute.xlu1 %7297 }
0x71a2   :  { %v7300_v61 = vadd.f32 %v7298_v54, %v11334_v17  ;;  %v7383_v17 = vld [vmem:[%s12487_s1] sm:$0xff] }
0x71a3   :  { %v12182_v6 = vpack.c.bf16 %v7384_v47, %v7383_v17 }
0x71a4   :  { %9690 = vmatmul.mubr.msk.f32.vlgmr.msra.gmra.mrb[74].mxu0 %vm7303_vm15, %v7300_v61 }
0x71a5   :  { %9713 = vmatprep.mubr.msk.f32.mxu0 %vm10855_vm2, %v10856_v10  ;;  %10177 = vmatpush3.bf16.msra.mxu0 %v12213_v42 }
0x71a6   :  { %10178 = vmatprep.subr.bf16.mxu0 %v10854_v3 }
0x71a8   :  { %v5730_v49 = vpop.permute.xlu0 %5729 }
0x71a9   :  { %v5732_v59 = vmul.f32 %v5730_v49, %v5727_v2  ;;  %10180 = vmatpush3.bf16.msra.mxu0 %v12221_v33 }
0x71aa   :  { %10181 = vmatprep.subr.bf16.mxu0 %v10854_v3 }
0x71ab   :  { %v5736_v31 = vadd.f32 %v5735_v27, %v5732_v59 }
0x71ad   :  { %v7205_v52 = vrot.slane %v5736_v31, 4  ;;  %5738 = vst.msk [vmem:[#allocation9 - $0x4] sm:$0xf0] %vm5737_vm4, %v5736_v31  ;;  %v12240_v31 = vld [vmem:[%s12491_s9] ss:$0 sm:$0xff] }
0x71af   :  { %9683 = vmatmul.mubr.msk.f32.vlgmr.msra.gmra.mrb[76].mxu1 %vm304_vm3, %v7205_v52 }
0x71b0   :  { %9702 = vmatprep.mubr.msk.f32.mxu1 %vm10855_vm2, %v10856_v10  ;;  %10171 = vmatpush3.bf16.msra.mxu1 %v12182_v6 }
0x71b1   :  { %10172 = vmatprep.subr.bf16.mxu1 %v10854_v3 }
0x71b4   :  { %10174 = vmatpush3.bf16.msra.mxu1 %v12186_v62 }
0x71b5   :  { %9700 = vmatprep.subr.mxu1 %v10856_v10 }
0x71b8   :  { %9701 = vmatpush3.msk.msra.mxu1 %vm205_vm0, %v12194_v20 }
0x71b9   :  { %10187 = vmatprep.subr.bf16.mxu1 %v10854_v3 }
0x7264   :  { %v7200_v51 = vpop.f32.mrb[72].mxu0 }
0x7265   :  { %v9673_v11 = vpop.f32.mrb[73].mxu0 }
0x7277   :  { %v7373_v24 = vpop.f32.mrb[74].mxu0 }
0x7278   :  { %v9691_v16 = vpop.f32.mrb[75].mxu0  ;;  %v7380_v13 = vrot.slane %v7373_v24, %v7379_v43 }
0x7282   :  { %v7274_v7 = vpop.f32.mrb[76].mxu1 }
0x7283   :  { %v7275_v0 = vadd.f32 %v7274_v7, %v7200_v51  ;;  %v9684_v12 = vpop.f32.mrb[77].mxu1 }
0x7285   :  { %v7285_v18 = vadd.f32 %v8494_v39, %v7275_v0 }
0x7287   :  { %v7381_v44 = vadd.f32 %v7380_v13, %v7285_v18 }
0x7289   :  { %10621 = vtanh.f32 %v7381_v44 }
0x7293   :  { %v10622_v15 = vpop.eup %10621 }
0x7294   :  { %v7407_v21 = vrot.slane %v10622_v15, 4 }
0x7296   :  { %7408 = vrot.lane.b32.xlu0 %v7407_v21, %s10860_s13 }
0x7308   :  { %v7409_v8 = vpop.permute.xlu0 %7408 }
0x7309   :  { %v7411_v5 = vsel %vm186_vm1, %v10694_v57, %v7409_v8 }
0x730a   :  { %v7413_v25 = vrot.slane %v7411_v5, 4 }
0x730c   :  { %9703 = vmatmul.mubr.msk.f32.vlgmr.msra.gmra.mrb[78].mxu1 %vm2403_vm9, %v7413_v25 }
0x730d   :  { %9737 = vmatprep.mubr.msk.f32.mxu1 %vm10855_vm2, %v10856_v10  ;;  %10189 = vmatpush3.bf16.msra.mxu1 %v12213_v42 }
0x730e   :  { %10190 = vmatprep.subr.bf16.mxu1 %v10854_v3 }
0x7311   :  { %10192 = vmatpush3.bf16.msra.mxu1 %v12221_v33 }
0x7312   :  { %10193 = vmatprep.subr.bf16.mxu1 %v10854_v3 }
0x73df   :  { %v7485_v55 = vpop.f32.mrb[78].mxu1 }
0x73e0   :  { %v7486_v56 = vadd.f32 %v12206_v1, %v7485_v55  ;;  %v9704_v58 = vpop.f32.mrb[79].mxu1 }
0x73e2   :  { %7496 = vrot.lane.b32.xlu1 %v7486_v56, %s10859_s7  ;;  %v8501_v32 = vmul.f32 -1.442695, %v7486_v56 }
0x73e4   :  { %10623 = vpow2.f32 %v8501_v32 }
0x73ee   :  { %v10624_v28 = vpop.eup %10623 }
0x73ef   :  { %v7492_v29 = vadd.f32 1.0, %v10624_v28 }
0x73f1   :  { %10625 = vrcp.f32 %v7492_v29 }
0x73fb   :  { %v10626_v9 = vpop.eup %10625 }
0x73fc   :  { %v7506_v26 = vsub.f32 1.0, %v10626_v9  ;;  %v7512_v49 = vmul.f32 %v10626_v9, %v10622_v15 }
0x7454   :  { %v7497_v19 = vpop.permute.xlu1 %7496 }
0x7455   :  { %v7499_v37 = vmul.f32 %v10626_v9, %v7497_v19 }
0x7457   :  { %7501 = vrot.lane.b32.xlu0 %v7499_v37, %s10858_s29 }
0x74c9   :  { %v7502_v46 = vpop.permute.xlu0 %7501 }
0x74ca   :  { %v7504_v54 = vadd.f32 %v7502_v46, %v7486_v56 }
0x74cc   :  { %10627 = vtanh.f32 %v7504_v54 }
0x74d6   :  { %v10628_v61 = vpop.eup %10627 }
0x74d7   :  { %7508 = vrot.lane.b32.xlu1 %v10628_v61, %s10859_s7 }
0x7549   :  { %v7509_v2 = vpop.permute.xlu1 %7508 }
0x754a   :  { %v7511_v27 = vmul.f32 %v7509_v2, %v7506_v26 }
0x754c   :  { %v7513_v59 = vadd.f32 %v7512_v49, %v7511_v27 }
0x754e   :  { %7587 = vrot.lane.b32.xlu0 %v7513_v59, %s10860_s13  ;;  %9714 = vmatmul.mubr.msk.f32.vlgmr.msra.gmra.mrb[76].mxu0 %vm304_vm3, %v7513_v59 }
0x754f   :  { %10183 = vmatpush3.bf16.msra.mxu0 %v12182_v6  ;;  %9726 = vmatprep.mubr.msk.f32.mxu0 %vm10855_vm2, %v10856_v10 }
0x7550   :  { %10184 = vmatprep.subr.bf16.mxu0 %v10854_v3 }
0x7553   :  { %10186 = vmatpush3.bf16.msra.mxu0 %v12186_v62 }
0x7554   :  { %9724 = vmatprep.subr.mxu0 %v10856_v10 }
0x7557   :  { %9725 = vmatpush3.msk.msra.mxu0 %vm205_vm0, %v12194_v20 }
0x7558   :  { %10199 = vmatprep.subr.bf16.mxu0 %v10854_v3 }
0x75c0   :  { %v7588_v34 = vpop.permute.xlu0 %7587 }
0x7621   :  { %v7583_v52 = vpop.f32.mrb[76].mxu0 }
0x7622   :  { %v12243_v17 = vadd.f32 %v12240_v31, %v7583_v52  ;;  %v9715_v47 = vpop.f32.mrb[77].mxu0 }
0x7624   :  { %v7590_v60 = vsel %vm186_vm1, %v12243_v17, %v7588_v34 }
0x7625   :  { %9727 = vmatmul.mubr.msk.f32.vlgmr.msra.gmra.mrb[78].mxu0 %vm2403_vm9, %v7590_v60 }
0x7626   :  { %10201 = vmatpush3.bf16.msra.mxu0 %v12213_v42  ;;  %9761 = vmatprep.mubr.msk.f32.mxu0 %vm10855_vm2, %v10856_v10 }
0x7627   :  { %10202 = vmatprep.subr.bf16.mxu0 %v10854_v3 }
0x762a   :  { %10204 = vmatpush3.bf16.msra.mxu0 %v12221_v33 }
0x762b   :  { %10205 = vmatprep.subr.bf16.mxu0 %v10854_v3 }
0x76f8   :  { %v7660_v51 = vpop.f32.mrb[78].mxu0 }
0x76f9   :  { %v7661_v11 = vadd.f32 %v12206_v1, %v7660_v51  ;;  %v9728_v24 = vpop.f32.mrb[79].mxu0 }
0x76fb   :  { %7671 = vrot.lane.b32.xlu1 %v7661_v11, %s10859_s7  ;;  %v8505_v16 = vmul.f32 -1.442695, %v7661_v11 }
0x76fd   :  { %10629 = vpow2.f32 %v8505_v16 }
0x7707   :  { %v10630_v4 = vpop.eup %10629 }
0x7708   :  { %v7667_v43 = vadd.f32 1.0, %v10630_v4 }
0x770a   :  { %10631 = vrcp.f32 %v7667_v43 }
0x7714   :  { %v10632_v7 = vpop.eup %10631 }
0x7715   :  { %v7681_v44 = vsub.f32 1.0, %v10632_v7  ;;  %v7687_v21 = vmul.f32 %v10632_v7, %v7513_v59 }
0x776d   :  { %v7672_v39 = vpop.permute.xlu1 %7671 }
0x776e   :  { %v7674_v0 = vmul.f32 %v10632_v7, %v7672_v39 }
0x7770   :  { %7676 = vrot.lane.b32.xlu0 %v7674_v0, %s10858_s29 }
0x77e2   :  { %v7677_v12 = vpop.permute.xlu0 %7676 }
0x77e3   :  { %v7679_v13 = vadd.f32 %v7677_v12, %v7661_v11  ;;  %v12313_v12 = vand.u32 127, %v3135_v50 }
0x77e5   :  { %10633 = vtanh.f32 %v7679_v13 }
0x77ef   :  { %v10634_v18 = vpop.eup %10633 }
0x77f0   :  { %7683 = vrot.lane.b32.xlu1 %v10634_v18, %s10859_s7 }
0x7862   :  { %v7684_v15 = vpop.permute.xlu1 %7683 }
0x7863   :  { %v7686_v8 = vmul.f32 %v7684_v15, %v7681_v44 }
0x7865   :  { %v7688_v57 = vadd.f32 %v7687_v21, %v7686_v8 }
0x7867   :  { %7762 = vrot.lane.b32.xlu0 %v7688_v57, %s10860_s13  ;;  %9738 = vmatmul.mubr.msk.f32.vlgmr.msra.gmra.mrb[80].mxu1 %vm304_vm3, %v7688_v57 }
0x7868   :  { %10195 = vmatpush3.bf16.msra.mxu1 %v12182_v6  ;;  %9750 = vmatprep.mubr.msk.f32.mxu1 %vm10855_vm2, %v10856_v10 }
0x7869   :  { %10196 = vmatprep.subr.bf16.mxu1 %v10854_v3 }
0x786c   :  { %10198 = vmatpush3.bf16.msra.mxu1 %v12186_v62 }
0x786d   :  { %9748 = vmatprep.subr.mxu1 %v10856_v10 }
0x7870   :  { %9749 = vmatpush3.msk.msra.mxu1 %vm205_vm0, %v12194_v20 }
0x7871   :  { %10211 = vmatprep.subr.bf16.mxu1 %v10854_v3 }
0x78d9   :  { %v7763_v56 = vpop.permute.xlu0 %7762 }
0x793a   :  { %v7758_v5 = vpop.f32.mrb[80].mxu1 }
0x793b   :  { %v7759_v25 = vadd.f32 %v12240_v31, %v7758_v5  ;;  %v9739_v55 = vpop.f32.mrb[81].mxu1  ;;  %v4788_v5 = vrot.slane %v11745_v53, 4 }
0x793d   :  { %v7765_v58 = vsel %vm186_vm1, %v7759_v25, %v7763_v56  ;;  %v8113_v24 = vrot.slane %v7759_v25, 4  ;;  %v10695_v25 = vld [vmem:[%s12475_s14] ss:$0 sm:$0xff] }
0x793e   :  { %9751 = vmatmul.mubr.msk.f32.vlgmr.msra.gmra.mrb[82].mxu1 %vm2403_vm9, %v7765_v58  ;;  %v4784_v55 = vadd.f32 %v10695_v25, %v11821_v41 }
0x793f   :  { %10213 = vmatpush3.bf16.msra.mxu1 %v12213_v42  ;;  %9785 = vmatprep.mubr.msk.f32.mxu1 %vm10855_vm2, %v10856_v10  ;;  %v12306_v16 = vsel %vm668_vm6, %v12243_v17, %v8113_v24 }
0x7940   :  { %10214 = vmatprep.subr.bf16.mxu1 %v10854_v3 }
0x7943   :  { %10216 = vmatpush3.bf16.msra.mxu1 %v12221_v33 }
0x7a11   :  { %v7835_v32 = vpop.f32.mrb[82].mxu1 }
0x7a12   :  { %v7836_v28 = vadd.f32 %v12206_v1, %v7835_v32  ;;  %v9752_v29 = vpop.f32.mrb[83].mxu1  ;;  %v4791_v32 = vrot.slane %v4784_v55, 4 }
0x7a14   :  { %7846 = vrot.lane.b32.xlu1 %v7836_v28, %s10859_s7  ;;  %v8509_v9 = vmul.f32 -1.442695, %v7836_v28  ;;  %v12340_v53 = vsel %vm668_vm6, %v11771_v14, %v4791_v32  ;;  %v8126_v14 = vand.u32 2147483647, %v12306_v16 }
0x7a15   :  { %v4796_v41 = vmul.f32 %v12340_v53, %v12340_v53 }
0x7a16   :  { %10635 = vpow2.f32 %v8509_v9 }
0x7a20   :  { %v10636_v19 = vpop.eup %10635 }
0x7a21   :  { %v7842_v37 = vadd.f32 1.0, %v10636_v19 }
0x7a23   :  { %10637 = vrcp.f32 %v7842_v37 }
0x7a2d   :  { %v10638_v38 = vpop.eup %10637 }
0x7a2e   :  { %v7856_v33 = vsub.f32 1.0, %v10638_v38  ;;  %v7862_v61 = vmul.f32 %v10638_v38, %v7688_v57  ;;  %v3105_v57 = vrot.slane %v11495_v63, 4 }
0x7a30   :  { %v12327_v56 = vsel %vm668_vm6, %v11468_v35, %v3105_v57 }
0x7a31   :  { %v3112_v58 = vmul.f32 %v12327_v56, %v12327_v56 }
0x7a86   :  { %v7847_v36 = vpop.permute.xlu1 %7846 }
0x7a87   :  { %v7849_v42 = vmul.f32 %v10638_v38, %v7847_v36 }
0x7a89   :  { %7851 = vrot.lane.b32.xlu0 %v7849_v42, %s10858_s29  ;;  %v8128_v42 = vsub.f32 0.0, %v8126_v14 }
0x7afb   :  { %v7852_v40 = vpop.permute.xlu0 %7851 }
0x7afc   :  { %v7854_v45 = vadd.f32 %v7852_v40, %v7836_v28  ;;  %v12333_v28 = vsel %vm668_vm6, %v11718_v22, %v4788_v5  ;;  %v8130_v40 = vmul.f32 1.442695, %v8128_v42 }
0x7afd   :  { %v4795_v63 = vmul.f32 %v12333_v28, %v12333_v28 }
0x7afe   :  { %10639 = vtanh.f32 %v7854_v45 }
0x7b08   :  { %v10640_v46 = vpop.eup %10639 }
0x7b09   :  { %7858 = vrot.lane.b32.xlu1 %v10640_v46, %s10859_s7 }
0x7b7b   :  { %v7859_v54 = vpop.permute.xlu1 %7858 }
0x7b7c   :  { %v7861_v26 = vmul.f32 %v7859_v54, %v7856_v33 }
0x7b7e   :  { %v12281_v2 = vadd.f32 %v7862_v61, %v7861_v26 }
0x7b80   :  { %7937 = vrot.lane.b32.xlu0 %v12281_v2, %s10860_s13  ;;  %9762 = vmatmul.mubr.msk.f32.vlgmr.msra.gmra.mrb[80].mxu0 %vm304_vm3, %v12281_v2 }
0x7b81   :  { %10207 = vmatpush3.bf16.msra.mxu0 %v12182_v6  ;;  %9774 = vmatprep.mubr.msk.f32.mxu0 %vm10855_vm2, %v10856_v10  ;;  %vm3137_vm2 = vcmp.lt.s32.totalorder %v12313_v12, 4 }
0x7b82   :  { %10208 = vmatprep.subr.bf16.mxu0 %v10854_v3 }
0x7b85   :  { %10210 = vmatpush3.bf16.msra.mxu0 %v12186_v62 }
0x7b86   :  { %9772 = vmatprep.subr.mxu0 %v10856_v10 }
0x7b89   :  { %9773 = vmatpush3.msk.msra.mxu0 %vm205_vm0, %v12194_v20  ;;  %vm3114_vm0 = vcmask 31744  }
0x7b8a   :  { %v3115_v29 = vsel %vm3114_vm0, %v3112_v58, 0.0  ;;  %v4797_v35 = vsel %vm3114_vm0, %v4795_v63, 0.0  ;;  %v4800_v9 = vsel %vm3114_vm0, %v4796_v41, 0.0 }
0x7bf2   :  { %v7938_v52 = vpop.permute.xlu0 %7937 }
0x7c53   :  { %v7933_v49 = vpop.f32.mrb[80].mxu0 }
0x7c54   :  { %v12296_v27 = vadd.f32 %v12240_v31, %v7933_v49  ;;  %v9763_v59 = vpop.f32.mrb[81].mxu0 }
0x7c56   :  { %v7940_v6 = vsel %vm186_vm1, %v12296_v27, %v7938_v52  ;;  %v8120_v52 = vmax.f32 %v12306_v16, 0.0 }
0x7c57   :  { %9775 = vmatmul.mubr.msk.f32.vlgmr.msra.gmra.mrb[82].mxu0 %vm2403_vm9, %v7940_v6 }
0x7d2a   :  { %v8010_v47 = vpop.f32.mrb[82].mxu0 }
0x7d2b   :  { %v8011_v3 = vadd.f32 %v12206_v1, %v8010_v47  ;;  %v9776_v62 = vpop.f32.mrb[83].mxu0  ;;  %v8160_v1 = vmul.f32 %v12306_v16, %v12306_v16 }
0x7d2d   :  { %8021 = vrot.lane.b32.xlu1 %v8011_v3, %s10859_s7  ;;  %v8513_v10 = vmul.f32 -1.442695, %v8011_v3  ;;  %v8162_v4 = vsel %vm3114_vm0, %v8160_v1, 0.0 }
0x7d2f   :  { %10641 = vpow2.f32 %v8513_v10 }
0x7d39   :  { %v10642_v20 = vpop.eup %10641 }
0x7d3a   :  { %v8017_v34 = vadd.f32 1.0, %v10642_v20 }
0x7d3c   :  { %10643 = vrcp.f32 %v8017_v34 }
0x7d46   :  { %v10644_v60 = vpop.eup %10643 }
0x7d47   :  { %v8031_v22 = vsub.f32 1.0, %v10644_v60  ;;  %v8037_v37 = vmul.f32 %v10644_v60, %v12281_v2 }
0x7d9f   :  { %v8022_v51 = vpop.permute.xlu1 %8021 }
0x7da0   :  { %v8024_v11 = vmul.f32 %v10644_v60, %v8022_v51 }
0x7da2   :  { %8026 = vrot.lane.b32.xlu0 %v8024_v11, %s10858_s29  ;;  %s10863_s29 = smov 121  }
0x7dc1   :  { %8163 = vadd.xlane.f32.xlu0 %v8162_v4 }
0x7e14   :  { %v8027_v43 = vpop.permute.xlu0 %8026 }
0x7e15   :  { %v8029_v7 = vadd.f32 %v8027_v43, %v8011_v3 }
0x7e17   :  { %10645 = vtanh.f32 %v8029_v7 }
0x7e21   :  { %v10646_v39 = vpop.eup %10645 }
0x7e22   :  { %8033 = vrot.lane.b32.xlu1 %v10646_v39, %s10859_s7 }
0x7e4e   :  { %v8164_v0 = vpop.xlane.xlu0 %8163 }
0x7e4f   :  { %10647 = vrsqrt.f32 %v8164_v0  ;;  %vm8170_vm5 = vcmp.eq.f32.partialorder %v8164_v0, inf  ;;  %v8173_v18 = vand.u32 2147483648, %v8164_v0  ;;  %vm8172_vm7 = vcmp.eq.f32.partialorder %v8164_v0, 0.0 }
0x7e59   :  { %v10648_v17 = vpop.eup %10647 }
0x7e5a   :  { %v8169_v13 = vmul.f32 %v10648_v17, %v8164_v0 }
0x7e5c   :  { %v8171_v44 = vsel %vm8170_vm5, %v8164_v0, %v8169_v13 }
0x7e5d   :  { %v8174_v15 = vsel %vm8172_vm7, %v8173_v18, %v8171_v44 }
0x7e5e   :  { %v8182_v21 = vsel %vm3137_vm2, %v8174_v15, 1.0 }
0x7e5f   :  { %8190 = vrot.lane.b32.xlu0 %v8182_v21, %s10860_s13  ;;  %10649 = vrcp.f32 %v8182_v21 }
0x7e60   :  { %10651 = vpow2.f32 %v8130_v40 }
0x7e69   :  { %v10650_v8 = vpop.eup %10649 }
0x7e6a   :  { %v8185_v50 = vmul.f32 %v10650_v8, %v12306_v16  ;;  %v10652_v45 = vpop.eup %10651 }
0x7e6b   :  { %v8134_v46 = vadd.f32 1.0, %v10652_v45  ;;  %v8137_v33 = vmul.f32 -0.5, %v10652_v45  ;;  %v8140_v26 = vand.u32 2147483647, %v10652_v45 }
0x7e6c   :  { %8200 = vst.msk [vmem:[#allocation6] sm:$0xff] %vm186_vm1, %v8185_v50 }
0x7e6d   :  { %10653 = vlog2.f32 %v8134_v46  ;;  %v8138_v61 = vadd.f32 1.0, %v8137_v33  ;;  %vm8141_vm9 = vcmp.lt.f32.partialorder %v8140_v26, 0.0004427343  ;;  %v10696_v46 = vld [vmem:[%s10934_s24] ss:$0 sm:$0xff]  ;;  %s10864_s24 = smov [#allocation2]  }
0x7e6e   :  { %v3101_v33 = vadd.f32 %v10696_v46, %v11571_v48  ;;  %s8218_s7 = sshll.u32 %s10864_s24, 4  ;;  %s8219_s7 = int_to_ptr.vmem [resolvable:$true] %s8218_s7 }
0x7e6f   :  { %v8139_v59 = vmul.f32 %v10652_v45, %v8138_v61  ;;  %s10701_s21 = scalar_lea.vmem %s8219_s7, 32  ;;  %p10702_p1 = scmp.lt.s32.totalorder %s8219_s7, %s8219_s7 }
0x7e77   :  { %v10654_v54 = vpop.eup %10653 }
0x7e78   :  { %v8136_v49 = vmul.f32 0.6931472, %v10654_v54  ;;  %v3108_v54 = vrot.slane %v3101_v33, 4 }
0x7e7a   :  { %v8142_v2 = vsel %vm8141_vm9, %v8139_v59, %v8136_v49  ;;  %v12382_v61 = vsel %vm668_vm6, %v11521_v23, %v3108_v54 }
0x7e7b   :  { %v8152_v6 = vadd.f32 %v8142_v2, %v8120_v52  ;;  %v3113_v26 = vmul.f32 %v12382_v61, %v12382_v61 }
0x7e7d   :  { %v3118_v49 = vsel %vm3114_vm0, %v3113_v26, 0.0 }
0x7e7e   :  { %3116 = vadd.xlane.f32.xlu0 %v3115_v29 }
0x7e82   :  { %4798 = vadd.xlane.f32.xlu0 %v4797_v35 }
0x7e86   :  { %4801 = vadd.xlane.f32.xlu0 %v4800_v9 }
0x7e94   :  { %v8034_v19 = vpop.permute.xlu1 %8033 }
0x7e95   :  { %v8036_v38 = vmul.f32 %v8034_v19, %v8031_v22 }
0x7e97   :  { %v8038_v36 = vadd.f32 %v8037_v37, %v8036_v38 }
0x7e99   :  { %9786 = vmatmul.mubr.msk.f32.vlgmr.msra.gmra.mrb[84].mxu1 %vm304_vm3, %v8038_v36  ;;  %vm8122_vm3 = vcmp.ne.f32.partialorder %v12306_v16, %v12306_v16 }
0x7e9a   :  { %v8154_v3 = vsel %vm8122_vm3, %v12306_v16, %v8152_v6 }
0x7e9b   :  { %v8156_v62 = vmul.f32 0.9, %v8154_v3 }
0x7e9d   :  { %v8158_v10 = vadd.f32 0.1, %v8156_v62 }
0x7ed1   :  { %v8191_v47 = vpop.permute.xlu0 %8190 }
0x7ed2   :  { %10655 = vrcp.f32 %v8191_v47 }
0x7edc   :  { %v10656_v20 = vpop.eup %10655 }
0x7edd   :  { %v8197_v34 = vmul.f32 %v10656_v20, %v8158_v10 }
0x7edf   :  { %8204 = vrot.lane.b32.xlu0 %v8197_v34, %s10863_s29 }
0x7f0b   :  { %v3117_v60 = vpop.xlane.xlu0 %3116 }
0x7f0c   :  { %10657 = vrsqrt.f32 %v3117_v60  ;;  %vm3123_vm10 = vcmp.eq.f32.partialorder %v3117_v60, inf  ;;  %v3126_v4 = vand.u32 2147483648, %v3117_v60  ;;  %vm3125_vm11 = vcmp.eq.f32.partialorder %v3117_v60, 0.0 }
0x7f0f   :  { %v4799_v51 = vpop.xlane.xlu0 %4798 }
0x7f10   :  { %10659 = vrsqrt.f32 %v4799_v51  ;;  %vm4805_vm12 = vcmp.eq.f32.partialorder %v4799_v51, inf  ;;  %v4808_v17 = vand.u32 2147483648, %v4799_v51  ;;  %vm4807_vm13 = vcmp.eq.f32.partialorder %v4799_v51, 0.0 }
0x7f13   :  { %v4802_v11 = vpop.xlane.xlu0 %4801 }
0x7f14   :  { %10661 = vrsqrt.f32 %v4802_v11  ;;  %vm4812_vm14 = vcmp.eq.f32.partialorder %v4802_v11, inf  ;;  %v4815_v8 = vand.u32 2147483648, %v4802_v11  ;;  %vm4814_vm15 = vcmp.eq.f32.partialorder %v4802_v11, 0.0 }
0x7f16   :  { %v10658_v24 = vpop.eup %10657 }
0x7f17   :  { %v3122_v1 = vmul.f32 %v10658_v24, %v3117_v60 }
0x7f19   :  { %v3124_v43 = vsel %vm3123_vm10, %v3117_v60, %v3122_v1 }
0x7f1a   :  { %v10660_v16 = vpop.eup %10659  ;;  %v3127_v7 = vsel %vm3125_vm11, %v3126_v4, %v3124_v43 }
0x7f1b   :  { %v3138_v39 = vsel %vm3137_vm2, %v3127_v7, 1.0  ;;  %v4804_v0 = vmul.f32 %v10660_v16, %v4799_v51 }
0x7f1c   :  { %10663 = vrcp.f32 %v3138_v39 }
0x7f1d   :  { %v4806_v13 = vsel %vm4805_vm12, %v4799_v51, %v4804_v0 }
0x7f1e   :  { %v10662_v18 = vpop.eup %10661  ;;  %v4809_v44 = vsel %vm4807_vm13, %v4808_v17, %v4806_v13 }
0x7f1f   :  { %v4817_v15 = vsel %vm3137_vm2, %v4809_v44, 1.0  ;;  %v4811_v21 = vmul.f32 %v10662_v18, %v4802_v11 }
0x7f20   :  { %10665 = vrcp.f32 %v4817_v15 }
0x7f21   :  { %v4813_v50 = vsel %vm4812_vm14, %v4802_v11, %v4811_v21 }
0x7f22   :  { %v4816_v57 = vsel %vm4814_vm15, %v4815_v8, %v4813_v50 }
0x7f23   :  { %v4818_v5 = vsel %vm3137_vm2, %v4816_v57, 1.0 }
0x7f24   :  { %10667 = vrcp.f32 %v4818_v5 }
0x7f26   :  { %v10664_v25 = vpop.eup %10663 }
0x7f27   :  { %v3141_v55 = vmul.f32 %v10664_v25, %v12327_v56 }
0x7f29   :  { %3144 = vst.msk [vmem:[%s11069_s30] sm:$0xff] %vm186_vm1, %v3141_v55 }
0x7f2a   :  { %v10666_v58 = vpop.eup %10665 }
0x7f2b   :  { %v4820_v32 = vmul.f32 %v10666_v58, %v12333_v28 }
0x7f2d   :  { %8436 = vst.msk [vmem:[%s11069_s30 + $0x10] sm:$0xff] %vm186_vm1, %v4820_v32 }
0x7f2e   :  { %v10668_v29 = vpop.eup %10667 }
0x7f2f   :  { %v4822_v63 = vmul.f32 %v10668_v29, %v12340_v53 }
0x7f31   :  { %8437 = vst.msk [vmem:[%s11069_s30 + $0x18] sm:$0xff] %vm186_vm1, %v4822_v63 }
0x7f51   :  { %v8205_v35 = vpop.permute.xlu0 %8204 }
0x7f52   :  { %8210 = vst.msk [vmem:[#allocation7] sm:$0xff] %vm186_vm1, %v8205_v35 }
0x7f6c   :  { %v8108_v41 = vpop.f32.mrb[84].mxu1 }
0x7f6d   :  { %v8109_v9 = vadd.f32 %v12240_v31, %v8108_v41  ;;  %v9787_v22 = vpop.f32.mrb[85].mxu1 }
0x7f6f   :  { %v8116_v56 = vrot.slane %v8109_v9, 4 }
0x7f71   :  { %v8119_v19 = vsel %vm668_vm6, %v12296_v27, %v8116_v56 }
0x7f72   :  { %v8161_v37 = vmul.f32 %v8119_v19, %v8119_v19  ;;  %v8127_v59 = vand.u32 2147483647, %v8119_v19  ;;  %v8121_v60 = vmax.f32 %v8119_v19, 0.0 }
0x7f74   :  { %v8165_v28 = vsel %vm3114_vm0, %v8161_v37, 0.0  ;;  %v8129_v2 = vsub.f32 0.0, %v8127_v59  ;;  %vm8123_vm0 = vcmp.ne.f32.partialorder %v8119_v19, %v8119_v19 }
0x7f75   :  { %8166 = vadd.xlane.f32.xlu1 %v8165_v28 }
0x7f76   :  { %v8132_v52 = vmul.f32 1.442695, %v8129_v2 }
0x8002   :  { %v8167_v38 = vpop.xlane.xlu1 %8166 }
0x8003   :  { %10669 = vrsqrt.f32 %v8167_v38  ;;  %vm8177_vm4 = vcmp.eq.f32.partialorder %v8167_v38, inf  ;;  %v8180_v14 = vand.u32 2147483648, %v8167_v38  ;;  %vm8179_vm5 = vcmp.eq.f32.partialorder %v8167_v38, 0.0 }
0x800d   :  { %v10670_v53 = vpop.eup %10669 }
0x800e   :  { %v8176_v36 = vmul.f32 %v10670_v53, %v8167_v38 }
0x8010   :  { %v8178_v42 = vsel %vm8177_vm4, %v8167_v38, %v8176_v36 }
0x8011   :  { %v8181_v40 = vsel %vm8179_vm5, %v8180_v14, %v8178_v42 }
0x8012   :  { %v8183_v31 = vsel %vm3137_vm2, %v8181_v40, 1.0 }
0x8013   :  { %8192 = vrot.lane.b32.xlu1 %v8183_v31, %s10860_s13  ;;  %10671 = vrcp.f32 %v8183_v31  ;;  %s10697_s13 = scalar_lea.vmem %s8219_s7, 16 }
0x8014   :  { %10673 = vpow2.f32 %v8132_v52  ;;  %p10698_p0 = scmp.ne.s32.totalorder %s8219_s7, %s10697_s13  ;;  %p10703_p2 = scmp.lt.s32.totalorder %s10701_s21, %s10697_s13 }
0x8016   :  { %p10704_p3 = por %p10703_p2, %p10702_p1 }
0x8018   :  { %p10705_p4 = pnand %p10704_p3, %p10698_p0 }
0x801d   :  { %v10672_v27 = vpop.eup %10671 }
0x801e   :  { %v8187_v45 = vmul.f32 %v10672_v27, %v8119_v19  ;;  %v10674_v6 = vpop.eup %10673 }
0x801f   :  { %v8143_v48 = vadd.f32 1.0, %v10674_v6  ;;  %v8146_v47 = vmul.f32 -0.5, %v10674_v6  ;;  %v8149_v62 = vand.u32 2147483647, %v10674_v6 }
0x8020   :  { %8201 = vst.msk [vmem:[#allocation6 + $0x8] sm:$0xff] %vm186_vm1, %v8187_v45 }
0x8021   :  { %10675 = vlog2.f32 %v8143_v48  ;;  %v8147_v23 = vadd.f32 1.0, %v8146_v47  ;;  %vm8150_vm6 = vcmp.lt.f32.partialorder %v8149_v62, 0.0004427343 }
0x8023   :  { %v8148_v20 = vmul.f32 %v10674_v6, %v8147_v23 }
0x802b   :  { %v10676_v3 = vpop.eup %10675 }
0x802c   :  { %v8145_v10 = vmul.f32 0.6931472, %v10676_v3 }
0x802e   :  { %v8151_v34 = vsel %vm8150_vm6, %v8148_v20, %v8145_v10 }
0x802f   :  { %v8153_v51 = vadd.f32 %v8151_v34, %v8121_v60 }
0x8037   :  { %3119 = vadd.xlane.f32.xlu1 %v3118_v49 }
0x8048   :  { %1446 = vrot.lane.b32.xlu1 %v12158_v30, %s10862_s28  ;;  %v8155_v30 = vsel %vm8123_vm0, %v8119_v19, %v8153_v51 }
0x8049   :  { %v8157_v24 = vmul.f32 0.9, %v8155_v30 }
0x8085   :  { %v8193_v11 = vpop.permute.xlu1 %8192 }
0x8086   :  { %10677 = vrcp.f32 %v8193_v11 }
0x8087   :  { %10708 = shalt.err (!%p10705_p4)
}
0x8088   :  { %s12492_s25 = sld [smem:[#allocation35_spill]] }
0x808e   :  { %s10709_s3 = scalar_lea.hbm %s12492_s25, 16 }
0x808f   :  { %p10710_p5 = scmp.ne.s32.totalorder %s12492_s25, %s10709_s3  ;;  %p10713_p6 = scmp.lt.u32.totalorder %s10709_s3, %s12492_s25 }
0x8091   :  { %p10715_p7 = pnand %p10713_p6, %p10710_p5 }
0x8093   :  { %10718 = shalt.err (!%p10715_p7)
}
0x8094   :  { %8221 = dma.vmem_to_hbm [thread:$0]  %s8219_s7, 16, %s12492_s25, [#allocation3]   ;;  %v8159_v1 = vadd.f32 0.1, %v8157_v24  ;;  %v10678_v4 = vpop.eup %10677 }
0x8095   :  { %s10865_s8 = smov [#allocation4]   ;;  %s10866_s19 = smov [#allocation6]  }
0x8096   :  { %v8199_v43 = vmul.f32 %v10678_v4, %v8159_v1  ;;  %s8228_s14 = sshll.u32 %s10865_s8, 4  ;;  %s8239_s4 = sshll.u32 %s10866_s19, 4  ;;  %s8229_s14 = int_to_ptr.vmem [resolvable:$true] %s8228_s14  ;;  %s12394_s4 = int_to_ptr.vmem [resolvable:$true] %s8239_s4 }
0x8097   :  { %s10719_s10 = scalar_lea.vmem %s8229_s14, 16  ;;  %s10723_s5 = scalar_lea.vmem %s8229_s14, 32 }
0x8098   :  { %8206 = vrot.lane.b32.xlu1 %v8199_v43, %s10863_s29  ;;  %p10720_p8 = scmp.ne.s32.totalorder %s8229_s14, %s10719_s10  ;;  %p10724_p9 = scmp.lt.s32.totalorder %s8229_s14, %s8229_s14 }
0x8099   :  { %p10725_p10 = scmp.lt.s32.totalorder %s10723_s5, %s10719_s10 }
0x809b   :  { %p10726_p11 = por %p10725_p10, %p10724_p9 }
0x809d   :  { %p10727_p12 = pnand %p10726_p11, %p10720_p8 }
0x80c4   :  { %v3120_v16 = vpop.xlane.xlu1 %3119 }
0x80c5   :  { %10679 = vrsqrt.f32 %v3120_v16 }
0x80c8   :  { %v1447_v7 = vpop.permute.xlu1 %1446 }
0x80c9   :  { %1449 = vst.msk [vmem:[#allocation4] sm:$0x1] %vm1443_vm8, %v1447_v7 }
0x80ca   :  { %10730 = shalt.err (!%p10727_p12)
}
0x80cb   :  { %s12493_s6 = sld [smem:[#allocation36_spill]] }
0x80d1   :  { %s10731_s11 = scalar_lea.hbm %s12493_s6, 16 }
0x80d2   :  { %p10732_p13 = scmp.ne.s32.totalorder %s12493_s6, %s10731_s11  ;;  %p10735_p0 = scmp.lt.u32.totalorder %s10731_s11, %s12493_s6 }
0x80d4   :  { %p10737_p1 = pnand %p10735_p0, %p10732_p13 }
0x80d6   :  { %10740 = shalt.err (!%p10737_p1)
}
0x80d7   :  { %8231 = dma.vmem_to_hbm [thread:$0]  %s8229_s14, 16, %s12493_s6, [#allocation5]  }
0x80d8   :  { %s10741_s15 = scalar_lea.vmem %s12394_s4, 256  ;;  %p10746_p3 = scmp.lt.s32.totalorder %s12394_s4, %s12394_s4 }
0x80d9   :  { %p10742_p2 = scmp.ne.s32.totalorder %s12394_s4, %s10741_s15  ;;  %p10747_p4 = scmp.lt.s32.totalorder %s10741_s15, %s10741_s15 }
0x80db   :  { %p10748_p5 = por %p10747_p4, %p10746_p3 }
0x80dd   :  { %p10749_p6 = pnand %p10748_p5, %p10742_p2 }
0x80df   :  { %10752 = shalt.err (!%p10749_p6)
}
0x80e0   :  { %s10753_s16 = scalar_lea.hbm %s11074_s27, 256 }
0x80e1   :  { %p10754_p7 = scmp.ne.s32.totalorder %s11074_s27, %s10753_s16  ;;  %p10757_p8 = scmp.lt.u32.totalorder %s10753_s16, %s11074_s27 }
0x80e3   :  { %p10759_p9 = pnand %p10757_p8, %p10754_p7 }
0x80e5   :  { %10762 = shalt.err (!%p10759_p9)
}
0x80e6   :  { %s10867_s18 = smov 128   ;;  %s10868_s22 = smov 8   ;;  %v10680_v39 = vpop.eup %10679  ;;  %vm3130_vm8 = vcmp.eq.f32.partialorder %v3120_v16, inf  ;;  %v3133_v17 = vand.u32 2147483648, %v3120_v16  ;;  %vm3132_vm7 = vcmp.eq.f32.partialorder %v3120_v16, 0.0 }
0x80e7   :  { %8245 = dma.vmem_to_hbm [thread:$0]  %s12394_s4, 256, %s11074_s27, [#allocation5], %s10867_s18, %s10867_s18, %s10868_s22   ;;  %v3129_v0 = vmul.f32 %v10680_v39, %v3120_v16 }
0x80e8   :  { %s10869_s23 = smov [#allocation7]   ;;  %s10870_s28 = smov [#allocation9]  }
0x80e9   :  { %v3131_v13 = vsel %vm3130_vm8, %v3120_v16, %v3129_v0  ;;  %s8251_s26 = sshll.u32 %s10869_s23, 4  ;;  %s8264_s27 = sshll.u32 %s10870_s28, 4  ;;  %s8252_s26 = int_to_ptr.vmem [resolvable:$true] %s8251_s26  ;;  %s8265_s27 = int_to_ptr.vmem [resolvable:$true] %s8264_s27 }
0x80ea   :  { %v3134_v18 = vsel %vm3132_vm7, %v3133_v17, %v3131_v13  ;;  %s10763_s1 = scalar_lea.vmem %s8252_s26, 256  ;;  %p10768_p11 = scmp.lt.s32.totalorder %s8252_s26, %s8252_s26 }
0x80eb   :  { %v3139_v44 = vsel %vm3137_vm2, %v3134_v18, 1.0  ;;  %p10764_p10 = scmp.ne.s32.totalorder %s8252_s26, %s10763_s1  ;;  %p10769_p12 = scmp.lt.s32.totalorder %s10763_s1, %s10763_s1 }
0x80ec   :  { %10681 = vrcp.f32 %v3139_v44 }
0x80ed   :  { %p10770_p13 = por %p10769_p12, %p10768_p11 }
0x80ef   :  { %p10771_p0 = pnand %p10770_p13, %p10764_p10 }
0x80f6   :  { %v10682_v15 = vpop.eup %10681 }
0x80f7   :  { %v3143_v21 = vmul.f32 %v10682_v15, %v12382_v61 }
0x80f9   :  { %3145 = vst.msk [vmem:[%s11069_s30 + $0x8] sm:$0xff] %vm186_vm1, %v3143_v21 }
0x810a   :  { %v8207_v8 = vpop.permute.xlu1 %8206 }
0x810b   :  { %8211 = vst.msk [vmem:[#allocation7 + $0x8] sm:$0xff] %vm186_vm1, %v8207_v8 }
0x810c   :  { %10774 = shalt.err (!%p10771_p0)
}
0x810d   :  { %s10775_s30 = scalar_lea.hbm %s11079_s20, 256 }
0x810e   :  { %p10776_p1 = scmp.ne.s32.totalorder %s11079_s20, %s10775_s30  ;;  %p10779_p2 = scmp.lt.u32.totalorder %s10775_s30, %s11079_s20 }
0x8110   :  { %p10781_p3 = pnand %p10779_p2, %p10776_p1 }
0x8112   :  { %10784 = shalt.err (!%p10781_p3)
}
0x8113   :  { %8257 = dma.vmem_to_hbm [thread:$0]  %s8252_s26, 256, %s11079_s20, [#allocation8], %s10867_s18, %s10867_s18, %s10868_s22  }
0x8114   :  { %s10785_s2 = scalar_lea.vmem %s8265_s27, 64  ;;  %p10790_p5 = scmp.lt.s32.totalorder %s8265_s27, %s8265_s27 }
0x8115   :  { %p10786_p4 = scmp.ne.s32.totalorder %s8265_s27, %s10785_s2  ;;  %p10791_p6 = scmp.lt.s32.totalorder %s10785_s2, %s10785_s2 }
0x8117   :  { %p10792_p7 = por %p10791_p6, %p10790_p5 }
0x8119   :  { %p10793_p8 = pnand %p10792_p7, %p10786_p4 }
0x811b   :  { %10796 = shalt.err (!%p10793_p8)
}
0x811c   :  { %s10797_s0 = scalar_lea.hbm %s11084_s12, 64 }
0x811d   :  { %p10798_p9 = scmp.ne.s32.totalorder %s11084_s12, %s10797_s0  ;;  %p10801_p10 = scmp.lt.u32.totalorder %s10797_s0, %s11084_s12 }
0x811f   :  { %p10803_p11 = pnand %p10801_p10, %p10798_p9 }
0x8121   :  { %10806 = shalt.err (!%p10803_p11)
}
0x8122   :  { %8267 = dma.vmem_to_hbm [thread:$0]  %s8265_s27, 64, %s11084_s12, [#allocation8]  }
0x8123   :  { %10807 = dma.done.wait [#allocation3], 16  }
0x8124   :  { %10808 = vsyncadd [#allocation3], 4294967280 }
0x8125   :  { %10809 = dma.done.wait [#allocation5], 272  }
0x8126   :  { %10810 = vsyncadd [#allocation5], 4294967024 }
0x8127   :  { %10811 = dma.done.wait [#allocation8], 320  }
0x8128   :  { %10812 = vsyncadd [#allocation8], 4294966976 }
0x8129   :  { %8285 = vsyncpa [#allocation3], 1 }
0x812a   :  { %8286 = vsyncpa [#allocation5], 1 }
0x812b   :  { %8287 = vsyncpa [#allocation8], 1 }

</bundles_post_ra>
